<compile_context>
chip_gen: v6e
topology: v6e:2x2x1
jax: 0.10.0
libtpu: 0.0.40
codegen_flags: <defaults>
</compile_context>

<pallas_src>
import math

import jax
import jax.numpy as jnp
from jax.experimental import pallas as pl
from jax.experimental.pallas import tpu as pltpu


_BN_EPS = 1e-5
_NORM_MEAN = 0.1307
_NORM_INV_STD = 1.0 / 0.3081
_ACT_DTYPE = jnp.bfloat16                   # activations/weights crossing HBM
_VMEM_LIMIT = 32 * 1024 * 1024

_VMEM_SPEC = pl.BlockSpec(memory_space=pltpu.MemorySpace.VMEM)


# ----------------------------- in-kernel helpers ------------------------------

def _bn_act(acc, g, b, relu):
    """Training-mode BatchNorm2d (batch stats, biased var) + optional ReLU.

    One pass over the f32 accumulator for the statistics."""
    m = acc.shape[0]
    s1 = jnp.sum(acc, axis=0, keepdims=True)
    s2 = jnp.sum(acc * acc, axis=0, keepdims=True)
    mean = s1 * (1.0 / m)
    var = s2 * (1.0 / m) - mean * mean
    scale = g * jax.lax.rsqrt(var + _BN_EPS)
    shift = b - mean * scale
    y = acc * scale + shift
    return jnp.maximum(y, 0.0) if relu else y


def _mm(a, w):
    # bf16 x bf16 -> f32 accumulation on the MXU.
    return jnp.dot(a, w, preferred_element_type=jnp.float32)


# -------------------------------- fused kernels --------------------------------

def _stem_kernel(a_ref, w0_ref, g0_ref, b0_ref, w1_ref, g1_ref, b1_ref,
                 h_ref, h1_ref):
    """stem conv(3x3 patches) + BN + ReLU, chained with block0 conv1(1x1)+BN+ReLU."""
    h = _bn_act(_mm(a_ref[...], w0_ref[...]), g0_ref[...], b0_ref[...], relu=True)
    h_ref[...] = h.astype(h_ref.dtype)
    h1 = _bn_act(_mm(h.astype(_ACT_DTYPE), w1_ref[...]),
                 g1_ref[...], b1_ref[...], relu=True)
    h1_ref[...] = h1.astype(h1_ref.dtype)


def _make_tail_kernel(has_ds, has_next):
    """conv2(3x3 patches)+BN+ReLU -> [ds conv+BN] -> conv3+BN+add+ReLU -> [next conv1+BN+ReLU].

    All intermediates (h2, res, out) stay in VMEM; only out (and the next
    block's h1) are written back to HBM."""
    def kernel(p_ref, w2_ref, g2_ref, b2_ref, w3_ref, g3_ref, b3_ref, r_ref, *rest):
        i = 0
        if has_ds:
            wd_ref, gd_ref, bd_ref = rest[i:i + 3]
            i += 3
        if has_next:
            w1_ref, g1_ref, b1_ref = rest[i:i + 3]
            i += 3
        out_ref = rest[i]
        i += 1
        h1n_ref = rest[i] if has_next else None

        # conv2 (3x3 via im2col patches) + BN + ReLU
        h2 = _bn_act(_mm(p_ref[...], w2_ref[...]), g2_ref[...], b2_ref[...], relu=True)
        # residual branch: 1x1 downsample conv + BN, or identity
        if has_ds:
            res = _bn_act(_mm(r_ref[...], wd_ref[...]), gd_ref[...], bd_ref[...],
                          relu=False)
        else:
            res = r_ref[...].astype(jnp.float32)
        # conv3 (1x1) + BN + residual add + ReLU
        y = _bn_act(_mm(h2.astype(_ACT_DTYPE), w3_ref[...]),
                    g3_ref[...], b3_ref[...], relu=False)
        out = jnp.maximum(y + res, 0.0)
        out_ref[...] = out.astype(out_ref.dtype)
        # next block's conv1 (1x1) + BN + ReLU, fused to save a launch
        if has_next:
            h1n = _bn_act(_mm(out.astype(_ACT_DTYPE), w1_ref[...]),
                          g1_ref[...], b1_ref[...], relu=True)
            h1n_ref[...] = h1n.astype(h1n_ref.dtype)
    return kernel


# ------------------------------ pallas_call wrappers ----------------------------

def _assert_vmem_fits(args, out_shapes, m_rows):
    io_bytes = sum(a.size * a.dtype.itemsize for a in args)
    io_bytes += sum(math.prod(s.shape) * jnp.dtype(s.dtype).itemsize
                    for s in out_shapes)
    tmp_bytes = 8 * m_rows * 256 * 4          # generous allowance for f32 temps
    assert io_bytes + tmp_bytes < 24 * 1024 * 1024, "kernel exceeds VMEM budget"


def stem_call(patches, stem_p, conv1_p):
    M = patches.shape[0]
    args = (patches, stem_p["wm"], stem_p["g"], stem_p["b"],
            conv1_p["wm"], conv1_p["g"], conv1_p["b"])
    out_shapes = (jax.ShapeDtypeStruct((M, stem_p["wm"].shape[1]), _ACT_DTYPE),
                  jax.ShapeDtypeStruct((M, conv1_p["wm"].shape[1]), _ACT_DTYPE))
    _assert_vmem_fits(args, out_shapes, M)
    h, h1 = pl.pallas_call(
        _stem_kernel,
        out_shape=out_shapes,
        in_specs=[_VMEM_SPEC] * len(args),
        out_specs=(_VMEM_SPEC, _VMEM_SPEC),
        compiler_params=pltpu.CompilerParams(vmem_limit_bytes=_VMEM_LIMIT),
    )(*args)
    return h, h1


def tail_call(patches, blk, xr, next_conv1):
    M = patches.shape[0]
    cout = blk["conv3"]["wm"].shape[1]
    has_ds = "ds" in blk
    has_next = next_conv1 is not None

    args = [patches,
            blk["conv2"]["wm"], blk["conv2"]["g"], blk["conv2"]["b"],
            blk["conv3"]["wm"], blk["conv3"]["g"], blk["conv3"]["b"],
            xr]
    if has_ds:
        args += [blk["ds"]["wm"], blk["ds"]["g"], blk["ds"]["b"]]
    if has_next:
        args += [next_conv1["wm"], next_conv1["g"], next_conv1["b"]]

    out_shapes = [jax.ShapeDtypeStruct((M, cout), _ACT_DTYPE)]
    if has_next:
        out_shapes.append(
            jax.ShapeDtypeStruct((M, next_conv1["wm"].shape[1]), _ACT_DTYPE))
    out_shapes = tuple(out_shapes)
    _assert_vmem_fits(args, out_shapes, M)

    outs = pl.pallas_call(
        _make_tail_kernel(has_ds, has_next),
        out_shape=out_shapes,
        in_specs=[_VMEM_SPEC] * len(args),
        out_specs=tuple([_VMEM_SPEC] * len(out_shapes)),
        compiler_params=pltpu.CompilerParams(vmem_limit_bytes=_VMEM_LIMIT),
    )(*args)
    if has_next:
        return outs[0], outs[1]
    return outs[0], None


# ------------------------------- conv plumbing ----------------------------------

def _im2col(x, kh, kw, stride, pad):
    """x: (N, H, W, C) -> patches (N*OH*OW, kh*kw*C), channel-minor."""
    if pad:
        x = jnp.pad(x, ((0, 0), (pad, pad), (pad, pad), (0, 0)))
    N, Hp, Wp, C = x.shape
    OH = (Hp - kh) // stride + 1
    OW = (Wp - kw) // stride + 1
    cols = []
    for i in range(kh):
        for j in range(kw):
            cols.append(x[:, i:i + stride * OH:stride,
                          j:j + stride * OW:stride, :])
    patches = jnp.stack(cols, axis=3)                      # (N, OH, OW, kh*kw, C)
    return patches.reshape(N * OH * OW, kh * kw * C), (OH, OW)


def _w2d(w_oihw):
    """PyTorch OIHW conv weight -> (kh*kw*cin, cout) bf16 matching _im2col order."""
    cout, cin, kh, kw = w_oihw.shape
    return (jnp.transpose(w_oihw, (2, 3, 1, 0))
            .reshape(kh * kw * cin, cout).astype(_ACT_DTYPE))


# ------------------------------ parameter setup ----------------------------------

def _conv_bn(key, cout, cin, kh, kw):
    n = kh * kw * cout
    w = jax.random.normal(key, (cout, cin, kh, kw), jnp.float32) * math.sqrt(2.0 / n)
    return {
        "w_oihw": w,                                       # only for the reference
        "wm": _w2d(w),                                     # matmul-ready, bf16
        "g": jnp.ones((1, cout), jnp.float32),
        "b": jnp.zeros((1, cout), jnp.float32),
    }


def init_params(key, depth=11):
    assert (depth - 2) % 9 == 0, "depth must be 9n+2"
    nblocks = (depth - 2) // 9
    expansion = 4                                          # Bottleneck.expansion
    keys = iter(jax.random.split(key, 1 + 12 * nblocks))
    params = {"stem": _conv_bn(next(keys), 16, 1, 3, 3)}
    inplanes = 16
    layers = []
    for planes, layer_stride in ((16, 1), (32, 2), (64, 2)):
        blocks = []
        for b in range(nblocks):
            s = layer_stride if b == 0 else 1
            blk = {
                "stride": s,
                "conv1": _conv_bn(next(keys), planes, inplanes, 1, 1),
                "conv2": _conv_bn(next(keys), planes, planes, 3, 3),
                "conv3": _conv_bn(next(keys), planes * expansion, planes, 1, 1),
            }
            if s != 1 or inplanes != planes * expansion:
                blk["ds"] = _conv_bn(next(keys), planes * expansion, inplanes, 1, 1)
            blocks.append(blk)
            inplanes = planes * expansion
        layers.append(blocks)
    params["layers"] = layers
    return params


# -------------------------------- forward pass ------------------------------------

def orig_res_encoder_forward(x_nchw, params):
    x = jnp.transpose(x_nchw, (0, 2, 3, 1)).astype(jnp.float32)   # NHWC
    N, H, W, _ = x.shape
    # input normalization folded into the XLA im2col preamble (no pallas_call)
    xn = ((x - _NORM_MEAN) * _NORM_INV_STD).astype(_ACT_DTYPE)
    patches, _ = _im2col(xn, 3, 3, 1, 1)

    blocks = [blk for layer in params["layers"] for blk in layer]
    # stem conv + BN + ReLU fused with block 0's conv1 + BN + ReLU (1 launch)
    h, h1 = stem_call(patches, params["stem"], blocks[0]["conv1"])

    for bi, blk in enumerate(blocks):
        stride = blk["stride"]
        planes = h1.shape[1]
        cin = h.shape[1]
        p2, (OH, OW) = _im2col(h1.reshape(N, H, W, planes), 3, 3, stride, 1)
        if stride != 1:
            xr = (h.reshape(N, H, W, cin)[:, ::stride, ::stride, :]
                  .reshape(N * OH * OW, cin))
        else:
            xr = h
        nxt = blocks[bi + 1]["conv1"] if bi + 1 < len(blocks) else None
        h, h1 = tail_call(p2, blk, xr, nxt)                # 1 launch per block
        H, W = OH, OW

    out = h.reshape(N, H, W, h.shape[-1]).astype(jnp.float32)
    return jnp.transpose(out, (0, 3, 1, 2))                # back to NCHW


# --------------- pure-JAX reference (mirrors bf16 rounding points) -----------------

def _round_act(x):
    return x.astype(_ACT_DTYPE).astype(jnp.float32)


def _ref_conv(x, w_oihw, stride, pad):
    return jax.lax.conv_general_dilated(
        x.astype(_ACT_DTYPE),
        jnp.transpose(w_oihw, (2, 3, 1, 0)).astype(_ACT_DTYPE),
        window_strides=(stride, stride), padding=[(pad, pad), (pad, pad)],
        dimension_numbers=("NHWC", "HWIO", "NHWC"),
        preferred_element_type=jnp.float32)


def _ref_bn(y, gamma, beta, relu):
    g = gamma.reshape(-1)
    b = beta.reshape(-1)
    mean = jnp.mean(y, axis=(0, 1, 2))
    var = jnp.mean(jnp.square(y - mean), axis=(0, 1, 2))
    scale = g * jax.lax.rsqrt(var + _BN_EPS)
    shift = b - mean * scale
    out = y * scale + shift
    return jnp.maximum(out, 0.0) if relu else out


def reference_forward(x_nchw, params):
    x = jnp.transpose(x_nchw, (0, 2, 3, 1)).astype(jnp.float32)
    x = _round_act((x - _NORM_MEAN) * _NORM_INV_STD)
    st = params["stem"]
    h = _round_act(_ref_bn(_ref_conv(x, st["w_oihw"], 1, 1), st["g"], st["b"], True))
    for layer in params["layers"]:
        for blk in layer:
            s = blk["stride"]
            c1, c2, c3 = blk["conv1"], blk["conv2"], blk["conv3"]
            h1 = _round_act(_ref_bn(_ref_conv(h, c1["w_oihw"], 1, 0),
                                    c1["g"], c1["b"], True))
            h2 = _round_act(_ref_bn(_ref_conv(h1, c2["w_oihw"], s, 1),
                                    c2["g"], c2["b"], True))
            if "ds" in blk:
                d = blk["ds"]
                res = _ref_bn(_ref_conv(h, d["w_oihw"], s, 0), d["g"], d["b"], False)
            else:
                res = h
            y3 = _ref_bn(_ref_conv(h2, c3["w_oihw"], 1, 0), c3["g"], c3["b"], False)
            h = _round_act(jnp.maximum(y3 + res, 0.0))
    return jnp.transpose(h, (0, 3, 1, 2))


# ------------------------------------- main ----------------------------------------

if __name__ == "__main__":
    key = jax.random.PRNGKey(0)
    kx, kp = jax.random.split(key)
    # input like the PyTorch module: NCHW, 1 channel
    x = jax.random.normal(kx, (2, 1, 16, 16), jnp.float32)
    params = init_params(kp, depth=11)  # smallest valid depth (n = 1)

    fwd = jax.jit(lambda a: orig_res_encoder_forward(a, params))
    out = jax.block_until_ready(fwd(x))
    assert out.shape == (2, 256, 4, 4), out.shape

    ref = jax.block_until_ready(reference_forward(x, params))
    max_err = float(jnp.max(jnp.abs(out - ref)))
    mean_err = float(jnp.mean(jnp.abs(out - ref)))
    # The kernel path and the reference share the same bf16 storage points, so
    # the remaining difference is f32 accumulation-order (im2col matmul vs
    # lax.conv) plus one-pass-variance rounding: a few bf16 ulps at |act|~O(4).
    assert max_err < 1e-1, f"max abs err vs bf16-matched reference: {max_err}"
    assert mean_err < 2e-2, f"mean abs err vs bf16-matched reference: {mean_err}"

    print("KERNEL_OK")
</pallas_src>

<mosaic_0001>
module attributes {stable_mosaic.version = 11 : i64} {
  func.func @_stem_kernel(%arg0: memref<512x9xbf16, #tpu.memory_space<vmem>>, %arg1: memref<9x16xbf16, #tpu.memory_space<vmem>>, %arg2: memref<1x16xf32, #tpu.memory_space<vmem>>, %arg3: memref<1x16xf32, #tpu.memory_space<vmem>>, %arg4: memref<16x16xbf16, #tpu.memory_space<vmem>>, %arg5: memref<1x16xf32, #tpu.memory_space<vmem>>, %arg6: memref<1x16xf32, #tpu.memory_space<vmem>>, %arg7: memref<512x16xbf16, #tpu.memory_space<vmem>>, %arg8: memref<512x16xbf16, #tpu.memory_space<vmem>>) attributes {dimension_semantics = [], scalar_prefetch = 0 : i64, scratch_operands = 0 : i64, tpu.core_type = #tpu.core_type<tc>} {
    %c0 = arith.constant 0 : index
    %c0_0 = arith.constant 0 : index
    %0 = vector.load %arg0[%c0, %c0_0] : memref<512x9xbf16, #tpu.memory_space<vmem>>, vector<512x9xbf16>
    %c0_1 = arith.constant 0 : index
    %c0_2 = arith.constant 0 : index
    %1 = vector.load %arg1[%c0_1, %c0_2] : memref<9x16xbf16, #tpu.memory_space<vmem>>, vector<9x16xbf16>
    %cst = arith.constant dense<0.000000e+00> : vector<512x16xf32>
    %2 = tpu.matmul %0, %1, %cst {dimension_numbers = #tpu.dot_dimension_numbers<[1], [0], [0], [1], [0, 0, 1, 1], [], []>} : vector<512x9xbf16>, vector<9x16xbf16>, vector<512x16xf32> -> vector<512x16xf32>
    %c0_3 = arith.constant 0 : index
    %c0_4 = arith.constant 0 : index
    %3 = vector.load %arg2[%c0_3, %c0_4] : memref<1x16xf32, #tpu.memory_space<vmem>>, vector<1x16xf32>
    %c0_5 = arith.constant 0 : index
    %c0_6 = arith.constant 0 : index
    %4 = vector.load %arg3[%c0_5, %c0_6] : memref<1x16xf32, #tpu.memory_space<vmem>>, vector<1x16xf32>
    %cst_7 = arith.constant dense<0.000000e+00> : vector<16xf32>
    %5 = vector.multi_reduction <add>, %2, %cst_7 [0] : vector<512x16xf32> to vector<16xf32>
    %6 = vector.shape_cast %5 : vector<16xf32> to vector<1x16xf32>
    %7 = arith.mulf %2, %2 : vector<512x16xf32>
    %cst_8 = arith.constant dense<0.000000e+00> : vector<16xf32>
    %8 = vector.multi_reduction <add>, %7, %cst_8 [0] : vector<512x16xf32> to vector<16xf32>
    %9 = vector.shape_cast %8 : vector<16xf32> to vector<1x16xf32>
    %cst_9 = arith.constant 0.001953125 : f32
    %10 = vector.broadcast %cst_9 : f32 to vector<1x16xf32>
    %11 = arith.mulf %6, %10 : vector<1x16xf32>
    %cst_10 = arith.constant 0.001953125 : f32
    %12 = vector.broadcast %cst_10 : f32 to vector<1x16xf32>
    %13 = arith.mulf %9, %12 : vector<1x16xf32>
    %14 = arith.mulf %11, %11 : vector<1x16xf32>
    %15 = arith.subf %13, %14 : vector<1x16xf32>
    %cst_11 = arith.constant 9.99999974E-6 : f32
    %16 = vector.broadcast %cst_11 : f32 to vector<1x16xf32>
    %17 = arith.addf %15, %16 : vector<1x16xf32>
    %18 = math.rsqrt %17 : vector<1x16xf32>
    %19 = arith.mulf %3, %18 : vector<1x16xf32>
    %20 = arith.mulf %11, %19 : vector<1x16xf32>
    %21 = arith.subf %4, %20 : vector<1x16xf32>
    %22 = vector.broadcast %19 : vector<1x16xf32> to vector<512x16xf32>
    %23 = arith.mulf %2, %22 : vector<512x16xf32>
    %24 = vector.broadcast %21 : vector<1x16xf32> to vector<512x16xf32>
    %25 = arith.addf %23, %24 : vector<512x16xf32>
    %cst_12 = arith.constant 0.000000e+00 : f32
    %26 = vector.broadcast %cst_12 : f32 to vector<512x16xf32>
    %27 = arith.maximumf %25, %26 : vector<512x16xf32>
    %28 = arith.truncf %27 : vector<512x16xf32> to vector<512x16xbf16>
    %c0_13 = arith.constant 0 : index
    %c0_14 = arith.constant 0 : index
    %29 = vector.load %arg7[%c0_13, %c0_14] : memref<512x16xbf16, #tpu.memory_space<vmem>>, vector<512x16xbf16>
    tpu.vector_store %arg7[%c0_13, %c0_14], %28 {strides = array<i32>} : memref<512x16xbf16, #tpu.memory_space<vmem>>, vector<512x16xbf16>,
    %30 = arith.truncf %27 : vector<512x16xf32> to vector<512x16xbf16>
    %c0_15 = arith.constant 0 : index
    %c0_16 = arith.constant 0 : index
    %31 = vector.load %arg4[%c0_15, %c0_16] : memref<16x16xbf16, #tpu.memory_space<vmem>>, vector<16x16xbf16>
    %cst_17 = arith.constant dense<0.000000e+00> : vector<512x16xf32>
    %32 = tpu.matmul %30, %31, %cst_17 {dimension_numbers = #tpu.dot_dimension_numbers<[1], [0], [0], [1], [0, 0, 1, 1], [], []>} : vector<512x16xbf16>, vector<16x16xbf16>, vector<512x16xf32> -> vector<512x16xf32>
    %c0_18 = arith.constant 0 : index
    %c0_19 = arith.constant 0 : index
    %33 = vector.load %arg5[%c0_18, %c0_19] : memref<1x16xf32, #tpu.memory_space<vmem>>, vector<1x16xf32>
    %c0_20 = arith.constant 0 : index
    %c0_21 = arith.constant 0 : index
    %34 = vector.load %arg6[%c0_20, %c0_21] : memref<1x16xf32, #tpu.memory_space<vmem>>, vector<1x16xf32>
    %cst_22 = arith.constant dense<0.000000e+00> : vector<16xf32>
    %35 = vector.multi_reduction <add>, %32, %cst_22 [0] : vector<512x16xf32> to vector<16xf32>
    %36 = vector.shape_cast %35 : vector<16xf32> to vector<1x16xf32>
    %37 = arith.mulf %32, %32 : vector<512x16xf32>
    %cst_23 = arith.constant dense<0.000000e+00> : vector<16xf32>
    %38 = vector.multi_reduction <add>, %37, %cst_23 [0] : vector<512x16xf32> to vector<16xf32>
    %39 = vector.shape_cast %38 : vector<16xf32> to vector<1x16xf32>
    %cst_24 = arith.constant 0.001953125 : f32
    %40 = vector.broadcast %cst_24 : f32 to vector<1x16xf32>
    %41 = arith.mulf %36, %40 : vector<1x16xf32>
    %cst_25 = arith.constant 0.001953125 : f32
    %42 = vector.broadcast %cst_25 : f32 to vector<1x16xf32>
    %43 = arith.mulf %39, %42 : vector<1x16xf32>
    %44 = arith.mulf %41, %41 : vector<1x16xf32>
    %45 = arith.subf %43, %44 : vector<1x16xf32>
    %cst_26 = arith.constant 9.99999974E-6 : f32
    %46 = vector.broadcast %cst_26 : f32 to vector<1x16xf32>
    %47 = arith.addf %45, %46 : vector<1x16xf32>
    %48 = math.rsqrt %47 : vector<1x16xf32>
    %49 = arith.mulf %33, %48 : vector<1x16xf32>
    %50 = arith.mulf %41, %49 : vector<1x16xf32>
    %51 = arith.subf %34, %50 : vector<1x16xf32>
    %52 = vector.broadcast %49 : vector<1x16xf32> to vector<512x16xf32>
    %53 = arith.mulf %32, %52 : vector<512x16xf32>
    %54 = vector.broadcast %51 : vector<1x16xf32> to vector<512x16xf32>
    %55 = arith.addf %53, %54 : vector<512x16xf32>
    %cst_27 = arith.constant 0.000000e+00 : f32
    %56 = vector.broadcast %cst_27 : f32 to vector<512x16xf32>
    %57 = arith.maximumf %55, %56 : vector<512x16xf32>
    %58 = arith.truncf %57 : vector<512x16xf32> to vector<512x16xbf16>
    %c0_28 = arith.constant 0 : index
    %c0_29 = arith.constant 0 : index
    %59 = vector.load %arg8[%c0_28, %c0_29] : memref<512x16xbf16, #tpu.memory_space<vmem>>, vector<512x16xbf16>
    tpu.vector_store %arg8[%c0_28, %c0_29], %58 {strides = array<i32>} : memref<512x16xbf16, #tpu.memory_space<vmem>>, vector<512x16xbf16>,
    return
  }
}

module attributes {stable_mosaic.version = 11 : i64} {
  func.func @kernel(%arg0: memref<512x144xbf16, #tpu.memory_space<vmem>>, %arg1: memref<144x16xbf16, #tpu.memory_space<vmem>>, %arg2: memref<1x16xf32, #tpu.memory_space<vmem>>, %arg3: memref<1x16xf32, #tpu.memory_space<vmem>>, %arg4: memref<16x64xbf16, #tpu.memory_space<vmem>>, %arg5: memref<1x64xf32, #tpu.memory_space<vmem>>, %arg6: memref<1x64xf32, #tpu.memory_space<vmem>>, %arg7: memref<512x16xbf16, #tpu.memory_space<vmem>>, %arg8: memref<16x64xbf16, #tpu.memory_space<vmem>>, %arg9: memref<1x64xf32, #tpu.memory_space<vmem>>, %arg10: memref<1x64xf32, #tpu.memory_space<vmem>>, %arg11: memref<64x32xbf16, #tpu.memory_space<vmem>>, %arg12: memref<1x32xf32, #tpu.memory_space<vmem>>, %arg13: memref<1x32xf32, #tpu.memory_space<vmem>>, %arg14: memref<512x64xbf16, #tpu.memory_space<vmem>>, %arg15: memref<512x32xbf16, #tpu.memory_space<vmem>>) attributes {dimension_semantics = [], scalar_prefetch = 0 : i64, scratch_operands = 0 : i64, tpu.core_type = #tpu.core_type<tc>} {
    %c0 = arith.constant 0 : index
    %c0_0 = arith.constant 0 : index
    %0 = vector.load %arg0[%c0, %c0_0] : memref<512x144xbf16, #tpu.memory_space<vmem>>, vector<512x144xbf16>
    %c0_1 = arith.constant 0 : index
    %c0_2 = arith.constant 0 : index
    %1 = vector.load %arg1[%c0_1, %c0_2] : memref<144x16xbf16, #tpu.memory_space<vmem>>, vector<144x16xbf16>
    %cst = arith.constant dense<0.000000e+00> : vector<512x16xf32>
    %2 = tpu.matmul %0, %1, %cst {dimension_numbers = #tpu.dot_dimension_numbers<[1], [0], [0], [1], [0, 0, 1, 1], [], []>} : vector<512x144xbf16>, vector<144x16xbf16>, vector<512x16xf32> -> vector<512x16xf32>
    %c0_3 = arith.constant 0 : index
    %c0_4 = arith.constant 0 : index
    %3 = vector.load %arg2[%c0_3, %c0_4] : memref<1x16xf32, #tpu.memory_space<vmem>>, vector<1x16xf32>
    %c0_5 = arith.constant 0 : index
    %c0_6 = arith.constant 0 : index
    %4 = vector.load %arg3[%c0_5, %c0_6] : memref<1x16xf32, #tpu.memory_space<vmem>>, vector<1x16xf32>
    %cst_7 = arith.constant dense<0.000000e+00> : vector<16xf32>
    %5 = vector.multi_reduction <add>, %2, %cst_7 [0] : vector<512x16xf32> to vector<16xf32>
    %6 = vector.shape_cast %5 : vector<16xf32> to vector<1x16xf32>
    %7 = arith.mulf %2, %2 : vector<512x16xf32>
    %cst_8 = arith.constant dense<0.000000e+00> : vector<16xf32>
    %8 = vector.multi_reduction <add>, %7, %cst_8 [0] : vector<512x16xf32> to vector<16xf32>
    %9 = vector.shape_cast %8 : vector<16xf32> to vector<1x16xf32>
    %cst_9 = arith.constant 0.001953125 : f32
    %10 = vector.broadcast %cst_9 : f32 to vector<1x16xf32>
    %11 = arith.mulf %6, %10 : vector<1x16xf32>
    %cst_10 = arith.constant 0.001953125 : f32
    %12 = vector.broadcast %cst_10 : f32 to vector<1x16xf32>
    %13 = arith.mulf %9, %12 : vector<1x16xf32>
    %14 = arith.mulf %11, %11 : vector<1x16xf32>
    %15 = arith.subf %13, %14 : vector<1x16xf32>
    %cst_11 = arith.constant 9.99999974E-6 : f32
    %16 = vector.broadcast %cst_11 : f32 to vector<1x16xf32>
    %17 = arith.addf %15, %16 : vector<1x16xf32>
    %18 = math.rsqrt %17 : vector<1x16xf32>
    %19 = arith.mulf %3, %18 : vector<1x16xf32>
    %20 = arith.mulf %11, %19 : vector<1x16xf32>
    %21 = arith.subf %4, %20 : vector<1x16xf32>
    %22 = vector.broadcast %19 : vector<1x16xf32> to vector<512x16xf32>
    %23 = arith.mulf %2, %22 : vector<512x16xf32>
    %24 = vector.broadcast %21 : vector<1x16xf32> to vector<512x16xf32>
    %25 = arith.addf %23, %24 : vector<512x16xf32>
    %cst_12 = arith.constant 0.000000e+00 : f32
    %26 = vector.broadcast %cst_12 : f32 to vector<512x16xf32>
    %27 = arith.maximumf %25, %26 : vector<512x16xf32>
    %c0_13 = arith.constant 0 : index
    %c0_14 = arith.constant 0 : index
    %28 = vector.load %arg7[%c0_13, %c0_14] : memref<512x16xbf16, #tpu.memory_space<vmem>>, vector<512x16xbf16>
    %c0_15 = arith.constant 0 : index
    %c0_16 = arith.constant 0 : index
    %29 = vector.load %arg8[%c0_15, %c0_16] : memref<16x64xbf16, #tpu.memory_space<vmem>>, vector<16x64xbf16>
    %cst_17 = arith.constant dense<0.000000e+00> : vector<512x64xf32>
    %30 = tpu.matmul %28, %29, %cst_17 {dimension_numbers = #tpu.dot_dimension_numbers<[1], [0], [0], [1], [0, 0, 1, 1], [], []>} : vector<512x16xbf16>, vector<16x64xbf16>, vector<512x64xf32> -> vector<512x64xf32>
    %c0_18 = arith.constant 0 : index
    %c0_19 = arith.constant 0 : index
    %31 = vector.load %arg9[%c0_18, %c0_19] : memref<1x64xf32, #tpu.memory_space<vmem>>, vector<1x64xf32>
    %c0_20 = arith.constant 0 : index
    %c0_21 = arith.constant 0 : index
    %32 = vector.load %arg10[%c0_20, %c0_21] : memref<1x64xf32, #tpu.memory_space<vmem>>, vector<1x64xf32>
    %cst_22 = arith.constant dense<0.000000e+00> : vector<64xf32>
    %33 = vector.multi_reduction <add>, %30, %cst_22 [0] : vector<512x64xf32> to vector<64xf32>
    %34 = vector.shape_cast %33 : vector<64xf32> to vector<1x64xf32>
    %35 = arith.mulf %30, %30 : vector<512x64xf32>
    %cst_23 = arith.constant dense<0.000000e+00> : vector<64xf32>
    %36 = vector.multi_reduction <add>, %35, %cst_23 [0] : vector<512x64xf32> to vector<64xf32>
    %37 = vector.shape_cast %36 : vector<64xf32> to vector<1x64xf32>
    %cst_24 = arith.constant 0.001953125 : f32
    %38 = vector.broadcast %cst_24 : f32 to vector<1x64xf32>
    %39 = arith.mulf %34, %38 : vector<1x64xf32>
    %cst_25 = arith.constant 0.001953125 : f32
    %40 = vector.broadcast %cst_25 : f32 to vector<1x64xf32>
    %41 = arith.mulf %37, %40 : vector<1x64xf32>
    %42 = arith.mulf %39, %39 : vector<1x64xf32>
    %43 = arith.subf %41, %42 : vector<1x64xf32>
    %cst_26 = arith.constant 9.99999974E-6 : f32
    %44 = vector.broadcast %cst_26 : f32 to vector<1x64xf32>
    %45 = arith.addf %43, %44 : vector<1x64xf32>
    %46 = math.rsqrt %45 : vector<1x64xf32>
    %47 = arith.mulf %31, %46 : vector<1x64xf32>
    %48 = arith.mulf %39, %47 : vector<1x64xf32>
    %49 = arith.subf %32, %48 : vector<1x64xf32>
    %50 = vector.broadcast %47 : vector<1x64xf32> to vector<512x64xf32>
    %51 = arith.mulf %30, %50 : vector<512x64xf32>
    %52 = vector.broadcast %49 : vector<1x64xf32> to vector<512x64xf32>
    %53 = arith.addf %51, %52 : vector<512x64xf32>
    %54 = arith.truncf %27 : vector<512x16xf32> to vector<512x16xbf16>
    %c0_27 = arith.constant 0 : index
    %c0_28 = arith.constant 0 : index
    %55 = vector.load %arg4[%c0_27, %c0_28] : memref<16x64xbf16, #tpu.memory_space<vmem>>, vector<16x64xbf16>
    %cst_29 = arith.constant dense<0.000000e+00> : vector<512x64xf32>
    %56 = tpu.matmul %54, %55, %cst_29 {dimension_numbers = #tpu.dot_dimension_numbers<[1], [0], [0], [1], [0, 0, 1, 1], [], []>} : vector<512x16xbf16>, vector<16x64xbf16>, vector<512x64xf32> -> vector<512x64xf32>
    %c0_30 = arith.constant 0 : index
    %c0_31 = arith.constant 0 : index
    %57 = vector.load %arg5[%c0_30, %c0_31] : memref<1x64xf32, #tpu.memory_space<vmem>>, vector<1x64xf32>
    %c0_32 = arith.constant 0 : index
    %c0_33 = arith.constant 0 : index
    %58 = vector.load %arg6[%c0_32, %c0_33] : memref<1x64xf32, #tpu.memory_space<vmem>>, vector<1x64xf32>
    %cst_34 = arith.constant dense<0.000000e+00> : vector<64xf32>
    %59 = vector.multi_reduction <add>, %56, %cst_34 [0] : vector<512x64xf32> to vector<64xf32>
    %60 = vector.shape_cast %59 : vector<64xf32> to vector<1x64xf32>
    %61 = arith.mulf %56, %56 : vector<512x64xf32>
    %cst_35 = arith.constant dense<0.000000e+00> : vector<64xf32>
    %62 = vector.multi_reduction <add>, %61, %cst_35 [0] : vector<512x64xf32> to vector<64xf32>
    %63 = vector.shape_cast %62 : vector<64xf32> to vector<1x64xf32>
    %cst_36 = arith.constant 0.001953125 : f32
    %64 = vector.broadcast %cst_36 : f32 to vector<1x64xf32>
    %65 = arith.mulf %60, %64 : vector<1x64xf32>
    %cst_37 = arith.constant 0.001953125 : f32
    %66 = vector.broadcast %cst_37 : f32 to vector<1x64xf32>
    %67 = arith.mulf %63, %66 : vector<1x64xf32>
    %68 = arith.mulf %65, %65 : vector<1x64xf32>
    %69 = arith.subf %67, %68 : vector<1x64xf32>
    %cst_38 = arith.constant 9.99999974E-6 : f32
    %70 = vector.broadcast %cst_38 : f32 to vector<1x64xf32>
    %71 = arith.addf %69, %70 : vector<1x64xf32>
    %72 = math.rsqrt %71 : vector<1x64xf32>
    %73 = arith.mulf %57, %72 : vector<1x64xf32>
    %74 = arith.mulf %65, %73 : vector<1x64xf32>
    %75 = arith.subf %58, %74 : vector<1x64xf32>
    %76 = vector.broadcast %73 : vector<1x64xf32> to vector<512x64xf32>
    %77 = arith.mulf %56, %76 : vector<512x64xf32>
    %78 = vector.broadcast %75 : vector<1x64xf32> to vector<512x64xf32>
    %79 = arith.addf %77, %78 : vector<512x64xf32>
    %80 = arith.addf %79, %53 : vector<512x64xf32>
    %cst_39 = arith.constant 0.000000e+00 : f32
    %81 = vector.broadcast %cst_39 : f32 to vector<512x64xf32>
    %82 = arith.maximumf %80, %81 : vector<512x64xf32>
    %83 = arith.truncf %82 : vector<512x64xf32> to vector<512x64xbf16>
    %c0_40 = arith.constant 0 : index
    %c0_41 = arith.constant 0 : index
    %84 = vector.load %arg14[%c0_40, %c0_41] : memref<512x64xbf16, #tpu.memory_space<vmem>>, vector<512x64xbf16>
    tpu.vector_store %arg14[%c0_40, %c0_41], %83 {strides = array<i32>} : memref<512x64xbf16, #tpu.memory_space<vmem>>, vector<512x64xbf16>,
    %85 = arith.truncf %82 : vector<512x64xf32> to vector<512x64xbf16>
    %c0_42 = arith.constant 0 : index
    %c0_43 = arith.constant 0 : index
    %86 = vector.load %arg11[%c0_42, %c0_43] : memref<64x32xbf16, #tpu.memory_space<vmem>>, vector<64x32xbf16>
    %cst_44 = arith.constant dense<0.000000e+00> : vector<512x32xf32>
    %87 = tpu.matmul %85, %86, %cst_44 {dimension_numbers = #tpu.dot_dimension_numbers<[1], [0], [0], [1], [0, 0, 1, 1], [], []>} : vector<512x64xbf16>, vector<64x32xbf16>, vector<512x32xf32> -> vector<512x32xf32>
    %c0_45 = arith.constant 0 : index
    %c0_46 = arith.constant 0 : index
    %88 = vector.load %arg12[%c0_45, %c0_46] : memref<1x32xf32, #tpu.memory_space<vmem>>, vector<1x32xf32>
    %c0_47 = arith.constant 0 : index
    %c0_48 = arith.constant 0 : index
    %89 = vector.load %arg13[%c0_47, %c0_48] : memref<1x32xf32, #tpu.memory_space<vmem>>, vector<1x32xf32>
    %cst_49 = arith.constant dense<0.000000e+00> : vector<32xf32>
    %90 = vector.multi_reduction <add>, %87, %cst_49 [0] : vector<512x32xf32> to vector<32xf32>
    %91 = vector.shape_cast %90 : vector<32xf32> to vector<1x32xf32>
    %92 = arith.mulf %87, %87 : vector<512x32xf32>
    %cst_50 = arith.constant dense<0.000000e+00> : vector<32xf32>
    %93 = vector.multi_reduction <add>, %92, %cst_50 [0] : vector<512x32xf32> to vector<32xf32>
    %94 = vector.shape_cast %93 : vector<32xf32> to vector<1x32xf32>
    %cst_51 = arith.constant 0.001953125 : f32
    %95 = vector.broadcast %cst_51 : f32 to vector<1x32xf32>
    %96 = arith.mulf %91, %95 : vector<1x32xf32>
    %cst_52 = arith.constant 0.001953125 : f32
    %97 = vector.broadcast %cst_52 : f32 to vector<1x32xf32>
    %98 = arith.mulf %94, %97 : vector<1x32xf32>
    %99 = arith.mulf %96, %96 : vector<1x32xf32>
    %100 = arith.subf %98, %99 : vector<1x32xf32>
    %cst_53 = arith.constant 9.99999974E-6 : f32
    %101 = vector.broadcast %cst_53 : f32 to vector<1x32xf32>
    %102 = arith.addf %100, %101 : vector<1x32xf32>
    %103 = math.rsqrt %102 : vector<1x32xf32>
    %104 = arith.mulf %88, %103 : vector<1x32xf32>
    %105 = arith.mulf %96, %104 : vector<1x32xf32>
    %106 = arith.subf %89, %105 : vector<1x32xf32>
    %107 = vector.broadcast %104 : vector<1x32xf32> to vector<512x32xf32>
    %108 = arith.mulf %87, %107 : vector<512x32xf32>
    %109 = vector.broadcast %106 : vector<1x32xf32> to vector<512x32xf32>
    %110 = arith.addf %108, %109 : vector<512x32xf32>
    %cst_54 = arith.constant 0.000000e+00 : f32
    %111 = vector.broadcast %cst_54 : f32 to vector<512x32xf32>
    %112 = arith.maximumf %110, %111 : vector<512x32xf32>
    %113 = arith.truncf %112 : vector<512x32xf32> to vector<512x32xbf16>
    %c0_55 = arith.constant 0 : index
    %c0_56 = arith.constant 0 : index
    %114 = vector.load %arg15[%c0_55, %c0_56] : memref<512x32xbf16, #tpu.memory_space<vmem>>, vector<512x32xbf16>
    tpu.vector_store %arg15[%c0_55, %c0_56], %113 {strides = array<i32>} : memref<512x32xbf16, #tpu.memory_space<vmem>>, vector<512x32xbf16>,
    return
  }
}

module attributes {stable_mosaic.version = 11 : i64} {
  func.func @kernel(%arg0: memref<128x288xbf16, #tpu.memory_space<vmem>>, %arg1: memref<288x32xbf16, #tpu.memory_space<vmem>>, %arg2: memref<1x32xf32, #tpu.memory_space<vmem>>, %arg3: memref<1x32xf32, #tpu.memory_space<vmem>>, %arg4: memref<32x128xbf16, #tpu.memory_space<vmem>>, %arg5: memref<1x128xf32, #tpu.memory_space<vmem>>, %arg6: memref<1x128xf32, #tpu.memory_space<vmem>>, %arg7: memref<128x64xbf16, #tpu.memory_space<vmem>>, %arg8: memref<64x128xbf16, #tpu.memory_space<vmem>>, %arg9: memref<1x128xf32, #tpu.memory_space<vmem>>, %arg10: memref<1x128xf32, #tpu.memory_space<vmem>>, %arg11: memref<128x64xbf16, #tpu.memory_space<vmem>>, %arg12: memref<1x64xf32, #tpu.memory_space<vmem>>, %arg13: memref<1x64xf32, #tpu.memory_space<vmem>>, %arg14: memref<128x128xbf16, #tpu.memory_space<vmem>>, %arg15: memref<128x64xbf16, #tpu.memory_space<vmem>>) attributes {dimension_semantics = [], scalar_prefetch = 0 : i64, scratch_operands = 0 : i64, tpu.core_type = #tpu.core_type<tc>} {
    %c0 = arith.constant 0 : index
    %c0_0 = arith.constant 0 : index
    %0 = vector.load %arg0[%c0, %c0_0] : memref<128x288xbf16, #tpu.memory_space<vmem>>, vector<128x288xbf16>
    %c0_1 = arith.constant 0 : index
    %c0_2 = arith.constant 0 : index
    %1 = vector.load %arg1[%c0_1, %c0_2] : memref<288x32xbf16, #tpu.memory_space<vmem>>, vector<288x32xbf16>
    %cst = arith.constant dense<0.000000e+00> : vector<128x32xf32>
    %2 = tpu.matmul %0, %1, %cst {dimension_numbers = #tpu.dot_dimension_numbers<[1], [0], [0], [1], [0, 0, 1, 1], [], []>} : vector<128x288xbf16>, vector<288x32xbf16>, vector<128x32xf32> -> vector<128x32xf32>
    %c0_3 = arith.constant 0 : index
    %c0_4 = arith.constant 0 : index
    %3 = vector.load %arg2[%c0_3, %c0_4] : memref<1x32xf32, #tpu.memory_space<vmem>>, vector<1x32xf32>
    %c0_5 = arith.constant 0 : index
    %c0_6 = arith.constant 0 : index
    %4 = vector.load %arg3[%c0_5, %c0_6] : memref<1x32xf32, #tpu.memory_space<vmem>>, vector<1x32xf32>
    %cst_7 = arith.constant dense<0.000000e+00> : vector<32xf32>
    %5 = vector.multi_reduction <add>, %2, %cst_7 [0] : vector<128x32xf32> to vector<32xf32>
    %6 = vector.shape_cast %5 : vector<32xf32> to vector<1x32xf32>
    %7 = arith.mulf %2, %2 : vector<128x32xf32>
    %cst_8 = arith.constant dense<0.000000e+00> : vector<32xf32>
    %8 = vector.multi_reduction <add>, %7, %cst_8 [0] : vector<128x32xf32> to vector<32xf32>
    %9 = vector.shape_cast %8 : vector<32xf32> to vector<1x32xf32>
    %cst_9 = arith.constant 7.812500e-03 : f32
    %10 = vector.broadcast %cst_9 : f32 to vector<1x32xf32>
    %11 = arith.mulf %6, %10 : vector<1x32xf32>
    %cst_10 = arith.constant 7.812500e-03 : f32
    %12 = vector.broadcast %cst_10 : f32 to vector<1x32xf32>
    %13 = arith.mulf %9, %12 : vector<1x32xf32>
    %14 = arith.mulf %11, %11 : vector<1x32xf32>
    %15 = arith.subf %13, %14 : vector<1x32xf32>
    %cst_11 = arith.constant 9.99999974E-6 : f32
    %16 = vector.broadcast %cst_11 : f32 to vector<1x32xf32>
    %17 = arith.addf %15, %16 : vector<1x32xf32>
    %18 = math.rsqrt %17 : vector<1x32xf32>
    %19 = arith.mulf %3, %18 : vector<1x32xf32>
    %20 = arith.mulf %11, %19 : vector<1x32xf32>
    %21 = arith.subf %4, %20 : vector<1x32xf32>
    %22 = vector.broadcast %19 : vector<1x32xf32> to vector<128x32xf32>
    %23 = arith.mulf %2, %22 : vector<128x32xf32>
    %24 = vector.broadcast %21 : vector<1x32xf32> to vector<128x32xf32>
    %25 = arith.addf %23, %24 : vector<128x32xf32>
    %cst_12 = arith.constant 0.000000e+00 : f32
    %26 = vector.broadcast %cst_12 : f32 to vector<128x32xf32>
    %27 = arith.maximumf %25, %26 : vector<128x32xf32>
    %c0_13 = arith.constant 0 : index
    %c0_14 = arith.constant 0 : index
    %28 = vector.load %arg7[%c0_13, %c0_14] : memref<128x64xbf16, #tpu.memory_space<vmem>>, vector<128x64xbf16>
    %c0_15 = arith.constant 0 : index
    %c0_16 = arith.constant 0 : index
    %29 = vector.load %arg8[%c0_15, %c0_16] : memref<64x128xbf16, #tpu.memory_space<vmem>>, vector<64x128xbf16>
    %cst_17 = arith.constant dense<0.000000e+00> : vector<128x128xf32>
    %30 = tpu.matmul %28, %29, %cst_17 {dimension_numbers = #tpu.dot_dimension_numbers<[1], [0], [0], [1], [0, 0, 1, 1], [], []>} : vector<128x64xbf16>, vector<64x128xbf16>, vector<128x128xf32> -> vector<128x128xf32>
    %c0_18 = arith.constant 0 : index
    %c0_19 = arith.constant 0 : index
    %31 = vector.load %arg9[%c0_18, %c0_19] : memref<1x128xf32, #tpu.memory_space<vmem>>, vector<1x128xf32>
    %c0_20 = arith.constant 0 : index
    %c0_21 = arith.constant 0 : index
    %32 = vector.load %arg10[%c0_20, %c0_21] : memref<1x128xf32, #tpu.memory_space<vmem>>, vector<1x128xf32>
    %cst_22 = arith.constant dense<0.000000e+00> : vector<128xf32>
    %33 = vector.multi_reduction <add>, %30, %cst_22 [0] : vector<128x128xf32> to vector<128xf32>
    %34 = vector.shape_cast %33 : vector<128xf32> to vector<1x128xf32>
    %35 = arith.mulf %30, %30 : vector<128x128xf32>
    %cst_23 = arith.constant dense<0.000000e+00> : vector<128xf32>
    %36 = vector.multi_reduction <add>, %35, %cst_23 [0] : vector<128x128xf32> to vector<128xf32>
    %37 = vector.shape_cast %36 : vector<128xf32> to vector<1x128xf32>
    %cst_24 = arith.constant 7.812500e-03 : f32
    %38 = vector.broadcast %cst_24 : f32 to vector<1x128xf32>
    %39 = arith.mulf %34, %38 : vector<1x128xf32>
    %cst_25 = arith.constant 7.812500e-03 : f32
    %40 = vector.broadcast %cst_25 : f32 to vector<1x128xf32>
    %41 = arith.mulf %37, %40 : vector<1x128xf32>
    %42 = arith.mulf %39, %39 : vector<1x128xf32>
    %43 = arith.subf %41, %42 : vector<1x128xf32>
    %cst_26 = arith.constant 9.99999974E-6 : f32
    %44 = vector.broadcast %cst_26 : f32 to vector<1x128xf32>
    %45 = arith.addf %43, %44 : vector<1x128xf32>
    %46 = math.rsqrt %45 : vector<1x128xf32>
    %47 = arith.mulf %31, %46 : vector<1x128xf32>
    %48 = arith.mulf %39, %47 : vector<1x128xf32>
    %49 = arith.subf %32, %48 : vector<1x128xf32>
    %50 = vector.broadcast %47 : vector<1x128xf32> to vector<128x128xf32>
    %51 = arith.mulf %30, %50 : vector<128x128xf32>
    %52 = vector.broadcast %49 : vector<1x128xf32> to vector<128x128xf32>
    %53 = arith.addf %51, %52 : vector<128x128xf32>
    %54 = arith.truncf %27 : vector<128x32xf32> to vector<128x32xbf16>
    %c0_27 = arith.constant 0 : index
    %c0_28 = arith.constant 0 : index
    %55 = vector.load %arg4[%c0_27, %c0_28] : memref<32x128xbf16, #tpu.memory_space<vmem>>, vector<32x128xbf16>
    %cst_29 = arith.constant dense<0.000000e+00> : vector<128x128xf32>
    %56 = tpu.matmul %54, %55, %cst_29 {dimension_numbers = #tpu.dot_dimension_numbers<[1], [0], [0], [1], [0, 0, 1, 1], [], []>} : vector<128x32xbf16>, vector<32x128xbf16>, vector<128x128xf32> -> vector<128x128xf32>
    %c0_30 = arith.constant 0 : index
    %c0_31 = arith.constant 0 : index
    %57 = vector.load %arg5[%c0_30, %c0_31] : memref<1x128xf32, #tpu.memory_space<vmem>>, vector<1x128xf32>
    %c0_32 = arith.constant 0 : index
    %c0_33 = arith.constant 0 : index
    %58 = vector.load %arg6[%c0_32, %c0_33] : memref<1x128xf32, #tpu.memory_space<vmem>>, vector<1x128xf32>
    %cst_34 = arith.constant dense<0.000000e+00> : vector<128xf32>
    %59 = vector.multi_reduction <add>, %56, %cst_34 [0] : vector<128x128xf32> to vector<128xf32>
    %60 = vector.shape_cast %59 : vector<128xf32> to vector<1x128xf32>
    %61 = arith.mulf %56, %56 : vector<128x128xf32>
    %cst_35 = arith.constant dense<0.000000e+00> : vector<128xf32>
    %62 = vector.multi_reduction <add>, %61, %cst_35 [0] : vector<128x128xf32> to vector<128xf32>
    %63 = vector.shape_cast %62 : vector<128xf32> to vector<1x128xf32>
    %cst_36 = arith.constant 7.812500e-03 : f32
    %64 = vector.broadcast %cst_36 : f32 to vector<1x128xf32>
    %65 = arith.mulf %60, %64 : vector<1x128xf32>
    %cst_37 = arith.constant 7.812500e-03 : f32
    %66 = vector.broadcast %cst_37 : f32 to vector<1x128xf32>
    %67 = arith.mulf %63, %66 : vector<1x128xf32>
    %68 = arith.mulf %65, %65 : vector<1x128xf32>
    %69 = arith.subf %67, %68 : vector<1x128xf32>
    %cst_38 = arith.constant 9.99999974E-6 : f32
    %70 = vector.broadcast %cst_38 : f32 to vector<1x128xf32>
    %71 = arith.addf %69, %70 : vector<1x128xf32>
    %72 = math.rsqrt %71 : vector<1x128xf32>
    %73 = arith.mulf %57, %72 : vector<1x128xf32>
    %74 = arith.mulf %65, %73 : vector<1x128xf32>
    %75 = arith.subf %58, %74 : vector<1x128xf32>
    %76 = vector.broadcast %73 : vector<1x128xf32> to vector<128x128xf32>
    %77 = arith.mulf %56, %76 : vector<128x128xf32>
    %78 = vector.broadcast %75 : vector<1x128xf32> to vector<128x128xf32>
    %79 = arith.addf %77, %78 : vector<128x128xf32>
    %80 = arith.addf %79, %53 : vector<128x128xf32>
    %cst_39 = arith.constant 0.000000e+00 : f32
    %81 = vector.broadcast %cst_39 : f32 to vector<128x128xf32>
    %82 = arith.maximumf %80, %81 : vector<128x128xf32>
    %83 = arith.truncf %82 : vector<128x128xf32> to vector<128x128xbf16>
    %c0_40 = arith.constant 0 : index
    %c0_41 = arith.constant 0 : index
    %84 = vector.load %arg14[%c0_40, %c0_41] : memref<128x128xbf16, #tpu.memory_space<vmem>>, vector<128x128xbf16>
    tpu.vector_store %arg14[%c0_40, %c0_41], %83 {strides = array<i32>} : memref<128x128xbf16, #tpu.memory_space<vmem>>, vector<128x128xbf16>,
    %85 = arith.truncf %82 : vector<128x128xf32> to vector<128x128xbf16>
    %c0_42 = arith.constant 0 : index
    %c0_43 = arith.constant 0 : index
    %86 = vector.load %arg11[%c0_42, %c0_43] : memref<128x64xbf16, #tpu.memory_space<vmem>>, vector<128x64xbf16>
    %cst_44 = arith.constant dense<0.000000e+00> : vector<128x64xf32>
    %87 = tpu.matmul %85, %86, %cst_44 {dimension_numbers = #tpu.dot_dimension_numbers<[1], [0], [0], [1], [0, 0, 1, 1], [], []>} : vector<128x128xbf16>, vector<128x64xbf16>, vector<128x64xf32> -> vector<128x64xf32>
    %c0_45 = arith.constant 0 : index
    %c0_46 = arith.constant 0 : index
    %88 = vector.load %arg12[%c0_45, %c0_46] : memref<1x64xf32, #tpu.memory_space<vmem>>, vector<1x64xf32>
    %c0_47 = arith.constant 0 : index
    %c0_48 = arith.constant 0 : index
    %89 = vector.load %arg13[%c0_47, %c0_48] : memref<1x64xf32, #tpu.memory_space<vmem>>, vector<1x64xf32>
    %cst_49 = arith.constant dense<0.000000e+00> : vector<64xf32>
    %90 = vector.multi_reduction <add>, %87, %cst_49 [0] : vector<128x64xf32> to vector<64xf32>
    %91 = vector.shape_cast %90 : vector<64xf32> to vector<1x64xf32>
    %92 = arith.mulf %87, %87 : vector<128x64xf32>
    %cst_50 = arith.constant dense<0.000000e+00> : vector<64xf32>
    %93 = vector.multi_reduction <add>, %92, %cst_50 [0] : vector<128x64xf32> to vector<64xf32>
    %94 = vector.shape_cast %93 : vector<64xf32> to vector<1x64xf32>
    %cst_51 = arith.constant 7.812500e-03 : f32
    %95 = vector.broadcast %cst_51 : f32 to vector<1x64xf32>
    %96 = arith.mulf %91, %95 : vector<1x64xf32>
    %cst_52 = arith.constant 7.812500e-03 : f32
    %97 = vector.broadcast %cst_52 : f32 to vector<1x64xf32>
    %98 = arith.mulf %94, %97 : vector<1x64xf32>
    %99 = arith.mulf %96, %96 : vector<1x64xf32>
    %100 = arith.subf %98, %99 : vector<1x64xf32>
    %cst_53 = arith.constant 9.99999974E-6 : f32
    %101 = vector.broadcast %cst_53 : f32 to vector<1x64xf32>
    %102 = arith.addf %100, %101 : vector<1x64xf32>
    %103 = math.rsqrt %102 : vector<1x64xf32>
    %104 = arith.mulf %88, %103 : vector<1x64xf32>
    %105 = arith.mulf %96, %104 : vector<1x64xf32>
    %106 = arith.subf %89, %105 : vector<1x64xf32>
    %107 = vector.broadcast %104 : vector<1x64xf32> to vector<128x64xf32>
    %108 = arith.mulf %87, %107 : vector<128x64xf32>
    %109 = vector.broadcast %106 : vector<1x64xf32> to vector<128x64xf32>
    %110 = arith.addf %108, %109 : vector<128x64xf32>
    %cst_54 = arith.constant 0.000000e+00 : f32
    %111 = vector.broadcast %cst_54 : f32 to vector<128x64xf32>
    %112 = arith.maximumf %110, %111 : vector<128x64xf32>
    %113 = arith.truncf %112 : vector<128x64xf32> to vector<128x64xbf16>
    %c0_55 = arith.constant 0 : index
    %c0_56 = arith.constant 0 : index
    %114 = vector.load %arg15[%c0_55, %c0_56] : memref<128x64xbf16, #tpu.memory_space<vmem>>, vector<128x64xbf16>
    tpu.vector_store %arg15[%c0_55, %c0_56], %113 {strides = array<i32>} : memref<128x64xbf16, #tpu.memory_space<vmem>>, vector<128x64xbf16>,
    return
  }
}

module attributes {stable_mosaic.version = 11 : i64} {
  func.func @kernel(%arg0: memref<32x576xbf16, #tpu.memory_space<vmem>>, %arg1: memref<576x64xbf16, #tpu.memory_space<vmem>>, %arg2: memref<1x64xf32, #tpu.memory_space<vmem>>, %arg3: memref<1x64xf32, #tpu.memory_space<vmem>>, %arg4: memref<64x256xbf16, #tpu.memory_space<vmem>>, %arg5: memref<1x256xf32, #tpu.memory_space<vmem>>, %arg6: memref<1x256xf32, #tpu.memory_space<vmem>>, %arg7: memref<32x128xbf16, #tpu.memory_space<vmem>>, %arg8: memref<128x256xbf16, #tpu.memory_space<vmem>>, %arg9: memref<1x256xf32, #tpu.memory_space<vmem>>, %arg10: memref<1x256xf32, #tpu.memory_space<vmem>>, %arg11: memref<32x256xbf16, #tpu.memory_space<vmem>>) attributes {dimension_semantics = [], scalar_prefetch = 0 : i64, scratch_operands = 0 : i64, tpu.core_type = #tpu.core_type<tc>} {
    %c0 = arith.constant 0 : index
    %c0_0 = arith.constant 0 : index
    %0 = vector.load %arg0[%c0, %c0_0] : memref<32x576xbf16, #tpu.memory_space<vmem>>, vector<32x576xbf16>
    %c0_1 = arith.constant 0 : index
    %c0_2 = arith.constant 0 : index
    %1 = vector.load %arg1[%c0_1, %c0_2] : memref<576x64xbf16, #tpu.memory_space<vmem>>, vector<576x64xbf16>
    %cst = arith.constant dense<0.000000e+00> : vector<32x64xf32>
    %2 = tpu.matmul %0, %1, %cst {dimension_numbers = #tpu.dot_dimension_numbers<[1], [0], [0], [1], [0, 0, 1, 1], [], []>} : vector<32x576xbf16>, vector<576x64xbf16>, vector<32x64xf32> -> vector<32x64xf32>
    %c0_3 = arith.constant 0 : index
    %c0_4 = arith.constant 0 : index
    %3 = vector.load %arg2[%c0_3, %c0_4] : memref<1x64xf32, #tpu.memory_space<vmem>>, vector<1x64xf32>
    %c0_5 = arith.constant 0 : index
    %c0_6 = arith.constant 0 : index
    %4 = vector.load %arg3[%c0_5, %c0_6] : memref<1x64xf32, #tpu.memory_space<vmem>>, vector<1x64xf32>
    %cst_7 = arith.constant dense<0.000000e+00> : vector<64xf32>
    %5 = vector.multi_reduction <add>, %2, %cst_7 [0] : vector<32x64xf32> to vector<64xf32>
    %6 = vector.shape_cast %5 : vector<64xf32> to vector<1x64xf32>
    %7 = arith.mulf %2, %2 : vector<32x64xf32>
    %cst_8 = arith.constant dense<0.000000e+00> : vector<64xf32>
    %8 = vector.multi_reduction <add>, %7, %cst_8 [0] : vector<32x64xf32> to vector<64xf32>
    %9 = vector.shape_cast %8 : vector<64xf32> to vector<1x64xf32>
    %cst_9 = arith.constant 3.125000e-02 : f32
    %10 = vector.broadcast %cst_9 : f32 to vector<1x64xf32>
    %11 = arith.mulf %6, %10 : vector<1x64xf32>
    %cst_10 = arith.constant 3.125000e-02 : f32
    %12 = vector.broadcast %cst_10 : f32 to vector<1x64xf32>
    %13 = arith.mulf %9, %12 : vector<1x64xf32>
    %14 = arith.mulf %11, %11 : vector<1x64xf32>
    %15 = arith.subf %13, %14 : vector<1x64xf32>
    %cst_11 = arith.constant 9.99999974E-6 : f32
    %16 = vector.broadcast %cst_11 : f32 to vector<1x64xf32>
    %17 = arith.addf %15, %16 : vector<1x64xf32>
    %18 = math.rsqrt %17 : vector<1x64xf32>
    %19 = arith.mulf %3, %18 : vector<1x64xf32>
    %20 = arith.mulf %11, %19 : vector<1x64xf32>
    %21 = arith.subf %4, %20 : vector<1x64xf32>
    %22 = vector.broadcast %19 : vector<1x64xf32> to vector<32x64xf32>
    %23 = arith.mulf %2, %22 : vector<32x64xf32>
    %24 = vector.broadcast %21 : vector<1x64xf32> to vector<32x64xf32>
    %25 = arith.addf %23, %24 : vector<32x64xf32>
    %cst_12 = arith.constant 0.000000e+00 : f32
    %26 = vector.broadcast %cst_12 : f32 to vector<32x64xf32>
    %27 = arith.maximumf %25, %26 : vector<32x64xf32>
    %c0_13 = arith.constant 0 : index
    %c0_14 = arith.constant 0 : index
    %28 = vector.load %arg7[%c0_13, %c0_14] : memref<32x128xbf16, #tpu.memory_space<vmem>>, vector<32x128xbf16>
    %c0_15 = arith.constant 0 : index
    %c0_16 = arith.constant 0 : index
    %29 = vector.load %arg8[%c0_15, %c0_16] : memref<128x256xbf16, #tpu.memory_space<vmem>>, vector<128x256xbf16>
    %cst_17 = arith.constant dense<0.000000e+00> : vector<32x256xf32>
    %30 = tpu.matmul %28, %29, %cst_17 {dimension_numbers = #tpu.dot_dimension_numbers<[1], [0], [0], [1], [0, 0, 1, 1], [], []>} : vector<32x128xbf16>, vector<128x256xbf16>, vector<32x256xf32> -> vector<32x256xf32>
    %c0_18 = arith.constant 0 : index
    %c0_19 = arith.constant 0 : index
    %31 = vector.load %arg9[%c0_18, %c0_19] : memref<1x256xf32, #tpu.memory_space<vmem>>, vector<1x256xf32>
    %c0_20 = arith.constant 0 : index
    %c0_21 = arith.constant 0 : index
    %32 = vector.load %arg10[%c0_20, %c0_21] : memref<1x256xf32, #tpu.memory_space<vmem>>, vector<1x256xf32>
    %cst_22 = arith.constant dense<0.000000e+00> : vector<256xf32>
    %33 = vector.multi_reduction <add>, %30, %cst_22 [0] : vector<32x256xf32> to vector<256xf32>
    %34 = vector.shape_cast %33 : vector<256xf32> to vector<1x256xf32>
    %35 = arith.mulf %30, %30 : vector<32x256xf32>
    %cst_23 = arith.constant dense<0.000000e+00> : vector<256xf32>
    %36 = vector.multi_reduction <add>, %35, %cst_23 [0] : vector<32x256xf32> to vector<256xf32>
    %37 = vector.shape_cast %36 : vector<256xf32> to vector<1x256xf32>
    %cst_24 = arith.constant 3.125000e-02 : f32
    %38 = vector.broadcast %cst_24 : f32 to vector<1x256xf32>
    %39 = arith.mulf %34, %38 : vector<1x256xf32>
    %cst_25 = arith.constant 3.125000e-02 : f32
    %40 = vector.broadcast %cst_25 : f32 to vector<1x256xf32>
    %41 = arith.mulf %37, %40 : vector<1x256xf32>
    %42 = arith.mulf %39, %39 : vector<1x256xf32>
    %43 = arith.subf %41, %42 : vector<1x256xf32>
    %cst_26 = arith.constant 9.99999974E-6 : f32
    %44 = vector.broadcast %cst_26 : f32 to vector<1x256xf32>
    %45 = arith.addf %43, %44 : vector<1x256xf32>
    %46 = math.rsqrt %45 : vector<1x256xf32>
    %47 = arith.mulf %31, %46 : vector<1x256xf32>
    %48 = arith.mulf %39, %47 : vector<1x256xf32>
    %49 = arith.subf %32, %48 : vector<1x256xf32>
    %50 = vector.broadcast %47 : vector<1x256xf32> to vector<32x256xf32>
    %51 = arith.mulf %30, %50 : vector<32x256xf32>
    %52 = vector.broadcast %49 : vector<1x256xf32> to vector<32x256xf32>
    %53 = arith.addf %51, %52 : vector<32x256xf32>
    %54 = arith.truncf %27 : vector<32x64xf32> to vector<32x64xbf16>
    %c0_27 = arith.constant 0 : index
    %c0_28 = arith.constant 0 : index
    %55 = vector.load %arg4[%c0_27, %c0_28] : memref<64x256xbf16, #tpu.memory_space<vmem>>, vector<64x256xbf16>
    %cst_29 = arith.constant dense<0.000000e+00> : vector<32x256xf32>
    %56 = tpu.matmul %54, %55, %cst_29 {dimension_numbers = #tpu.dot_dimension_numbers<[1], [0], [0], [1], [0, 0, 1, 1], [], []>} : vector<32x64xbf16>, vector<64x256xbf16>, vector<32x256xf32> -> vector<32x256xf32>
    %c0_30 = arith.constant 0 : index
    %c0_31 = arith.constant 0 : index
    %57 = vector.load %arg5[%c0_30, %c0_31] : memref<1x256xf32, #tpu.memory_space<vmem>>, vector<1x256xf32>
    %c0_32 = arith.constant 0 : index
    %c0_33 = arith.constant 0 : index
    %58 = vector.load %arg6[%c0_32, %c0_33] : memref<1x256xf32, #tpu.memory_space<vmem>>, vector<1x256xf32>
    %cst_34 = arith.constant dense<0.000000e+00> : vector<256xf32>
    %59 = vector.multi_reduction <add>, %56, %cst_34 [0] : vector<32x256xf32> to vector<256xf32>
    %60 = vector.shape_cast %59 : vector<256xf32> to vector<1x256xf32>
    %61 = arith.mulf %56, %56 : vector<32x256xf32>
    %cst_35 = arith.constant dense<0.000000e+00> : vector<256xf32>
    %62 = vector.multi_reduction <add>, %61, %cst_35 [0] : vector<32x256xf32> to vector<256xf32>
    %63 = vector.shape_cast %62 : vector<256xf32> to vector<1x256xf32>
    %cst_36 = arith.constant 3.125000e-02 : f32
    %64 = vector.broadcast %cst_36 : f32 to vector<1x256xf32>
    %65 = arith.mulf %60, %64 : vector<1x256xf32>
    %cst_37 = arith.constant 3.125000e-02 : f32
    %66 = vector.broadcast %cst_37 : f32 to vector<1x256xf32>
    %67 = arith.mulf %63, %66 : vector<1x256xf32>
    %68 = arith.mulf %65, %65 : vector<1x256xf32>
    %69 = arith.subf %67, %68 : vector<1x256xf32>
    %cst_38 = arith.constant 9.99999974E-6 : f32
    %70 = vector.broadcast %cst_38 : f32 to vector<1x256xf32>
    %71 = arith.addf %69, %70 : vector<1x256xf32>
    %72 = math.rsqrt %71 : vector<1x256xf32>
    %73 = arith.mulf %57, %72 : vector<1x256xf32>
    %74 = arith.mulf %65, %73 : vector<1x256xf32>
    %75 = arith.subf %58, %74 : vector<1x256xf32>
    %76 = vector.broadcast %73 : vector<1x256xf32> to vector<32x256xf32>
    %77 = arith.mulf %56, %76 : vector<32x256xf32>
    %78 = vector.broadcast %75 : vector<1x256xf32> to vector<32x256xf32>
    %79 = arith.addf %77, %78 : vector<32x256xf32>
    %80 = arith.addf %79, %53 : vector<32x256xf32>
    %cst_39 = arith.constant 0.000000e+00 : f32
    %81 = vector.broadcast %cst_39 : f32 to vector<32x256xf32>
    %82 = arith.maximumf %80, %81 : vector<32x256xf32>
    %83 = arith.truncf %82 : vector<32x256xf32> to vector<32x256xbf16>
    %c0_40 = arith.constant 0 : index
    %c0_41 = arith.constant 0 : index
    %84 = vector.load %arg11[%c0_40, %c0_41] : memref<32x256xbf16, #tpu.memory_space<vmem>>, vector<32x256xbf16>
    tpu.vector_store %arg11[%c0_40, %c0_41], %83 {strides = array<i32>} : memref<32x256xbf16, #tpu.memory_space<vmem>>, vector<32x256xbf16>,
    return
  }
}

</mosaic_0001>

<bundles_post_ra>
// kernel: _lambda_.4
= control target key start
LH: loop header
LB: loop body
LE: loop exit
PB: predicated region body
PF: predicated region fallthrough
CT: control target
= control target key end

     0   :  { %14 = vsyncpa [#allocation3], 0  ;;  %s6462_s0 = inlined_call_operand.vmem [shape: bf16[512,9], index: 0, kind: input, shape index: {}]   ;;  %s6463_s1 = inlined_call_operand.hbm [shape: bf16[9,16], index: 1, kind: input, shape index: {}]   ;;  %s6464_s2 = inlined_call_operand.vmem [shape: f32[1,16], index: 2, kind: input, shape index: {}, may-alias: {2,5}]   ;;  %s6465_s3 = inlined_call_operand.vmem [shape: f32[1,16], index: 3, kind: input, shape index: {}, may-alias: {3,6}]   ;;  %s6466_s4 = inlined_call_operand.hbm [shape: bf16[16,16], index: 4, kind: input, shape index: {}]   ;;  %s6467_s5 = inlined_call_operand.vmem [shape: f32[1,16], index: 5, kind: input, shape index: {}, may-alias: {2,5}]   ;;  %s6468_s6 = inlined_call_operand.vmem [shape: f32[1,16], index: 6, kind: input, shape index: {}, may-alias: {3,6}]   ;;  %s6469_s7 = inlined_call_operand.vmem [shape: bf16[512,16], index: 7, kind: output, shape index: {0}]   ;;  %s6470_s8 = inlined_call_operand.vmem [shape: bf16[512,16], index: 8, kind: output, shape index: {1}]  }
   0x1   :  { %15 = vsyncpa [#allocation5], 0  ;;  %s3455_s27 = smov [#allocation2]  }
   0x2   :  { %s23_s28 = sshll.u32 %s3455_s27, 4  ;;  %s24_s28 = int_to_ptr.vmem [resolvable:$true] %s23_s28 }
   0x3   :  { %s3419_s29 = scalar_lea.vmem %s24_s28, 128  ;;  %p3424_p1 = scmp.lt.s32.totalorder %s24_s28, %s24_s28 }
   0x4   :  { %p3420_p0 = scmp.ne.s32.totalorder %s24_s28, %s3419_s29  ;;  %p3425_p2 = scmp.lt.s32.totalorder %s3419_s29, %s3419_s29 }
   0x6   :  { %p3426_p3 = por %p3425_p2, %p3424_p1 }
   0x8   :  { %p3427_p4 = pnand %p3426_p3, %p3420_p0 }
   0xa   :  { %3430 = shalt.err (!%p3427_p4)
}
   0xb   :  { %s3456_s30 = smov 64   ;;  %s3457_s9 = smov 4  }
   0xc   :  { %29 = dma.hbm_to_vmem [thread:$0]  %s6463_s1, 128, %s24_s28, [#allocation3], %s3456_s30, %s3456_s30, %s3457_s9  }
   0xd   :  { %s3458_s12 = smov [#allocation4]  }
   0xe   :  { %s39_s13 = sshll.u32 %s3458_s12, 4  ;;  %s40_s13 = int_to_ptr.vmem [resolvable:$true] %s39_s13 }
   0xf   :  { %s3439_s14 = scalar_lea.vmem %s40_s13, 128  ;;  %p3444_p6 = scmp.lt.s32.totalorder %s40_s13, %s40_s13 }
  0x10   :  { %p3440_p5 = scmp.ne.s32.totalorder %s40_s13, %s3439_s14  ;;  %p3445_p7 = scmp.lt.s32.totalorder %s3439_s14, %s3439_s14 }
  0x12   :  { %p3446_p8 = por %p3445_p7, %p3444_p6 }
  0x14   :  { %p3447_p9 = pnand %p3446_p8, %p3440_p5 }
  0x16   :  { %3450 = shalt.err (!%p3447_p9)
}
  0x17   :  { %45 = dma.hbm_to_vmem [thread:$0]  %s6466_s4, 128, %s40_s13, [#allocation5], %s3456_s30, %s3456_s30, %s3457_s9  }
  0x18   :  { %3451 = dma.done.wait [#allocation3], 128  }
  0x19   :  { %3452 = vsyncadd [#allocation3], 4294967168 }
  0x1a   :  { %3453 = dma.done.wait [#allocation5], 128  }
  0x1b   :  { %3454 = vsyncadd [#allocation5], 4294967168  ;;  %vm385_vm0 = vcmask 1043456   ;;  %vm386_vm1 = vcmask 1044480   ;;  %v3459_v0 = vmov 65535   ;;  %vm288_vm2 = vcmask 72704  }
  0x1c   :  { %v387_v1 = vsel %vm385_vm0, 4294967295, %v3459_v0  ;;  %v3373_v3 = vld [vmem:[#allocation2] sm:$0x1f]   ;;  %v3375_v6 = vld [vmem:[%s6462_s0 + $0x8] sm:$0xff]   ;;  %v3376_v7 = vld [vmem:[%s6462_s0 + $0x10] sm:$0xff]   ;;  %vm683_vm3 = vcmask 130048  }
  0x1d   :  { %v388_v2 = vsel %vm386_vm1, %v387_v1, 0  ;;  %v3374_v4 = vld [vmem:[%s6462_s0] sm:$0xff]   ;;  %v3377_v8 = vld [vmem:[%s6462_s0 + $0x18] sm:$0xff]   ;;  %v3379_v10 = vld [vmem:[%s6462_s0 + $0x28] sm:$0xff]   ;;  %vm1483_vm4 = vcmask 125952  }
  0x1e   :  { %v390_v5 = vand.u32 %v3373_v3, %v388_v2  ;;  %3238 = vmatprep.mubr.msk.bf16.mxu0 %vm288_vm2, %v3374_v4  ;;  %v3378_v9 = vld [vmem:[%s6462_s0 + $0x20] sm:$0xff]   ;;  %v3380_v11 = vld [vmem:[%s6462_s0 + $0x30] sm:$0xff]   ;;  %v3381_v12 = vld [vmem:[%s6462_s0 + $0x38] sm:$0xff]  }
  0x1f   :  { %v3382_v13 = vld [vmem:[%s6462_s0 + $0x40] sm:$0xff]   ;;  %v3383_v14 = vld [vmem:[%s6462_s0 + $0x48] sm:$0xff]   ;;  %v3384_v15 = vld [vmem:[%s6462_s0 + $0x50] sm:$0xff]  }
  0x20   :  { %3236 = vmatprep.subr.bf16.mxu0 %v390_v5  ;;  %v3385_v16 = vld [vmem:[%s6462_s0 + $0x58] sm:$0xff]   ;;  %v3386_v17 = vld [vmem:[%s6462_s0 + $0x60] sm:$0xff]   ;;  %v3387_v18 = vld [vmem:[%s6462_s0 + $0x68] sm:$0xff]  }
  0x21   :  { %3237 = vmatpush3.bf16.msra.mxu0 %v390_v5  ;;  %v3388_v19 = vld [vmem:[%s6462_s0 + $0x70] sm:$0xff]   ;;  %v3389_v20 = vld [vmem:[%s6462_s0 + $0x78] sm:$0xff]   ;;  %v3390_v21 = vld [vmem:[%s6462_s0 + $0x80] sm:$0xff]  }
  0x22   :  { %v3391_v22 = vld [vmem:[%s6462_s0 + $0x88] sm:$0xff]   ;;  %v3392_v23 = vld [vmem:[%s6462_s0 + $0x90] sm:$0xff]   ;;  %v3393_v24 = vld [vmem:[%s6462_s0 + $0x98] sm:$0xff]  }
  0x23   :  { %v3394_v25 = vld [vmem:[%s6462_s0 + $0xa0] sm:$0xff]   ;;  %v3395_v26 = vld [vmem:[%s6462_s0 + $0xa8] sm:$0xff]   ;;  %v3396_v27 = vld [vmem:[%s6462_s0 + $0xb0] sm:$0xff]  }
  0x24   :  { %3239 = vmatmul.mubr.msk.bf16.vlgmr.msra.gmra.mxu0 %vm288_vm2, %v3375_v6  ;;  %v3397_v28 = vld [vmem:[%s6462_s0 + $0xb8] sm:$0xff]   ;;  %v3398_v29 = vld [vmem:[%s6462_s0 + $0xc0] sm:$0xff]   ;;  %v3399_v30 = vld [vmem:[%s6462_s0 + $0xc8] sm:$0xff]  }
  0x25   :  { %3242 = vmatprep.mubr.msk.bf16.mxu0 %vm288_vm2, %v3376_v7  ;;  %v3400_v31 = vld [vmem:[%s6462_s0 + $0xd0] sm:$0xff]   ;;  %v3401_v32 = vld [vmem:[%s6462_s0 + $0xd8] sm:$0xff]   ;;  %v3402_v33 = vld [vmem:[%s6462_s0 + $0xe0] sm:$0xff]  }
  0x26   :  { %v3403_v34 = vld [vmem:[%s6462_s0 + $0xe8] sm:$0xff]   ;;  %v3404_v35 = vld [vmem:[%s6462_s0 + $0xf0] sm:$0xff]   ;;  %v3405_v36 = vld [vmem:[%s6462_s0 + $0xf8] sm:$0xff]  }
  0x2c   :  { %3243 = vmatmul.mubr.msk.bf16.gmra.mxu0 %vm288_vm2, %v3377_v8 }
  0x2d   :  { %3246 = vmatprep.mubr.msk.bf16.mxu0 %vm288_vm2, %v3378_v9 }
  0x34   :  { %3247 = vmatmul.mubr.msk.bf16.gmra.mxu0 %vm288_vm2, %v3379_v10 }
  0x35   :  { %3250 = vmatprep.mubr.msk.bf16.mxu0 %vm288_vm2, %v3380_v11 }
  0x3c   :  { %3251 = vmatmul.mubr.msk.bf16.gmra.mxu0 %vm288_vm2, %v3381_v12 }
  0x3d   :  { %3254 = vmatprep.mubr.msk.bf16.mxu0 %vm288_vm2, %v3382_v13 }
  0x44   :  { %3255 = vmatmul.mubr.msk.bf16.gmra.mxu0 %vm288_vm2, %v3383_v14 }
  0x45   :  { %3258 = vmatprep.mubr.msk.bf16.mxu0 %vm288_vm2, %v3384_v15 }
  0x4c   :  { %3259 = vmatmul.mubr.msk.bf16.gmra.mxu0 %vm288_vm2, %v3385_v16 }
  0x4d   :  { %3262 = vmatprep.mubr.msk.bf16.mxu0 %vm288_vm2, %v3386_v17 }
  0x54   :  { %3263 = vmatmul.mubr.msk.bf16.gmra.mxu0 %vm288_vm2, %v3387_v18 }
  0x55   :  { %3266 = vmatprep.mubr.msk.bf16.mxu0 %vm288_vm2, %v3388_v19 }
  0x5c   :  { %3267 = vmatmul.mubr.msk.bf16.gmra.mxu0 %vm288_vm2, %v3389_v20 }
  0x5d   :  { %3270 = vmatprep.mubr.msk.bf16.mxu0 %vm288_vm2, %v3390_v21 }
  0x64   :  { %3271 = vmatmul.mubr.msk.bf16.gmra.mxu0 %vm288_vm2, %v3391_v22 }
  0x65   :  { %3274 = vmatprep.mubr.msk.bf16.mxu0 %vm288_vm2, %v3392_v23 }
  0x6c   :  { %3275 = vmatmul.mubr.msk.bf16.gmra.mxu0 %vm288_vm2, %v3393_v24 }
  0x6d   :  { %3278 = vmatprep.mubr.msk.bf16.mxu0 %vm288_vm2, %v3394_v25 }
  0x74   :  { %3279 = vmatmul.mubr.msk.bf16.gmra.mxu0 %vm288_vm2, %v3395_v26 }
  0x75   :  { %3282 = vmatprep.mubr.msk.bf16.mxu0 %vm288_vm2, %v3396_v27 }
  0x7c   :  { %3283 = vmatmul.mubr.msk.bf16.gmra.mxu0 %vm288_vm2, %v3397_v28 }
  0x7d   :  { %3286 = vmatprep.mubr.msk.bf16.mxu0 %vm288_vm2, %v3398_v29 }
  0x84   :  { %3287 = vmatmul.mubr.msk.bf16.gmra.mxu0 %vm288_vm2, %v3399_v30 }
  0x85   :  { %3290 = vmatprep.mubr.msk.bf16.mxu0 %vm288_vm2, %v3400_v31 }
  0x8c   :  { %3291 = vmatmul.mubr.msk.bf16.gmra.mxu0 %vm288_vm2, %v3401_v32 }
  0x8d   :  { %3294 = vmatprep.mubr.msk.bf16.mxu0 %vm288_vm2, %v3402_v33 }
  0x94   :  { %3295 = vmatmul.mubr.msk.bf16.gmra.mxu0 %vm288_vm2, %v3403_v34 }
  0x95   :  { %3298 = vmatprep.mubr.msk.bf16.mxu0 %vm288_vm2, %v3404_v35 }
  0x9c   :  { %3299 = vmatmul.mubr.msk.bf16.gmra.mxu0 %vm288_vm2, %v3405_v36 }
  0xe4   :  { %v3639_v37 = vpop.f32.mrf.mxu0 }
  0xe5   :  { %v819_v42 = vmul.f32 %v3639_v37, %v3639_v37  ;;  %v687_v48 = vsel %vm683_vm3, %v3639_v37, 0.0 }
  0xe6   :  { %v3641_v38 = vpop.f32.mrf.mxu0 }
  0xe7   :  { %v817_v40 = vmul.f32 %v3641_v38, %v3641_v38  ;;  %v684_v43 = vsel %vm683_vm3, %v3641_v38, 0.0  ;;  %v884_v55 = vsel %vm683_vm3, %v819_v42, 0.0 }
  0xe8   :  { %v3643_v39 = vpop.f32.mrf.mxu0 }
  0xe9   :  { %v881_v49 = vsel %vm683_vm3, %v817_v40, 0.0  ;;  %v820_v50 = vmul.f32 %v3643_v39, %v3643_v39  ;;  %v689_v56 = vsel %vm683_vm3, %v3643_v39, 0.0 }
  0xea   :  { %v3647_v41 = vpop.f32.mrf.mxu0 }
  0xeb   :  { %v685_v44 = vsel %vm683_vm3, %v3647_v41, 0.0  ;;  %v818_v45 = vmul.f32 %v3647_v41, %v3647_v41  ;;  %v886_v61 = vsel %vm683_vm3, %v820_v50, 0.0 }
  0xec   :  { %v686_v46 = vadd.f32 %v685_v44, %v684_v43  ;;  %v3657_v47 = vpop.f32.mrf.mxu0 }
  0xed   :  { %v882_v51 = vsel %vm683_vm3, %v818_v45, 0.0  ;;  %v823_v2 = vmul.f32 %v3657_v47, %v3657_v47  ;;  %v695_v9 = vsel %vm683_vm3, %v3657_v47, 0.0 }
  0xee   :  { %v688_v52 = vadd.f32 %v687_v48, %v686_v46  ;;  %v883_v53 = vadd.f32 %v882_v51, %v881_v49  ;;  %v3665_v54 = vpop.f32.mrf.mxu0 }
  0xef   :  { %v821_v57 = vmul.f32 %v3665_v54, %v3665_v54  ;;  %v691_v62 = vsel %vm683_vm3, %v3665_v54, 0.0  ;;  %v892_v15 = vsel %vm683_vm3, %v823_v2, 0.0 }
  0xf0   :  { %v885_v58 = vadd.f32 %v884_v55, %v883_v53  ;;  %v690_v59 = vadd.f32 %v689_v56, %v688_v52  ;;  %v3672_v60 = vpop.f32.mrf.mxu0 }
  0xf1   :  { %v888_v3 = vsel %vm683_vm3, %v821_v57, 0.0  ;;  %v824_v10 = vmul.f32 %v3672_v60, %v3672_v60  ;;  %v697_v16 = vsel %vm683_vm3, %v3672_v60, 0.0 }
  0xf2   :  { %v692_v63 = vadd.f32 %v691_v62, %v690_v59  ;;  %v887_v0 = vadd.f32 %v886_v61, %v885_v58  ;;  %v3677_v1 = vpop.f32.mrf.mxu0 }
  0xf3   :  { %v693_v4 = vsel %vm683_vm3, %v3677_v1, 0.0  ;;  %v822_v5 = vmul.f32 %v3677_v1, %v3677_v1  ;;  %v894_v21 = vsel %vm683_vm3, %v824_v10, 0.0 }
  0xf4   :  { %v889_v6 = vadd.f32 %v888_v3, %v887_v0  ;;  %v694_v7 = vadd.f32 %v693_v4, %v692_v63  ;;  %v3686_v8 = vpop.f32.mrf.mxu0 }
  0xf5   :  { %v890_v11 = vsel %vm683_vm3, %v822_v5, 0.0  ;;  %v827_v26 = vmul.f32 %v3686_v8, %v3686_v8  ;;  %v703_v33 = vsel %vm683_vm3, %v3686_v8, 0.0 }
  0xf6   :  { %v696_v12 = vadd.f32 %v695_v9, %v694_v7  ;;  %v891_v13 = vadd.f32 %v890_v11, %v889_v6  ;;  %v3693_v14 = vpop.f32.mrf.mxu0 }
  0xf7   :  { %v825_v17 = vmul.f32 %v3693_v14, %v3693_v14  ;;  %v699_v22 = vsel %vm683_vm3, %v3693_v14, 0.0  ;;  %v900_v43 = vsel %vm683_vm3, %v827_v26, 0.0 }
  0xf8   :  { %v893_v18 = vadd.f32 %v892_v15, %v891_v13  ;;  %v698_v19 = vadd.f32 %v697_v16, %v696_v12  ;;  %v3700_v20 = vpop.f32.mrf.mxu0 }
  0xf9   :  { %v896_v27 = vsel %vm683_vm3, %v825_v17, 0.0  ;;  %v828_v34 = vmul.f32 %v3700_v20, %v3700_v20  ;;  %v705_v44 = vsel %vm683_vm3, %v3700_v20, 0.0 }
  0xfa   :  { %v700_v23 = vadd.f32 %v699_v22, %v698_v19  ;;  %v895_v24 = vadd.f32 %v894_v21, %v893_v18  ;;  %v3705_v25 = vpop.f32.mrf.mxu0 }
  0xfb   :  { %v701_v28 = vsel %vm683_vm3, %v3705_v25, 0.0  ;;  %v826_v29 = vmul.f32 %v3705_v25, %v3705_v25  ;;  %v902_v50 = vsel %vm683_vm3, %v828_v34, 0.0 }
  0xfc   :  { %v897_v30 = vadd.f32 %v896_v27, %v895_v24  ;;  %v702_v31 = vadd.f32 %v701_v28, %v700_v23  ;;  %v3714_v32 = vpop.f32.mrf.mxu0 }
  0xfd   :  { %v898_v35 = vsel %vm683_vm3, %v826_v29, 0.0  ;;  %v831_v56 = vmul.f32 %v3714_v32, %v3714_v32  ;;  %v711_v0 = vsel %vm683_vm3, %v3714_v32, 0.0 }
  0xfe   :  { %v704_v36 = vadd.f32 %v703_v33, %v702_v31  ;;  %v899_v40 = vadd.f32 %v898_v35, %v897_v30  ;;  %v3721_v42 = vpop.f32.mrf.mxu0 }
  0xff   :  { %v829_v45 = vmul.f32 %v3721_v42, %v3721_v42  ;;  %v707_v51 = vsel %vm683_vm3, %v3721_v42, 0.0  ;;  %v908_v7 = vsel %vm683_vm3, %v831_v56, 0.0 }
 0x100   :  { %v901_v46 = vadd.f32 %v900_v43, %v899_v40  ;;  %v706_v48 = vadd.f32 %v705_v44, %v704_v36  ;;  %v3728_v49 = vpop.f32.mrf.mxu0 }
 0x101   :  { %v904_v57 = vsel %vm683_vm3, %v829_v45, 0.0  ;;  %v832_v2 = vmul.f32 %v3728_v49, %v3728_v49  ;;  %v713_v9 = vsel %vm683_vm3, %v3728_v49, 0.0 }
 0x102   :  { %v708_v52 = vadd.f32 %v707_v51, %v706_v48  ;;  %v903_v53 = vadd.f32 %v902_v50, %v901_v46  ;;  %v3733_v55 = vpop.f32.mrf.mxu0 }
 0x103   :  { %v709_v58 = vsel %vm683_vm3, %v3733_v55, 0.0  ;;  %v830_v59 = vmul.f32 %v3733_v55, %v3733_v55  ;;  %v910_v15 = vsel %vm683_vm3, %v832_v2, 0.0 }
 0x104   :  { %v905_v61 = vadd.f32 %v904_v57, %v903_v53  ;;  %v710_v62 = vadd.f32 %v709_v58, %v708_v52  ;;  %v3742_v63 = vpop.f32.mrf.mxu0 }
 0x105   :  { %v906_v3 = vsel %vm683_vm3, %v830_v59, 0.0  ;;  %v835_v21 = vmul.f32 %v3742_v63, %v3742_v63  ;;  %v719_v29 = vsel %vm683_vm3, %v3742_v63, 0.0 }
 0x106   :  { %v712_v4 = vadd.f32 %v711_v0, %v710_v62  ;;  %v907_v5 = vadd.f32 %v906_v3, %v905_v61  ;;  %v3749_v6 = vpop.f32.mrf.mxu0 }
 0x107   :  { %v833_v10 = vmul.f32 %v3749_v6, %v3749_v6  ;;  %v715_v16 = vsel %vm683_vm3, %v3749_v6, 0.0  ;;  %v916_v36 = vsel %vm683_vm3, %v835_v21, 0.0 }
 0x108   :  { %v909_v11 = vadd.f32 %v908_v7, %v907_v5  ;;  %v714_v12 = vadd.f32 %v713_v9, %v712_v4  ;;  %v3756_v13 = vpop.f32.mrf.mxu0 }
 0x109   :  { %v912_v22 = vsel %vm683_vm3, %v833_v10, 0.0  ;;  %v836_v30 = vmul.f32 %v3756_v13, %v3756_v13  ;;  %v721_v40 = vsel %vm683_vm3, %v3756_v13, 0.0 }
 0x10a   :  { %v716_v17 = vadd.f32 %v715_v16, %v714_v12  ;;  %v911_v18 = vadd.f32 %v910_v15, %v909_v11  ;;  %v3761_v19 = vpop.f32.mrf.mxu0 }
 0x10b   :  { %v717_v23 = vsel %vm683_vm3, %v3761_v19, 0.0  ;;  %v834_v24 = vmul.f32 %v3761_v19, %v3761_v19  ;;  %v918_v48 = vsel %vm683_vm3, %v836_v30, 0.0 }
 0x10c   :  { %v913_v26 = vadd.f32 %v912_v22, %v911_v18  ;;  %v718_v27 = vadd.f32 %v717_v23, %v716_v17  ;;  %v3770_v28 = vpop.f32.mrf.mxu0 }
 0x10d   :  { %v914_v31 = vsel %vm683_vm3, %v834_v24, 0.0  ;;  %v839_v56 = vmul.f32 %v3770_v28, %v3770_v28  ;;  %v727_v2 = vsel %vm683_vm3, %v3770_v28, 0.0 }
 0x10e   :  { %v720_v33 = vadd.f32 %v719_v29, %v718_v27  ;;  %v915_v34 = vadd.f32 %v914_v31, %v913_v26  ;;  %v3777_v35 = vpop.f32.mrf.mxu0 }
 0x10f   :  { %v837_v43 = vmul.f32 %v3777_v35, %v3777_v35  ;;  %v723_v50 = vsel %vm683_vm3, %v3777_v35, 0.0  ;;  %v924_v10 = vsel %vm683_vm3, %v839_v56, 0.0 }
 0x110   :  { %v917_v44 = vadd.f32 %v916_v36, %v915_v34  ;;  %v722_v45 = vadd.f32 %v721_v40, %v720_v33  ;;  %v3784_v46 = vpop.f32.mrf.mxu0 }
 0x111   :  { %v920_v57 = vsel %vm683_vm3, %v837_v43, 0.0  ;;  %v840_v3 = vmul.f32 %v3784_v46, %v3784_v46  ;;  %v729_v11 = vsel %vm683_vm3, %v3784_v46, 0.0 }
 0x112   :  { %v724_v51 = vadd.f32 %v723_v50, %v722_v45  ;;  %v919_v52 = vadd.f32 %v918_v48, %v917_v44  ;;  %v3789_v53 = vpop.f32.mrf.mxu0 }
 0x113   :  { %v725_v58 = vsel %vm683_vm3, %v3789_v53, 0.0  ;;  %v838_v59 = vmul.f32 %v3789_v53, %v3789_v53  ;;  %v926_v18 = vsel %vm683_vm3, %v840_v3, 0.0 }
 0x114   :  { %v921_v61 = vadd.f32 %v920_v57, %v919_v52  ;;  %v726_v62 = vadd.f32 %v725_v58, %v724_v51  ;;  %v3798_v0 = vpop.f32.mrf.mxu0 }
 0x115   :  { %v922_v4 = vsel %vm683_vm3, %v838_v59, 0.0  ;;  %v843_v26 = vmul.f32 %v3798_v0, %v3798_v0  ;;  %v735_v36 = vsel %vm683_vm3, %v3798_v0, 0.0 }
 0x116   :  { %v728_v5 = vadd.f32 %v727_v2, %v726_v62  ;;  %v923_v7 = vadd.f32 %v922_v4, %v921_v61  ;;  %v3805_v9 = vpop.f32.mrf.mxu0 }
 0x117   :  { %v841_v12 = vmul.f32 %v3805_v9, %v3805_v9  ;;  %v731_v21 = vsel %vm683_vm3, %v3805_v9, 0.0  ;;  %v932_v50 = vsel %vm683_vm3, %v843_v26, 0.0 }
 0x118   :  { %v925_v15 = vadd.f32 %v924_v10, %v923_v7  ;;  %v730_v16 = vadd.f32 %v729_v11, %v728_v5  ;;  %v3812_v17 = vpop.f32.mrf.mxu0 }
 0x119   :  { %v928_v27 = vsel %vm683_vm3, %v841_v12, 0.0  ;;  %v844_v40 = vmul.f32 %v3812_v17, %v3812_v17  ;;  %v737_v51 = vsel %vm683_vm3, %v3812_v17, 0.0 }
 0x11a   :  { %v732_v22 = vadd.f32 %v731_v21, %v730_v16  ;;  %v927_v23 = vadd.f32 %v926_v18, %v925_v15  ;;  %v3817_v24 = vpop.f32.mrf.mxu0 }
 0x11b   :  { %v733_v29 = vsel %vm683_vm3, %v3817_v24, 0.0  ;;  %v842_v30 = vmul.f32 %v3817_v24, %v3817_v24  ;;  %v934_v59 = vsel %vm683_vm3, %v844_v40, 0.0 }
 0x11c   :  { %v929_v31 = vadd.f32 %v928_v27, %v927_v23  ;;  %v734_v33 = vadd.f32 %v733_v29, %v732_v22  ;;  %v3826_v34 = vpop.f32.mrf.mxu0 }
 0x11d   :  { %v930_v43 = vsel %vm683_vm3, %v842_v30, 0.0  ;;  %v847_v4 = vmul.f32 %v3826_v34, %v3826_v34  ;;  %v743_v16 = vsel %vm683_vm3, %v3826_v34, 0.0 }
 0x11e   :  { %v736_v44 = vadd.f32 %v735_v36, %v734_v33  ;;  %v931_v45 = vadd.f32 %v930_v43, %v929_v31  ;;  %v3833_v48 = vpop.f32.mrf.mxu0 }
 0x11f   :  { %v845_v52 = vmul.f32 %v3833_v48, %v3833_v48  ;;  %v739_v61 = vsel %vm683_vm3, %v3833_v48, 0.0  ;;  %v940_v27 = vsel %vm683_vm3, %v847_v4, 0.0 }
 0x120   :  { %v933_v56 = vadd.f32 %v932_v50, %v931_v45  ;;  %v738_v57 = vadd.f32 %v737_v51, %v736_v44  ;;  %v3840_v58 = vpop.f32.mrf.mxu0 }
 0x121   :  { %v936_v5 = vsel %vm683_vm3, %v845_v52, 0.0  ;;  %v848_v18 = vmul.f32 %v3840_v58, %v3840_v58  ;;  %v745_v29 = vsel %vm683_vm3, %v3840_v58, 0.0 }
 0x122   :  { %v740_v62 = vadd.f32 %v739_v61, %v738_v57  ;;  %v935_v2 = vadd.f32 %v934_v59, %v933_v56  ;;  %v3845_v3 = vpop.f32.mrf.mxu0 }
 0x123   :  { %v741_v7 = vsel %vm683_vm3, %v3845_v3, 0.0  ;;  %v846_v10 = vmul.f32 %v3845_v3, %v3845_v3  ;;  %v942_v40 = vsel %vm683_vm3, %v848_v18, 0.0 }
 0x124   :  { %v937_v11 = vadd.f32 %v936_v5, %v935_v2  ;;  %v742_v12 = vadd.f32 %v741_v7, %v740_v62  ;;  %v3854_v15 = vpop.f32.mrf.mxu0 }
 0x125   :  { %v938_v21 = vsel %vm683_vm3, %v846_v10, 0.0  ;;  %v851_v51 = vmul.f32 %v3854_v15, %v3854_v15  ;;  %v751_v2 = vsel %vm683_vm3, %v3854_v15, 0.0 }
 0x126   :  { %v744_v22 = vadd.f32 %v743_v16, %v742_v12  ;;  %v939_v23 = vadd.f32 %v938_v21, %v937_v11  ;;  %v3861_v26 = vpop.f32.mrf.mxu0 }
 0x127   :  { %v849_v30 = vmul.f32 %v3861_v26, %v3861_v26  ;;  %v747_v43 = vsel %vm683_vm3, %v3861_v26, 0.0  ;;  %v948_v12 = vsel %vm683_vm3, %v851_v51, 0.0 }
 0x128   :  { %v941_v31 = vadd.f32 %v940_v27, %v939_v23  ;;  %v746_v33 = vadd.f32 %v745_v29, %v744_v22  ;;  %v3868_v36 = vpop.f32.mrf.mxu0 }
 0x129   :  { %v944_v52 = vsel %vm683_vm3, %v849_v30, 0.0  ;;  %v852_v4 = vmul.f32 %v3868_v36, %v3868_v36  ;;  %v753_v16 = vsel %vm683_vm3, %v3868_v36, 0.0 }
 0x12a   :  { %v748_v44 = vadd.f32 %v747_v43, %v746_v33  ;;  %v943_v45 = vadd.f32 %v942_v40, %v941_v31  ;;  %v3873_v50 = vpop.f32.mrf.mxu0 }
 0x12b   :  { %v749_v56 = vsel %vm683_vm3, %v3873_v50, 0.0  ;;  %v850_v57 = vmul.f32 %v3873_v50, %v3873_v50  ;;  %v950_v27 = vsel %vm683_vm3, %v852_v4, 0.0 }
 0x12c   :  { %v945_v59 = vadd.f32 %v944_v52, %v943_v45  ;;  %v750_v61 = vadd.f32 %v749_v56, %v748_v44  ;;  %v3882_v62 = vpop.f32.mrf.mxu0 }
 0x12d   :  { %6558 = vst [vmem:[#allocation8_spill] sm:$0xff] %v3882_v62  ;;  %v946_v5 = vsel %vm683_vm3, %v850_v57, 0.0  ;;  %v855_v40 = vmul.f32 %v3882_v62, %v3882_v62  ;;  %v759_v57 = vsel %vm683_vm3, %v3882_v62, 0.0 }
 0x12e   :  { %v752_v7 = vadd.f32 %v751_v2, %v750_v61  ;;  %v947_v10 = vadd.f32 %v946_v5, %v945_v59  ;;  %v3889_v11 = vpop.f32.mrf.mxu0 }
 0x12f   :  { %v853_v18 = vmul.f32 %v3889_v11, %v3889_v11  ;;  %v755_v29 = vsel %vm683_vm3, %v3889_v11, 0.0 }
 0x130   :  { %v949_v21 = vadd.f32 %v948_v12, %v947_v10  ;;  %v754_v22 = vadd.f32 %v753_v16, %v752_v7  ;;  %v3896_v23 = vpop.f32.mrf.mxu0  ;;  %v956_v7 = vsel %vm683_vm3, %v855_v40, 0.0 }
 0x131   :  { %6559 = vst [vmem:[#allocation9_spill] sm:$0xff] %v3896_v23  ;;  %v952_v43 = vsel %vm683_vm3, %v853_v18, 0.0  ;;  %v856_v59 = vmul.f32 %v3896_v23, %v3896_v23  ;;  %v761_v10 = vsel %vm683_vm3, %v3896_v23, 0.0 }
 0x132   :  { %v756_v30 = vadd.f32 %v755_v29, %v754_v22  ;;  %v951_v31 = vadd.f32 %v950_v27, %v949_v21  ;;  %v3901_v33 = vpop.f32.mrf.mxu0 }
 0x133   :  { %v757_v44 = vsel %vm683_vm3, %v3901_v33, 0.0  ;;  %v854_v45 = vmul.f32 %v3901_v33, %v3901_v33  ;;  %v958_v22 = vsel %vm683_vm3, %v856_v59, 0.0 }
 0x134   :  { %v953_v51 = vadd.f32 %v952_v43, %v951_v31  ;;  %v758_v52 = vadd.f32 %v757_v44, %v756_v30  ;;  %v3910_v56 = vpop.f32.mrf.mxu0 }
 0x135   :  { %6560 = vst [vmem:[#allocation10_spill] sm:$0xff] %v3910_v56  ;;  %v954_v61 = vsel %vm683_vm3, %v854_v45, 0.0  ;;  %v859_v40 = vmul.f32 %v3910_v56, %v3910_v56  ;;  %v767_v59 = vsel %vm683_vm3, %v3910_v56, 0.0 }
 0x136   :  { %v760_v2 = vadd.f32 %v759_v57, %v758_v52  ;;  %v955_v4 = vadd.f32 %v954_v61, %v953_v51  ;;  %v3917_v5 = vpop.f32.mrf.mxu0 }
 0x137   :  { %6561 = vst [vmem:[#allocation11_spill] sm:$0xff] %v3917_v5  ;;  %v857_v12 = vmul.f32 %v3917_v5, %v3917_v5  ;;  %v763_v27 = vsel %vm683_vm3, %v3917_v5, 0.0 }
 0x138   :  { %v957_v16 = vadd.f32 %v956_v7, %v955_v4  ;;  %v762_v18 = vadd.f32 %v761_v10, %v760_v2  ;;  %v3924_v21 = vpop.f32.mrf.mxu0 }
 0x139   :  { %6562 = vst [vmem:[#allocation12_spill] sm:$0xff] %v3924_v21  ;;  %v960_v43 = vsel %vm683_vm3, %v857_v12, 0.0  ;;  %v860_v61 = vmul.f32 %v3924_v21, %v3924_v21  ;;  %v964_v12 = vsel %vm683_vm3, %v859_v40, 0.0 }
 0x13a   :  { %v764_v29 = vadd.f32 %v763_v27, %v762_v18  ;;  %v959_v30 = vadd.f32 %v958_v22, %v957_v16  ;;  %v3929_v31 = vpop.f32.mrf.mxu0  ;;  %v769_v16 = vsel %vm683_vm3, %v3924_v21, 0.0 }
 0x13b   :  { %6563 = vst [vmem:[#allocation13_spill] sm:$0xff] %v3929_v31  ;;  %v765_v44 = vsel %vm683_vm3, %v3929_v31, 0.0  ;;  %v858_v45 = vmul.f32 %v3929_v31, %v3929_v31 }
 0x13c   :  { %v961_v51 = vadd.f32 %v960_v43, %v959_v30  ;;  %v766_v52 = vadd.f32 %v765_v44, %v764_v29  ;;  %v3938_v57 = vpop.f32.mrf.mxu0  ;;  %v966_v30 = vsel %vm683_vm3, %v860_v61, 0.0 }
 0x13d   :  { %6564 = vst [vmem:[#allocation14_spill] sm:$0xff] %v3938_v57  ;;  %v962_v2 = vsel %vm683_vm3, %v858_v45, 0.0  ;;  %v863_v40 = vmul.f32 %v3938_v57, %v3938_v57 }
 0x13e   :  { %v768_v4 = vadd.f32 %v767_v59, %v766_v52  ;;  %v963_v7 = vadd.f32 %v962_v2, %v961_v51  ;;  %v3945_v10 = vpop.f32.mrf.mxu0 }
 0x13f   :  { %6565 = vst [vmem:[#allocation15_spill] sm:$0xff] %v3945_v10  ;;  %v861_v18 = vmul.f32 %v3945_v10, %v3945_v10  ;;  %v771_v43 = vsel %vm683_vm3, %v3945_v10, 0.0 }
 0x140   :  { %v965_v22 = vadd.f32 %v964_v12, %v963_v7  ;;  %v770_v27 = vadd.f32 %v769_v16, %v768_v4  ;;  %v3952_v29 = vpop.f32.mrf.mxu0  ;;  %v775_v12 = vsel %vm683_vm3, %v3938_v57, 0.0 }
 0x141   :  { %6566 = vst [vmem:[#allocation16_spill] sm:$0xff] %v3952_v29  ;;  %v968_v52 = vsel %vm683_vm3, %v861_v18, 0.0  ;;  %v864_v16 = vmul.f32 %v3952_v29, %v3952_v29 }
 0x142   :  { %v772_v44 = vadd.f32 %v771_v43, %v770_v27  ;;  %v967_v45 = vadd.f32 %v966_v30, %v965_v22  ;;  %v3957_v51 = vpop.f32.mrf.mxu0  ;;  %v972_v43 = vsel %vm683_vm3, %v863_v40, 0.0 }
 0x143   :  { %6567 = vst [vmem:[#allocation17_spill] sm:$0xff] %v3957_v51  ;;  %v773_v59 = vsel %vm683_vm3, %v3957_v51, 0.0  ;;  %v862_v2 = vmul.f32 %v3957_v51, %v3957_v51  ;;  %v974_v51 = vsel %vm683_vm3, %v864_v16, 0.0 }
 0x144   :  { %v969_v4 = vadd.f32 %v968_v52, %v967_v45  ;;  %v774_v61 = vadd.f32 %v773_v59, %v772_v44  ;;  %v3966_v7 = vpop.f32.mrf.mxu0  ;;  %v777_v45 = vsel %vm683_vm3, %v3952_v29, 0.0 }
 0x145   :  { %6568 = vst [vmem:[#allocation18_spill] sm:$0xff] %v3966_v7  ;;  %v970_v22 = vsel %vm683_vm3, %v862_v2, 0.0  ;;  %v867_v40 = vmul.f32 %v3966_v7, %v3966_v7 }
 0x146   :  { %v776_v27 = vadd.f32 %v775_v12, %v774_v61  ;;  %v971_v18 = vadd.f32 %v970_v22, %v969_v4  ;;  %v3973_v30 = vpop.f32.mrf.mxu0 }
 0x147   :  { %6569 = vst [vmem:[#allocation19_spill] sm:$0xff] %v3973_v30  ;;  %v865_v44 = vmul.f32 %v3973_v30, %v3973_v30  ;;  %v779_v2 = vsel %vm683_vm3, %v3973_v30, 0.0  ;;  %v3406_v30 = vld [vmem:[#allocation4] sm:$0xff]  }
 0x148   :  { %v973_v52 = vadd.f32 %v972_v43, %v971_v18  ;;  %v778_v59 = vadd.f32 %v777_v45, %v776_v27  ;;  %v3980_v57 = vpop.f32.mrf.mxu0  ;;  %3302 = vmatprep.subr.bf16.mxu1 %v3406_v30 }
 0x149   :  { %6570 = vst [vmem:[#allocation20_spill] sm:$0xff] %v3980_v57  ;;  %v976_v22 = vsel %vm683_vm3, %v865_v44, 0.0  ;;  %3303 = vmatpush3.bf16.msra.mxu1 %v3406_v30 }
 0x14a   :  { %v780_v4 = vadd.f32 %v779_v2, %v778_v59  ;;  %v975_v61 = vadd.f32 %v974_v51, %v973_v52  ;;  %v3985_v12 = vpop.f32.mrf.mxu0  ;;  %v783_v51 = vsel %vm683_vm3, %v3966_v7, 0.0  ;;  %v868_v52 = vmul.f32 %v3980_v57, %v3980_v57 }
 0x14b   :  { %6571 = vst [vmem:[#allocation21_spill] sm:$0xff] %v3985_v12  ;;  %v781_v18 = vsel %vm683_vm3, %v3985_v12, 0.0  ;;  %v866_v27 = vmul.f32 %v3985_v12, %v3985_v12  ;;  %v980_v12 = vsel %vm683_vm3, %v867_v40, 0.0 }
 0x14c   :  { %v977_v43 = vadd.f32 %v976_v22, %v975_v61  ;;  %v782_v16 = vadd.f32 %v781_v18, %v780_v4  ;;  %v3994_v45 = vpop.f32.mrf.mxu0  ;;  %v785_v4 = vsel %vm683_vm3, %v3980_v57, 0.0 }
 0x14d   :  { %6572 = vst [vmem:[#allocation22_spill] sm:$0xff] %v3994_v45  ;;  %v978_v59 = vsel %vm683_vm3, %v866_v27, 0.0  ;;  %v982_v27 = vsel %vm683_vm3, %v868_v52, 0.0  ;;  %v871_v40 = vmul.f32 %v3994_v45, %v3994_v45 }
 0x14e   :  { %v784_v44 = vadd.f32 %v783_v51, %v782_v16  ;;  %v979_v2 = vadd.f32 %v978_v59, %v977_v43  ;;  %v4001_v29 = vpop.f32.mrf.mxu0 }
 0x14f   :  { %6573 = vst [vmem:[#allocation23_spill] sm:$0xff] %v4001_v29  ;;  %v869_v61 = vmul.f32 %v4001_v29, %v4001_v29  ;;  %v787_v43 = vsel %vm683_vm3, %v4001_v29, 0.0  ;;  %v988_v29 = vsel %vm683_vm3, %v871_v40, 0.0 }
 0x150   :  { %v981_v22 = vadd.f32 %v980_v12, %v979_v2  ;;  %v786_v18 = vadd.f32 %v785_v4, %v784_v44  ;;  %v4008_v7 = vpop.f32.mrf.mxu0  ;;  %v791_v4 = vsel %vm683_vm3, %v3994_v45, 0.0 }
 0x151   :  { %6574 = vst [vmem:[#allocation24_spill] sm:$0xff] %v4008_v7  ;;  %v984_v57 = vsel %vm683_vm3, %v869_v61, 0.0 }
 0x152   :  { %v788_v16 = vadd.f32 %v787_v43, %v786_v18  ;;  %v983_v51 = vadd.f32 %v982_v27, %v981_v22  ;;  %v4013_v59 = vpop.f32.mrf.mxu0  ;;  %v872_v22 = vmul.f32 %v4008_v7, %v4008_v7 }
 0x153   :  { %6575 = vst [vmem:[#allocation25_spill] sm:$0xff] %v4013_v59  ;;  %v789_v30 = vsel %vm683_vm3, %v4013_v59, 0.0  ;;  %v870_v12 = vmul.f32 %v4013_v59, %v4013_v59 }
 0x154   :  { %v985_v44 = vadd.f32 %v984_v57, %v983_v51  ;;  %v790_v52 = vadd.f32 %v789_v30, %v788_v16  ;;  %v4022_v2 = vpop.f32.mrf.mxu0  ;;  %v793_v57 = vsel %vm683_vm3, %v4008_v7, 0.0  ;;  %v990_v59 = vsel %vm683_vm3, %v872_v22, 0.0 }
 0x155   :  { %6576 = vst [vmem:[#allocation26_spill] sm:$0xff] %v4022_v2  ;;  %v986_v18 = vsel %vm683_vm3, %v870_v12, 0.0  ;;  %v875_v40 = vmul.f32 %v4022_v2, %v4022_v2 }
 0x156   :  { %v792_v27 = vadd.f32 %v791_v4, %v790_v52  ;;  %v987_v61 = vadd.f32 %v986_v18, %v985_v44  ;;  %v4029_v43 = vpop.f32.mrf.mxu0 }
 0x157   :  { %6577 = vst [vmem:[#allocation27_spill] sm:$0xff] %v4029_v43  ;;  %v873_v16 = vmul.f32 %v4029_v43, %v4029_v43  ;;  %v795_v12 = vsel %vm683_vm3, %v4029_v43, 0.0  ;;  %v996_v7 = vsel %vm683_vm3, %v875_v40, 0.0 }
 0x158   :  { %v989_v51 = vadd.f32 %v988_v29, %v987_v61  ;;  %v794_v30 = vadd.f32 %v793_v57, %v792_v27  ;;  %v4036_v45 = vpop.f32.mrf.mxu0 }
 0x159   :  { %6578 = vst [vmem:[#allocation28_spill] sm:$0xff] %v4036_v45  ;;  %v992_v18 = vsel %vm683_vm3, %v873_v16, 0.0 }
 0x15a   :  { %v796_v44 = vadd.f32 %v795_v12, %v794_v30  ;;  %v991_v52 = vadd.f32 %v990_v59, %v989_v51  ;;  %v4041_v4 = vpop.f32.mrf.mxu0  ;;  %v799_v59 = vsel %vm683_vm3, %v4022_v2, 0.0  ;;  %v876_v51 = vmul.f32 %v4036_v45, %v4036_v45 }
 0x15b   :  { %6579 = vst [vmem:[#allocation29_spill] sm:$0xff] %v4041_v4  ;;  %v797_v29 = vsel %vm683_vm3, %v4041_v4, 0.0  ;;  %v874_v27 = vmul.f32 %v4041_v4, %v4041_v4  ;;  %v801_v4 = vsel %vm683_vm3, %v4036_v45, 0.0 }
 0x15c   :  { %v993_v61 = vadd.f32 %v992_v18, %v991_v52  ;;  %v798_v22 = vadd.f32 %v797_v29, %v796_v44  ;;  %v4050_v57 = vpop.f32.mrf.mxu0  ;;  %v998_v2 = vsel %vm683_vm3, %v876_v51, 0.0 }
 0x15d   :  { %6580 = vst [vmem:[#allocation30_spill] sm:$0xff] %v4050_v57  ;;  %v994_v30 = vsel %vm683_vm3, %v874_v27, 0.0 }
 0x15e   :  { %v800_v12 = vadd.f32 %v799_v59, %v798_v22  ;;  %v995_v16 = vadd.f32 %v994_v30, %v993_v61  ;;  %v666_v43 = vpop.f32.mrf.mxu0  ;;  %v879_v61 = vmul.f32 %v4050_v57, %v4050_v57 }
 0x15f   :  { %v877_v52 = vmul.f32 %v666_v43, %v666_v43  ;;  %v803_v10 = vsel %vm683_vm3, %v666_v43, 0.0 }
 0x160   :  { %v997_v44 = vadd.f32 %v996_v7, %v995_v16  ;;  %v802_v18 = vadd.f32 %v801_v4, %v800_v12  ;;  %v4060_v29 = vpop.f32.mrf.mxu0  ;;  %v807_v4 = vsel %vm683_vm3, %v4050_v57, 0.0  ;;  %v1004_v16 = vsel %vm683_vm3, %v879_v61, 0.0 }
 0x161   :  { %6581 = vst [vmem:[#allocation31_spill] sm:$0xff] %v4060_v29  ;;  %v1000_v40 = vsel %vm683_vm3, %v877_v52, 0.0  ;;  %v880_v51 = vmul.f32 %v4060_v29, %v4060_v29  ;;  %v809_v52 = vsel %vm683_vm3, %v4060_v29, 0.0 }
 0x162   :  { %v804_v21 = vadd.f32 %v803_v10, %v802_v18  ;;  %v999_v56 = vadd.f32 %v998_v2, %v997_v44  ;;  %v669_v27 = vpop.f32.mrf.mxu0 }
 0x163   :  { %v805_v22 = vsel %vm683_vm3, %v669_v27, 0.0  ;;  %v878_v59 = vmul.f32 %v669_v27, %v669_v27 }
 0x164   :  { %v1001_v30 = vadd.f32 %v1000_v40, %v999_v56  ;;  %v806_v7 = vadd.f32 %v805_v22, %v804_v21  ;;  %v1006_v56 = vsel %vm683_vm3, %v880_v51, 0.0  ;;  %v1024_v51 = vlaneseq }
 0x165   :  { %v1002_v10 = vsel %vm683_vm3, %v878_v59, 0.0 }
 0x166   :  { %v808_v2 = vadd.f32 %v807_v4, %v806_v7  ;;  %v1003_v12 = vadd.f32 %v1002_v10, %v1001_v30 }
 0x168   :  { %v810_v44 = vadd.f32 %v809_v52, %v808_v2  ;;  %v1005_v18 = vadd.f32 %v1004_v16, %v1003_v12  ;;  %v1025_v16 = vshrl.u32 %v1024_v51, 7  ;;  %v681_v52 = vld [vmem:[%s6464_s2] sm:$0x1] }
 0x16a   :  { %v811_v21 = vrot.slane %v810_v44, 4  ;;  %v1007_v40 = vadd.f32 %v1006_v56, %v1005_v18 }
 0x16c   :  { %v812_v22 = vadd.f32 %v811_v21, %v810_v44  ;;  %v1008_v57 = vrot.slane %v1007_v40, 4 }
 0x16e   :  { %v813_v45 = vrot.slane %v812_v22, 2  ;;  %v1009_v31 = vadd.f32 %v1008_v57, %v1007_v40  ;;  %v4080_v57 = vsub.s32 0, %v1025_v16 }
 0x170   :  { %v814_v5 = vadd.f32 %v813_v45, %v812_v22  ;;  %v1010_v23 = vrot.slane %v1009_v31, 2  ;;  %6582 = vst [vmem:[#allocation32_spill] sm:$0xff] %v4080_v57 }
 0x172   :  { %v815_v59 = vrot.slane %v814_v5, 1  ;;  %v1011_v7 = vadd.f32 %v1010_v23, %v1009_v31  ;;  %v682_v23 = vld [vmem:[%s6465_s3] sm:$0x1] }
 0x174   :  { %v816_v30 = vadd.f32 %v815_v59, %v814_v5  ;;  %v1012_v4 = vrot.slane %v1011_v7, 1 }
 0x176   :  { %v1013_v61 = vadd.f32 %v1012_v4, %v1011_v7  ;;  %v1014_v10 = vmul.f32 0.001953125, %v816_v30 }
 0x178   :  { %v1015_v62 = vmul.f32 0.001953125, %v1013_v61  ;;  %v1016_v29 = vmul.f32 %v1014_v10, %v1014_v10 }
 0x17a   :  { %v1017_v2 = vsub.f32 %v1015_v62, %v1016_v29 }
 0x17c   :  { %v1018_v12 = vadd.f32 1e-05, %v1017_v2 }
 0x17e   :  { %3407 = vrsqrt.f32 %v1018_v12 }
 0x18b   :  { %v3408_v45 = vpop.eup %3407 }
 0x18c   :  { %v1020_v44 = vmul.f32 %v3408_v45, %v681_v52  ;;  %v6596_v52 = vld [vmem:[#allocation11_spill] sm:$0xff]  ;;  %v6597_v45 = vld [vmem:[#allocation13_spill] sm:$0xff] }
 0x18e   :  { %v1021_v5 = vmul.f32 %v1020_v44, %v1014_v10  ;;  %v4086_v31 = vrot.slane %v1020_v44, %v4080_v57 }
 0x190   :  { %v1022_v62 = vsub.f32 %v682_v23, %v1021_v5  ;;  %v1089_v29 = vmul.f32 %v4086_v31, %v666_v43  ;;  %v1090_v18 = vmul.f32 %v4086_v31, %v669_v27  ;;  %v4092_v56 = vmul.f32 %v4086_v31, %v3641_v38  ;;  %v6600_v5 = vld [vmem:[#allocation15_spill] sm:$0xff] }
 0x191   :  { %v4096_v21 = vmul.f32 %v4086_v31, %v3647_v41  ;;  %v4100_v40 = vmul.f32 %v3639_v37, %v4086_v31  ;;  %v4104_v22 = vmul.f32 %v3643_v39, %v4086_v31  ;;  %v4108_v43 = vmul.f32 %v4086_v31, %v3665_v54 }
 0x192   :  { %6583 = vst [vmem:[#allocation33_spill] sm:$0xff] %v4092_v56  ;;  %v4111_v27 = vrot.slane %v1022_v62, %v4080_v57  ;;  %v4115_v38 = vmul.f32 %v4086_v31, %v3677_v1  ;;  %v4119_v41 = vmul.f32 %v3657_v47, %v4086_v31  ;;  %v4123_v37 = vmul.f32 %v3672_v60, %v4086_v31  ;;  %v6601_v62 = vld [vmem:[#allocation17_spill] sm:$0xff]  ;;  %v6608_v57 = vld [vmem:[#allocation23_spill] sm:$0xff] }
 0x193   :  { %6584 = vst [vmem:[#allocation34_spill] sm:$0xff] %v4096_v21  ;;  %v4127_v39 = vmul.f32 %v4086_v31, %v3693_v14  ;;  %v4131_v54 = vmul.f32 %v4086_v31, %v3705_v25  ;;  %v4135_v1 = vmul.f32 %v3686_v8, %v4086_v31  ;;  %v4139_v47 = vmul.f32 %v3700_v20, %v4086_v31 }
 0x194   :  { %6585 = vst [vmem:[#allocation35_spill] sm:$0xff] %v4111_v27  ;;  %v1159_v59 = vadd.f32 %v4111_v27, %v1089_v29  ;;  %v1160_v60 = vadd.f32 %v4111_v27, %v1090_v18  ;;  %v4145_v14 = vmul.f32 %v4086_v31, %v3721_v42  ;;  %v4149_v25 = vmul.f32 %v4086_v31, %v3733_v55  ;;  %v6602_v18 = vld [vmem:[#allocation14_spill] sm:$0xff] }
 0x195   :  { %v4153_v8 = vmul.f32 %v3714_v32, %v4086_v31  ;;  %v4157_v20 = vmul.f32 %v3728_v49, %v4086_v31  ;;  %v4161_v7 = vmul.f32 %v4086_v31, %v3749_v6  ;;  %v4165_v42 = vmul.f32 %v4086_v31, %v3761_v19 }
 0x196   :  { %v4167_v30 = vmax.f32 %v1159_v59, 0.0  ;;  %v4169_v55 = vmax.f32 %v1160_v60, 0.0  ;;  %v4173_v32 = vmul.f32 %v3742_v63, %v4086_v31  ;;  %v4177_v49 = vmul.f32 %v3756_v13, %v4086_v31  ;;  %v6603_v60 = vld [vmem:[#allocation16_spill] sm:$0xff] }
 0x197   :  { %v4181_v6 = vmul.f32 %v4086_v31, %v3777_v35  ;;  %v4185_v19 = vmul.f32 %v4086_v31, %v3789_v53  ;;  %v4189_v4 = vmul.f32 %v3770_v28, %v4086_v31  ;;  %v4193_v63 = vmul.f32 %v3784_v46, %v4086_v31 }
 0x198   :  { %6586 = vst [vmem:[#allocation36_spill] sm:$0xff] %v4167_v30  ;;  %6587 = vst [vmem:[#allocation37_spill] sm:$0xff] %v4169_v55  ;;  %v3103_v61 = vpack.c.bf16 %v4169_v55, %v4169_v55  ;;  %v4201_v35 = vmul.f32 %v4086_v31, %v3805_v9  ;;  %v4205_v53 = vmul.f32 %v4086_v31, %v3817_v24  ;;  %v6609_v55 = vld [vmem:[#allocation25_spill] sm:$0xff] }
 0x199   :  { %v4209_v28 = vmul.f32 %v3798_v0, %v4086_v31  ;;  %v4213_v46 = vmul.f32 %v3812_v17, %v4086_v31  ;;  %v4217_v10 = vmul.f32 %v4086_v31, %v3833_v48  ;;  %v4221_v9 = vmul.f32 %v4086_v31, %v3845_v3 }
 0x19a   :  { %6588 = vst [vmem:[#allocation38_spill] sm:$0xff] %v4201_v35  ;;  %6589 = vst [vmem:[#allocation39_spill] sm:$0xff] %v4205_v53  ;;  %v1059_v0 = vmul.f32 %v3826_v34, %v4086_v31  ;;  %v1060_v17 = vmul.f32 %v3840_v58, %v4086_v31  ;;  %v1061_v24 = vmul.f32 %v4086_v31, %v3861_v26  ;;  %v6594_v58 = vld [vmem:[#allocation8_spill] sm:$0xff]  ;;  %v6595_v26 = vld [vmem:[#allocation9_spill] sm:$0xff] }
 0x19b   :  { %6590 = vst [vmem:[#allocation40_spill] sm:$0xff] %v4209_v28  ;;  %6591 = vst [vmem:[#allocation41_spill] sm:$0xff] %v4213_v46  ;;  %v1062_v48 = vmul.f32 %v4086_v31, %v3873_v50  ;;  %v1063_v3 = vmul.f32 %v3854_v15, %v4086_v31  ;;  %v1064_v2 = vmul.f32 %v3868_v36, %v4086_v31  ;;  %v6598_v36 = vld [vmem:[#allocation10_spill] sm:$0xff] }
 0x19c   :  { %6592 = vst [vmem:[#allocation42_spill] sm:$0xff] %v4217_v10  ;;  %6593 = vst [vmem:[#allocation43_spill] sm:$0xff] %v4221_v9  ;;  %v1065_v12 = vmul.f32 %v4086_v31, %v3889_v11  ;;  %v1066_v34 = vmul.f32 %v4086_v31, %v3901_v33  ;;  %v1067_v51 = vmul.f32 %v6594_v58, %v4086_v31  ;;  %v6599_v11 = vld [vmem:[#allocation12_spill] sm:$0xff]  ;;  %v6604_v58 = vld [vmem:[#allocation19_spill] sm:$0xff] }
 0x19d   :  { %1545 = vst.msk [vmem:[%s6469_s7 + $0xf4] sm:$0xf] %vm1483_vm4, %v3103_v61  ;;  %v1068_v16 = vmul.f32 %v6595_v26, %v4086_v31  ;;  %v1069_v50 = vmul.f32 %v4086_v31, %v6596_v52  ;;  %v1070_v15 = vmul.f32 %v4086_v31, %v6597_v45  ;;  %v1071_v44 = vmul.f32 %v6598_v36, %v4086_v31  ;;  %v6605_v52 = vld [vmem:[#allocation21_spill] sm:$0xff]  ;;  %v6606_v36 = vld [vmem:[#allocation18_spill] sm:$0xff]  ;;  %v6612_v9 = vld [vmem:[#allocation27_spill] sm:$0xff] }
 0x19e   :  { %v1072_v23 = vmul.f32 %v6599_v11, %v4086_v31  ;;  %v1073_v33 = vmul.f32 %v4086_v31, %v6600_v5  ;;  %v1074_v29 = vmul.f32 %v4086_v31, %v6601_v62  ;;  %v1075_v59 = vmul.f32 %v6602_v18, %v4086_v31  ;;  %v6607_v5 = vld [vmem:[#allocation20_spill] sm:$0xff]  ;;  %v6613_v10 = vld [vmem:[#allocation29_spill] sm:$0xff] }
 0x19f   :  { %v1076_v61 = vmul.f32 %v6603_v60, %v4086_v31  ;;  %v1077_v26 = vmul.f32 %v4086_v31, %v6604_v58  ;;  %v1078_v45 = vmul.f32 %v4086_v31, %v6605_v52  ;;  %v1079_v11 = vmul.f32 %v6606_v36, %v4086_v31  ;;  %v6610_v60 = vld [vmem:[#allocation22_spill] sm:$0xff]  ;;  %v6611_v58 = vld [vmem:[#allocation24_spill] sm:$0xff] }
 0x1a0   :  { %v1080_v13 = vmul.f32 %v6607_v5, %v4086_v31  ;;  %v1081_v62 = vmul.f32 %v4086_v31, %v6608_v57  ;;  %v1082_v18 = vmul.f32 %v4086_v31, %v6609_v55  ;;  %v1083_v21 = vmul.f32 %v6610_v60, %v4086_v31  ;;  %v6614_v5 = vld [vmem:[#allocation26_spill] sm:$0xff]  ;;  %v6615_v57 = vld [vmem:[#allocation28_spill] sm:$0xff]  ;;  %v6617_v60 = vld [vmem:[#allocation31_spill] sm:$0xff] }
 0x1a1   :  { %v1084_v56 = vmul.f32 %v6611_v58, %v4086_v31  ;;  %v1085_v52 = vmul.f32 %v4086_v31, %v6612_v9  ;;  %v1086_v36 = vmul.f32 %v4086_v31, %v6613_v10  ;;  %v1087_v46 = vmul.f32 %v6614_v5, %v4086_v31  ;;  %v6616_v55 = vld [vmem:[#allocation30_spill] sm:$0xff] }
 0x1a2   :  { %v1088_v28 = vmul.f32 %v6615_v57, %v4086_v31  ;;  %v1091_v53 = vmul.f32 %v6616_v55, %v4086_v31  ;;  %v1092_v35 = vmul.f32 %v6617_v60, %v4086_v31  ;;  %v3102_v58 = vpack.c.bf16 %v4167_v30, %v4167_v30  ;;  %v6619_v30 = vld [vmem:[#allocation39_spill] sm:$0xff] }
 0x1a3   :  { %v1101_v9 = vadd.f32 %v4111_v27, %v4100_v40  ;;  %v1102_v10 = vadd.f32 %v4111_v27, %v4104_v22  ;;  %v1103_v5 = vadd.f32 %v4111_v27, %v4108_v43  ;;  %v1104_v57 = vadd.f32 %v4111_v27, %v4115_v38 }
 0x1a4   :  { %v1105_v55 = vadd.f32 %v4111_v27, %v4119_v41  ;;  %v1106_v31 = vadd.f32 %v4111_v27, %v4123_v37  ;;  %v1107_v60 = vadd.f32 %v4111_v27, %v4127_v39  ;;  %v1108_v40 = vadd.f32 %v4111_v27, %v4131_v54  ;;  %1544 = vst.msk [vmem:[%s6469_s7 + $0xf0] sm:$0xf] %vm1483_vm4, %v3102_v58  ;;  %v6618_v58 = vld [vmem:[#allocation38_spill] sm:$0xff] }
 0x1a5   :  { %v1109_v22 = vadd.f32 %v4111_v27, %v4135_v1  ;;  %v1110_v43 = vadd.f32 %v4111_v27, %v4139_v47  ;;  %v1111_v38 = vadd.f32 %v4111_v27, %v4145_v14  ;;  %v1112_v41 = vadd.f32 %v4111_v27, %v4149_v25 }
 0x1a6   :  { %v1113_v37 = vadd.f32 %v4111_v27, %v4153_v8  ;;  %v1114_v39 = vadd.f32 %v4111_v27, %v4157_v20  ;;  %v1115_v54 = vadd.f32 %v4111_v27, %v4161_v7  ;;  %v1116_v1 = vadd.f32 %v4111_v27, %v4165_v42 }
 0x1a7   :  { %v1117_v47 = vadd.f32 %v4111_v27, %v4173_v32  ;;  %v1118_v14 = vadd.f32 %v4111_v27, %v4177_v49  ;;  %v1119_v25 = vadd.f32 %v4111_v27, %v4181_v6  ;;  %v1120_v8 = vadd.f32 %v4111_v27, %v4185_v19  ;;  %v6620_v49 = vld [vmem:[#allocation40_spill] sm:$0xff]  ;;  %v6621_v19 = vld [vmem:[#allocation41_spill] sm:$0xff] }
 0x1a8   :  { %v1121_v20 = vadd.f32 %v4111_v27, %v4189_v4  ;;  %v1122_v7 = vadd.f32 %v4111_v27, %v4193_v63  ;;  %v1123_v42 = vadd.f32 %v4111_v27, %v6618_v58  ;;  %v1124_v32 = vadd.f32 %v4111_v27, %v6619_v30  ;;  %v6622_v63 = vld [vmem:[#allocation42_spill] sm:$0xff]  ;;  %v6623_v30 = vld [vmem:[#allocation43_spill] sm:$0xff] }
 0x1a9   :  { %v1125_v6 = vadd.f32 %v4111_v27, %v6620_v49  ;;  %v1126_v4 = vadd.f32 %v4111_v27, %v6621_v19  ;;  %v1127_v58 = vadd.f32 %v4111_v27, %v6622_v63  ;;  %v1128_v49 = vadd.f32 %v4111_v27, %v6623_v30 }
 0x1aa   :  { %v1129_v19 = vadd.f32 %v4111_v27, %v1059_v0  ;;  %v1130_v63 = vadd.f32 %v4111_v27, %v1060_v17  ;;  %v1131_v30 = vadd.f32 %v4111_v27, %v1061_v24  ;;  %v1132_v0 = vadd.f32 %v4111_v27, %v1062_v48 }
 0x1ab   :  { %v1133_v17 = vadd.f32 %v4111_v27, %v1063_v3  ;;  %v1134_v24 = vadd.f32 %v4111_v27, %v1064_v2  ;;  %v1135_v48 = vadd.f32 %v4111_v27, %v1065_v12  ;;  %v1136_v3 = vadd.f32 %v4111_v27, %v1066_v34 }
 0x1ac   :  { %v1137_v2 = vadd.f32 %v4111_v27, %v1067_v51  ;;  %v1138_v12 = vadd.f32 %v4111_v27, %v1068_v16  ;;  %v1139_v34 = vadd.f32 %v4111_v27, %v1069_v50  ;;  %v1140_v51 = vadd.f32 %v4111_v27, %v1070_v15 }
 0x1ad   :  { %v1141_v16 = vadd.f32 %v4111_v27, %v1071_v44  ;;  %v1142_v50 = vadd.f32 %v4111_v27, %v1072_v23  ;;  %v1143_v15 = vadd.f32 %v4111_v27, %v1073_v33  ;;  %v1144_v44 = vadd.f32 %v4111_v27, %v1074_v29 }
 0x1ae   :  { %v1145_v23 = vadd.f32 %v4111_v27, %v1075_v59  ;;  %v1146_v33 = vadd.f32 %v4111_v27, %v1076_v61  ;;  %v1147_v29 = vadd.f32 %v4111_v27, %v1077_v26  ;;  %v1148_v59 = vadd.f32 %v4111_v27, %v1078_v45 }
 0x1af   :  { %v1149_v61 = vadd.f32 %v4111_v27, %v1079_v11  ;;  %v1150_v26 = vadd.f32 %v4111_v27, %v1080_v13  ;;  %v1151_v45 = vadd.f32 %v4111_v27, %v1081_v62  ;;  %v1152_v11 = vadd.f32 %v4111_v27, %v1082_v18 }
 0x1b0   :  { %v1153_v13 = vadd.f32 %v4111_v27, %v1083_v21  ;;  %v1154_v62 = vadd.f32 %v4111_v27, %v1084_v56  ;;  %v1155_v18 = vadd.f32 %v4111_v27, %v1085_v52  ;;  %v1156_v21 = vadd.f32 %v4111_v27, %v1086_v36 }
 0x1b1   :  { %v1157_v56 = vadd.f32 %v4111_v27, %v1087_v46  ;;  %v1158_v52 = vadd.f32 %v4111_v27, %v1088_v28  ;;  %v1161_v36 = vadd.f32 %v4111_v27, %v1091_v53  ;;  %v1162_v46 = vadd.f32 %v4111_v27, %v1092_v35 }
 0x1b2   :  { %v4385_v28 = vmax.f32 %v1101_v9, 0.0  ;;  %v4387_v53 = vmax.f32 %v1102_v10, 0.0  ;;  %v4389_v27 = vmax.f32 %v1103_v5, 0.0  ;;  %v4391_v35 = vmax.f32 %v1104_v57, 0.0 }
 0x1b3   :  { %v4393_v9 = vmax.f32 %v1105_v55, 0.0  ;;  %v4397_v10 = vmax.f32 %v1107_v60, 0.0  ;;  %v4401_v5 = vmax.f32 %v1109_v22, 0.0  ;;  %v4405_v57 = vmax.f32 %v1111_v38, 0.0 }
 0x1b4   :  { %6624 = vst [vmem:[#allocation8_spill] sm:$0xff] %v4385_v28  ;;  %6625 = vst [vmem:[#allocation9_spill] sm:$0xff] %v4387_v53  ;;  %v4395_v28 = vmax.f32 %v1106_v31, 0.0  ;;  %v4399_v53 = vmax.f32 %v1108_v40, 0.0  ;;  %v4409_v55 = vmax.f32 %v1113_v37, 0.0  ;;  %v4413_v31 = vmax.f32 %v1115_v54, 0.0 }
 0x1b5   :  { %6626 = vst [vmem:[#allocation11_spill] sm:$0xff] %v4389_v27  ;;  %6627 = vst [vmem:[#allocation13_spill] sm:$0xff] %v4391_v35  ;;  %v4403_v27 = vmax.f32 %v1110_v43, 0.0  ;;  %v4407_v35 = vmax.f32 %v1112_v41, 0.0  ;;  %v4417_v60 = vmax.f32 %v1117_v47, 0.0  ;;  %v4419_v40 = vmax.f32 %v1118_v14, 0.0 }
 0x1b6   :  { %6628 = vst [vmem:[#allocation10_spill] sm:$0xff] %v4393_v9  ;;  %6629 = vst [vmem:[#allocation12_spill] sm:$0xff] %v4395_v28  ;;  %v4411_v9 = vmax.f32 %v1114_v39, 0.0  ;;  %v4415_v28 = vmax.f32 %v1116_v1, 0.0  ;;  %v4421_v22 = vmax.f32 %v1119_v25, 0.0  ;;  %v4423_v43 = vmax.f32 %v1120_v8, 0.0 }
 0x1b7   :  { %6630 = vst [vmem:[#allocation15_spill] sm:$0xff] %v4401_v5  ;;  %6631 = vst [vmem:[#allocation17_spill] sm:$0xff] %v4403_v27  ;;  %v4425_v38 = vmax.f32 %v1121_v20, 0.0  ;;  %v4427_v41 = vmax.f32 %v1122_v7, 0.0  ;;  %v4429_v37 = vmax.f32 %v1123_v42, 0.0  ;;  %v4431_v39 = vmax.f32 %v1124_v32, 0.0 }
 0x1b8   :  { %6632 = vst [vmem:[#allocation14_spill] sm:$0xff] %v4405_v57  ;;  %v4433_v54 = vmax.f32 %v1125_v6, 0.0  ;;  %v4435_v1 = vmax.f32 %v1126_v4, 0.0  ;;  %v4437_v47 = vmax.f32 %v1127_v58, 0.0  ;;  %v4439_v14 = vmax.f32 %v1128_v49, 0.0 }
 0x1b9   :  { %6633 = vst [vmem:[#allocation16_spill] sm:$0xff] %v4431_v39  ;;  %v4441_v25 = vmax.f32 %v1129_v19, 0.0  ;;  %v4443_v8 = vmax.f32 %v1130_v63, 0.0  ;;  %v4445_v20 = vmax.f32 %v1131_v30, 0.0  ;;  %v4447_v7 = vmax.f32 %v1132_v0, 0.0 }
 0x1ba   :  { %6634 = vst [vmem:[#allocation19_spill] sm:$0xff] %v4433_v54  ;;  %6635 = vst [vmem:[#allocation21_spill] sm:$0xff] %v4435_v1  ;;  %v4449_v42 = vmax.f32 %v1133_v17, 0.0  ;;  %v4451_v32 = vmax.f32 %v1134_v24, 0.0  ;;  %v4453_v6 = vmax.f32 %v1135_v48, 0.0  ;;  %v4455_v4 = vmax.f32 %v1136_v3, 0.0 }
 0x1bb   :  { %6636 = vst [vmem:[#allocation18_spill] sm:$0xff] %v4437_v47  ;;  %6637 = vst [vmem:[#allocation20_spill] sm:$0xff] %v4439_v14  ;;  %v4457_v58 = vmax.f32 %v1137_v2, 0.0  ;;  %v4459_v49 = vmax.f32 %v1138_v12, 0.0  ;;  %v4461_v19 = vmax.f32 %v1139_v34, 0.0  ;;  %v4463_v63 = vmax.f32 %v1140_v51, 0.0 }
 0x1bc   :  { %v4465_v30 = vmax.f32 %v1141_v16, 0.0  ;;  %v4467_v0 = vmax.f32 %v1142_v50, 0.0  ;;  %v4469_v17 = vmax.f32 %v1143_v15, 0.0  ;;  %v4471_v24 = vmax.f32 %v1144_v44, 0.0 }
 0x1bd   :  { %v4473_v48 = vmax.f32 %v1145_v23, 0.0  ;;  %v4475_v3 = vmax.f32 %v1146_v33, 0.0  ;;  %v4477_v2 = vmax.f32 %v1147_v29, 0.0  ;;  %v4479_v12 = vmax.f32 %v1148_v59, 0.0 }
 0x1be   :  { %v4481_v34 = vmax.f32 %v1149_v61, 0.0  ;;  %v4483_v51 = vmax.f32 %v1150_v26, 0.0  ;;  %v4485_v16 = vmax.f32 %v1151_v45, 0.0  ;;  %v4487_v50 = vmax.f32 %v1152_v11, 0.0  ;;  %v6641_v45 = vld [vmem:[#allocation8_spill] sm:$0xff] }
 0x1bf   :  { %v4489_v15 = vmax.f32 %v1153_v13, 0.0  ;;  %v4491_v44 = vmax.f32 %v1154_v62, 0.0  ;;  %v4493_v23 = vmax.f32 %v1155_v18, 0.0  ;;  %v4495_v33 = vmax.f32 %v1156_v21, 0.0  ;;  %v6643_v62 = vld [vmem:[#allocation11_spill] sm:$0xff] }
 0x1c0   :  { %6638 = vst [vmem:[#allocation23_spill] sm:$0xff] %v4487_v50  ;;  %v4497_v29 = vmax.f32 %v1157_v56, 0.0  ;;  %v4499_v59 = vmax.f32 %v1158_v52, 0.0  ;;  %v4501_v61 = vmax.f32 %v1161_v36, 0.0  ;;  %v4503_v26 = vmax.f32 %v1162_v46, 0.0  ;;  %v6642_v50 = vld [vmem:[#allocation9_spill] sm:$0xff] }
 0x1c1   :  { %6639 = vst [vmem:[#allocation25_spill] sm:$0xff] %v4493_v23  ;;  %v3044_v11 = vpack.c.bf16 %v6641_v45, %v6641_v45  ;;  %v3045_v13 = vpack.c.bf16 %v6642_v50, %v6642_v50  ;;  %v3046_v18 = vpack.c.bf16 %v6643_v62, %v6643_v62  ;;  %v6644_v23 = vld [vmem:[#allocation13_spill] sm:$0xff]  ;;  %v6645_v56 = vld [vmem:[#allocation10_spill] sm:$0xff]  ;;  %v3050_v46 = vpack.c.bf16 %v4397_v10, %v4397_v10 }
 0x1c2   :  { %6640 = vst [vmem:[#allocation22_spill] sm:$0xff] %v4499_v59  ;;  %v3047_v21 = vpack.c.bf16 %v6644_v23, %v6644_v23  ;;  %v3048_v52 = vpack.c.bf16 %v6645_v56, %v6645_v56  ;;  %v6646_v59 = vld [vmem:[#allocation12_spill] sm:$0xff]  ;;  %v3051_v45 = vpack.c.bf16 %v4399_v53, %v4399_v53  ;;  %v3052_v50 = vpack.c.bf16 %v4401_v5, %v4401_v5 }
 0x1c3   :  { %v3049_v36 = vpack.c.bf16 %v6646_v59, %v6646_v59  ;;  %v3053_v62 = vpack.c.bf16 %v4403_v27, %v4403_v27  ;;  %v3054_v23 = vpack.c.bf16 %v4405_v57, %v4405_v57  ;;  %1486 = vst.msk [vmem:[%s6469_s7 + $0x8] sm:$0xf] %vm1483_vm4, %v3044_v11  ;;  %1487 = vst.msk [vmem:[%s6469_s7 + $0xc] sm:$0xf] %vm1483_vm4, %v3045_v13 }
 0x1c4   :  { %1488 = vst.msk [vmem:[%s6469_s7 + $0x10] sm:$0xf] %vm1483_vm4, %v3046_v18  ;;  %v3055_v27 = vpack.c.bf16 %v4407_v35, %v4407_v35  ;;  %v3056_v57 = vpack.c.bf16 %v4409_v55, %v4409_v55  ;;  %v3057_v5 = vpack.c.bf16 %v4411_v9, %v4411_v9  ;;  %v3058_v11 = vpack.c.bf16 %v4413_v31, %v4413_v31 }
 0x1c5   :  { %1489 = vst.msk [vmem:[%s6469_s7 + $0x14] sm:$0xf] %vm1483_vm4, %v3047_v21  ;;  %1490 = vst.msk [vmem:[%s6469_s7 + $0x18] sm:$0xf] %vm1483_vm4, %v3048_v52  ;;  %v3059_v13 = vpack.c.bf16 %v4415_v28, %v4415_v28  ;;  %v3060_v18 = vpack.c.bf16 %v4417_v60, %v4417_v60  ;;  %v3061_v21 = vpack.c.bf16 %v4419_v40, %v4419_v40 }
 0x1c6   :  { %1491 = vst.msk [vmem:[%s6469_s7 + $0x1c] sm:$0xf] %vm1483_vm4, %v3049_v36  ;;  %1492 = vst.msk [vmem:[%s6469_s7 + $0x20] sm:$0xf] %vm1483_vm4, %v3050_v46  ;;  %v3062_v52 = vpack.c.bf16 %v4421_v22, %v4421_v22  ;;  %v3063_v36 = vpack.c.bf16 %v4423_v43, %v4423_v43  ;;  %v3065_v46 = vpack.c.bf16 %v4427_v41, %v4427_v41 }
 0x1c7   :  { %1493 = vst.msk [vmem:[%s6469_s7 + $0x24] sm:$0xf] %vm1483_vm4, %v3051_v45  ;;  %1494 = vst.msk [vmem:[%s6469_s7 + $0x28] sm:$0xf] %vm1483_vm4, %v3052_v50  ;;  %v3064_v45 = vpack.c.bf16 %v4425_v38, %v4425_v38  ;;  %v3066_v50 = vpack.c.bf16 %v4429_v37, %v4429_v37 }
 0x1c8   :  { %1495 = vst.msk [vmem:[%s6469_s7 + $0x2c] sm:$0xf] %vm1483_vm4, %v3053_v62  ;;  %1496 = vst.msk [vmem:[%s6469_s7 + $0x30] sm:$0xf] %vm1483_vm4, %v3054_v23  ;;  %v3067_v23 = vpack.c.bf16 %v4431_v39, %v4431_v39  ;;  %v3069_v62 = vpack.c.bf16 %v4435_v1, %v4435_v1  ;;  %v1242_v39 = vpack.c.bf16 %v4443_v8, %v4441_v25 }
 0x1c9   :  { %1497 = vst.msk [vmem:[%s6469_s7 + $0x34] sm:$0xf] %vm1483_vm4, %v3055_v27  ;;  %1498 = vst.msk [vmem:[%s6469_s7 + $0x38] sm:$0xf] %vm1483_vm4, %v3056_v57  ;;  %v3068_v27 = vpack.c.bf16 %v4433_v54, %v4433_v54  ;;  %v3070_v57 = vpack.c.bf16 %v4437_v47, %v4437_v47 }
 0x1ca   :  { %1499 = vst.msk [vmem:[%s6469_s7 + $0x3c] sm:$0xf] %vm1483_vm4, %v3057_v5  ;;  %1500 = vst.msk [vmem:[%s6469_s7 + $0x40] sm:$0xf] %vm1483_vm4, %v3058_v11  ;;  %v3071_v5 = vpack.c.bf16 %v4439_v14, %v4439_v14  ;;  %v3072_v11 = vpack.c.bf16 %v4441_v25, %v4441_v25  ;;  %v3097_v14 = vpack.c.bf16 %v4491_v44, %v4491_v44 }
 0x1cb   :  { %1501 = vst.msk [vmem:[%s6469_s7 + $0x44] sm:$0xf] %vm1483_vm4, %v3059_v13  ;;  %1502 = vst.msk [vmem:[%s6469_s7 + $0x48] sm:$0xf] %vm1483_vm4, %v3060_v18  ;;  %v3073_v13 = vpack.c.bf16 %v4443_v8, %v4443_v8  ;;  %v3074_v18 = vpack.c.bf16 %v4445_v20, %v4445_v20  ;;  %v1245_v25 = vpack.c.bf16 %v4455_v4, %v4453_v6 }
 0x1cc   :  { %1503 = vst.msk [vmem:[%s6469_s7 + $0x4c] sm:$0xf] %vm1483_vm4, %v3061_v21  ;;  %1504 = vst.msk [vmem:[%s6469_s7 + $0x50] sm:$0xf] %vm1483_vm4, %v3062_v52  ;;  %v3075_v21 = vpack.c.bf16 %v4447_v7, %v4447_v7  ;;  %v3076_v52 = vpack.c.bf16 %v4449_v42, %v4449_v42  ;;  %v1246_v8 = vpack.c.bf16 %v4459_v49, %v4457_v58 }
 0x1cd   :  { %1505 = vst.msk [vmem:[%s6469_s7 + $0x54] sm:$0xf] %vm1483_vm4, %v3063_v36  ;;  %1506 = vst.msk [vmem:[%s6469_s7 + $0x58] sm:$0xf] %vm1483_vm4, %v3064_v45  ;;  %v3077_v36 = vpack.c.bf16 %v4451_v32, %v4451_v32  ;;  %v3078_v45 = vpack.c.bf16 %v4453_v6, %v4453_v6  ;;  %v1252_v6 = vpack.c.bf16 %v4483_v51, %v4481_v34 }
 0x1ce   :  { %1507 = vst.msk [vmem:[%s6469_s7 + $0x5c] sm:$0xf] %vm1483_vm4, %v3065_v46  ;;  %1508 = vst.msk [vmem:[%s6469_s7 + $0x60] sm:$0xf] %vm1483_vm4, %v3066_v50  ;;  %v3079_v46 = vpack.c.bf16 %v4455_v4, %v4455_v4  ;;  %v3080_v50 = vpack.c.bf16 %v4457_v58, %v4457_v58  ;;  %v1254_v58 = vpack.c.bf16 %v4491_v44, %v4489_v15 }
 0x1cf   :  { %1509 = vst.msk [vmem:[%s6469_s7 + $0x64] sm:$0xf] %vm1483_vm4, %v3067_v23  ;;  %1510 = vst.msk [vmem:[%s6469_s7 + $0x68] sm:$0xf] %vm1483_vm4, %v3068_v27  ;;  %v3081_v23 = vpack.c.bf16 %v4459_v49, %v4459_v49  ;;  %v3082_v27 = vpack.c.bf16 %v4461_v19, %v4461_v19 }
 0x1d0   :  { %1511 = vst.msk [vmem:[%s6469_s7 + $0x6c] sm:$0xf] %vm1483_vm4, %v3069_v62  ;;  %1512 = vst.msk [vmem:[%s6469_s7 + $0x70] sm:$0xf] %vm1483_vm4, %v3070_v57  ;;  %v3083_v62 = vpack.c.bf16 %v4463_v63, %v4463_v63  ;;  %v3084_v57 = vpack.c.bf16 %v4465_v30, %v4465_v30 }
 0x1d1   :  { %1513 = vst.msk [vmem:[%s6469_s7 + $0x74] sm:$0xf] %vm1483_vm4, %v3071_v5  ;;  %1514 = vst.msk [vmem:[%s6469_s7 + $0x78] sm:$0xf] %vm1483_vm4, %v3072_v11  ;;  %v3085_v5 = vpack.c.bf16 %v4467_v0, %v4467_v0  ;;  %v3086_v11 = vpack.c.bf16 %v4469_v17, %v4469_v17 }
 0x1d2   :  { %1515 = vst.msk [vmem:[%s6469_s7 + $0x7c] sm:$0xf] %vm1483_vm4, %v3073_v13  ;;  %1516 = vst.msk [vmem:[%s6469_s7 + $0x80] sm:$0xf] %vm1483_vm4, %v3074_v18  ;;  %v3087_v13 = vpack.c.bf16 %v4471_v24, %v4471_v24  ;;  %v3088_v18 = vpack.c.bf16 %v4473_v48, %v4473_v48 }
 0x1d3   :  { %1517 = vst.msk [vmem:[%s6469_s7 + $0x84] sm:$0xf] %vm1483_vm4, %v3075_v21  ;;  %1518 = vst.msk [vmem:[%s6469_s7 + $0x88] sm:$0xf] %vm1483_vm4, %v3076_v52  ;;  %v3089_v21 = vpack.c.bf16 %v4475_v3, %v4475_v3  ;;  %v3090_v52 = vpack.c.bf16 %v4477_v2, %v4477_v2 }
 0x1d4   :  { %1519 = vst.msk [vmem:[%s6469_s7 + $0x8c] sm:$0xf] %vm1483_vm4, %v3077_v36  ;;  %1520 = vst.msk [vmem:[%s6469_s7 + $0x90] sm:$0xf] %vm1483_vm4, %v3078_v45  ;;  %v3091_v36 = vpack.c.bf16 %v4479_v12, %v4479_v12  ;;  %v3092_v45 = vpack.c.bf16 %v4481_v34, %v4481_v34  ;;  %v6664_v34 = vld [vmem:[#allocation20_spill] sm:$0xff] }
 0x1d5   :  { %1521 = vst.msk [vmem:[%s6469_s7 + $0x94] sm:$0xf] %vm1483_vm4, %v3079_v46  ;;  %1522 = vst.msk [vmem:[%s6469_s7 + $0x98] sm:$0xf] %vm1483_vm4, %v3080_v50  ;;  %v3093_v46 = vpack.c.bf16 %v4483_v51, %v4483_v51  ;;  %v3094_v50 = vpack.c.bf16 %v4485_v16, %v4485_v16 }
 0x1d6   :  { %1523 = vst.msk [vmem:[%s6469_s7 + $0x9c] sm:$0xf] %vm1483_vm4, %v3081_v23  ;;  %1524 = vst.msk [vmem:[%s6469_s7 + $0xa0] sm:$0xf] %vm1483_vm4, %v3082_v27  ;;  %v6647_v23 = vld [vmem:[#allocation23_spill] sm:$0xff] }
 0x1d7   :  { %1525 = vst.msk [vmem:[%s6469_s7 + $0xa4] sm:$0xf] %vm1483_vm4, %v3083_v62  ;;  %1526 = vst.msk [vmem:[%s6469_s7 + $0xa8] sm:$0xf] %vm1483_vm4, %v3084_v57  ;;  %v3095_v27 = vpack.c.bf16 %v6647_v23, %v6647_v23  ;;  %v3096_v62 = vpack.c.bf16 %v4489_v15, %v4489_v15  ;;  %v6648_v57 = vld [vmem:[#allocation25_spill] sm:$0xff]  ;;  %v1253_v4 = vpack.c.bf16 %v6647_v23, %v4485_v16 }
 0x1d8   :  { %1527 = vst.msk [vmem:[%s6469_s7 + $0xac] sm:$0xf] %vm1483_vm4, %v3085_v5  ;;  %1528 = vst.msk [vmem:[%s6469_s7 + $0xb0] sm:$0xf] %vm1483_vm4, %v3086_v11  ;;  %v3098_v47 = vpack.c.bf16 %v6648_v57, %v6648_v57  ;;  %v3099_v5 = vpack.c.bf16 %v4495_v33, %v4495_v33  ;;  %v3100_v11 = vpack.c.bf16 %v4497_v29, %v4497_v29 }
 0x1d9   :  { %1529 = vst.msk [vmem:[%s6469_s7 + $0xb4] sm:$0xf] %vm1483_vm4, %v3087_v13  ;;  %1530 = vst.msk [vmem:[%s6469_s7 + $0xb8] sm:$0xf] %vm1483_vm4, %v3088_v18  ;;  %v6649_v13 = vld [vmem:[#allocation22_spill] sm:$0xff]  ;;  %v3104_v18 = vpack.c.bf16 %v4501_v61, %v4501_v61  ;;  %v1255_v49 = vpack.c.bf16 %v4495_v33, %v6648_v57 }
 0x1da   :  { %1531 = vst.msk [vmem:[%s6469_s7 + $0xbc] sm:$0xf] %vm1483_vm4, %v3089_v21  ;;  %1532 = vst.msk [vmem:[%s6469_s7 + $0xc0] sm:$0xf] %vm1483_vm4, %v3090_v52  ;;  %v3101_v1 = vpack.c.bf16 %v6649_v13, %v6649_v13  ;;  %v3105_v21 = vpack.c.bf16 %v4503_v26, %v4503_v26  ;;  %v6650_v52 = vld [vmem:[#allocation33_spill] sm:$0xff] }
 0x1db   :  { %1533 = vst.msk [vmem:[%s6469_s7 + $0xc4] sm:$0xf] %vm1483_vm4, %v3091_v36  ;;  %1534 = vst.msk [vmem:[%s6469_s7 + $0xc8] sm:$0xf] %vm1483_vm4, %v3092_v45  ;;  %v6651_v36 = vld [vmem:[#allocation35_spill] sm:$0xff] }
 0x1dc   :  { %1535 = vst.msk [vmem:[%s6469_s7 + $0xcc] sm:$0xf] %vm1483_vm4, %v3093_v46  ;;  %1536 = vst.msk [vmem:[%s6469_s7 + $0xd0] sm:$0xf] %vm1483_vm4, %v3094_v50  ;;  %v1099_v45 = vadd.f32 %v6651_v36, %v6650_v52  ;;  %v6652_v46 = vld [vmem:[#allocation34_spill] sm:$0xff] }
 0x1dd   :  { %1537 = vst.msk [vmem:[%s6469_s7 + $0xd4] sm:$0xf] %vm1483_vm4, %v3095_v27  ;;  %1538 = vst.msk [vmem:[%s6469_s7 + $0xd8] sm:$0xf] %vm1483_vm4, %v3096_v62  ;;  %v1100_v50 = vadd.f32 %v6651_v36, %v6652_v46  ;;  %v6653_v27 = vld [vmem:[#allocation8_spill] sm:$0xff]  ;;  %v6654_v62 = vld [vmem:[#allocation9_spill] sm:$0xff] }
 0x1de   :  { %1539 = vst.msk [vmem:[%s6469_s7 + $0xdc] sm:$0xf] %vm1483_vm4, %v3097_v14  ;;  %1540 = vst.msk [vmem:[%s6469_s7 + $0xe0] sm:$0xf] %vm1483_vm4, %v3098_v47  ;;  %v1163_v47 = vmax.f32 %v1099_v45, 0.0  ;;  %v6655_v46 = vld [vmem:[#allocation11_spill] sm:$0xff]  ;;  %v1249_v45 = vpack.c.bf16 %v4471_v24, %v4469_v17 }
 0x1df   :  { %1541 = vst.msk [vmem:[%s6469_s7 + $0xe4] sm:$0xf] %vm1483_vm4, %v3099_v5  ;;  %1542 = vst.msk [vmem:[%s6469_s7 + $0xe8] sm:$0xf] %vm1483_vm4, %v3100_v11  ;;  %v1164_v14 = vmax.f32 %v1100_v50, 0.0  ;;  %v1228_v5 = vpack.c.bf16 %v6654_v62, %v6653_v27  ;;  %v6658_v17 = vld [vmem:[#allocation17_spill] sm:$0xff] }
 0x1e0   :  { %1543 = vst.msk [vmem:[%s6469_s7 + $0xec] sm:$0xf] %vm1483_vm4, %v3101_v1  ;;  %1546 = vst.msk [vmem:[%s6469_s7 + $0xf8] sm:$0xf] %vm1483_vm4, %v3104_v18  ;;  %v3042_v52 = vpack.c.bf16 %v1163_v47, %v1163_v47  ;;  %v6656_v1 = vld [vmem:[#allocation13_spill] sm:$0xff]  ;;  %v1243_v18 = vpack.c.bf16 %v4447_v7, %v4445_v20  ;;  %v1247_v20 = vpack.c.bf16 %v4463_v63, %v4461_v19 }
 0x1e1   :  { %1547 = vst.msk [vmem:[%s6469_s7 + $0xfc] sm:$0xf] %vm1483_vm4, %v3105_v21  ;;  %v1227_v11 = vpack.c.bf16 %v1164_v14, %v1163_v47  ;;  %v3043_v36 = vpack.c.bf16 %v1164_v14, %v1164_v14  ;;  %v1229_v54 = vpack.c.bf16 %v6656_v1, %v6655_v46  ;;  %v1244_v21 = vpack.c.bf16 %v4451_v32, %v4449_v42 }
 0x1e2   :  { %1484 = vst.msk [vmem:[%s6469_s7] sm:$0xf] %vm1483_vm4, %v3042_v52  ;;  %v1248_v7 = vpack.c.bf16 %v4467_v0, %v4465_v30  ;;  %v1250_v42 = vpack.c.bf16 %v4475_v3, %v4473_v48  ;;  %v1251_v32 = vpack.c.bf16 %v4479_v12, %v4477_v2  ;;  %v1256_v19 = vpack.c.bf16 %v6649_v13, %v4497_v29  ;;  %v6657_v0 = vld [vmem:[#allocation15_spill] sm:$0xff]  ;;  %v6659_v48 = vld [vmem:[#allocation14_spill] sm:$0xff]  ;;  %v6662_v12 = vld [vmem:[#allocation21_spill] sm:$0xff] }
 0x1e3   :  { %1485 = vst.msk [vmem:[%s6469_s7 + $0x4] sm:$0xf] %vm1483_vm4, %v3043_v36  ;;  %3304 = vmatprep.mubr.msk.bf16.mxu1 %vm683_vm3, %v1227_v11  ;;  %v1258_v63 = vpack.c.bf16 %v4503_v26, %v4501_v61  ;;  %v1231_v30 = vpack.c.bf16 %v4399_v53, %v4397_v10  ;;  %v1232_v24 = vpack.c.bf16 %v6658_v17, %v6657_v0 }
 0x1e4   :  { %3305 = vmatmul.mubr.msk.bf16.vlgmr.msra.gmra.mxu1 %vm683_vm3, %v1228_v5  ;;  %v1233_v3 = vpack.c.bf16 %v4407_v35, %v6659_v48  ;;  %v1234_v2 = vpack.c.bf16 %v4411_v9, %v4409_v55  ;;  %v1235_v53 = vpack.c.bf16 %v4415_v28, %v4413_v31  ;;  %v1236_v10 = vpack.c.bf16 %v4419_v40, %v4417_v60  ;;  %v6660_v55 = vld [vmem:[#allocation16_spill] sm:$0xff]  ;;  %v6661_v31 = vld [vmem:[#allocation19_spill] sm:$0xff]  ;;  %v6663_v40 = vld [vmem:[#allocation18_spill] sm:$0xff] }
 0x1e5   :  { %3308 = vmatprep.mubr.msk.bf16.mxu1 %vm683_vm3, %v1229_v54  ;;  %v1230_v54 = vpack.c.bf16 %v6646_v59, %v6645_v56  ;;  %v1237_v35 = vpack.c.bf16 %v4423_v43, %v4421_v22  ;;  %v1238_v9 = vpack.c.bf16 %v4427_v41, %v4425_v38  ;;  %v1239_v28 = vpack.c.bf16 %v6660_v55, %v4429_v37  ;;  %v6665_v43 = vld [vmem:[#allocation37_spill] sm:$0xff]  ;;  %v6666_v38 = vld [vmem:[#allocation36_spill] sm:$0xff] }
 0x1e6   :  { %v1240_v60 = vpack.c.bf16 %v6662_v12, %v6661_v31  ;;  %v1241_v22 = vpack.c.bf16 %v6664_v34, %v6663_v40  ;;  %v6667_v41 = vpack.c.bf16 %v6665_v43, %v6666_v38 }
 0x1ec   :  { %3309 = vmatmul.mubr.msk.bf16.gmra.mxu1 %vm683_vm3, %v1230_v54 }
 0x1ed   :  { %3312 = vmatprep.mubr.msk.bf16.mxu1 %vm683_vm3, %v1231_v30 }
 0x1f4   :  { %3313 = vmatmul.mubr.msk.bf16.gmra.mxu1 %vm683_vm3, %v1232_v24 }
 0x1f5   :  { %3316 = vmatprep.mubr.msk.bf16.mxu1 %vm683_vm3, %v1233_v3 }
 0x1fc   :  { %3317 = vmatmul.mubr.msk.bf16.gmra.mxu1 %vm683_vm3, %v1234_v2 }
 0x1fd   :  { %3320 = vmatprep.mubr.msk.bf16.mxu1 %vm683_vm3, %v1235_v53 }
 0x204   :  { %3321 = vmatmul.mubr.msk.bf16.gmra.mxu1 %vm683_vm3, %v1236_v10 }
 0x205   :  { %3324 = vmatprep.mubr.msk.bf16.mxu1 %vm683_vm3, %v1237_v35 }
 0x20c   :  { %3325 = vmatmul.mubr.msk.bf16.gmra.mxu1 %vm683_vm3, %v1238_v9 }
 0x20d   :  { %3328 = vmatprep.mubr.msk.bf16.mxu1 %vm683_vm3, %v1239_v28 }
 0x214   :  { %3329 = vmatmul.mubr.msk.bf16.gmra.mxu1 %vm683_vm3, %v1240_v60 }
 0x215   :  { %3332 = vmatprep.mubr.msk.bf16.mxu1 %vm683_vm3, %v1241_v22 }
 0x21c   :  { %3333 = vmatmul.mubr.msk.bf16.gmra.mxu1 %vm683_vm3, %v1242_v39 }
 0x21d   :  { %3336 = vmatprep.mubr.msk.bf16.mxu1 %vm683_vm3, %v1243_v18 }
 0x224   :  { %3337 = vmatmul.mubr.msk.bf16.gmra.mxu1 %vm683_vm3, %v1244_v21 }
 0x225   :  { %3340 = vmatprep.mubr.msk.bf16.mxu1 %vm683_vm3, %v1245_v25 }
 0x22c   :  { %3341 = vmatmul.mubr.msk.bf16.gmra.mxu1 %vm683_vm3, %v1246_v8 }
 0x22d   :  { %3344 = vmatprep.mubr.msk.bf16.mxu1 %vm683_vm3, %v1247_v20 }
 0x234   :  { %3345 = vmatmul.mubr.msk.bf16.gmra.mxu1 %vm683_vm3, %v1248_v7 }
 0x235   :  { %3348 = vmatprep.mubr.msk.bf16.mxu1 %vm683_vm3, %v1249_v45 }
 0x23c   :  { %3349 = vmatmul.mubr.msk.bf16.gmra.mxu1 %vm683_vm3, %v1250_v42 }
 0x23d   :  { %3352 = vmatprep.mubr.msk.bf16.mxu1 %vm683_vm3, %v1251_v32 }
 0x244   :  { %3353 = vmatmul.mubr.msk.bf16.gmra.mxu1 %vm683_vm3, %v1252_v6 }
 0x245   :  { %3356 = vmatprep.mubr.msk.bf16.mxu1 %vm683_vm3, %v1253_v4 }
 0x24c   :  { %3357 = vmatmul.mubr.msk.bf16.gmra.mxu1 %vm683_vm3, %v1254_v58 }
 0x24d   :  { %3360 = vmatprep.mubr.msk.bf16.mxu1 %vm683_vm3, %v1255_v49 }
 0x254   :  { %3361 = vmatmul.mubr.msk.bf16.gmra.mxu1 %vm683_vm3, %v1256_v19 }
 0x255   :  { %3364 = vmatprep.mubr.msk.bf16.mxu1 %vm683_vm3, %v6667_v41 }
 0x25c   :  { %3365 = vmatmul.mubr.msk.bf16.gmra.mxu1 %vm683_vm3, %v1258_v63 }
 0x2a4   :  { %v4972_v37 = vpop.f32.mrf.mxu1 }
 0x2a5   :  { %v2078_v44 = vmul.f32 %v4972_v37, %v4972_v37  ;;  %v1946_v56 = vsel %vm683_vm3, %v4972_v37, 0.0 }
 0x2a6   :  { %v4974_v39 = vpop.f32.mrf.mxu1 }
 0x2a7   :  { %v2076_v16 = vmul.f32 %v4974_v39, %v4974_v39  ;;  %v1943_v33 = vsel %vm683_vm3, %v4974_v39, 0.0  ;;  %v2143_v27 = vsel %vm683_vm3, %v2078_v44, 0.0 }
 0x2a8   :  { %v4976_v51 = vpop.f32.mrf.mxu1 }
 0x2a9   :  { %v2140_v23 = vsel %vm683_vm3, %v2076_v16, 0.0  ;;  %v2079_v57 = vmul.f32 %v4976_v51, %v4976_v51  ;;  %v1948_v62 = vsel %vm683_vm3, %v4976_v51, 0.0 }
 0x2aa   :  { %v4980_v15 = vpop.f32.mrf.mxu1 }
 0x2ab   :  { %v1944_v29 = vsel %vm683_vm3, %v4980_v15, 0.0  ;;  %v2077_v59 = vmul.f32 %v4980_v15, %v4980_v15  ;;  %v2145_v46 = vsel %vm683_vm3, %v2079_v57, 0.0 }
 0x2ac   :  { %v1945_v61 = vadd.f32 %v1944_v29, %v1943_v33  ;;  %v4990_v26 = vpop.f32.mrf.mxu1 }
 0x2ad   :  { %v2141_v13 = vsel %vm683_vm3, %v2077_v59, 0.0  ;;  %v2082_v8 = vmul.f32 %v4990_v26, %v4990_v26  ;;  %v1954_v4 = vsel %vm683_vm3, %v4990_v26, 0.0 }
 0x2ae   :  { %v1947_v50 = vadd.f32 %v1946_v56, %v1945_v61  ;;  %v2142_v47 = vadd.f32 %v2141_v13, %v2140_v23  ;;  %v4998_v14 = vpop.f32.mrf.mxu1 }
 0x2af   :  { %v2080_v5 = vmul.f32 %v4998_v14, %v4998_v14  ;;  %v1950_v1 = vsel %vm683_vm3, %v4998_v14, 0.0  ;;  %v2151_v30 = vsel %vm683_vm3, %v2082_v8, 0.0 }
 0x2b0   :  { %v2144_v11 = vadd.f32 %v2143_v27, %v2142_v47  ;;  %v1949_v52 = vadd.f32 %v1948_v62, %v1947_v50  ;;  %v5005_v36 = vpop.f32.mrf.mxu1 }
 0x2b1   :  { %v2147_v20 = vsel %vm683_vm3, %v2080_v5, 0.0  ;;  %v2083_v58 = vmul.f32 %v5005_v36, %v5005_v36  ;;  %v1956_v0 = vsel %vm683_vm3, %v5005_v36, 0.0 }
 0x2b2   :  { %v1951_v18 = vadd.f32 %v1950_v1, %v1949_v52  ;;  %v2146_v21 = vadd.f32 %v2145_v46, %v2144_v11  ;;  %v5010_v25 = vpop.f32.mrf.mxu1 }
 0x2b3   :  { %v1952_v7 = vsel %vm683_vm3, %v5010_v25, 0.0  ;;  %v2081_v45 = vmul.f32 %v5010_v25, %v5010_v25  ;;  %v2153_v2 = vsel %vm683_vm3, %v2083_v58, 0.0 }
 0x2b4   :  { %v2148_v42 = vadd.f32 %v2147_v20, %v2146_v21  ;;  %v1953_v32 = vadd.f32 %v1952_v7, %v1951_v18  ;;  %v5019_v6 = vpop.f32.mrf.mxu1 }
 0x2b5   :  { %v2149_v49 = vsel %vm683_vm3, %v2081_v45, 0.0  ;;  %v2086_v55 = vmul.f32 %v5019_v6, %v5019_v6  ;;  %v1962_v22 = vsel %vm683_vm3, %v5019_v6, 0.0 }
 0x2b6   :  { %v1955_v19 = vadd.f32 %v1954_v4, %v1953_v32  ;;  %v2150_v63 = vadd.f32 %v2149_v49, %v2148_v42  ;;  %v5026_v54 = vpop.f32.mrf.mxu1 }
 0x2b7   :  { %v2084_v17 = vmul.f32 %v5026_v54, %v5026_v54  ;;  %v1958_v53 = vsel %vm683_vm3, %v5026_v54, 0.0  ;;  %v2159_v33 = vsel %vm683_vm3, %v2086_v55, 0.0 }
 0x2b8   :  { %v2152_v24 = vadd.f32 %v2151_v30, %v2150_v63  ;;  %v1957_v48 = vadd.f32 %v1956_v0, %v1955_v19  ;;  %v5033_v3 = vpop.f32.mrf.mxu1 }
 0x2b9   :  { %v2155_v28 = vsel %vm683_vm3, %v2084_v17, 0.0  ;;  %v2087_v43 = vmul.f32 %v5033_v3, %v5033_v3  ;;  %v1964_v29 = vsel %vm683_vm3, %v5033_v3, 0.0 }
 0x2ba   :  { %v1959_v10 = vadd.f32 %v1958_v53, %v1957_v48  ;;  %v2154_v35 = vadd.f32 %v2153_v2, %v2152_v24  ;;  %v5038_v9 = vpop.f32.mrf.mxu1 }
 0x2bb   :  { %v1960_v31 = vsel %vm683_vm3, %v5038_v9, 0.0  ;;  %v2085_v12 = vmul.f32 %v5038_v9, %v5038_v9  ;;  %v2161_v57 = vsel %vm683_vm3, %v2087_v43, 0.0 }
 0x2bc   :  { %v2156_v60 = vadd.f32 %v2155_v28, %v2154_v35  ;;  %v1961_v40 = vadd.f32 %v1960_v31, %v1959_v10  ;;  %v5047_v34 = vpop.f32.mrf.mxu1 }
 0x2bd   :  { %v2157_v38 = vsel %vm683_vm3, %v2085_v12, 0.0  ;;  %v2090_v62 = vmul.f32 %v5047_v34, %v5047_v34  ;;  %v1970_v21 = vsel %vm683_vm3, %v5047_v34, 0.0 }
 0x2be   :  { %v1963_v41 = vadd.f32 %v1962_v22, %v1961_v40  ;;  %v2158_v16 = vadd.f32 %v2157_v38, %v2156_v60  ;;  %v5054_v44 = vpop.f32.mrf.mxu1 }
 0x2bf   :  { %v2088_v59 = vmul.f32 %v5054_v44, %v5054_v44  ;;  %v1966_v13 = vsel %vm683_vm3, %v5054_v44, 0.0  ;;  %v2167_v32 = vsel %vm683_vm3, %v2090_v62, 0.0 }
 0x2c0   :  { %v2160_v61 = vadd.f32 %v2159_v33, %v2158_v16  ;;  %v1965_v56 = vadd.f32 %v1964_v29, %v1963_v41  ;;  %v5061_v23 = vpop.f32.mrf.mxu1 }
 0x2c1   :  { %v2163_v5 = vsel %vm683_vm3, %v2088_v59, 0.0  ;;  %v2091_v8 = vmul.f32 %v5061_v23, %v5061_v23  ;;  %v1972_v4 = vsel %vm683_vm3, %v5061_v23, 0.0 }
 0x2c2   :  { %v1967_v50 = vadd.f32 %v1966_v13, %v1965_v56  ;;  %v2162_v47 = vadd.f32 %v2161_v57, %v2160_v61  ;;  %v5066_v27 = vpop.f32.mrf.mxu1 }
 0x2c3   :  { %v1968_v11 = vsel %vm683_vm3, %v5066_v27, 0.0  ;;  %v2089_v52 = vmul.f32 %v5066_v27, %v5066_v27  ;;  %v2169_v30 = vsel %vm683_vm3, %v2091_v8, 0.0 }
 0x2c4   :  { %v2164_v46 = vadd.f32 %v2163_v5, %v2162_v47  ;;  %v1969_v1 = vadd.f32 %v1968_v11, %v1967_v50  ;;  %v5075_v18 = vpop.f32.mrf.mxu1 }
 0x2c5   :  { %v2165_v20 = vsel %vm683_vm3, %v2089_v52, 0.0  ;;  %v2094_v2 = vmul.f32 %v5075_v18, %v5075_v18  ;;  %v1978_v12 = vsel %vm683_vm3, %v5075_v18, 0.0 }
 0x2c6   :  { %v1971_v7 = vadd.f32 %v1970_v21, %v1969_v1  ;;  %v2166_v45 = vadd.f32 %v2165_v20, %v2164_v46  ;;  %v5082_v42 = vpop.f32.mrf.mxu1 }
 0x2c7   :  { %v2092_v58 = vmul.f32 %v5082_v42, %v5082_v42  ;;  %v1974_v0 = vsel %vm683_vm3, %v5082_v42, 0.0  ;;  %v2175_v41 = vsel %vm683_vm3, %v2094_v2, 0.0 }
 0x2c8   :  { %v2168_v49 = vadd.f32 %v2167_v32, %v2166_v45  ;;  %v1973_v19 = vadd.f32 %v1972_v4, %v1971_v7  ;;  %v5089_v63 = vpop.f32.mrf.mxu1 }
 0x2c9   :  { %v2171_v53 = vsel %vm683_vm3, %v2092_v58, 0.0  ;;  %v2095_v60 = vmul.f32 %v5089_v63, %v5089_v63  ;;  %v1980_v16 = vsel %vm683_vm3, %v5089_v63, 0.0 }
 0x2ca   :  { %v1975_v17 = vadd.f32 %v1974_v0, %v1973_v19  ;;  %v2170_v24 = vadd.f32 %v2169_v30, %v2168_v49  ;;  %v5094_v48 = vpop.f32.mrf.mxu1 }
 0x2cb   :  { %v1976_v10 = vsel %vm683_vm3, %v5094_v48, 0.0  ;;  %v2093_v35 = vmul.f32 %v5094_v48, %v5094_v48  ;;  %v2177_v56 = vsel %vm683_vm3, %v2095_v60, 0.0 }
 0x2cc   :  { %v2172_v55 = vadd.f32 %v2171_v53, %v2170_v24  ;;  %v1977_v28 = vadd.f32 %v1976_v10, %v1975_v17  ;;  %v5103_v31 = vpop.f32.mrf.mxu1 }
 0x2cd   :  { %v2173_v40 = vsel %vm683_vm3, %v2093_v35, 0.0  ;;  %v2098_v62 = vmul.f32 %v5103_v31, %v5103_v31  ;;  %v1986_v8 = vsel %vm683_vm3, %v5103_v31, 0.0 }
 0x2ce   :  { %v1979_v22 = vadd.f32 %v1978_v12, %v1977_v28  ;;  %v2174_v43 = vadd.f32 %v2173_v40, %v2172_v55  ;;  %v5110_v38 = vpop.f32.mrf.mxu1 }
 0x2cf   :  { %v2096_v33 = vmul.f32 %v5110_v38, %v5110_v38  ;;  %v1982_v57 = vsel %vm683_vm3, %v5110_v38, 0.0  ;;  %v2183_v58 = vsel %vm683_vm3, %v2098_v62, 0.0 }
 0x2d0   :  { %v2176_v29 = vadd.f32 %v2175_v41, %v2174_v43  ;;  %v1981_v59 = vadd.f32 %v1980_v16, %v1979_v22  ;;  %v5117_v61 = vpop.f32.mrf.mxu1 }
 0x2d1   :  { %v2179_v5 = vsel %vm683_vm3, %v2096_v33, 0.0  ;;  %v2099_v20 = vmul.f32 %v5117_v61, %v5117_v61  ;;  %v1988_v49 = vsel %vm683_vm3, %v5117_v61, 0.0 }
 0x2d2   :  { %v1983_v13 = vadd.f32 %v1982_v57, %v1981_v59  ;;  %v2178_v50 = vadd.f32 %v2177_v56, %v2176_v29  ;;  %v5122_v47 = vpop.f32.mrf.mxu1 }
 0x2d3   :  { %v1984_v11 = vsel %vm683_vm3, %v5122_v47, 0.0  ;;  %v2097_v52 = vmul.f32 %v5122_v47, %v5122_v47  ;;  %v2185_v24 = vsel %vm683_vm3, %v2099_v20, 0.0 }
 0x2d4   :  { %v2180_v46 = vadd.f32 %v2179_v5, %v2178_v50  ;;  %v1985_v1 = vadd.f32 %v1984_v11, %v1983_v13  ;;  %v5131_v21 = vpop.f32.mrf.mxu1 }
 0x2d5   :  { %v2181_v7 = vsel %vm683_vm3, %v2097_v52, 0.0  ;;  %v2102_v55 = vmul.f32 %v5131_v21, %v5131_v21  ;;  %v1994_v41 = vsel %vm683_vm3, %v5131_v21, 0.0 }
 0x2d6   :  { %v1987_v45 = vadd.f32 %v1986_v8, %v1985_v1  ;;  %v2182_v32 = vadd.f32 %v2181_v7, %v2180_v46  ;;  %v5138_v4 = vpop.f32.mrf.mxu1 }
 0x2d7   :  { %v2100_v19 = vmul.f32 %v5138_v4, %v5138_v4  ;;  %v1990_v2 = vsel %vm683_vm3, %v5138_v4, 0.0  ;;  %v2191_v57 = vsel %vm683_vm3, %v2102_v55, 0.0 }
 0x2d8   :  { %v2184_v30 = vadd.f32 %v2183_v58, %v2182_v32  ;;  %v1989_v0 = vadd.f32 %v1988_v49, %v1987_v45  ;;  %v5145_v17 = vpop.f32.mrf.mxu1 }
 0x2d9   :  { %v2187_v28 = vsel %vm683_vm3, %v2100_v19, 0.0  ;;  %v2103_v16 = vmul.f32 %v5145_v17, %v5145_v17  ;;  %v1996_v13 = vsel %vm683_vm3, %v5145_v17, 0.0 }
 0x2da   :  { %v1991_v53 = vadd.f32 %v1990_v2, %v1989_v0  ;;  %v2186_v10 = vadd.f32 %v2185_v24, %v2184_v30  ;;  %v5150_v35 = vpop.f32.mrf.mxu1 }
 0x2db   :  { %v1992_v12 = vsel %vm683_vm3, %v5150_v35, 0.0  ;;  %v2101_v60 = vmul.f32 %v5150_v35, %v5150_v35  ;;  %v2193_v52 = vsel %vm683_vm3, %v2103_v16, 0.0 }
 0x2dc   :  { %v2188_v40 = vadd.f32 %v2187_v28, %v2186_v10  ;;  %v1993_v22 = vadd.f32 %v1992_v12, %v1991_v53  ;;  %v5159_v43 = vpop.f32.mrf.mxu1 }
 0x2dd   :  { %v2189_v33 = vsel %vm683_vm3, %v2101_v60, 0.0  ;;  %v2106_v7 = vmul.f32 %v5159_v43, %v5159_v43  ;;  %v2002_v0 = vsel %vm683_vm3, %v5159_v43, 0.0 }
 0x2de   :  { %v1995_v29 = vadd.f32 %v1994_v41, %v1993_v22  ;;  %v2190_v59 = vadd.f32 %v2189_v33, %v2188_v40  ;;  %v5166_v56 = vpop.f32.mrf.mxu1 }
 0x2df   :  { %v2104_v50 = vmul.f32 %v5166_v56, %v5166_v56  ;;  %v1998_v46 = vsel %vm683_vm3, %v5166_v56, 0.0  ;;  %v2199_v28 = vsel %vm683_vm3, %v2106_v7, 0.0 }
 0x2e0   :  { %v2192_v62 = vadd.f32 %v2191_v57, %v2190_v59  ;;  %v1997_v5 = vadd.f32 %v1996_v13, %v1995_v29  ;;  %v5173_v11 = vpop.f32.mrf.mxu1 }
 0x2e1   :  { %v2195_v45 = vsel %vm683_vm3, %v2104_v50, 0.0  ;;  %v2107_v24 = vmul.f32 %v5173_v11, %v5173_v11  ;;  %v2004_v12 = vsel %vm683_vm3, %v5173_v11, 0.0 }
 0x2e2   :  { %v1999_v1 = vadd.f32 %v1998_v46, %v1997_v5  ;;  %v2194_v8 = vadd.f32 %v2193_v52, %v2192_v62  ;;  %v5178_v20 = vpop.f32.mrf.mxu1 }
 0x2e3   :  { %v2000_v32 = vsel %vm683_vm3, %v5178_v20, 0.0  ;;  %v2105_v58 = vmul.f32 %v5178_v20, %v5178_v20  ;;  %v2201_v16 = vsel %vm683_vm3, %v2107_v24, 0.0 }
 0x2e4   :  { %v2196_v49 = vadd.f32 %v2195_v45, %v2194_v8  ;;  %v2001_v19 = vadd.f32 %v2000_v32, %v1999_v1  ;;  %v5187_v30 = vpop.f32.mrf.mxu1 }
 0x2e5   :  { %v2197_v2 = vsel %vm683_vm3, %v2105_v58, 0.0  ;;  %v2110_v13 = vmul.f32 %v5187_v30, %v5187_v30  ;;  %v2010_v8 = vsel %vm683_vm3, %v5187_v30, 0.0 }
 0x2e6   :  { %v2003_v53 = vadd.f32 %v2002_v0, %v2001_v19  ;;  %v2198_v10 = vadd.f32 %v2197_v2, %v2196_v49  ;;  %v5194_v55 = vpop.f32.mrf.mxu1 }
 0x2e7   :  { %v2108_v60 = vmul.f32 %v5194_v55, %v5194_v55  ;;  %v2006_v33 = vsel %vm683_vm3, %v5194_v55, 0.0  ;;  %v2207_v19 = vsel %vm683_vm3, %v2110_v13, 0.0 }
 0x2e8   :  { %v2200_v40 = vadd.f32 %v2199_v28, %v2198_v10  ;;  %v2005_v22 = vadd.f32 %v2004_v12, %v2003_v53  ;;  %v5201_v41 = vpop.f32.mrf.mxu1 }
 0x2e9   :  { %v2203_v50 = vsel %vm683_vm3, %v2108_v60, 0.0  ;;  %v2111_v7 = vmul.f32 %v5201_v41, %v5201_v41  ;;  %v2012_v0 = vsel %vm683_vm3, %v5201_v41, 0.0 }
 0x2ea   :  { %v2007_v29 = vadd.f32 %v2006_v33, %v2005_v22  ;;  %v2202_v59 = vadd.f32 %v2201_v16, %v2200_v40  ;;  %v5206_v57 = vpop.f32.mrf.mxu1 }
 0x2eb   :  { %v2008_v62 = vsel %vm683_vm3, %v5206_v57, 0.0  ;;  %v2109_v5 = vmul.f32 %v5206_v57, %v5206_v57  ;;  %v2209_v28 = vsel %vm683_vm3, %v2111_v7, 0.0 }
 0x2ec   :  { %v2204_v52 = vadd.f32 %v2203_v50, %v2202_v59  ;;  %v2009_v46 = vadd.f32 %v2008_v62, %v2007_v29  ;;  %v5215_v1 = vpop.f32.mrf.mxu1 }
 0x2ed   :  { %v2205_v45 = vsel %vm683_vm3, %v2109_v5, 0.0  ;;  %v2114_v16 = vmul.f32 %v5215_v1, %v5215_v1  ;;  %v2018_v5 = vsel %vm683_vm3, %v5215_v1, 0.0 }
 0x2ee   :  { %v2011_v32 = vadd.f32 %v2010_v8, %v2009_v46  ;;  %v2206_v58 = vadd.f32 %v2205_v45, %v2204_v52  ;;  %v5222_v49 = vpop.f32.mrf.mxu1 }
 0x2ef   :  { %v2112_v24 = vmul.f32 %v5222_v49, %v5222_v49  ;;  %v2014_v12 = vsel %vm683_vm3, %v5222_v49, 0.0 }
 0x2f0   :  { %v2208_v2 = vadd.f32 %v2207_v19, %v2206_v58  ;;  %v2013_v53 = vadd.f32 %v2012_v0, %v2011_v32  ;;  %v5229_v10 = vpop.f32.mrf.mxu1  ;;  %v2215_v32 = vsel %vm683_vm3, %v2114_v16, 0.0 }
 0x2f1   :  { %v2211_v33 = vsel %vm683_vm3, %v2112_v24, 0.0  ;;  %v2115_v52 = vmul.f32 %v5229_v10, %v5229_v10  ;;  %v2020_v58 = vsel %vm683_vm3, %v5229_v10, 0.0 }
 0x2f2   :  { %v2015_v60 = vadd.f32 %v2014_v12, %v2013_v53  ;;  %v2210_v40 = vadd.f32 %v2209_v28, %v2208_v2  ;;  %v5234_v22 = vpop.f32.mrf.mxu1 }
 0x2f3   :  { %v2016_v29 = vsel %vm683_vm3, %v5234_v22, 0.0  ;;  %v2113_v59 = vmul.f32 %v5234_v22, %v5234_v22  ;;  %v2217_v53 = vsel %vm683_vm3, %v2115_v52, 0.0 }
 0x2f4   :  { %v2212_v13 = vadd.f32 %v2211_v33, %v2210_v40  ;;  %v2017_v50 = vadd.f32 %v2016_v29, %v2015_v60  ;;  %v5243_v62 = vpop.f32.mrf.mxu1 }
 0x2f5   :  { %6668 = vst [vmem:[#allocation24_spill] sm:$0xff] %v5243_v62  ;;  %v2213_v46 = vsel %vm683_vm3, %v2113_v59, 0.0  ;;  %v2118_v16 = vmul.f32 %v5243_v62, %v5243_v62  ;;  %v2026_v52 = vsel %vm683_vm3, %v5243_v62, 0.0 }
 0x2f6   :  { %v2019_v8 = vadd.f32 %v2018_v5, %v2017_v50  ;;  %v2214_v7 = vadd.f32 %v2213_v46, %v2212_v13  ;;  %v5250_v45 = vpop.f32.mrf.mxu1 }
 0x2f7   :  { %6669 = vst [vmem:[#allocation27_spill] sm:$0xff] %v5250_v45  ;;  %v2116_v19 = vmul.f32 %v5250_v45, %v5250_v45  ;;  %v2022_v28 = vsel %vm683_vm3, %v5250_v45, 0.0 }
 0x2f8   :  { %v2216_v0 = vadd.f32 %v2215_v32, %v2214_v7  ;;  %v2021_v24 = vadd.f32 %v2020_v58, %v2019_v8  ;;  %v5257_v2 = vpop.f32.mrf.mxu1 }
 0x2f9   :  { %6670 = vst [vmem:[#allocation29_spill] sm:$0xff] %v5257_v2  ;;  %v2219_v33 = vsel %vm683_vm3, %v2116_v19, 0.0  ;;  %v2119_v46 = vmul.f32 %v5257_v2, %v5257_v2  ;;  %v2223_v19 = vsel %vm683_vm3, %v2118_v16, 0.0 }
 0x2fa   :  { %v2023_v12 = vadd.f32 %v2022_v28, %v2021_v24  ;;  %v2218_v60 = vadd.f32 %v2217_v53, %v2216_v0  ;;  %v5262_v40 = vpop.f32.mrf.mxu1  ;;  %v2028_v0 = vsel %vm683_vm3, %v5257_v2, 0.0 }
 0x2fb   :  { %6671 = vst [vmem:[#allocation26_spill] sm:$0xff] %v5262_v40  ;;  %v2024_v29 = vsel %vm683_vm3, %v5262_v40, 0.0  ;;  %v2117_v59 = vmul.f32 %v5262_v40, %v5262_v40 }
 0x2fc   :  { %v2220_v13 = vadd.f32 %v2219_v33, %v2218_v60  ;;  %v2025_v50 = vadd.f32 %v2024_v29, %v2023_v12  ;;  %v5271_v5 = vpop.f32.mrf.mxu1  ;;  %v2225_v60 = vsel %vm683_vm3, %v2119_v46, 0.0 }
 0x2fd   :  { %6672 = vst [vmem:[#allocation28_spill] sm:$0xff] %v5271_v5  ;;  %v2221_v8 = vsel %vm683_vm3, %v2117_v59, 0.0  ;;  %v2122_v16 = vmul.f32 %v5271_v5, %v5271_v5 }
 0x2fe   :  { %v2027_v7 = vadd.f32 %v2026_v52, %v2025_v50  ;;  %v2222_v32 = vadd.f32 %v2221_v8, %v2220_v13  ;;  %v5278_v58 = vpop.f32.mrf.mxu1 }
 0x2ff   :  { %6673 = vst [vmem:[#allocation30_spill] sm:$0xff] %v5278_v58  ;;  %v2120_v24 = vmul.f32 %v5278_v58, %v5278_v58  ;;  %v2030_v33 = vsel %vm683_vm3, %v5278_v58, 0.0 }
 0x300   :  { %v2224_v53 = vadd.f32 %v2223_v19, %v2222_v32  ;;  %v2029_v28 = vadd.f32 %v2028_v0, %v2027_v7  ;;  %v5285_v12 = vpop.f32.mrf.mxu1  ;;  %v2034_v19 = vsel %vm683_vm3, %v5271_v5, 0.0 }
 0x301   :  { %6674 = vst [vmem:[#allocation31_spill] sm:$0xff] %v5285_v12  ;;  %v2227_v50 = vsel %vm683_vm3, %v2120_v24, 0.0  ;;  %v2123_v0 = vmul.f32 %v5285_v12, %v5285_v12 }
 0x302   :  { %v2031_v29 = vadd.f32 %v2030_v33, %v2029_v28  ;;  %v2226_v59 = vadd.f32 %v2225_v60, %v2224_v53  ;;  %v5290_v13 = vpop.f32.mrf.mxu1  ;;  %v2231_v33 = vsel %vm683_vm3, %v2122_v16, 0.0 }
 0x303   :  { %6675 = vst [vmem:[#allocation38_spill] sm:$0xff] %v5290_v13  ;;  %v2032_v52 = vsel %vm683_vm3, %v5290_v13, 0.0  ;;  %v2121_v8 = vmul.f32 %v5290_v13, %v5290_v13  ;;  %v2233_v13 = vsel %vm683_vm3, %v2123_v0, 0.0 }
 0x304   :  { %v2228_v7 = vadd.f32 %v2227_v50, %v2226_v59  ;;  %v2033_v46 = vadd.f32 %v2032_v52, %v2031_v29  ;;  %v5299_v32 = vpop.f32.mrf.mxu1  ;;  %v2036_v59 = vsel %vm683_vm3, %v5285_v12, 0.0 }
 0x305   :  { %6676 = vst [vmem:[#allocation39_spill] sm:$0xff] %v5299_v32  ;;  %v2229_v53 = vsel %vm683_vm3, %v2121_v8, 0.0  ;;  %v2126_v16 = vmul.f32 %v5299_v32, %v5299_v32 }
 0x306   :  { %v2035_v28 = vadd.f32 %v2034_v19, %v2033_v46  ;;  %v2230_v24 = vadd.f32 %v2229_v53, %v2228_v7  ;;  %v5306_v60 = vpop.f32.mrf.mxu1 }
 0x307   :  { %6677 = vst [vmem:[#allocation40_spill] sm:$0xff] %v5306_v60  ;;  %v2124_v29 = vmul.f32 %v5306_v60, %v5306_v60  ;;  %v2038_v8 = vsel %vm683_vm3, %v5306_v60, 0.0  ;;  %v2239_v12 = vsel %vm683_vm3, %v2126_v16, 0.0 }
 0x308   :  { %v2232_v50 = vadd.f32 %v2231_v33, %v2230_v24  ;;  %v2037_v52 = vadd.f32 %v2036_v59, %v2035_v28  ;;  %v5313_v5 = vpop.f32.mrf.mxu1 }
 0x309   :  { %6678 = vst [vmem:[#allocation41_spill] sm:$0xff] %v5313_v5  ;;  %v2235_v53 = vsel %vm683_vm3, %v2124_v29, 0.0 }
 0x30a   :  { %v2039_v7 = vadd.f32 %v2038_v8, %v2037_v52  ;;  %v2234_v46 = vadd.f32 %v2233_v13, %v2232_v50  ;;  %v5318_v19 = vpop.f32.mrf.mxu1  ;;  %v2042_v13 = vsel %vm683_vm3, %v5299_v32, 0.0  ;;  %v2127_v50 = vmul.f32 %v5313_v5, %v5313_v5 }
 0x30b   :  { %6679 = vst [vmem:[#allocation42_spill] sm:$0xff] %v5318_v19  ;;  %v2040_v24 = vsel %vm683_vm3, %v5318_v19, 0.0  ;;  %v2125_v28 = vmul.f32 %v5318_v19, %v5318_v19 }
 0x30c   :  { %v2236_v33 = vadd.f32 %v2235_v53, %v2234_v46  ;;  %v2041_v0 = vadd.f32 %v2040_v24, %v2039_v7  ;;  %v5327_v59 = vpop.f32.mrf.mxu1  ;;  %v2044_v46 = vsel %vm683_vm3, %v5313_v5, 0.0  ;;  %v2241_v19 = vsel %vm683_vm3, %v2127_v50, 0.0 }
 0x30d   :  { %6680 = vst [vmem:[#allocation43_spill] sm:$0xff] %v5327_v59  ;;  %v2237_v52 = vsel %vm683_vm3, %v2125_v28, 0.0  ;;  %v2130_v16 = vmul.f32 %v5327_v59, %v5327_v59 }
 0x30e   :  { %v2043_v8 = vadd.f32 %v2042_v13, %v2041_v0  ;;  %v2238_v29 = vadd.f32 %v2237_v52, %v2236_v33  ;;  %v5334_v60 = vpop.f32.mrf.mxu1 }
 0x30f   :  { %6681 = vst [vmem:[#allocation10_spill] sm:$0xff] %v5334_v60  ;;  %v2128_v7 = vmul.f32 %v5334_v60, %v5334_v60  ;;  %v2046_v28 = vsel %vm683_vm3, %v5334_v60, 0.0  ;;  %v2247_v5 = vsel %vm683_vm3, %v2130_v16, 0.0 }
 0x310   :  { %v2240_v53 = vadd.f32 %v2239_v12, %v2238_v29  ;;  %v2045_v24 = vadd.f32 %v2044_v46, %v2043_v8  ;;  %v5341_v32 = vpop.f32.mrf.mxu1 }
 0x311   :  { %6682 = vst [vmem:[#allocation12_spill] sm:$0xff] %v5341_v32  ;;  %v2243_v52 = vsel %vm683_vm3, %v2128_v7, 0.0 }
 0x312   :  { %v2047_v33 = vadd.f32 %v2046_v28, %v2045_v24  ;;  %v2242_v0 = vadd.f32 %v2241_v19, %v2240_v53  ;;  %v5346_v13 = vpop.f32.mrf.mxu1  ;;  %v2050_v19 = vsel %vm683_vm3, %v5327_v59, 0.0  ;;  %v2131_v53 = vmul.f32 %v5341_v32, %v5341_v32 }
 0x313   :  { %6683 = vst [vmem:[#allocation23_spill] sm:$0xff] %v5346_v13  ;;  %v2048_v12 = vsel %vm683_vm3, %v5346_v13, 0.0  ;;  %v2129_v8 = vmul.f32 %v5346_v13, %v5346_v13 }
 0x314   :  { %v2244_v29 = vadd.f32 %v2243_v52, %v2242_v0  ;;  %v2049_v50 = vadd.f32 %v2048_v12, %v2047_v33  ;;  %v5355_v46 = vpop.f32.mrf.mxu1  ;;  %v2052_v0 = vsel %vm683_vm3, %v5341_v32, 0.0  ;;  %v2249_v13 = vsel %vm683_vm3, %v2131_v53, 0.0 }
 0x315   :  { %6684 = vst [vmem:[#allocation25_spill] sm:$0xff] %v5355_v46  ;;  %v2245_v24 = vsel %vm683_vm3, %v2129_v8, 0.0  ;;  %v2134_v16 = vmul.f32 %v5355_v46, %v5355_v46 }
 0x316   :  { %v2051_v28 = vadd.f32 %v2050_v19, %v2049_v50  ;;  %v2246_v7 = vadd.f32 %v2245_v24, %v2244_v29  ;;  %v5362_v60 = vpop.f32.mrf.mxu1 }
 0x317   :  { %6685 = vst [vmem:[#allocation22_spill] sm:$0xff] %v5362_v60  ;;  %v2132_v33 = vmul.f32 %v5362_v60, %v5362_v60  ;;  %v2054_v8 = vsel %vm683_vm3, %v5362_v60, 0.0  ;;  %v2255_v32 = vsel %vm683_vm3, %v2134_v16, 0.0 }
 0x318   :  { %v2248_v52 = vadd.f32 %v2247_v5, %v2246_v7  ;;  %v2053_v12 = vadd.f32 %v2052_v0, %v2051_v28  ;;  %v5369_v59 = vpop.f32.mrf.mxu1 }
 0x319   :  { %6686 = vst [vmem:[#allocation33_spill] sm:$0xff] %v5369_v59  ;;  %v2251_v24 = vsel %vm683_vm3, %v2132_v33, 0.0 }
 0x31a   :  { %v2055_v29 = vadd.f32 %v2054_v8, %v2053_v12  ;;  %v2250_v50 = vadd.f32 %v2249_v13, %v2248_v52  ;;  %v5374_v19 = vpop.f32.mrf.mxu1  ;;  %v2058_v13 = vsel %vm683_vm3, %v5355_v46, 0.0  ;;  %v2135_v52 = vmul.f32 %v5369_v59, %v5369_v59 }
 0x31b   :  { %6687 = vst [vmem:[#allocation35_spill] sm:$0xff] %v5374_v19  ;;  %v2056_v5 = vsel %vm683_vm3, %v5374_v19, 0.0  ;;  %v2133_v28 = vmul.f32 %v5374_v19, %v5374_v19 }
 0x31c   :  { %v2252_v7 = vadd.f32 %v2251_v24, %v2250_v50  ;;  %v2057_v53 = vadd.f32 %v2056_v5, %v2055_v29  ;;  %v5383_v0 = vpop.f32.mrf.mxu1  ;;  %v2060_v50 = vsel %vm683_vm3, %v5369_v59, 0.0  ;;  %v2257_v19 = vsel %vm683_vm3, %v2135_v52, 0.0 }
 0x31d   :  { %6688 = vst [vmem:[#allocation34_spill] sm:$0xff] %v5383_v0  ;;  %v2253_v12 = vsel %vm683_vm3, %v2133_v28, 0.0  ;;  %v2138_v16 = vmul.f32 %v5383_v0, %v5383_v0 }
 0x31e   :  { %v2059_v8 = vadd.f32 %v2058_v13, %v2057_v53  ;;  %v2254_v33 = vadd.f32 %v2253_v12, %v2252_v7  ;;  %v5390_v60 = vpop.f32.mrf.mxu1 }
 0x31f   :  { %6689 = vst [vmem:[#allocation8_spill] sm:$0xff] %v5390_v60  ;;  %v2136_v29 = vmul.f32 %v5390_v60, %v5390_v60  ;;  %v2062_v28 = vsel %vm683_vm3, %v5390_v60, 0.0 }
 0x320   :  { %v2256_v24 = vadd.f32 %v2255_v32, %v2254_v33  ;;  %v2061_v5 = vadd.f32 %v2060_v50, %v2059_v8  ;;  %v5397_v46 = vpop.f32.mrf.mxu1  ;;  %v2066_v50 = vsel %vm683_vm3, %v5383_v0, 0.0 }
 0x321   :  { %6690 = vst [vmem:[#allocation9_spill] sm:$0xff] %v5397_v46  ;;  %v2259_v12 = vsel %vm683_vm3, %v2136_v29, 0.0  ;;  %v2263_v29 = vsel %vm683_vm3, %v2138_v16, 0.0  ;;  %v2068_v60 = vsel %vm683_vm3, %v5397_v46, 0.0 }
 0x322   :  { %v2063_v7 = vadd.f32 %v2062_v28, %v2061_v5  ;;  %v2258_v53 = vadd.f32 %v2257_v19, %v2256_v24  ;;  %v5402_v13 = vpop.f32.mrf.mxu1  ;;  %v2139_v19 = vmul.f32 %v5397_v46, %v5397_v46 }
 0x323   :  { %6691 = vst [vmem:[#allocation11_spill] sm:$0xff] %v5402_v13  ;;  %v2064_v32 = vsel %vm683_vm3, %v5402_v13, 0.0  ;;  %v2137_v8 = vmul.f32 %v5402_v13, %v5402_v13 }
 0x324   :  { %v2260_v33 = vadd.f32 %v2259_v12, %v2258_v53  ;;  %v2065_v52 = vadd.f32 %v2064_v32, %v2063_v7  ;;  %v2265_v53 = vsel %vm683_vm3, %v2139_v19, 0.0 }
 0x325   :  { %v2261_v24 = vsel %vm683_vm3, %v2137_v8, 0.0 }
 0x326   :  { %v2067_v5 = vadd.f32 %v2066_v50, %v2065_v52  ;;  %v2262_v28 = vadd.f32 %v2261_v24, %v2260_v33 }
 0x328   :  { %v2069_v59 = vadd.f32 %v2068_v60, %v2067_v5  ;;  %v2264_v58 = vadd.f32 %v2263_v29, %v2262_v28 }
 0x32a   :  { %v2070_v7 = vrot.slane %v2069_v59, 4  ;;  %v2266_v12 = vadd.f32 %v2265_v53, %v2264_v58  ;;  %v1941_v58 = vld [vmem:[%s6467_s5] sm:$0x1] }
 0x32c   :  { %v2071_v32 = vadd.f32 %v2070_v7, %v2069_v59  ;;  %v2267_v0 = vrot.slane %v2266_v12, 4  ;;  %v6693_v7 = vld [vmem:[#allocation27_spill] sm:$0xff] }
 0x32e   :  { %v2072_v13 = vrot.slane %v2071_v32, 2  ;;  %v2268_v2 = vadd.f32 %v2267_v0, %v2266_v12  ;;  %v5426_v0 = vld [vmem:[%s6468_s6] sm:$0x1] }
 0x32f   :  { %v6694_v12 = vld [vmem:[#allocation26_spill] sm:$0xff] }
 0x330   :  { %v2073_v62 = vadd.f32 %v2072_v13, %v2071_v32  ;;  %v2269_v40 = vrot.slane %v2268_v2, 2  ;;  %v6695_v32 = vld [vmem:[#allocation24_spill] sm:$0xff] }
 0x332   :  { %v2074_v8 = vrot.slane %v2073_v62, 1  ;;  %v2270_v52 = vadd.f32 %v2269_v40, %v2268_v2  ;;  %v6692_v2 = vld [vmem:[#allocation32_spill] sm:$0xff] }
 0x334   :  { %v2075_v33 = vadd.f32 %v2074_v8, %v2073_v62  ;;  %v2271_v50 = vrot.slane %v2270_v52, 1  ;;  %v6696_v8 = vld [vmem:[#allocation29_spill] sm:$0xff] }
 0x336   :  { %v2272_v16 = vadd.f32 %v2271_v50, %v2270_v52  ;;  %v2273_v24 = vmul.f32 0.001953125, %v2075_v33  ;;  %v6697_v52 = vld [vmem:[#allocation30_spill] sm:$0xff] }
 0x337   :  { %v6698_v33 = vld [vmem:[#allocation38_spill] sm:$0xff] }
 0x338   :  { %v2274_v45 = vmul.f32 0.001953125, %v2272_v16  ;;  %v2275_v46 = vmul.f32 %v2273_v24, %v2273_v24  ;;  %v6699_v16 = vld [vmem:[#allocation28_spill] sm:$0xff] }
 0x33a   :  { %v2276_v60 = vsub.f32 %v2274_v45, %v2275_v46 }
 0x33c   :  { %v2277_v5 = vadd.f32 1e-05, %v2276_v60  ;;  %v6700_v60 = vld [vmem:[#allocation31_spill] sm:$0xff] }
 0x33e   :  { %3409 = vrsqrt.f32 %v2277_v5 }
 0x34b   :  { %v3410_v59 = vpop.eup %3409 }
 0x34c   :  { %v2279_v19 = vmul.f32 %v3410_v59, %v1941_v58  ;;  %v6701_v58 = vld [vmem:[#allocation40_spill] sm:$0xff] }
 0x34e   :  { %v5428_v62 = vmul.f32 %v2279_v19, %v2273_v24  ;;  %v5431_v40 = vrot.slane %v2279_v19, %v6692_v2  ;;  %v6702_v19 = vld [vmem:[#allocation42_spill] sm:$0xff] }
 0x350   :  { %v2281_v45 = vsub.f32 %v5426_v0, %v5428_v62  ;;  %v5437_v46 = vmul.f32 %v5431_v40, %v4974_v39  ;;  %v5441_v13 = vmul.f32 %v5431_v40, %v4980_v15  ;;  %v5445_v28 = vmul.f32 %v4972_v37, %v5431_v40  ;;  %v6703_v62 = vld [vmem:[#allocation39_spill] sm:$0xff] }
 0x351   :  { %v5449_v29 = vmul.f32 %v4976_v51, %v5431_v40  ;;  %v5453_v53 = vmul.f32 %v5431_v40, %v4998_v14  ;;  %v5457_v39 = vmul.f32 %v5431_v40, %v5010_v25  ;;  %v5461_v15 = vmul.f32 %v4990_v26, %v5431_v40 }
 0x352   :  { %v5465_v37 = vmul.f32 %v5005_v36, %v5431_v40  ;;  %v5469_v51 = vmul.f32 %v5431_v40, %v5026_v54  ;;  %v5473_v14 = vmul.f32 %v5431_v40, %v5038_v9  ;;  %v5477_v25 = vmul.f32 %v5019_v6, %v5431_v40 }
 0x353   :  { %v5481_v26 = vmul.f32 %v5033_v3, %v5431_v40  ;;  %v5485_v36 = vmul.f32 %v5431_v40, %v5054_v44  ;;  %v5489_v54 = vmul.f32 %v5431_v40, %v5066_v27  ;;  %v5493_v9 = vmul.f32 %v5047_v34, %v5431_v40 }
 0x354   :  { %v5497_v6 = vmul.f32 %v5061_v23, %v5431_v40  ;;  %v5501_v3 = vmul.f32 %v5431_v40, %v5082_v42  ;;  %v5505_v44 = vmul.f32 %v5431_v40, %v5094_v48  ;;  %v5509_v27 = vmul.f32 %v5075_v18, %v5431_v40 }
 0x355   :  { %v5513_v34 = vmul.f32 %v5089_v63, %v5431_v40  ;;  %v5517_v23 = vmul.f32 %v5431_v40, %v5110_v38  ;;  %v5521_v42 = vmul.f32 %v5431_v40, %v5122_v47  ;;  %v5525_v48 = vmul.f32 %v5103_v31, %v5431_v40 }
 0x356   :  { %v5529_v18 = vmul.f32 %v5117_v61, %v5431_v40  ;;  %v5533_v63 = vmul.f32 %v5431_v40, %v5138_v4  ;;  %v5537_v38 = vmul.f32 %v5431_v40, %v5150_v35  ;;  %v5541_v47 = vmul.f32 %v5131_v21, %v5431_v40 }
 0x357   :  { %v5545_v31 = vmul.f32 %v5145_v17, %v5431_v40  ;;  %v5549_v61 = vmul.f32 %v5431_v40, %v5166_v56  ;;  %v5553_v4 = vmul.f32 %v5431_v40, %v5178_v20  ;;  %v5557_v35 = vmul.f32 %v5159_v43, %v5431_v40 }
 0x358   :  { %v5561_v21 = vmul.f32 %v5173_v11, %v5431_v40  ;;  %v5565_v17 = vmul.f32 %v5431_v40, %v5194_v55  ;;  %v5569_v56 = vmul.f32 %v5431_v40, %v5206_v57  ;;  %v5573_v20 = vmul.f32 %v5187_v30, %v5431_v40 }
 0x359   :  { %v5577_v43 = vmul.f32 %v5201_v41, %v5431_v40  ;;  %v5581_v11 = vmul.f32 %v5431_v40, %v5222_v49  ;;  %v5585_v55 = vmul.f32 %v5431_v40, %v5234_v22  ;;  %v5589_v57 = vmul.f32 %v5215_v1, %v5431_v40 }
 0x35a   :  { %v5593_v30 = vmul.f32 %v5229_v10, %v5431_v40  ;;  %v5597_v41 = vmul.f32 %v5431_v40, %v6693_v7  ;;  %v5601_v49 = vmul.f32 %v5431_v40, %v6694_v12  ;;  %v5605_v22 = vmul.f32 %v6695_v32, %v5431_v40  ;;  %v6705_v12 = vld [vmem:[#allocation41_spill] sm:$0xff] }
 0x35b   :  { %v5609_v1 = vmul.f32 %v6696_v8, %v5431_v40  ;;  %v5613_v10 = vmul.f32 %v5431_v40, %v6697_v52  ;;  %v5617_v50 = vmul.f32 %v5431_v40, %v6698_v33  ;;  %v5621_v24 = vmul.f32 %v6699_v16, %v5431_v40  ;;  %v6707_v8 = vld [vmem:[#allocation10_spill] sm:$0xff]  ;;  %v6709_v33 = vld [vmem:[#allocation23_spill] sm:$0xff] }
 0x35c   :  { %v5625_v5 = vmul.f32 %v6700_v60, %v5431_v40  ;;  %v5629_v59 = vmul.f32 %v5431_v40, %v6701_v58  ;;  %v5633_v0 = vmul.f32 %v5431_v40, %v6702_v19  ;;  %v5637_v7 = vmul.f32 %v6703_v62, %v5431_v40  ;;  %v6711_v60 = vld [vmem:[#allocation43_spill] sm:$0xff]  ;;  %v6713_v19 = vld [vmem:[#allocation12_spill] sm:$0xff] }
 0x35d   :  { %v5641_v32 = vmul.f32 %v6705_v12, %v5431_v40  ;;  %v5645_v52 = vmul.f32 %v5431_v40, %v6707_v8  ;;  %v5649_v16 = vmul.f32 %v5431_v40, %v6709_v33  ;;  %v5653_v58 = vmul.f32 %v6711_v60, %v5431_v40 }
 0x35e   :  { %6704 = vst [vmem:[#allocation13_spill] sm:$0xff] %v5637_v7  ;;  %v5657_v62 = vmul.f32 %v6713_v19, %v5431_v40  ;;  %v6715_v7 = vld [vmem:[#allocation22_spill] sm:$0xff]  ;;  %v6722_v19 = vld [vmem:[#allocation8_spill] sm:$0xff] }
 0x35f   :  { %6706 = vst [vmem:[#allocation15_spill] sm:$0xff] %v5641_v32  ;;  %6708 = vst [vmem:[#allocation17_spill] sm:$0xff] %v5645_v52  ;;  %v5661_v12 = vmul.f32 %v5431_v40, %v6715_v7  ;;  %v6717_v32 = vld [vmem:[#allocation35_spill] sm:$0xff]  ;;  %v6719_v52 = vld [vmem:[#allocation25_spill] sm:$0xff] }
 0x360   :  { %6710 = vst [vmem:[#allocation14_spill] sm:$0xff] %v5649_v16  ;;  %6712 = vst [vmem:[#allocation16_spill] sm:$0xff] %v5653_v58  ;;  %v5665_v8 = vmul.f32 %v5431_v40, %v6717_v32  ;;  %v5669_v33 = vmul.f32 %v6719_v52, %v5431_v40  ;;  %v6721_v16 = vld [vmem:[#allocation33_spill] sm:$0xff]  ;;  %v5676_v58 = vrot.slane %v2281_v45, %v6692_v2  ;;  %v6723_v7 = vld [vmem:[#allocation11_spill] sm:$0xff] }
 0x361   :  { %6714 = vst [vmem:[#allocation19_spill] sm:$0xff] %v5657_v62  ;;  %6716 = vst [vmem:[#allocation21_spill] sm:$0xff] %v5661_v12  ;;  %v5673_v60 = vmul.f32 %v6721_v16, %v5431_v40  ;;  %v5680_v62 = vmul.f32 %v5431_v40, %v6722_v19  ;;  %v5684_v12 = vmul.f32 %v5431_v40, %v6723_v7  ;;  %v6724_v32 = vld [vmem:[#allocation34_spill] sm:$0xff]  ;;  %v6725_v52 = vld [vmem:[#allocation9_spill] sm:$0xff] }
 0x362   :  { %6718 = vst [vmem:[#allocation18_spill] sm:$0xff] %v5665_v8  ;;  %6720 = vst [vmem:[#allocation20_spill] sm:$0xff] %v5669_v33  ;;  %v5688_v8 = vmul.f32 %v6724_v32, %v5431_v40  ;;  %v5692_v33 = vmul.f32 %v6725_v52, %v5431_v40  ;;  %v5696_v2 = vadd.f32 %v5676_v58, %v5437_v46 }
 0x363   :  { %v5700_v45 = vadd.f32 %v5676_v58, %v5441_v13  ;;  %v5704_v16 = vadd.f32 %v5676_v58, %v5445_v28  ;;  %v5708_v19 = vadd.f32 %v5676_v58, %v5449_v29  ;;  %v5712_v40 = vadd.f32 %v5676_v58, %v5453_v53 }
 0x364   :  { %v5716_v46 = vadd.f32 %v5676_v58, %v5457_v39  ;;  %v5720_v13 = vadd.f32 %v5676_v58, %v5461_v15  ;;  %v5724_v28 = vadd.f32 %v5676_v58, %v5465_v37  ;;  %v5728_v29 = vadd.f32 %v5676_v58, %v5469_v51 }
 0x365   :  { %v5732_v53 = vadd.f32 %v5676_v58, %v5473_v14  ;;  %v5736_v39 = vadd.f32 %v5676_v58, %v5477_v25  ;;  %v5740_v15 = vadd.f32 %v5676_v58, %v5481_v26  ;;  %v5744_v37 = vadd.f32 %v5676_v58, %v5485_v36  ;;  %v6734_v7 = vld [vmem:[#allocation13_spill] sm:$0xff] }
 0x366   :  { %v5748_v51 = vadd.f32 %v5676_v58, %v5489_v54  ;;  %v5752_v14 = vadd.f32 %v5676_v58, %v5493_v9  ;;  %v5756_v25 = vadd.f32 %v5676_v58, %v5497_v6  ;;  %v5760_v26 = vadd.f32 %v5676_v58, %v5501_v3  ;;  %v6736_v32 = vld [vmem:[#allocation15_spill] sm:$0xff]  ;;  %v6738_v52 = vld [vmem:[#allocation17_spill] sm:$0xff] }
 0x367   :  { %v5764_v36 = vadd.f32 %v5676_v58, %v5505_v44  ;;  %v5768_v54 = vadd.f32 %v5676_v58, %v5509_v27  ;;  %v5772_v9 = vadd.f32 %v5676_v58, %v5513_v34  ;;  %v5776_v6 = vadd.f32 %v5676_v58, %v5517_v23 }
 0x368   :  { %v5780_v3 = vadd.f32 %v5676_v58, %v5521_v42  ;;  %v5784_v44 = vadd.f32 %v5676_v58, %v5525_v48  ;;  %v5788_v27 = vadd.f32 %v5676_v58, %v5529_v18  ;;  %v5792_v34 = vadd.f32 %v5676_v58, %v5533_v63 }
 0x369   :  { %v5796_v23 = vadd.f32 %v5676_v58, %v5537_v38  ;;  %v5800_v42 = vadd.f32 %v5676_v58, %v5541_v47  ;;  %v5804_v48 = vadd.f32 %v5676_v58, %v5545_v31  ;;  %v5808_v18 = vadd.f32 %v5676_v58, %v5549_v61 }
 0x36a   :  { %v5812_v63 = vadd.f32 %v5676_v58, %v5553_v4  ;;  %v5816_v38 = vadd.f32 %v5676_v58, %v5557_v35  ;;  %v5820_v47 = vadd.f32 %v5676_v58, %v5561_v21  ;;  %v5824_v31 = vadd.f32 %v5676_v58, %v5565_v17 }
 0x36b   :  { %v5828_v61 = vadd.f32 %v5676_v58, %v5569_v56  ;;  %v5832_v4 = vadd.f32 %v5676_v58, %v5573_v20  ;;  %v5836_v35 = vadd.f32 %v5676_v58, %v5577_v43  ;;  %v5840_v21 = vadd.f32 %v5676_v58, %v5581_v11 }
 0x36c   :  { %v5844_v17 = vadd.f32 %v5676_v58, %v5585_v55  ;;  %v5848_v56 = vadd.f32 %v5676_v58, %v5589_v57  ;;  %v5852_v20 = vadd.f32 %v5676_v58, %v5593_v30  ;;  %v5856_v43 = vadd.f32 %v5676_v58, %v5597_v41 }
 0x36d   :  { %v5860_v11 = vadd.f32 %v5676_v58, %v5601_v49  ;;  %v5864_v55 = vadd.f32 %v5676_v58, %v5605_v22  ;;  %v5868_v57 = vadd.f32 %v5676_v58, %v5609_v1  ;;  %v5872_v30 = vadd.f32 %v5676_v58, %v5613_v10 }
 0x36e   :  { %6726 = vst [vmem:[#allocation37_spill] sm:$0xff] %v5844_v17  ;;  %6727 = vst [vmem:[#allocation36_spill] sm:$0xff] %v5848_v56  ;;  %v5876_v41 = vadd.f32 %v5676_v58, %v5617_v50  ;;  %v5880_v49 = vadd.f32 %v5676_v58, %v5621_v24  ;;  %v5884_v22 = vadd.f32 %v5676_v58, %v5625_v5 }
 0x36f   :  { %6728 = vst [vmem:[#allocation32_spill] sm:$0xff] %v5852_v20  ;;  %6729 = vst [vmem:[#allocation27_spill] sm:$0xff] %v5856_v43  ;;  %v5888_v1 = vadd.f32 %v5676_v58, %v5629_v59  ;;  %v5892_v10 = vadd.f32 %v5676_v58, %v5633_v0  ;;  %v5896_v50 = vadd.f32 %v5676_v58, %v6734_v7 }
 0x370   :  { %6730 = vst [vmem:[#allocation26_spill] sm:$0xff] %v5860_v11  ;;  %6731 = vst [vmem:[#allocation24_spill] sm:$0xff] %v5884_v22  ;;  %v5900_v24 = vadd.f32 %v5676_v58, %v6736_v32  ;;  %v5904_v5 = vadd.f32 %v5676_v58, %v6738_v52  ;;  %v6740_v22 = vld [vmem:[#allocation14_spill] sm:$0xff] }
 0x371   :  { %6732 = vst [vmem:[#allocation29_spill] sm:$0xff] %v5888_v1  ;;  %6733 = vst [vmem:[#allocation30_spill] sm:$0xff] %v5892_v10  ;;  %v5908_v59 = vadd.f32 %v5676_v58, %v6740_v22  ;;  %v6741_v1 = vld [vmem:[#allocation16_spill] sm:$0xff]  ;;  %v6742_v10 = vld [vmem:[#allocation19_spill] sm:$0xff] }
 0x372   :  { %6735 = vst [vmem:[#allocation38_spill] sm:$0xff] %v5896_v50  ;;  %6737 = vst [vmem:[#allocation28_spill] sm:$0xff] %v5900_v24  ;;  %v5912_v0 = vadd.f32 %v5676_v58, %v6741_v1  ;;  %v5916_v7 = vadd.f32 %v5676_v58, %v6742_v10  ;;  %v6743_v50 = vld [vmem:[#allocation21_spill] sm:$0xff]  ;;  %v6744_v24 = vld [vmem:[#allocation18_spill] sm:$0xff]  ;;  %v5932_v1 = vadd.f32 %v5676_v58, %v5673_v60 }
 0x373   :  { %6739 = vst [vmem:[#allocation31_spill] sm:$0xff] %v5904_v5  ;;  %v5920_v32 = vadd.f32 %v5676_v58, %v6743_v50  ;;  %v5924_v52 = vadd.f32 %v5676_v58, %v6744_v24  ;;  %v6745_v5 = vld [vmem:[#allocation20_spill] sm:$0xff]  ;;  %v5936_v10 = vadd.f32 %v5676_v58, %v5680_v62  ;;  %v5940_v50 = vadd.f32 %v5676_v58, %v5684_v12 }
 0x374   :  { %v5928_v22 = vadd.f32 %v5676_v58, %v6745_v5  ;;  %6747 = vst [vmem:[#allocation42_spill] sm:$0xff] %v5932_v1  ;;  %v5944_v24 = vadd.f32 %v5676_v58, %v5688_v8  ;;  %v5948_v5 = vadd.f32 %v5676_v58, %v5692_v33  ;;  %v6758_v17 = vmov %v5932_v1 }
 0x375   :  { %6748 = vst [vmem:[#allocation39_spill] sm:$0xff] %v5936_v10  ;;  %6749 = vst [vmem:[#allocation41_spill] sm:$0xff] %v5940_v50  ;;  %v6759_v56 = vmov %v5936_v10  ;;  %v6760_v20 = vmov %v5940_v50  ;;  %v6762_v10 = vmax.f32 %v5696_v2, 0.0  ;;  %v6763_v50 = vmax.f32 %v5700_v45, 0.0 }
 0x376   :  { %6746 = vst [vmem:[#allocation40_spill] sm:$0xff] %v5928_v22  ;;  %6750 = vst [vmem:[#allocation10_spill] sm:$0xff] %v5944_v24  ;;  %v6761_v43 = vmov %v5944_v24  ;;  %v6764_v24 = vmax.f32 %v5704_v16, 0.0  ;;  %v6765_v33 = vmax.f32 %v5708_v19, 0.0  ;;  %v6766_v1 = vmax.f32 %v5712_v40, 0.0 }
 0x377   :  { %v3106_v12 = vpack.c.bf16 %v6762_v10, %v6762_v10  ;;  %v3107_v8 = vpack.c.bf16 %v6763_v50, %v6763_v50  ;;  %v6767_v2 = vmax.f32 %v5716_v46, 0.0  ;;  %v6768_v45 = vmax.f32 %v5720_v13, 0.0 }
 0x378   :  { %v3108_v58 = vpack.c.bf16 %v6764_v24, %v6764_v24  ;;  %v3109_v60 = vpack.c.bf16 %v6765_v33, %v6765_v33  ;;  %v3110_v62 = vpack.c.bf16 %v6766_v1, %v6766_v1  ;;  %v6769_v16 = vmax.f32 %v5724_v28, 0.0 }
 0x379   :  { %v3111_v10 = vpack.c.bf16 %v6767_v2, %v6767_v2  ;;  %v3112_v50 = vpack.c.bf16 %v6768_v45, %v6768_v45  ;;  %v6770_v19 = vmax.f32 %v5728_v29, 0.0  ;;  %v6771_v40 = vmax.f32 %v5732_v53, 0.0  ;;  %2742 = vst.msk [vmem:[%s6470_s8] sm:$0xf] %vm1483_vm4, %v3106_v12  ;;  %2743 = vst.msk [vmem:[%s6470_s8 + $0x4] sm:$0xf] %vm1483_vm4, %v3107_v8 }
 0x37a   :  { %v6756_v11 = vld [vmem:[#allocation31_spill] sm:$0xff]  ;;  %v3113_v24 = vpack.c.bf16 %v6769_v16, %v6769_v16  ;;  %v6772_v46 = vmax.f32 %v5736_v39, 0.0  ;;  %v6773_v13 = vmax.f32 %v5740_v15, 0.0  ;;  %2744 = vst.msk [vmem:[%s6470_s8 + $0x8] sm:$0xf] %vm1483_vm4, %v3108_v58  ;;  %v6774_v28 = vmax.f32 %v5744_v37, 0.0 }
 0x37b   :  { %v3114_v33 = vpack.c.bf16 %v6770_v19, %v6770_v19  ;;  %v3115_v1 = vpack.c.bf16 %v6771_v40, %v6771_v40  ;;  %2745 = vst.msk [vmem:[%s6470_s8 + $0xc] sm:$0xf] %vm1483_vm4, %v3109_v60  ;;  %v6775_v53 = vmax.f32 %v5748_v51, 0.0  ;;  %v6776_v15 = vmax.f32 %v5752_v14, 0.0  ;;  %2746 = vst.msk [vmem:[%s6470_s8 + $0x10] sm:$0xf] %vm1483_vm4, %v3110_v62 }
 0x37c   :  { %v3116_v2 = vpack.c.bf16 %v6772_v46, %v6772_v46  ;;  %v3117_v45 = vpack.c.bf16 %v6773_v13, %v6773_v13  ;;  %v3118_v29 = vpack.c.bf16 %v6774_v28, %v6774_v28  ;;  %v6777_v8 = vmax.f32 %v5756_v25, 0.0  ;;  %2747 = vst.msk [vmem:[%s6470_s8 + $0x14] sm:$0xf] %vm1483_vm4, %v3111_v10  ;;  %2748 = vst.msk [vmem:[%s6470_s8 + $0x18] sm:$0xf] %vm1483_vm4, %v3112_v50 }
 0x37d   :  { %v6757_v22 = vld [vmem:[#allocation40_spill] sm:$0xff]  ;;  %v3119_v39 = vpack.c.bf16 %v6775_v53, %v6775_v53  ;;  %v3120_v12 = vpack.c.bf16 %v6776_v15, %v6776_v15  ;;  %2749 = vst.msk [vmem:[%s6470_s8 + $0x1c] sm:$0xf] %vm1483_vm4, %v3113_v24  ;;  %v6778_v37 = vmax.f32 %v5760_v26, 0.0  ;;  %v6779_v14 = vmax.f32 %v5764_v36, 0.0 }
 0x37e   :  { %v3121_v58 = vpack.c.bf16 %v6777_v8, %v6777_v8  ;;  %v6780_v60 = vmax.f32 %v5768_v54, 0.0  ;;  %v6781_v10 = vmax.f32 %v5772_v9, 0.0  ;;  %2750 = vst.msk [vmem:[%s6470_s8 + $0x20] sm:$0xf] %vm1483_vm4, %v3114_v33  ;;  %2751 = vst.msk [vmem:[%s6470_s8 + $0x24] sm:$0xf] %vm1483_vm4, %v3115_v1 }
 0x37f   :  { %v3122_v51 = vpack.c.bf16 %v6778_v37, %v6778_v37  ;;  %v3123_v25 = vpack.c.bf16 %v6779_v14, %v6779_v14  ;;  %2752 = vst.msk [vmem:[%s6470_s8 + $0x28] sm:$0xf] %vm1483_vm4, %v3116_v2  ;;  %2753 = vst.msk [vmem:[%s6470_s8 + $0x2c] sm:$0xf] %vm1483_vm4, %v3117_v45  ;;  %v6782_v26 = vmax.f32 %v5776_v6, 0.0  ;;  %v6783_v54 = vmax.f32 %v5780_v3, 0.0 }
 0x380   :  { %v3124_v62 = vpack.c.bf16 %v6780_v60, %v6780_v60  ;;  %v3125_v50 = vpack.c.bf16 %v6781_v10, %v6781_v10  ;;  %v6784_v16 = vmax.f32 %v5784_v44, 0.0  ;;  %v6785_v19 = vmax.f32 %v5788_v27, 0.0  ;;  %2754 = vst.msk [vmem:[%s6470_s8 + $0x30] sm:$0xf] %vm1483_vm4, %v3118_v29  ;;  %2755 = vst.msk [vmem:[%s6470_s8 + $0x34] sm:$0xf] %vm1483_vm4, %v3119_v39 }
 0x381   :  { %v3126_v36 = vpack.c.bf16 %v6782_v26, %v6782_v26  ;;  %v3127_v9 = vpack.c.bf16 %v6783_v54, %v6783_v54  ;;  %2756 = vst.msk [vmem:[%s6470_s8 + $0x38] sm:$0xf] %vm1483_vm4, %v3120_v12  ;;  %2757 = vst.msk [vmem:[%s6470_s8 + $0x3c] sm:$0xf] %vm1483_vm4, %v3121_v58  ;;  %v6786_v6 = vmax.f32 %v5792_v34, 0.0  ;;  %v6787_v44 = vmax.f32 %v5796_v23, 0.0 }
 0x382   :  { %v3128_v24 = vpack.c.bf16 %v6784_v16, %v6784_v16  ;;  %v3129_v33 = vpack.c.bf16 %v6785_v19, %v6785_v19  ;;  %v6788_v40 = vmax.f32 %v5800_v42, 0.0  ;;  %v6789_v46 = vmax.f32 %v5804_v48, 0.0  ;;  %2758 = vst.msk [vmem:[%s6470_s8 + $0x40] sm:$0xf] %vm1483_vm4, %v3122_v51  ;;  %2759 = vst.msk [vmem:[%s6470_s8 + $0x44] sm:$0xf] %vm1483_vm4, %v3123_v25 }
 0x383   :  { %v3130_v3 = vpack.c.bf16 %v6786_v6, %v6786_v6  ;;  %v3131_v27 = vpack.c.bf16 %v6787_v44, %v6787_v44  ;;  %2760 = vst.msk [vmem:[%s6470_s8 + $0x48] sm:$0xf] %vm1483_vm4, %v3124_v62  ;;  %2761 = vst.msk [vmem:[%s6470_s8 + $0x4c] sm:$0xf] %vm1483_vm4, %v3125_v50  ;;  %v6790_v34 = vmax.f32 %v5808_v18, 0.0  ;;  %v6791_v42 = vmax.f32 %v5812_v63, 0.0 }
 0x384   :  { %v3132_v1 = vpack.c.bf16 %v6788_v40, %v6788_v40  ;;  %v3133_v2 = vpack.c.bf16 %v6789_v46, %v6789_v46  ;;  %v6792_v13 = vmax.f32 %v5816_v38, 0.0  ;;  %v6793_v28 = vmax.f32 %v5820_v47, 0.0  ;;  %2762 = vst.msk [vmem:[%s6470_s8 + $0x50] sm:$0xf] %vm1483_vm4, %v3126_v36  ;;  %2763 = vst.msk [vmem:[%s6470_s8 + $0x54] sm:$0xf] %vm1483_vm4, %v3127_v9 }
 0x385   :  { %v3134_v23 = vpack.c.bf16 %v6790_v34, %v6790_v34  ;;  %v3135_v48 = vpack.c.bf16 %v6791_v42, %v6791_v42  ;;  %2764 = vst.msk [vmem:[%s6470_s8 + $0x58] sm:$0xf] %vm1483_vm4, %v3128_v24  ;;  %2765 = vst.msk [vmem:[%s6470_s8 + $0x5c] sm:$0xf] %vm1483_vm4, %v3129_v33  ;;  %v6794_v18 = vmax.f32 %v5824_v31, 0.0  ;;  %v6795_v38 = vmax.f32 %v5828_v61, 0.0 }
 0x386   :  { %v3136_v45 = vpack.c.bf16 %v6792_v13, %v6792_v13  ;;  %v3137_v29 = vpack.c.bf16 %v6793_v28, %v6793_v28  ;;  %v6796_v53 = vmax.f32 %v5832_v4, 0.0  ;;  %v6797_v15 = vmax.f32 %v5836_v35, 0.0  ;;  %2766 = vst.msk [vmem:[%s6470_s8 + $0x60] sm:$0xf] %vm1483_vm4, %v3130_v3  ;;  %2767 = vst.msk [vmem:[%s6470_s8 + $0x64] sm:$0xf] %vm1483_vm4, %v3131_v27 }
 0x387   :  { %v3138_v63 = vpack.c.bf16 %v6794_v18, %v6794_v18  ;;  %v3139_v47 = vpack.c.bf16 %v6795_v38, %v6795_v38  ;;  %2768 = vst.msk [vmem:[%s6470_s8 + $0x68] sm:$0xf] %vm1483_vm4, %v3132_v1  ;;  %2769 = vst.msk [vmem:[%s6470_s8 + $0x6c] sm:$0xf] %vm1483_vm4, %v3133_v2  ;;  %v6798_v31 = vmax.f32 %v5840_v21, 0.0  ;;  %v6799_v4 = vld [vmem:[#allocation37_spill] sm:$0xff] }
 0x388   :  { %v3140_v39 = vpack.c.bf16 %v6796_v53, %v6796_v53  ;;  %v3141_v12 = vpack.c.bf16 %v6797_v15, %v6797_v15  ;;  %v6800_v35 = vmax.f32 %v6799_v4, 0.0  ;;  %v6801_v58 = vld [vmem:[#allocation36_spill] sm:$0xff]  ;;  %2770 = vst.msk [vmem:[%s6470_s8 + $0x70] sm:$0xf] %vm1483_vm4, %v3134_v23  ;;  %2771 = vst.msk [vmem:[%s6470_s8 + $0x74] sm:$0xf] %vm1483_vm4, %v3135_v48 }
 0x389   :  { %v3142_v61 = vpack.c.bf16 %v6798_v31, %v6798_v31  ;;  %v6802_v37 = vmax.f32 %v6801_v58, 0.0  ;;  %v6803_v14 = vld [vmem:[#allocation32_spill] sm:$0xff]  ;;  %2772 = vst.msk [vmem:[%s6470_s8 + $0x78] sm:$0xf] %vm1483_vm4, %v3136_v45  ;;  %2773 = vst.msk [vmem:[%s6470_s8 + $0x7c] sm:$0xf] %vm1483_vm4, %v3137_v29 }
 0x38a   :  { %v3143_v8 = vpack.c.bf16 %v6800_v35, %v6800_v35  ;;  %v6804_v25 = vmax.f32 %v6803_v14, 0.0  ;;  %v6805_v21 = vld [vmem:[#allocation27_spill] sm:$0xff]  ;;  %v6807_v50 = vld [vmem:[#allocation26_spill] sm:$0xff]  ;;  %v6809_v54 = vmax.f32 %v5864_v55, 0.0  ;;  %v6810_v16 = vmax.f32 %v5868_v57, 0.0  ;;  %v6814_v44 = vld [vmem:[#allocation24_spill] sm:$0xff] }
 0x38b   :  { %v3144_v51 = vpack.c.bf16 %v6802_v37, %v6802_v37  ;;  %v6806_v62 = vmax.f32 %v6805_v21, 0.0  ;;  %v6808_v26 = vmax.f32 %v6807_v50, 0.0  ;;  %2774 = vst.msk [vmem:[%s6470_s8 + $0x80] sm:$0xf] %vm1483_vm4, %v3138_v63  ;;  %2775 = vst.msk [vmem:[%s6470_s8 + $0x84] sm:$0xf] %vm1483_vm4, %v3139_v47 }
 0x38c   :  { %v3145_v60 = vpack.c.bf16 %v6804_v25, %v6804_v25  ;;  %v3148_v9 = vpack.c.bf16 %v6809_v54, %v6809_v54  ;;  %v3149_v24 = vpack.c.bf16 %v6810_v16, %v6810_v16  ;;  %2776 = vst.msk [vmem:[%s6470_s8 + $0x88] sm:$0xf] %vm1483_vm4, %v3140_v39  ;;  %2777 = vst.msk [vmem:[%s6470_s8 + $0x8c] sm:$0xf] %vm1483_vm4, %v3141_v12  ;;  %v6811_v55 = vmax.f32 %v5872_v30, 0.0  ;;  %v6816_v30 = vld [vmem:[#allocation29_spill] sm:$0xff] }
 0x38d   :  { %v3146_v10 = vpack.c.bf16 %v6806_v62, %v6806_v62  ;;  %v3147_v36 = vpack.c.bf16 %v6808_v26, %v6808_v26  ;;  %v6812_v19 = vmax.f32 %v5876_v41, 0.0  ;;  %v6813_v6 = vmax.f32 %v5880_v49, 0.0  ;;  %2778 = vst.msk [vmem:[%s6470_s8 + $0x90] sm:$0xf] %vm1483_vm4, %v3142_v61  ;;  %2779 = vst.msk [vmem:[%s6470_s8 + $0x94] sm:$0xf] %vm1483_vm4, %v3143_v8 }
 0x38e   :  { %v3150_v57 = vpack.c.bf16 %v6811_v55, %v6811_v55  ;;  %v6815_v27 = vmax.f32 %v6814_v44, 0.0  ;;  %2780 = vst.msk [vmem:[%s6470_s8 + $0x98] sm:$0xf] %vm1483_vm4, %v3144_v51  ;;  %2781 = vst.msk [vmem:[%s6470_s8 + $0x9c] sm:$0xf] %vm1483_vm4, %v3145_v60  ;;  %v6817_v41 = vmax.f32 %v6816_v30, 0.0 }
 0x38f   :  { %v3151_v33 = vpack.c.bf16 %v6812_v19, %v6812_v19  ;;  %v3152_v3 = vpack.c.bf16 %v6813_v6, %v6813_v6  ;;  %v6818_v1 = vld [vmem:[#allocation30_spill] sm:$0xff]  ;;  %v6822_v48 = vld [vmem:[#allocation28_spill] sm:$0xff]  ;;  %2782 = vst.msk [vmem:[%s6470_s8 + $0xa0] sm:$0xf] %vm1483_vm4, %v3146_v10  ;;  %2783 = vst.msk [vmem:[%s6470_s8 + $0xa4] sm:$0xf] %vm1483_vm4, %v3147_v36 }
 0x390   :  { %v3153_v40 = vpack.c.bf16 %v6815_v27, %v6815_v27  ;;  %v3154_v49 = vpack.c.bf16 %v6817_v41, %v6817_v41  ;;  %v6819_v46 = vmax.f32 %v6818_v1, 0.0  ;;  %v6820_v34 = vld [vmem:[#allocation38_spill] sm:$0xff]  ;;  %v6823_v13 = vmax.f32 %v6822_v48, 0.0  ;;  %2784 = vst.msk [vmem:[%s6470_s8 + $0xa8] sm:$0xf] %vm1483_vm4, %v3148_v9 }
 0x391   :  { %v6821_v23 = vmax.f32 %v6820_v34, 0.0  ;;  %2785 = vst.msk [vmem:[%s6470_s8 + $0xac] sm:$0xf] %vm1483_vm4, %v3149_v24  ;;  %v6824_v28 = vmax.f32 %v6756_v11, 0.0  ;;  %v6825_v18 = vmax.f32 %v5908_v59, 0.0  ;;  %v6826_v38 = vmax.f32 %v5912_v0, 0.0 }
 0x392   :  { %v3155_v2 = vpack.c.bf16 %v6819_v46, %v6819_v46  ;;  %v3157_v45 = vpack.c.bf16 %v6823_v13, %v6823_v13  ;;  %v6827_v53 = vmax.f32 %v5916_v7, 0.0  ;;  %2786 = vst.msk [vmem:[%s6470_s8 + $0xb0] sm:$0xf] %vm1483_vm4, %v3150_v57  ;;  %2787 = vst.msk [vmem:[%s6470_s8 + $0xb4] sm:$0xf] %vm1483_vm4, %v3151_v33  ;;  %v6828_v11 = vmax.f32 %v5920_v32, 0.0 }
 0x393   :  { %v3156_v42 = vpack.c.bf16 %v6821_v23, %v6821_v23  ;;  %v3158_v29 = vpack.c.bf16 %v6824_v28, %v6824_v28  ;;  %v3159_v63 = vpack.c.bf16 %v6825_v18, %v6825_v18  ;;  %v3160_v47 = vpack.c.bf16 %v6826_v38, %v6826_v38  ;;  %2788 = vst.msk [vmem:[%s6470_s8 + $0xb8] sm:$0xf] %vm1483_vm4, %v3152_v3 }
 0x394   :  { %v3161_v39 = vpack.c.bf16 %v6827_v53, %v6827_v53  ;;  %2789 = vst.msk [vmem:[%s6470_s8 + $0xbc] sm:$0xf] %vm1483_vm4, %v3153_v40  ;;  %v3162_v59 = vpack.c.bf16 %v6828_v11, %v6828_v11  ;;  %v6829_v0 = vmax.f32 %v5924_v52, 0.0  ;;  %v6830_v15 = vmax.f32 %v6757_v22, 0.0  ;;  %2790 = vst.msk [vmem:[%s6470_s8 + $0xc0] sm:$0xf] %vm1483_vm4, %v3154_v49 }
 0x395   :  { %v6831_v31 = vmax.f32 %v6758_v17, 0.0  ;;  %2791 = vst.msk [vmem:[%s6470_s8 + $0xc4] sm:$0xf] %vm1483_vm4, %v3155_v2  ;;  %2792 = vst.msk [vmem:[%s6470_s8 + $0xc8] sm:$0xf] %vm1483_vm4, %v3156_v42  ;;  %v6832_v17 = vmax.f32 %v6759_v56, 0.0 }
 0x396   :  { %v3163_v7 = vpack.c.bf16 %v6829_v0, %v6829_v0  ;;  %v3164_v12 = vpack.c.bf16 %v6830_v15, %v6830_v15  ;;  %2793 = vst.msk [vmem:[%s6470_s8 + $0xcc] sm:$0xf] %vm1483_vm4, %v3157_v45  ;;  %v6833_v52 = vmax.f32 %v6760_v20, 0.0  ;;  %v6834_v4 = vmax.f32 %v6761_v43, 0.0  ;;  %2794 = vst.msk [vmem:[%s6470_s8 + $0xd0] sm:$0xf] %vm1483_vm4, %v3158_v29 }
 0x397   :  { %v3165_v61 = vpack.c.bf16 %v6831_v31, %v6831_v31  ;;  %v3166_v32 = vpack.c.bf16 %v6832_v17, %v6832_v17  ;;  %v6835_v8 = vmax.f32 %v5948_v5, 0.0  ;;  %2795 = vst.msk [vmem:[%s6470_s8 + $0xd4] sm:$0xf] %vm1483_vm4, %v3159_v63  ;;  %2796 = vst.msk [vmem:[%s6470_s8 + $0xd8] sm:$0xf] %vm1483_vm4, %v3160_v47 }
 0x398   :  { %v3167_v22 = vpack.c.bf16 %v6833_v52, %v6833_v52  ;;  %v3168_v35 = vpack.c.bf16 %v6834_v4, %v6834_v4  ;;  %2797 = vst.msk [vmem:[%s6470_s8 + $0xdc] sm:$0xf] %vm1483_vm4, %v3161_v39  ;;  %2798 = vst.msk [vmem:[%s6470_s8 + $0xe0] sm:$0xf] %vm1483_vm4, %v3162_v59 }
 0x399   :  { %v3169_v58 = vpack.c.bf16 %v6835_v8, %v6835_v8  ;;  %2799 = vst.msk [vmem:[%s6470_s8 + $0xe4] sm:$0xf] %vm1483_vm4, %v3163_v7  ;;  %2800 = vst.msk [vmem:[%s6470_s8 + $0xe8] sm:$0xf] %vm1483_vm4, %v3164_v12 }
 0x39a   :  { %2801 = vst.msk [vmem:[%s6470_s8 + $0xec] sm:$0xf] %vm1483_vm4, %v3165_v61  ;;  %2802 = vst.msk [vmem:[%s6470_s8 + $0xf0] sm:$0xf] %vm1483_vm4, %v3166_v32 }
 0x39b   :  { %2803 = vst.msk [vmem:[%s6470_s8 + $0xf4] sm:$0xf] %vm1483_vm4, %v3167_v22  ;;  %2804 = vst.msk [vmem:[%s6470_s8 + $0xf8] sm:$0xf] %vm1483_vm4, %v3168_v35 }
 0x39c   :  { %2805 = vst.msk [vmem:[%s6470_s8 + $0xfc] sm:$0xf] %vm1483_vm4, %v3169_v58 }
 0x39d   :  { %2814 = vsyncpa [#allocation3], 1 }
 0x39e   :  { %2815 = vsyncpa [#allocation5], 1 }

// kernel: _lambda_.5
= control target key start
LH: loop header
LB: loop body
LE: loop exit
PB: predicated region body
PF: predicated region fallthrough
CT: control target
= control target key end

     0   :  { %v6106_v0 = vmov 0   ;;  %vm474_vm0 = vcmask 130048   ;;  %vm2024_vm1 = vcmask 523264   ;;  %vm3794_vm2 = vcmask 519168   ;;  %s11526_s1 = inlined_call_operand.vmem [shape: bf16[144,16], index: 1, kind: input, shape index: {}]   ;;  %s11527_s0 = inlined_call_operand.vmem [shape: bf16[512,144], index: 0, kind: input, shape index: {}]   ;;  %s11528_s8 = inlined_call_operand.vmem [shape: bf16[16,64], index: 8, kind: input, shape index: {}]   ;;  %s11529_s7 = inlined_call_operand.vmem [shape: bf16[512,16], index: 7, kind: input, shape index: {}]   ;;  %s11530_s4 = inlined_call_operand.vmem [shape: bf16[16,64], index: 4, kind: input, shape index: {}]   ;;  %s11531_s2 = inlined_call_operand.vmem [shape: f32[1,16], index: 2, kind: input, shape index: {}]   ;;  %s11532_s3 = inlined_call_operand.vmem [shape: f32[1,16], index: 3, kind: input, shape index: {}]   ;;  %s11533_s9 = inlined_call_operand.vmem [shape: f32[1,64], index: 9, kind: input, shape index: {}, may-alias: {5,9}]   ;;  %s11534_s11 = inlined_call_operand.vmem [shape: bf16[64,32], index: 11, kind: input, shape index: {}]   ;;  %s11535_s10 = inlined_call_operand.vmem [shape: f32[1,64], index: 10, kind: input, shape index: {}, may-alias: {6,10}]   ;;  %s11536_s5 = inlined_call_operand.vmem [shape: f32[1,64], index: 5, kind: input, shape index: {}, may-alias: {5,9}]   ;;  %s11537_s6 = inlined_call_operand.vmem [shape: f32[1,64], index: 6, kind: input, shape index: {}, may-alias: {6,10}]   ;;  %s11538_s14 = inlined_call_operand.vmem [shape: bf16[512,64], index: 14, kind: output, shape index: {0}]   ;;  %s11539_s12 = inlined_call_operand.vmem [shape: f32[1,32], index: 12, kind: input, shape index: {}]   ;;  %s11540_s13 = inlined_call_operand.vmem [shape: f32[1,32], index: 13, kind: input, shape index: {}]   ;;  %s11541_s15 = inlined_call_operand.vmem [shape: bf16[512,32], index: 15, kind: output, shape index: {1}]  }
   0x1   :  { %571 = vmatprep.subr.bf16.mxu0 %v6106_v0  ;;  %v5955_v1 = vld [vmem:[%s11526_s1 + $0x38] sm:$0xff]   ;;  %v5956_v2 = vld [vmem:[%s11526_s1 + $0x30] sm:$0xff]   ;;  %v5957_v3 = vld [vmem:[%s11526_s1 + $0x28] sm:$0xff]   ;;  %vm4278_vm3 = vcmask 261120   ;;  %vm5078_vm4 = vcmask 257024  }
   0x2   :  { %572 = vmatpush1.bf16.msra.mxu0 %v5955_v1  ;;  %v5958_v4 = vld [vmem:[%s11526_s1 + $0x20] sm:$0xff]   ;;  %v5959_v6 = vld [vmem:[%s11526_s1 + $0x18] sm:$0xff]   ;;  %v5960_v7 = vld [vmem:[%s11526_s1 + $0x10] sm:$0xff]  }
   0x3   :  { %573 = vmatprep.subr.bf16.mxu0 %v6106_v0  ;;  %v5966_v5 = vld [vmem:[%s11527_s0 + $0x4] ss:$8 sps:$4 sm:$0xff]   ;;  %v5964_v11 = vld [vmem:[%s11527_s0] ss:$8 sps:$4 sm:$0xff]   ;;  %v5967_v12 = vld [vmem:[%s11527_s0 + $0x14] ss:$8 sps:$4 sm:$0xff]  }
   0x4   :  { %5224 = vmatprep.mubr.msk.bf16.mxu0 %vm474_vm0, %v5966_v5  ;;  %v5961_v8 = vld [vmem:[%s11526_s1 + $0x8] sm:$0xff]   ;;  %v5962_v9 = vld [vmem:[%s11526_s1] sm:$0xff]   ;;  %v5969_v13 = vld [vmem:[%s11527_s0 + $0x10] ss:$8 sps:$4 sm:$0xff]  }
   0x5   :  { %v5963_v10 = vld [vmem:[%s11526_s1 + $0x40] sm:$0xff]   ;;  %v5973_v16 = vld [vmem:[%s11527_s0 + $0x34] ss:$8 sps:$4 sm:$0xff]   ;;  %v5975_v17 = vld [vmem:[%s11527_s0 + $0x30] ss:$8 sps:$4 sm:$0xff]  }
   0x6   :  { %574 = vmatpush1.bf16.msra.mxu0 %v5956_v2  ;;  %v5970_v14 = vld [vmem:[%s11527_s0 + $0x24] ss:$8 sps:$4 sm:$0xff]   ;;  %v5972_v15 = vld [vmem:[%s11527_s0 + $0x20] ss:$8 sps:$4 sm:$0xff]   ;;  %v5979_v20 = vld [vmem:[%s11527_s0 + $0x54] ss:$8 sps:$4 sm:$0xff]  }
   0x7   :  { %575 = vmatprep.subr.bf16.mxu0 %v6106_v0  ;;  %v5976_v18 = vld [vmem:[%s11527_s0 + $0x44] ss:$8 sps:$4 sm:$0xff]   ;;  %v5978_v19 = vld [vmem:[%s11527_s0 + $0x40] ss:$8 sps:$4 sm:$0xff]   ;;  %v5981_v21 = vld [vmem:[%s11527_s0 + $0x50] ss:$8 sps:$4 sm:$0xff]  }
   0x8   :  { %v5982_v22 = vld [vmem:[%s11527_s0 + $0x64] ss:$8 sps:$4 sm:$0xff]   ;;  %v5984_v23 = vld [vmem:[%s11527_s0 + $0x60] ss:$8 sps:$4 sm:$0xff]   ;;  %v5985_v24 = vld [vmem:[%s11527_s0 + $0x74] ss:$8 sps:$4 sm:$0xff]  }
   0x9   :  { %v5987_v25 = vld [vmem:[%s11527_s0 + $0x70] ss:$8 sps:$4 sm:$0xff]   ;;  %v5988_v26 = vld [vmem:[%s11527_s0 + $0x84] ss:$8 sps:$4 sm:$0xff]   ;;  %v5990_v27 = vld [vmem:[%s11527_s0 + $0x80] ss:$8 sps:$4 sm:$0xff]  }
   0xa   :  { %576 = vmatpush1.bf16.msra.mxu0 %v5957_v3  ;;  %v5991_v28 = vld [vmem:[%s11527_s0 + $0x94] ss:$8 sps:$4 sm:$0xff]   ;;  %v5993_v29 = vld [vmem:[%s11527_s0 + $0x90] ss:$8 sps:$4 sm:$0xff]   ;;  %v5994_v30 = vld [vmem:[%s11527_s0 + $0xa4] ss:$8 sps:$4 sm:$0xff]  }
   0xb   :  { %577 = vmatprep.subr.bf16.mxu0 %v6106_v0  ;;  %v5996_v31 = vld [vmem:[%s11527_s0 + $0xa0] ss:$8 sps:$4 sm:$0xff]   ;;  %v5997_v32 = vld [vmem:[%s11527_s0 + $0xb4] ss:$8 sps:$4 sm:$0xff]   ;;  %v5999_v33 = vld [vmem:[%s11527_s0 + $0xb0] ss:$8 sps:$4 sm:$0xff]  }
   0xc   :  { %v6000_v34 = vld [vmem:[%s11527_s0 + $0xc4] ss:$8 sps:$4 sm:$0xff]   ;;  %v6002_v35 = vld [vmem:[%s11527_s0 + $0xc0] ss:$8 sps:$4 sm:$0xff]   ;;  %v6003_v36 = vld [vmem:[%s11527_s0 + $0xd4] ss:$8 sps:$4 sm:$0xff]  }
   0xd   :  { %v6005_v37 = vld [vmem:[%s11527_s0 + $0xd0] ss:$8 sps:$4 sm:$0xff]   ;;  %v6006_v38 = vld [vmem:[%s11527_s0 + $0xe4] ss:$8 sps:$4 sm:$0xff]   ;;  %v6008_v39 = vld [vmem:[%s11527_s0 + $0xe0] ss:$8 sps:$4 sm:$0xff]  }
   0xe   :  { %578 = vmatpush1.bf16.msra.mxu0 %v5958_v4  ;;  %v6009_v40 = vld [vmem:[%s11527_s0 + $0xf4] ss:$8 sps:$4 sm:$0xff]   ;;  %v6011_v41 = vld [vmem:[%s11527_s0 + $0xf0] ss:$8 sps:$4 sm:$0xff]   ;;  %v6012_v42 = vld [vmem:[%s11527_s0 + $0x104] ss:$8 sps:$4 sm:$0xff]  }
   0xf   :  { %579 = vmatprep.subr.bf16.mxu0 %v6106_v0  ;;  %v6057_v43 = vld [vmem:[%s11528_s8] sm:$0xff]   ;;  %v6015_v45 = vld [vmem:[%s11527_s0 + $0x114] ss:$8 sps:$4 sm:$0xff]   ;;  %v6017_v46 = vld [vmem:[%s11527_s0 + $0x110] ss:$8 sps:$4 sm:$0xff]  }
  0x10   :  { %5952 = vmatprep.subr.bf16.mxu1 %v6057_v43  ;;  %v6014_v44 = vld [vmem:[%s11527_s0 + $0x100] ss:$8 sps:$4 sm:$0xff]   ;;  %v6018_v47 = vld [vmem:[%s11527_s0 + $0x124] ss:$8 sps:$4 sm:$0xff]   ;;  %v6021_v49 = vld [vmem:[%s11527_s0 + $0x134] ss:$8 sps:$4 sm:$0xff]  }
  0x11   :  { %5953 = vmatpush3.bf16.msra.mxu1 %v6057_v43  ;;  %v6020_v48 = vld [vmem:[%s11527_s0 + $0x120] ss:$8 sps:$4 sm:$0xff]   ;;  %v6023_v50 = vld [vmem:[%s11527_s0 + $0x130] ss:$8 sps:$4 sm:$0xff]   ;;  %v6024_v51 = vld [vmem:[%s11527_s0 + $0x144] ss:$8 sps:$4 sm:$0xff]  }
  0x12   :  { %580 = vmatpush1.bf16.msra.mxu0 %v5959_v6  ;;  %v6026_v52 = vld [vmem:[%s11527_s0 + $0x140] ss:$8 sps:$4 sm:$0xff]   ;;  %v6027_v53 = vld [vmem:[%s11527_s0 + $0x154] ss:$8 sps:$4 sm:$0xff]   ;;  %v6029_v54 = vld [vmem:[%s11527_s0 + $0x150] ss:$8 sps:$4 sm:$0xff]  }
  0x13   :  { %581 = vmatprep.subr.bf16.mxu0 %v6106_v0  ;;  %v6030_v55 = vld [vmem:[%s11527_s0 + $0x164] ss:$8 sps:$4 sm:$0xff]   ;;  %v6032_v56 = vld [vmem:[%s11527_s0 + $0x160] ss:$8 sps:$4 sm:$0xff]   ;;  %v6033_v57 = vld [vmem:[%s11527_s0 + $0x174] ss:$8 sps:$4 sm:$0xff]  }
  0x14   :  { %v6073_v58 = vld [vmem:[%s11529_s7 + $0x60] sm:$0xff]   ;;  %v6074_v59 = vld [vmem:[%s11529_s7 + $0x68] sm:$0xff]   ;;  %v6035_v60 = vld [vmem:[%s11527_s0 + $0x170] ss:$8 sps:$4 sm:$0xff]  }
  0x15   :  { %5774 = vmatprep.mubr.msk.bf16.mxu1 %vm474_vm0, %v6073_v58  ;;  %v6036_v61 = vld [vmem:[%s11527_s0 + $0x184] ss:$8 sps:$4 sm:$0xff]   ;;  %v6075_v62 = vld [vmem:[%s11529_s7 + $0x70] sm:$0xff]   ;;  %v6076_v63 = vld [vmem:[%s11529_s7 + $0x78] sm:$0xff]  }
  0x16   :  { %582 = vmatpush1.bf16.msra.mxu0 %v5960_v7  ;;  %5775 = vmatmul.mubr.msk.bf16.vlgmr.msra.gmra.mxu1 %vm474_vm0, %v6074_v59  ;;  %v6039_v1 = vld [vmem:[%s11527_s0 + $0x194] ss:$8 sps:$4 sm:$0xff]   ;;  %v6077_v2 = vld [vmem:[%s11529_s7 + $0x80] sm:$0xff]   ;;  %v6078_v3 = vld [vmem:[%s11529_s7 + $0x88] sm:$0xff]  }
  0x17   :  { %583 = vmatprep.subr.bf16.mxu0 %v6106_v0  ;;  %5778 = vmatprep.mubr.msk.bf16.mxu1 %vm474_vm0, %v6075_v62  ;;  %v6041_v7 = vld [vmem:[%s11527_s0 + $0x190] ss:$8 sps:$4 sm:$0xff]  }
  0x18   :  { %v6092_v59 = vld [vmem:[%s11529_s7 + $0xf8] sm:$0xff]  }
  0x1a   :  { %584 = vmatpush1.bf16.msra.mxu0 %v5961_v8  ;;  %v6042_v8 = vld [vmem:[%s11527_s0 + $0x1a4] ss:$8 sps:$4 sm:$0xff]  }
  0x1b   :  { %585 = vmatprep.subr.bf16.mxu0 %v6106_v0 }
  0x1e   :  { %586 = vmatpush1.bf16.msra.mxu0 %v5962_v9  ;;  %5779 = vmatmul.mubr.msk.bf16.gmra.mxu1 %vm474_vm0, %v6076_v63  ;;  %v6079_v9 = vld [vmem:[%s11529_s7 + $0x90] sm:$0xff]   ;;  %v6062_v63 = vld [vmem:[%s11529_s7 + $0x8] sm:$0xff]  }
  0x1f   :  { %601 = vmatprep.subr.bf16.mxu0 %v6106_v0  ;;  %v6038_v0 = vld [vmem:[%s11527_s0 + $0x180] ss:$8 sps:$4 sm:$0xff]   ;;  %5782 = vmatprep.mubr.msk.bf16.mxu1 %vm474_vm0, %v6077_v2 }
  0x22   :  { %602 = vmatpush2.bf16.msra.mxu0 %v5963_v10 }
  0x23   :  { %5748 = vmatprep.subr.bf16.mxu0 %v6057_v43 }
  0x25   :  { %604 = vmatmul.mubr.bf16.vlgmr.msra.gmra.mxu0 %v5964_v11  ;;  %v6080_v11 = vld [vmem:[%s11529_s7 + $0x98] sm:$0xff]  }
  0x26   :  { %5225 = vmatprep.mubr.msk.bf16.mxu0 %vm474_vm0, %v5967_v12  ;;  %5749 = vmatpush3.bf16.msra.mxu0 %v6057_v43  ;;  %v6088_v43 = vld [vmem:[%s11529_s7 + $0xd8] sm:$0xff]  }
  0x27   :  { %5783 = vmatmul.mubr.msk.bf16.gmra.mxu1 %vm474_vm0, %v6078_v3 }
  0x28   :  { %5786 = vmatprep.mubr.msk.bf16.mxu1 %vm474_vm0, %v6079_v9 }
  0x2d   :  { %612 = vmatmul.mubr.bf16.gmra.mxu0 %v5969_v13 }
  0x2e   :  { %5226 = vmatprep.mubr.msk.bf16.mxu0 %vm474_vm0, %v5970_v14 }
  0x2f   :  { %5787 = vmatmul.mubr.msk.bf16.gmra.mxu1 %vm474_vm0, %v6080_v11 }
  0x35   :  { %620 = vmatmul.mubr.bf16.gmra.mxu0 %v5972_v15  ;;  %v6044_v15 = vld [vmem:[%s11527_s0 + $0x1a0] ss:$8 sps:$4 sm:$0xff]  }
  0x36   :  { %5227 = vmatprep.mubr.msk.bf16.mxu0 %vm474_vm0, %v5973_v16  ;;  %v6045_v16 = vld [vmem:[%s11527_s0 + $0x1b4] ss:$8 sps:$4 sm:$0xff]  }
  0x3d   :  { %628 = vmatmul.mubr.bf16.gmra.mxu0 %v5975_v17  ;;  %v6081_v17 = vld [vmem:[%s11529_s7 + $0xa0] sm:$0xff]  }
  0x3e   :  { %5228 = vmatprep.mubr.msk.bf16.mxu0 %vm474_vm0, %v5976_v18  ;;  %5790 = vmatprep.mubr.msk.bf16.mxu1 %vm474_vm0, %v6081_v17 }
  0x45   :  { %636 = vmatmul.mubr.bf16.gmra.mxu0 %v5978_v19  ;;  %v6082_v19 = vld [vmem:[%s11529_s7 + $0xa8] sm:$0xff]  }
  0x46   :  { %5229 = vmatprep.mubr.msk.bf16.mxu0 %vm474_vm0, %v5979_v20  ;;  %5791 = vmatmul.mubr.msk.bf16.gmra.mxu1 %vm474_vm0, %v6082_v19 }
  0x4d   :  { %644 = vmatmul.mubr.bf16.gmra.mxu0 %v5981_v21 }
  0x4e   :  { %5230 = vmatprep.mubr.msk.bf16.mxu0 %vm474_vm0, %v5982_v22 }
  0x55   :  { %652 = vmatmul.mubr.bf16.gmra.mxu0 %v5984_v23  ;;  %v6047_v23 = vld [vmem:[%s11527_s0 + $0x1b0] ss:$8 sps:$4 sm:$0xff]  }
  0x56   :  { %5231 = vmatprep.mubr.msk.bf16.mxu0 %vm474_vm0, %v5985_v24  ;;  %v6048_v24 = vld [vmem:[%s11527_s0 + $0x1c4] ss:$8 sps:$4 sm:$0xff]  }
  0x5d   :  { %660 = vmatmul.mubr.bf16.gmra.mxu0 %v5987_v25  ;;  %v6083_v25 = vld [vmem:[%s11529_s7 + $0xb0] sm:$0xff]  }
  0x5e   :  { %5232 = vmatprep.mubr.msk.bf16.mxu0 %vm474_vm0, %v5988_v26  ;;  %5794 = vmatprep.mubr.msk.bf16.mxu1 %vm474_vm0, %v6083_v25 }
  0x65   :  { %668 = vmatmul.mubr.bf16.gmra.mxu0 %v5990_v27  ;;  %v6084_v27 = vld [vmem:[%s11529_s7 + $0xb8] sm:$0xff]  }
  0x66   :  { %5233 = vmatprep.mubr.msk.bf16.mxu0 %vm474_vm0, %v5991_v28  ;;  %5795 = vmatmul.mubr.msk.bf16.gmra.mxu1 %vm474_vm0, %v6084_v27 }
  0x6d   :  { %676 = vmatmul.mubr.bf16.gmra.mxu0 %v5993_v29 }
  0x6e   :  { %5234 = vmatprep.mubr.msk.bf16.mxu0 %vm474_vm0, %v5994_v30 }
  0x75   :  { %684 = vmatmul.mubr.bf16.gmra.mxu0 %v5996_v31  ;;  %v6050_v31 = vld [vmem:[%s11527_s0 + $0x1c0] ss:$8 sps:$4 sm:$0xff]  }
  0x76   :  { %5235 = vmatprep.mubr.msk.bf16.mxu0 %vm474_vm0, %v5997_v32  ;;  %v6051_v32 = vld [vmem:[%s11527_s0 + $0x1d4] ss:$8 sps:$4 sm:$0xff]  }
  0x7d   :  { %692 = vmatmul.mubr.bf16.gmra.mxu0 %v5999_v33  ;;  %v6085_v33 = vld [vmem:[%s11529_s7 + $0xc0] sm:$0xff]  }
  0x7e   :  { %5236 = vmatprep.mubr.msk.bf16.mxu0 %vm474_vm0, %v6000_v34  ;;  %5798 = vmatprep.mubr.msk.bf16.mxu1 %vm474_vm0, %v6085_v33 }
  0x85   :  { %700 = vmatmul.mubr.bf16.gmra.mxu0 %v6002_v35  ;;  %v6086_v35 = vld [vmem:[%s11529_s7 + $0xc8] sm:$0xff]  }
  0x86   :  { %5237 = vmatprep.mubr.msk.bf16.mxu0 %vm474_vm0, %v6003_v36  ;;  %5799 = vmatmul.mubr.msk.bf16.gmra.mxu1 %vm474_vm0, %v6086_v35 }
  0x8d   :  { %708 = vmatmul.mubr.bf16.gmra.mxu0 %v6005_v37 }
  0x8e   :  { %5238 = vmatprep.mubr.msk.bf16.mxu0 %vm474_vm0, %v6006_v38 }
  0x95   :  { %716 = vmatmul.mubr.bf16.gmra.mxu0 %v6008_v39  ;;  %v6053_v39 = vld [vmem:[%s11527_s0 + $0x1d0] ss:$8 sps:$4 sm:$0xff]  }
  0x96   :  { %5239 = vmatprep.mubr.msk.bf16.mxu0 %vm474_vm0, %v6009_v40  ;;  %v6054_v40 = vld [vmem:[%s11527_s0 + $0x1e4] ss:$8 sps:$4 sm:$0xff]  }
  0x9d   :  { %724 = vmatmul.mubr.bf16.gmra.mxu0 %v6011_v41  ;;  %v6087_v41 = vld [vmem:[%s11529_s7 + $0xd0] sm:$0xff]  }
  0x9e   :  { %5240 = vmatprep.mubr.msk.bf16.mxu0 %vm474_vm0, %v6012_v42  ;;  %5802 = vmatprep.mubr.msk.bf16.mxu1 %vm474_vm0, %v6087_v41 }
  0x9f   :  { %5803 = vmatmul.mubr.msk.bf16.gmra.mxu1 %vm474_vm0, %v6088_v43 }
  0xa5   :  { %732 = vmatmul.mubr.bf16.gmra.mxu0 %v6014_v44 }
  0xa6   :  { %5241 = vmatprep.mubr.msk.bf16.mxu0 %vm474_vm0, %v6015_v45 }
  0xad   :  { %740 = vmatmul.mubr.bf16.gmra.mxu0 %v6017_v46 }
  0xae   :  { %5242 = vmatprep.mubr.msk.bf16.mxu0 %vm474_vm0, %v6018_v47  ;;  %v6056_v47 = vld [vmem:[%s11527_s0 + $0x1e0] ss:$8 sps:$4 sm:$0xff]  }
  0xb5   :  { %748 = vmatmul.mubr.bf16.gmra.mxu0 %v6020_v48  ;;  %v6058_v48 = vld [vmem:[%s11527_s0 + $0x1f4] ss:$8 sps:$4 sm:$0xff]  }
  0xb6   :  { %5243 = vmatprep.mubr.msk.bf16.mxu0 %vm474_vm0, %v6021_v49  ;;  %v6089_v49 = vld [vmem:[%s11529_s7 + $0xe0] sm:$0xff]  }
  0xb7   :  { %5806 = vmatprep.mubr.msk.bf16.mxu1 %vm474_vm0, %v6089_v49 }
  0xbd   :  { %756 = vmatmul.mubr.bf16.gmra.mxu0 %v6023_v50 }
  0xbe   :  { %5244 = vmatprep.mubr.msk.bf16.mxu0 %vm474_vm0, %v6024_v51  ;;  %v6090_v51 = vld [vmem:[%s11529_s7 + $0xe8] sm:$0xff]  }
  0xbf   :  { %5807 = vmatmul.mubr.msk.bf16.gmra.mxu1 %vm474_vm0, %v6090_v51 }
  0xc5   :  { %764 = vmatmul.mubr.bf16.gmra.mxu0 %v6026_v52 }
  0xc6   :  { %5245 = vmatprep.mubr.msk.bf16.mxu0 %vm474_vm0, %v6027_v53 }
  0xcd   :  { %772 = vmatmul.mubr.bf16.gmra.mxu0 %v6029_v54 }
  0xce   :  { %5246 = vmatprep.mubr.msk.bf16.mxu0 %vm474_vm0, %v6030_v55  ;;  %v6060_v55 = vld [vmem:[%s11527_s0 + $0x1f0] ss:$8 sps:$4 sm:$0xff]  }
  0xd5   :  { %780 = vmatmul.mubr.bf16.gmra.mxu0 %v6032_v56  ;;  %v6061_v56 = vld [vmem:[%s11529_s7] sm:$0xff]  }
  0xd6   :  { %5247 = vmatprep.mubr.msk.bf16.mxu0 %vm474_vm0, %v6033_v57  ;;  %v6091_v57 = vld [vmem:[%s11529_s7 + $0xf0] sm:$0xff]  }
  0xd7   :  { %5810 = vmatprep.mubr.msk.bf16.mxu1 %vm474_vm0, %v6091_v57 }
  0xd8   :  { %5811 = vmatmul.mubr.msk.bf16.gmra.mxu1 %vm474_vm0, %v6092_v59 }
  0xdd   :  { %788 = vmatmul.mubr.bf16.gmra.mxu0 %v6035_v60 }
  0xde   :  { %5248 = vmatprep.mubr.msk.bf16.mxu0 %vm474_vm0, %v6036_v61 }
  0xe5   :  { %v6418_v4 = vpop.f32.mrf.mxu0  ;;  %796 = vmatmul.mubr.bf16.gmra.mxu0 %v6038_v0  ;;  %v6063_v0 = vld [vmem:[%s11529_s7 + $0x10] sm:$0xff]  }
  0xe6   :  { %5249 = vmatprep.mubr.msk.bf16.mxu0 %vm474_vm0, %v6039_v1  ;;  %v995_v59 = vmul.f32 %v6418_v4, %v6418_v4 }
  0xe7   :  { %v607_v5 = vpop.f32.mrf.mxu0 }
  0xe9   :  { %v6422_v6 = vpop.f32.mrf.mxu0 }
  0xea   :  { %v996_v57 = vmul.f32 %v6422_v6, %v6422_v6 }
  0xeb   :  { %v610_v10 = vpop.f32.mrf.mxu0 }
  0xed   :  { %v6437_v12 = vpop.f32.mrf.mxu0  ;;  %804 = vmatmul.mubr.bf16.gmra.mxu0 %v6041_v7  ;;  %v6064_v7 = vld [vmem:[%s11529_s7 + $0x18] sm:$0xff]  }
  0xee   :  { %5250 = vmatprep.mubr.msk.bf16.mxu0 %vm474_vm0, %v6042_v8  ;;  %v6065_v8 = vld [vmem:[%s11529_s7 + $0x20] sm:$0xff]  }
  0xef   :  { %v615_v13 = vpop.f32.mrf.mxu0 }
  0xf1   :  { %v6441_v14 = vpop.f32.mrf.mxu0 }
  0xf3   :  { %v618_v18 = vpop.f32.mrf.mxu0 }
  0xf5   :  { %v6456_v20 = vpop.f32.mrf.mxu0  ;;  %812 = vmatmul.mubr.bf16.gmra.mxu0 %v6044_v15  ;;  %v6066_v15 = vld [vmem:[%s11529_s7 + $0x28] sm:$0xff]  }
  0xf6   :  { %5251 = vmatprep.mubr.msk.bf16.mxu0 %vm474_vm0, %v6045_v16  ;;  %v6067_v16 = vld [vmem:[%s11529_s7 + $0x30] sm:$0xff]  }
  0xf7   :  { %v623_v21 = vpop.f32.mrf.mxu0 }
  0xf9   :  { %v6460_v22 = vpop.f32.mrf.mxu0 }
  0xfa   :  { %11715 = vst [vmem:[#allocation2_spill] sm:$0xff] %v6460_v22 }
  0xfb   :  { %v626_v26 = vpop.f32.mrf.mxu0 }
  0xfd   :  { %v6475_v28 = vpop.f32.mrf.mxu0  ;;  %820 = vmatmul.mubr.bf16.gmra.mxu0 %v6047_v23  ;;  %v6068_v23 = vld [vmem:[%s11529_s7 + $0x38] sm:$0xff]  }
  0xfe   :  { %11716 = vst [vmem:[#allocation3_spill] sm:$0xff] %v6475_v28  ;;  %5252 = vmatprep.mubr.msk.bf16.mxu0 %vm474_vm0, %v6048_v24  ;;  %v6069_v24 = vld [vmem:[%s11529_s7 + $0x40] sm:$0xff]  }
  0xff   :  { %v631_v29 = vpop.f32.mrf.mxu0 }
 0x101   :  { %v6479_v30 = vpop.f32.mrf.mxu0 }
 0x102   :  { %11717 = vst [vmem:[#allocation4_spill] sm:$0xff] %v6479_v30 }
 0x103   :  { %v634_v34 = vpop.f32.mrf.mxu0 }
 0x105   :  { %v6494_v36 = vpop.f32.mrf.mxu0  ;;  %828 = vmatmul.mubr.bf16.gmra.mxu0 %v6050_v31  ;;  %v6070_v31 = vld [vmem:[%s11529_s7 + $0x48] sm:$0xff]  }
 0x106   :  { %11718 = vst [vmem:[#allocation5_spill] sm:$0xff] %v6494_v36  ;;  %5253 = vmatprep.mubr.msk.bf16.mxu0 %vm474_vm0, %v6051_v32  ;;  %v6071_v32 = vld [vmem:[%s11529_s7 + $0x50] sm:$0xff]  }
 0x107   :  { %v639_v37 = vpop.f32.mrf.mxu0 }
 0x109   :  { %v6498_v38 = vpop.f32.mrf.mxu0 }
 0x10a   :  { %11719 = vst [vmem:[#allocation6_spill] sm:$0xff] %v6498_v38 }
 0x10b   :  { %v642_v42 = vpop.f32.mrf.mxu0 }
 0x10d   :  { %v6513_v44 = vpop.f32.mrf.mxu0  ;;  %836 = vmatmul.mubr.bf16.gmra.mxu0 %v6053_v39  ;;  %v6072_v39 = vld [vmem:[%s11529_s7 + $0x58] sm:$0xff]  }
 0x10e   :  { %11720 = vst [vmem:[#allocation7_spill] sm:$0xff] %v6513_v44  ;;  %5254 = vmatprep.mubr.msk.bf16.mxu0 %vm474_vm0, %v6054_v40  ;;  %v6093_v40 = vld [vmem:[%s11530_s4] sm:$0xff]  }
 0x10f   :  { %v647_v45 = vpop.f32.mrf.mxu0  ;;  %5814 = vmatprep.subr.bf16.mxu1 %v6093_v40 }
 0x110   :  { %5815 = vmatpush3.bf16.msra.mxu1 %v6093_v40 }
 0x111   :  { %v6517_v46 = vpop.f32.mrf.mxu0 }
 0x112   :  { %11721 = vst [vmem:[#allocation8_spill] sm:$0xff] %v6517_v46 }
 0x113   :  { %v650_v50 = vpop.f32.mrf.mxu0 }
 0x115   :  { %v6532_v52 = vpop.f32.mrf.mxu0  ;;  %844 = vmatmul.mubr.bf16.gmra.mxu0 %v6056_v47 }
 0x116   :  { %11722 = vst [vmem:[#allocation9_spill] sm:$0xff] %v6532_v52  ;;  %5255 = vmatprep.mubr.msk.bf16.mxu0 %vm474_vm0, %v6058_v48 }
 0x117   :  { %v655_v53 = vpop.f32.mrf.mxu0 }
 0x119   :  { %v6536_v54 = vpop.f32.mrf.mxu0 }
 0x11a   :  { %11723 = vst [vmem:[#allocation10_spill] sm:$0xff] %v6536_v54 }
 0x11b   :  { %v658_v58 = vpop.f32.mrf.mxu0 }
 0x11d   :  { %v6551_v60 = vpop.f32.mrf.mxu0  ;;  %852 = vmatmul.mubr.bf16.gmra.mxu0 %v6060_v55 }
 0x11e   :  { %11724 = vst [vmem:[#allocation11_spill] sm:$0xff] %v6551_v60  ;;  %5750 = vmatprep.mubr.msk.bf16.mxu0 %vm474_vm0, %v6061_v56 }
 0x11f   :  { %v663_v61 = vpop.f32.mrf.mxu0 }
 0x120   :  { %v863_v61 = vsel %vm474_vm0, %v6422_v6, 0.0 }
 0x121   :  { %v6555_v62 = vpop.f32.mrf.mxu0 }
 0x122   :  { %11725 = vst [vmem:[#allocation12_spill] sm:$0xff] %v6555_v62 }
 0x123   :  { %v666_v1 = vpop.f32.mrf.mxu0 }
 0x124   :  { %v862_v1 = vsel %vm474_vm0, %v6418_v4, 0.0 }
 0x125   :  { %v6563_v2 = vpop.f32.mrf.mxu0  ;;  %5751 = vmatmul.mubr.msk.bf16.vlgmr.msra.gmra.mxu0 %vm474_vm0, %v6062_v63  ;;  %v997_v63 = vmul.f32 %v6437_v12, %v6437_v12 }
 0x126   :  { %11726 = vst [vmem:[#allocation13_spill] sm:$0xff] %v6563_v2  ;;  %5754 = vmatprep.mubr.msk.bf16.mxu0 %vm474_vm0, %v6063_v0 }
 0x127   :  { %v671_v3 = vpop.f32.mrf.mxu0 }
 0x128   :  { %v1060_v3 = vsel %vm474_vm0, %v996_v57, 0.0  ;;  %v873_v57 = vsel %vm474_vm0, %v6475_v28, 0.0 }
 0x129   :  { %v6567_v5 = vpop.f32.mrf.mxu0 }
 0x12a   :  { %11727 = vst [vmem:[#allocation14_spill] sm:$0xff] %v6567_v5 }
 0x12b   :  { %v674_v9 = vpop.f32.mrf.mxu0 }
 0x12c   :  { %v864_v9 = vadd.f32 %v863_v61, %v862_v1 }
 0x12d   :  { %v6575_v10 = vpop.f32.mrf.mxu0  ;;  %5755 = vmatmul.mubr.msk.bf16.gmra.mxu0 %vm474_vm0, %v6064_v7  ;;  %v865_v7 = vsel %vm474_vm0, %v6437_v12, 0.0 }
 0x12e   :  { %11728 = vst [vmem:[#allocation15_spill] sm:$0xff] %v6575_v10  ;;  %5758 = vmatprep.mubr.msk.bf16.mxu0 %vm474_vm0, %v6065_v8  ;;  %v998_v8 = vmul.f32 %v6441_v14, %v6441_v14 }
 0x12f   :  { %v679_v11 = vpop.f32.mrf.mxu0 }
 0x131   :  { %v6579_v13 = vpop.f32.mrf.mxu0 }
 0x132   :  { %11729 = vst [vmem:[#allocation16_spill] sm:$0xff] %v6579_v13 }
 0x133   :  { %v682_v17 = vpop.f32.mrf.mxu0 }
 0x134   :  { %v867_v17 = vsel %vm474_vm0, %v6441_v14, 0.0 }
 0x135   :  { %v6587_v18 = vpop.f32.mrf.mxu0  ;;  %5759 = vmatmul.mubr.msk.bf16.gmra.mxu0 %vm474_vm0, %v6066_v15  ;;  %v1059_v15 = vsel %vm474_vm0, %v995_v59, 0.0 }
 0x136   :  { %11730 = vst [vmem:[#allocation17_spill] sm:$0xff] %v6587_v18  ;;  %5762 = vmatprep.mubr.msk.bf16.mxu0 %vm474_vm0, %v6067_v16  ;;  %v1062_v16 = vsel %vm474_vm0, %v997_v63, 0.0 }
 0x137   :  { %v687_v19 = vpop.f32.mrf.mxu0 }
 0x138   :  { %v999_v19 = vmul.f32 %v6456_v20, %v6456_v20 }
 0x139   :  { %v6591_v21 = vpop.f32.mrf.mxu0 }
 0x13a   :  { %11731 = vst [vmem:[#allocation18_spill] sm:$0xff] %v6591_v21  ;;  %v1066_v40 = vsel %vm474_vm0, %v999_v19, 0.0 }
 0x13b   :  { %v690_v25 = vpop.f32.mrf.mxu0 }
 0x13d   :  { %v6599_v26 = vpop.f32.mrf.mxu0  ;;  %5763 = vmatmul.mubr.msk.bf16.gmra.mxu0 %vm474_vm0, %v6068_v23  ;;  %v1061_v23 = vadd.f32 %v1060_v3, %v1059_v15  ;;  %v875_v3 = vsel %vm474_vm0, %v6479_v30, 0.0 }
 0x13e   :  { %11732 = vst [vmem:[#allocation19_spill] sm:$0xff] %v6599_v26  ;;  %5766 = vmatprep.mubr.msk.bf16.mxu0 %vm474_vm0, %v6069_v24  ;;  %v866_v24 = vadd.f32 %v865_v7, %v864_v9  ;;  %v1003_v7 = vmul.f32 %v6494_v36, %v6494_v36 }
 0x13f   :  { %v695_v27 = vpop.f32.mrf.mxu0 }
 0x140   :  { %v1064_v27 = vsel %vm474_vm0, %v998_v8, 0.0 }
 0x141   :  { %v6603_v29 = vpop.f32.mrf.mxu0 }
 0x142   :  { %11733 = vst [vmem:[#allocation20_spill] sm:$0xff] %v6603_v29 }
 0x143   :  { %v698_v33 = vpop.f32.mrf.mxu0 }
 0x144   :  { %v1063_v33 = vadd.f32 %v1062_v16, %v1061_v23  ;;  %v877_v16 = vsel %vm474_vm0, %v6494_v36, 0.0 }
 0x145   :  { %v6611_v34 = vpop.f32.mrf.mxu0  ;;  %5767 = vmatmul.mubr.msk.bf16.gmra.mxu0 %vm474_vm0, %v6070_v31  ;;  %v869_v31 = vsel %vm474_vm0, %v6456_v20, 0.0 }
 0x146   :  { %11734 = vst [vmem:[#allocation21_spill] sm:$0xff] %v6611_v34  ;;  %5770 = vmatprep.mubr.msk.bf16.mxu0 %vm474_vm0, %v6071_v32  ;;  %v1000_v32 = vmul.f32 %v6460_v22, %v6460_v22 }
 0x147   :  { %v703_v35 = vpop.f32.mrf.mxu0 }
 0x148   :  { %v868_v35 = vadd.f32 %v867_v17, %v866_v24  ;;  %v1004_v17 = vmul.f32 %v6498_v38, %v6498_v38 }
 0x149   :  { %v6615_v37 = vpop.f32.mrf.mxu0 }
 0x14a   :  { %11735 = vst [vmem:[#allocation22_spill] sm:$0xff] %v6615_v37 }
 0x14b   :  { %v706_v41 = vpop.f32.mrf.mxu0 }
 0x14c   :  { %v871_v41 = vsel %vm474_vm0, %v6460_v22, 0.0 }
 0x14d   :  { %v6623_v42 = vpop.f32.mrf.mxu0  ;;  %5771 = vmatmul.mubr.msk.bf16.gmra.mxu0 %vm474_vm0, %v6072_v39 }
 0x14e   :  { %11736 = vst [vmem:[#allocation23_spill] sm:$0xff] %v6623_v42 }
 0x14f   :  { %v711_v43 = vpop.f32.mrf.mxu0 }
 0x150   :  { %v1001_v43 = vmul.f32 %v6475_v28, %v6475_v28 }
 0x151   :  { %v6626_v45 = vpop.f32.mrf.mxu0 }
 0x152   :  { %11737 = vst [vmem:[#allocation24_spill] sm:$0xff] %v6626_v45  ;;  %v1070_v1 = vsel %vm474_vm0, %v1001_v43, 0.0  ;;  %v1006_v43 = vmul.f32 %v6517_v46, %v6517_v46 }
 0x153   :  { %v714_v47 = vpop.f32.mrf.mxu0 }
 0x154   :  { %v1065_v47 = vadd.f32 %v1064_v27, %v1063_v33  ;;  %v1074_v27 = vsel %vm474_vm0, %v1003_v7, 0.0  ;;  %v885_v7 = vsel %vm474_vm0, %v6532_v52, 0.0 }
 0x155   :  { %v6628_v48 = vpop.f32.mrf.mxu0 }
 0x156   :  { %11738 = vst [vmem:[#allocation25_spill] sm:$0xff] %v6628_v48  ;;  %v1067_v59 = vadd.f32 %v1066_v40, %v1065_v47  ;;  %v1076_v40 = vsel %vm474_vm0, %v1004_v17, 0.0 }
 0x157   :  { %v719_v49 = vpop.f32.mrf.mxu0 }
 0x158   :  { %v870_v49 = vadd.f32 %v869_v31, %v868_v35  ;;  %v879_v31 = vsel %vm474_vm0, %v6498_v38, 0.0 }
 0x159   :  { %v6630_v50 = vpop.f32.mrf.mxu0 }
 0x15a   :  { %11739 = vst [vmem:[#allocation26_spill] sm:$0xff] %v6630_v50  ;;  %v872_v61 = vadd.f32 %v871_v41, %v870_v49  ;;  %v881_v41 = vsel %vm474_vm0, %v6513_v44, 0.0 }
 0x15b   :  { %v722_v51 = vpop.f32.mrf.mxu0 }
 0x15c   :  { %v874_v9 = vadd.f32 %v873_v57, %v872_v61 }
 0x15d   :  { %v6632_v53 = vpop.f32.mrf.mxu0 }
 0x15e   :  { %11740 = vst [vmem:[#allocation27_spill] sm:$0xff] %v6632_v53  ;;  %v876_v23 = vadd.f32 %v875_v3, %v874_v9  ;;  %v1080_v3 = vsel %vm474_vm0, %v1006_v43, 0.0 }
 0x15f   :  { %v727_v55 = vpop.f32.mrf.mxu0 }
 0x160   :  { %v1068_v55 = vsel %vm474_vm0, %v1000_v32, 0.0  ;;  %v1005_v32 = vmul.f32 %v6513_v44, %v6513_v44  ;;  %v878_v35 = vadd.f32 %v877_v16, %v876_v23  ;;  %v1009_v23 = vmul.f32 %v6551_v60, %v6551_v60 }
 0x161   :  { %v6634_v56 = vpop.f32.mrf.mxu0  ;;  %v1069_v8 = vadd.f32 %v1068_v55, %v1067_v59  ;;  %v1007_v59 = vmul.f32 %v6532_v52, %v6532_v52 }
 0x162   :  { %11741 = vst [vmem:[#allocation28_spill] sm:$0xff] %v6634_v56  ;;  %v880_v49 = vadd.f32 %v879_v31, %v878_v35  ;;  %v1078_v57 = vsel %vm474_vm0, %v1005_v32, 0.0  ;;  %v1010_v35 = vmul.f32 %v6555_v62, %v6555_v62 }
 0x163   :  { %v730_v58 = vpop.f32.mrf.mxu0  ;;  %v1071_v19 = vadd.f32 %v1070_v1, %v1069_v8  ;;  %v1008_v8 = vmul.f32 %v6536_v54, %v6536_v54  ;;  %v1082_v17 = vsel %vm474_vm0, %v1007_v59, 0.0 }
 0x164   :  { %v1002_v58 = vmul.f32 %v6479_v30, %v6479_v30 }
 0x165   :  { %v6644_v0 = vpop.f32.mrf.mxu0  ;;  %v1084_v32 = vsel %vm474_vm0, %v1008_v8, 0.0 }
 0x166   :  { %11742 = vst [vmem:[#allocation29_spill] sm:$0xff] %v6644_v0  ;;  %v1072_v15 = vsel %vm474_vm0, %v1002_v58, 0.0  ;;  %v883_v58 = vsel %vm474_vm0, %v6517_v46, 0.0 }
 0x167   :  { %v735_v11 = vpop.f32.mrf.mxu0  ;;  %v1073_v33 = vadd.f32 %v1072_v15, %v1071_v19  ;;  %v887_v19 = vsel %vm474_vm0, %v6536_v54, 0.0 }
 0x169   :  { %v6659_v25 = vpop.f32.mrf.mxu0  ;;  %v1075_v47 = vadd.f32 %v1074_v27, %v1073_v33  ;;  %v889_v33 = vsel %vm474_vm0, %v6551_v60, 0.0 }
 0x16a   :  { %11743 = vst [vmem:[#allocation30_spill] sm:$0xff] %v6659_v25 }
 0x16b   :  { %v738_v39 = vpop.f32.mrf.mxu0  ;;  %v1077_v61 = vadd.f32 %v1076_v40, %v1075_v47  ;;  %v1086_v47 = vsel %vm474_vm0, %v1009_v23, 0.0 }
 0x16d   :  { %v6671_v51 = vpop.f32.mrf.mxu0  ;;  %v1079_v9 = vadd.f32 %v1078_v57, %v1077_v61  ;;  %v1088_v61 = vsel %vm474_vm0, %v1010_v35, 0.0 }
 0x16f   :  { %v743_v63 = vpop.f32.mrf.mxu0 }
 0x170   :  { %v882_v63 = vadd.f32 %v881_v41, %v880_v49  ;;  %v891_v49 = vsel %vm474_vm0, %v6555_v62, 0.0 }
 0x171   :  { %v6683_v11 = vpop.f32.mrf.mxu0 }
 0x172   :  { %v884_v15 = vadd.f32 %v883_v58, %v882_v63  ;;  %v893_v63 = vsel %vm474_vm0, %v6563_v2, 0.0 }
 0x173   :  { %v746_v24 = vpop.f32.mrf.mxu0 }
 0x174   :  { %v1081_v24 = vadd.f32 %v1080_v3, %v1079_v9  ;;  %v886_v27 = vadd.f32 %v885_v7, %v884_v15  ;;  %v1012_v3 = vmul.f32 %v6567_v5, %v6567_v5 }
 0x175   :  { %v6695_v39 = vpop.f32.mrf.mxu0 }
 0x176   :  { %v1083_v40 = vadd.f32 %v1082_v17, %v1081_v24  ;;  %v888_v41 = vadd.f32 %v887_v19, %v886_v27  ;;  %v1013_v17 = vmul.f32 %v6575_v10, %v6575_v10  ;;  %v1092_v27 = vsel %vm474_vm0, %v1012_v3, 0.0 }
 0x177   :  { %v751_v55 = vpop.f32.mrf.mxu0  ;;  %v1016_v3 = vmul.f32 %v6591_v21, %v6591_v21 }
 0x178   :  { %v1011_v55 = vmul.f32 %v6563_v2, %v6563_v2  ;;  %v1085_v57 = vadd.f32 %v1084_v32, %v1083_v40  ;;  %v890_v58 = vadd.f32 %v889_v33, %v888_v41  ;;  %v897_v32 = vsel %vm474_vm0, %v6575_v10, 0.0 }
 0x179   :  { %v6707_v1 = vpop.f32.mrf.mxu0  ;;  %v1014_v33 = vmul.f32 %v6579_v13, %v6579_v13 }
 0x17a   :  { %v1087_v7 = vadd.f32 %v1086_v47, %v1085_v57  ;;  %v892_v8 = vadd.f32 %v891_v49, %v890_v58  ;;  %v1090_v15 = vsel %vm474_vm0, %v1011_v55, 0.0  ;;  %v899_v47 = vsel %vm474_vm0, %v6579_v13, 0.0 }
 0x17b   :  { %v754_v16 = vpop.f32.mrf.mxu0  ;;  %v1015_v49 = vmul.f32 %v6587_v18, %v6587_v18 }
 0x17c   :  { %v895_v16 = vsel %vm474_vm0, %v6567_v5, 0.0  ;;  %v1089_v19 = vadd.f32 %v1088_v61, %v1087_v7  ;;  %v894_v23 = vadd.f32 %v893_v63, %v892_v8  ;;  %v1096_v61 = vsel %vm474_vm0, %v1014_v33, 0.0 }
 0x17d   :  { %v6719_v31 = vpop.f32.mrf.mxu0  ;;  %v901_v63 = vsel %vm474_vm0, %v6587_v18, 0.0  ;;  %v905_v33 = vsel %vm474_vm0, %v6599_v26, 0.0 }
 0x17e   :  { %v1091_v35 = vadd.f32 %v1090_v15, %v1089_v19  ;;  %v896_v40 = vadd.f32 %v895_v16, %v894_v23  ;;  %v1098_v15 = vsel %vm474_vm0, %v1015_v49, 0.0  ;;  %v903_v16 = vsel %vm474_vm0, %v6591_v21, 0.0 }
 0x17f   :  { %v759_v43 = vpop.f32.mrf.mxu0  ;;  %v907_v49 = vsel %vm474_vm0, %v6603_v29, 0.0 }
 0x180   :  { %v1094_v43 = vsel %vm474_vm0, %v1013_v17, 0.0  ;;  %v1093_v55 = vadd.f32 %v1092_v27, %v1091_v35  ;;  %v898_v57 = vadd.f32 %v897_v32, %v896_v40  ;;  %v1017_v17 = vmul.f32 %v6599_v26, %v6599_v26 }
 0x181   :  { %v6731_v59 = vpop.f32.mrf.mxu0  ;;  %v1100_v32 = vsel %vm474_vm0, %v1016_v3, 0.0  ;;  %v1018_v35 = vmul.f32 %v6603_v29, %v6603_v29 }
 0x182   :  { %v1095_v7 = vadd.f32 %v1094_v43, %v1093_v55  ;;  %v900_v8 = vadd.f32 %v899_v47, %v898_v57  ;;  %v1102_v47 = vsel %vm474_vm0, %v1017_v17, 0.0  ;;  %v1019_v55 = vmul.f32 %v6611_v34, %v6611_v34 }
 0x183   :  { %v762_v9 = vpop.f32.mrf.mxu0  ;;  %v1104_v3 = vsel %vm474_vm0, %v1018_v35, 0.0 }
 0x184   :  { %v1097_v19 = vadd.f32 %v1096_v61, %v1095_v7  ;;  %v902_v23 = vadd.f32 %v901_v63, %v900_v8  ;;  %v909_v7 = vsel %vm474_vm0, %v6611_v34, 0.0  ;;  %v1020_v8 = vmul.f32 %v6615_v37, %v6615_v37 }
 0x185   :  { %v6743_v24 = vpop.f32.mrf.mxu0  ;;  %v1106_v17 = vsel %vm474_vm0, %v1019_v55, 0.0 }
 0x186   :  { %v1099_v40 = vadd.f32 %v1098_v15, %v1097_v19  ;;  %v911_v19 = vsel %vm474_vm0, %v6615_v37, 0.0 }
 0x187   :  { %v767_v41 = vpop.f32.mrf.mxu0 }
 0x188   :  { %v904_v41 = vadd.f32 %v903_v16, %v902_v23  ;;  %v1101_v57 = vadd.f32 %v1100_v32, %v1099_v40  ;;  %v1021_v23 = vmul.f32 %v6623_v42, %v6623_v42  ;;  %v1108_v40 = vsel %vm474_vm0, %v1020_v8, 0.0 }
 0x189   :  { %v6755_v58 = vpop.f32.mrf.mxu0 }
 0x18a   :  { %v906_v61 = vadd.f32 %v905_v33, %v904_v41  ;;  %v913_v41 = vsel %vm474_vm0, %v6623_v42, 0.0 }
 0x18b   :  { %v770_v9 = vpop.f32.mrf.mxu0 }
 0x18c   :  { %v1103_v9 = vadd.f32 %v1102_v47, %v1101_v57  ;;  %v908_v15 = vadd.f32 %v907_v49, %v906_v61  ;;  %v1110_v57 = vsel %vm474_vm0, %v1021_v23, 0.0  ;;  %v915_v61 = vsel %vm474_vm0, %v6626_v45, 0.0 }
 0x18d   :  { %v6767_v27 = vpop.f32.mrf.mxu0 }
 0x18e   :  { %v1105_v32 = vadd.f32 %v1104_v3, %v1103_v9  ;;  %v910_v33 = vadd.f32 %v909_v7, %v908_v15  ;;  %v1023_v3 = vmul.f32 %v6628_v48, %v6628_v48 }
 0x18f   :  { %v775_v43 = vpop.f32.mrf.mxu0 }
 0x190   :  { %v1022_v43 = vmul.f32 %v6626_v45, %v6626_v45  ;;  %v1107_v47 = vadd.f32 %v1106_v17, %v1105_v32  ;;  %v912_v49 = vadd.f32 %v911_v19, %v910_v33  ;;  %v1024_v17 = vmul.f32 %v6630_v50, %v6630_v50 }
 0x191   :  { %v6779_v63 = vpop.f32.mrf.mxu0  ;;  %v1114_v33 = vsel %vm474_vm0, %v1023_v3, 0.0  ;;  %v945_v45 = vsel %vm474_vm0, %v6767_v27, 0.0 }
 0x192   :  { %v1109_v7 = vadd.f32 %v1108_v40, %v1107_v47  ;;  %v914_v9 = vadd.f32 %v913_v41, %v912_v49  ;;  %v1112_v15 = vsel %vm474_vm0, %v1022_v43, 0.0  ;;  %v1025_v40 = vmul.f32 %v6632_v53, %v6632_v53 }
 0x193   :  { %v778_v16 = vpop.f32.mrf.mxu0  ;;  %v1116_v49 = vsel %vm474_vm0, %v1024_v17, 0.0 }
 0x194   :  { %v917_v16 = vsel %vm474_vm0, %v6628_v48, 0.0  ;;  %v1111_v19 = vadd.f32 %v1110_v57, %v1109_v7  ;;  %v916_v23 = vadd.f32 %v915_v61, %v914_v9  ;;  %v921_v48 = vsel %vm474_vm0, %v6632_v53, 0.0 }
 0x195   :  { %v6791_v35 = vpop.f32.mrf.mxu0  ;;  %v1026_v57 = vmul.f32 %v6634_v56, %v6634_v56  ;;  %v1118_v9 = vsel %vm474_vm0, %v1025_v40, 0.0  ;;  %v925_v53 = vsel %vm474_vm0, %v6644_v0, 0.0 }
 0x196   :  { %v1113_v41 = vadd.f32 %v1112_v15, %v1111_v19  ;;  %v918_v47 = vadd.f32 %v917_v16, %v916_v23  ;;  %v1027_v15 = vmul.f32 %v6644_v0, %v6644_v0  ;;  %v929_v0 = vsel %vm474_vm0, %v6671_v51, 0.0 }
 0x197   :  { %v783_v55 = vpop.f32.mrf.mxu0  ;;  %v1120_v23 = vsel %vm474_vm0, %v1026_v57, 0.0  ;;  %v949_v42 = vsel %vm474_vm0, %v6791_v35, 0.0 }
 0x198   :  { %v919_v55 = vsel %vm474_vm0, %v6630_v50, 0.0  ;;  %v1115_v61 = vadd.f32 %v1114_v33, %v1113_v41  ;;  %v1028_v33 = vmul.f32 %v6659_v25, %v6659_v25  ;;  %v941_v50 = vsel %vm474_vm0, %v6743_v24, 0.0 }
 0x199   :  { %v6803_v8 = vpop.f32.mrf.mxu0  ;;  %v920_v3 = vadd.f32 %v919_v55, %v918_v47  ;;  %v1122_v47 = vsel %vm474_vm0, %v1027_v15, 0.0 }
 0x19a   :  { %v1117_v16 = vadd.f32 %v1116_v49, %v1115_v61 }
 0x19b   :  { %v786_v32 = vpop.f32.mrf.mxu0  ;;  %v922_v19 = vadd.f32 %v921_v48, %v920_v3  ;;  %v1029_v48 = vmul.f32 %v6671_v51, %v6671_v51  ;;  %v1124_v3 = vsel %vm474_vm0, %v1028_v33, 0.0 }
 0x19c   :  { %v923_v32 = vsel %vm474_vm0, %v6634_v56, 0.0  ;;  %v1119_v55 = vadd.f32 %v1118_v9, %v1117_v16  ;;  %v1030_v9 = vmul.f32 %v6683_v11, %v6683_v11  ;;  %v937_v56 = vsel %vm474_vm0, %v6719_v31, 0.0 }
 0x19d   :  { %v6815_v43 = vpop.f32.mrf.mxu0  ;;  %v924_v40 = vadd.f32 %v923_v32, %v922_v19  ;;  %v1126_v19 = vsel %vm474_vm0, %v1029_v48, 0.0 }
 0x19e   :  { %v1121_v49 = vadd.f32 %v1120_v23, %v1119_v55  ;;  %v953_v37 = vsel %vm474_vm0, %v6815_v43, 0.0 }
 0x19f   :  { %v791_v7 = vpop.f32.mrf.mxu0  ;;  %v926_v61 = vadd.f32 %v925_v53, %v924_v40  ;;  %v1031_v53 = vmul.f32 %v6695_v39, %v6695_v39  ;;  %v1128_v40 = vsel %vm474_vm0, %v1030_v9, 0.0 }
 0x1a0   :  { %v927_v7 = vsel %vm474_vm0, %v6659_v25, 0.0  ;;  %v1123_v32 = vadd.f32 %v1122_v47, %v1121_v49  ;;  %v933_v25 = vsel %vm474_vm0, %v6695_v39, 0.0  ;;  %v1032_v47 = vmul.f32 %v6707_v1, %v6707_v1 }
 0x1a1   :  { %v6827_v17 = vpop.f32.mrf.mxu0  ;;  %v928_v15 = vadd.f32 %v927_v7, %v926_v61  ;;  %v1130_v61 = vsel %vm474_vm0, %v1031_v53, 0.0 }
 0x1a2   :  { %v1125_v23 = vadd.f32 %v1124_v3, %v1123_v32 }
 0x1a3   :  { %v794_v41 = vpop.f32.mrf.mxu0  ;;  %v930_v55 = vadd.f32 %v929_v0, %v928_v15  ;;  %v1033_v0 = vmul.f32 %v6719_v31, %v6719_v31  ;;  %v1132_v15 = vsel %vm474_vm0, %v1032_v47, 0.0 }
 0x1a4   :  { %v931_v41 = vsel %vm474_vm0, %v6683_v11, 0.0  ;;  %v1127_v7 = vadd.f32 %v1126_v19, %v1125_v23  ;;  %v1034_v19 = vmul.f32 %v6731_v59, %v6731_v59 }
 0x1a5   :  { %v6839_v57 = vpop.f32.mrf.mxu0  ;;  %v932_v48 = vadd.f32 %v931_v41, %v930_v55  ;;  %v1134_v55 = vsel %vm474_vm0, %v1033_v0, 0.0 }
 0x1a6   :  { %v1129_v3 = vadd.f32 %v1128_v40, %v1127_v7  ;;  %v957_v34 = vsel %vm474_vm0, %v6839_v57, 0.0 }
 0x1a7   :  { %v799_v16 = vpop.f32.mrf.mxu0  ;;  %v934_v32 = vadd.f32 %v933_v25, %v932_v48  ;;  %v1035_v25 = vmul.f32 %v6743_v24, %v6743_v24  ;;  %v1136_v48 = vsel %vm474_vm0, %v1034_v19, 0.0 }
 0x1a8   :  { %v935_v16 = vsel %vm474_vm0, %v6707_v1, 0.0  ;;  %v1131_v41 = vadd.f32 %v1130_v61, %v1129_v3  ;;  %v1036_v61 = vmul.f32 %v6755_v58, %v6755_v58 }
 0x1a9   :  { %v6851_v33 = vpop.f32.mrf.mxu0  ;;  %v936_v53 = vadd.f32 %v935_v16, %v934_v32  ;;  %v1138_v32 = vsel %vm474_vm0, %v1035_v25, 0.0 }
 0x1aa   :  { %v1133_v40 = vadd.f32 %v1132_v15, %v1131_v41 }
 0x1ab   :  { %v802_v49 = vpop.f32.mrf.mxu0  ;;  %v938_v7 = vadd.f32 %v937_v56, %v936_v53  ;;  %v1037_v56 = vmul.f32 %v6767_v27, %v6767_v27  ;;  %v1140_v53 = vsel %vm474_vm0, %v1036_v61, 0.0 }
 0x1ac   :  { %v939_v49 = vsel %vm474_vm0, %v6731_v59, 0.0  ;;  %v1135_v16 = vadd.f32 %v1134_v55, %v1133_v40  ;;  %v1038_v55 = vmul.f32 %v6779_v63, %v6779_v63 }
 0x1ad   :  { %v6863_v9 = vpop.f32.mrf.mxu0  ;;  %v940_v0 = vadd.f32 %v939_v49, %v938_v7  ;;  %v1142_v7 = vsel %vm474_vm0, %v1037_v56, 0.0 }
 0x1ae   :  { %v1137_v15 = vadd.f32 %v1136_v48, %v1135_v16  ;;  %v961_v29 = vsel %vm474_vm0, %v6863_v9, 0.0 }
 0x1af   :  { %v807_v23 = vpop.f32.mrf.mxu0  ;;  %v942_v41 = vadd.f32 %v941_v50, %v940_v0  ;;  %v1039_v50 = vmul.f32 %v6791_v35, %v6791_v35  ;;  %v1144_v0 = vsel %vm474_vm0, %v1038_v55, 0.0 }
 0x1b0   :  { %v943_v23 = vsel %vm474_vm0, %v6755_v58, 0.0  ;;  %v1139_v49 = vadd.f32 %v1138_v32, %v1137_v15  ;;  %v1040_v32 = vmul.f32 %v6803_v8, %v6803_v8 }
 0x1b1   :  { %v6875_v47 = vpop.f32.mrf.mxu0  ;;  %v944_v25 = vadd.f32 %v943_v23, %v942_v41  ;;  %v1146_v41 = vsel %vm474_vm0, %v1039_v50, 0.0 }
 0x1b2   :  { %v1141_v48 = vadd.f32 %v1140_v53, %v1139_v49 }
 0x1b3   :  { %v810_v3 = vpop.f32.mrf.mxu0  ;;  %v946_v16 = vadd.f32 %v945_v45, %v944_v25  ;;  %v1041_v45 = vmul.f32 %v6815_v43, %v6815_v43  ;;  %v1148_v25 = vsel %vm474_vm0, %v1040_v32, 0.0 }
 0x1b4   :  { %v947_v3 = vsel %vm474_vm0, %v6779_v63, 0.0  ;;  %v1143_v23 = vadd.f32 %v1142_v7, %v1141_v48  ;;  %v1042_v7 = vmul.f32 %v6827_v17, %v6827_v17 }
 0x1b5   :  { %v6887_v19 = vpop.f32.mrf.mxu0  ;;  %v948_v56 = vadd.f32 %v947_v3, %v946_v16  ;;  %v1150_v16 = vsel %vm474_vm0, %v1041_v45, 0.0 }
 0x1b6   :  { %v1145_v53 = vadd.f32 %v1144_v0, %v1143_v23  ;;  %v965_v26 = vsel %vm474_vm0, %v6887_v19, 0.0 }
 0x1b7   :  { %v815_v40 = vpop.f32.mrf.mxu0  ;;  %v950_v49 = vadd.f32 %v949_v42, %v948_v56  ;;  %v1043_v42 = vmul.f32 %v6839_v57, %v6839_v57  ;;  %v1152_v56 = vsel %vm474_vm0, %v1042_v7, 0.0 }
 0x1b8   :  { %v951_v40 = vsel %vm474_vm0, %v6803_v8, 0.0  ;;  %v1147_v3 = vadd.f32 %v1146_v41, %v1145_v53  ;;  %v1044_v41 = vmul.f32 %v6851_v33, %v6851_v33 }
 0x1b9   :  { %v6899_v61 = vpop.f32.mrf.mxu0  ;;  %v952_v50 = vadd.f32 %v951_v40, %v950_v49  ;;  %v1154_v49 = vsel %vm474_vm0, %v1043_v42, 0.0 }
 0x1ba   :  { %v1149_v0 = vadd.f32 %v1148_v25, %v1147_v3 }
 0x1bb   :  { %v818_v15 = vpop.f32.mrf.mxu0  ;;  %v954_v23 = vadd.f32 %v953_v37, %v952_v50  ;;  %v1045_v37 = vmul.f32 %v6863_v9, %v6863_v9  ;;  %v1156_v50 = vsel %vm474_vm0, %v1044_v41, 0.0 }
 0x1bc   :  { %v955_v15 = vsel %vm474_vm0, %v6827_v17, 0.0  ;;  %v1151_v40 = vadd.f32 %v1150_v16, %v1149_v0  ;;  %v1046_v16 = vmul.f32 %v6875_v47, %v6875_v47 }
 0x1bd   :  { %v6911_v55 = vpop.f32.mrf.mxu0  ;;  %v956_v45 = vadd.f32 %v955_v15, %v954_v23  ;;  %v1158_v23 = vsel %vm474_vm0, %v1045_v37, 0.0 }
 0x1be   :  { %v1153_v25 = vadd.f32 %v1152_v56, %v1151_v40  ;;  %v969_v21 = vsel %vm474_vm0, %v6911_v55, 0.0 }
 0x1bf   :  { %v823_v48 = vpop.f32.mrf.mxu0  ;;  %v958_v3 = vadd.f32 %v957_v34, %v956_v45  ;;  %v1047_v34 = vmul.f32 %v6887_v19, %v6887_v19  ;;  %v1160_v45 = vsel %vm474_vm0, %v1046_v16, 0.0 }
 0x1c0   :  { %v959_v48 = vsel %vm474_vm0, %v6851_v33, 0.0  ;;  %v1155_v15 = vadd.f32 %v1154_v49, %v1153_v25  ;;  %v1048_v49 = vmul.f32 %v6899_v61, %v6899_v61 }
 0x1c1   :  { %v6923_v32 = vpop.f32.mrf.mxu0  ;;  %v960_v42 = vadd.f32 %v959_v48, %v958_v3  ;;  %v1162_v3 = vsel %vm474_vm0, %v1047_v34, 0.0 }
 0x1c2   :  { %v1157_v56 = vadd.f32 %v1156_v50, %v1155_v15 }
 0x1c3   :  { %v826_v53 = vpop.f32.mrf.mxu0  ;;  %v962_v40 = vadd.f32 %v961_v29, %v960_v42  ;;  %v1049_v29 = vmul.f32 %v6911_v55, %v6911_v55  ;;  %v1164_v42 = vsel %vm474_vm0, %v1048_v49, 0.0 }
 0x1c4   :  { %v963_v53 = vsel %vm474_vm0, %v6875_v47, 0.0  ;;  %v1159_v48 = vadd.f32 %v1158_v23, %v1157_v56  ;;  %v1050_v23 = vmul.f32 %v6923_v32, %v6923_v32 }
 0x1c5   :  { %v6935_v7 = vpop.f32.mrf.mxu0  ;;  %v964_v37 = vadd.f32 %v963_v53, %v962_v40  ;;  %v1166_v40 = vsel %vm474_vm0, %v1049_v29, 0.0 }
 0x1c6   :  { %v1161_v50 = vadd.f32 %v1160_v45, %v1159_v48  ;;  %v973_v18 = vsel %vm474_vm0, %v6935_v7, 0.0 }
 0x1c7   :  { %v831_v0 = vpop.f32.mrf.mxu0  ;;  %v966_v15 = vadd.f32 %v965_v26, %v964_v37  ;;  %v1051_v26 = vmul.f32 %v6935_v7, %v6935_v7  ;;  %v1168_v37 = vsel %vm474_vm0, %v1050_v23, 0.0 }
 0x1c8   :  { %v967_v0 = vsel %vm474_vm0, %v6899_v61, 0.0  ;;  %v1163_v53 = vadd.f32 %v1162_v3, %v1161_v50 }
 0x1c9   :  { %v6947_v41 = vpop.f32.mrf.mxu0  ;;  %v968_v34 = vadd.f32 %v967_v0, %v966_v15  ;;  %v1170_v15 = vsel %vm474_vm0, %v1051_v26, 0.0 }
 0x1ca   :  { %v1165_v45 = vadd.f32 %v1164_v42, %v1163_v53  ;;  %v1052_v3 = vmul.f32 %v6947_v41, %v6947_v41 }
 0x1cb   :  { %v834_v25 = vpop.f32.mrf.mxu0  ;;  %v970_v48 = vadd.f32 %v969_v21, %v968_v34 }
 0x1cc   :  { %v971_v25 = vsel %vm474_vm0, %v6923_v32, 0.0  ;;  %v1167_v0 = vadd.f32 %v1166_v40, %v1165_v45  ;;  %v1172_v34 = vsel %vm474_vm0, %v1052_v3, 0.0 }
 0x1cd   :  { %v6959_v16 = vpop.f32.mrf.mxu0  ;;  %v972_v29 = vadd.f32 %v971_v25, %v970_v48 }
 0x1ce   :  { %v1053_v21 = vmul.f32 %v6959_v16, %v6959_v16  ;;  %v1169_v42 = vadd.f32 %v1168_v37, %v1167_v0  ;;  %v977_v13 = vsel %vm474_vm0, %v6959_v16, 0.0 }
 0x1cf   :  { %v839_v56 = vpop.f32.mrf.mxu0  ;;  %v974_v53 = vadd.f32 %v973_v18, %v972_v29 }
 0x1d0   :  { %v975_v56 = vsel %vm474_vm0, %v6947_v41, 0.0  ;;  %v1171_v25 = vadd.f32 %v1170_v15, %v1169_v42  ;;  %v1174_v48 = vsel %vm474_vm0, %v1053_v21, 0.0 }
 0x1d1   :  { %v6971_v49 = vpop.f32.mrf.mxu0  ;;  %v976_v26 = vadd.f32 %v975_v56, %v974_v53 }
 0x1d2   :  { %v1054_v40 = vmul.f32 %v6971_v49, %v6971_v49  ;;  %v1173_v37 = vadd.f32 %v1172_v34, %v1171_v25 }
 0x1d3   :  { %v842_v50 = vpop.f32.mrf.mxu0  ;;  %v978_v0 = vadd.f32 %v977_v13, %v976_v26 }
 0x1d4   :  { %v979_v50 = vsel %vm474_vm0, %v6971_v49, 0.0  ;;  %v1176_v29 = vsel %vm474_vm0, %v1054_v40, 0.0  ;;  %v1175_v56 = vadd.f32 %v1174_v48, %v1173_v37 }
 0x1d5   :  { %v6983_v23 = vpop.f32.mrf.mxu0  ;;  %v980_v21 = vadd.f32 %v979_v50, %v978_v0 }
 0x1d6   :  { %v1055_v18 = vmul.f32 %v6983_v23, %v6983_v23  ;;  %v981_v10 = vsel %vm474_vm0, %v6983_v23, 0.0  ;;  %v1177_v34 = vadd.f32 %v1176_v29, %v1175_v56 }
 0x1d7   :  { %v847_v45 = vpop.f32.mrf.mxu0  ;;  %v982_v13 = vadd.f32 %v981_v10, %v980_v21 }
 0x1d8   :  { %v1178_v53 = vsel %vm474_vm0, %v1055_v18, 0.0 }
 0x1d9   :  { %v6995_v3 = vpop.f32.mrf.mxu0  ;;  %v1179_v48 = vadd.f32 %v1178_v53, %v1177_v34 }
 0x1da   :  { %v1056_v15 = vmul.f32 %v6995_v3, %v6995_v3  ;;  %v983_v45 = vsel %vm474_vm0, %v6995_v3, 0.0 }
 0x1db   :  { %v850_v42 = vpop.f32.mrf.mxu0  ;;  %v984_v50 = vadd.f32 %v983_v45, %v982_v13 }
 0x1dc   :  { %v1180_v40 = vsel %vm474_vm0, %v1056_v15, 0.0 }
 0x1dd   :  { %v7005_v25 = vpop.f32.mrf.mxu0  ;;  %v1181_v0 = vadd.f32 %v1180_v40, %v1179_v48 }
 0x1de   :  { %v985_v26 = vsel %vm474_vm0, %v7005_v25, 0.0  ;;  %v1057_v5 = vmul.f32 %v7005_v25, %v7005_v25 }
 0x1df   :  { %v855_v37 = vpop.f32.mrf.mxu0  ;;  %v986_v42 = vadd.f32 %v985_v26, %v984_v50 }
 0x1e0   :  { %v1182_v18 = vsel %vm474_vm0, %v1057_v5, 0.0 }
 0x1e1   :  { %v7013_v2 = vpop.f32.mrf.mxu0  ;;  %v1183_v15 = vadd.f32 %v1182_v18, %v1181_v0 }
 0x1e2   :  { %v987_v10 = vsel %vm474_vm0, %v7013_v2, 0.0  ;;  %v1058_v29 = vmul.f32 %v7013_v2, %v7013_v2 }
 0x1e3   :  { %v988_v56 = vadd.f32 %v987_v10, %v986_v42  ;;  %v858_v21 = vpop.f32.mrf.mxu0 }
 0x1e4   :  { %v1184_v62 = vsel %vm474_vm0, %v1058_v29, 0.0 }
 0x1e5   :  { %v989_v53 = vrot.slane %v988_v56, 4  ;;  %v1185_v45 = vadd.f32 %v1184_v62, %v1183_v15  ;;  %v7020_v34 = vpop.f32.mrf.mxu0 }
 0x1e6   :  { %11744 = vst [vmem:[#allocation31_spill] sm:$0xff] %v7020_v34  ;;  %v2160_v10 = vmul.f32 %v7020_v34, %v7020_v34 }
 0x1e7   :  { %v990_v5 = vadd.f32 %v989_v53, %v988_v56  ;;  %v1186_v13 = vrot.slane %v1185_v45, 4  ;;  %v7022_v40 = vpop.f32.mrf.mxu0 }
 0x1e8   :  { %11745 = vst [vmem:[#allocation32_spill] sm:$0xff] %v7022_v40  ;;  %v2158_v50 = vmul.f32 %v7022_v40, %v7022_v40  ;;  %v2025_v18 = vsel %vm2024_vm1, %v7022_v40, 0.0  ;;  %v2225_v52 = vsel %vm2024_vm1, %v2160_v10, 0.0 }
 0x1e9   :  { %v991_v26 = vrot.slane %v990_v5, 2  ;;  %v1187_v48 = vadd.f32 %v1186_v13, %v1185_v45  ;;  %v7026_v37 = vpop.f32.mrf.mxu0 }
 0x1ea   :  { %11746 = vst [vmem:[#allocation33_spill] sm:$0xff] %v7026_v37  ;;  %v2222_v53 = vsel %vm2024_vm1, %v2158_v50, 0.0 }
 0x1eb   :  { %v992_v0 = vadd.f32 %v991_v26, %v990_v5  ;;  %v1188_v42 = vrot.slane %v1187_v48, 2  ;;  %v7030_v62 = vpop.f32.mrf.mxu0  ;;  %v2028_v5 = vsel %vm2024_vm1, %v7020_v34, 0.0 }
 0x1ec   :  { %11747 = vst [vmem:[#allocation34_spill] sm:$0xff] %v7030_v62  ;;  %v2026_v29 = vsel %vm2024_vm1, %v7030_v62, 0.0  ;;  %v2159_v15 = vmul.f32 %v7030_v62, %v7030_v62 }
 0x1ed   :  { %v993_v56 = vrot.slane %v992_v0, 1  ;;  %v1189_v21 = vadd.f32 %v1188_v42, %v1187_v48  ;;  %v2027_v45 = vadd.f32 %v2026_v29, %v2025_v18  ;;  %v7039_v13 = vpop.f32.mrf.mxu0  ;;  %v2161_v48 = vmul.f32 %v7026_v37, %v7026_v37  ;;  %v7053_v29 = vpop.f32.mrf.mxu1 }
 0x1ee   :  { %11748 = vst [vmem:[#allocation35_spill] sm:$0xff] %v7039_v13  ;;  %v2223_v26 = vsel %vm2024_vm1, %v2159_v15, 0.0  ;;  %v2030_v18 = vsel %vm2024_vm1, %v7026_v37, 0.0  ;;  %11751 = vst [vmem:[#allocation38_spill] sm:$0xff] %v7053_v29 }
 0x1ef   :  { %v994_v40 = vadd.f32 %v993_v56, %v992_v0  ;;  %v1190_v60 = vrot.slane %v1189_v21, 1  ;;  %v7044_v54 = vpop.f32.mrf.mxu0  ;;  %v2224_v46 = vadd.f32 %v2223_v26, %v2222_v53  ;;  %v2029_v50 = vadd.f32 %v2028_v5, %v2027_v45  ;;  %v7062_v45 = vpop.f32.mrf.mxu1 }
 0x1f0   :  { %11749 = vst [vmem:[#allocation36_spill] sm:$0xff] %v7044_v54  ;;  %v2227_v10 = vsel %vm2024_vm1, %v2161_v48, 0.0  ;;  %11753 = vst [vmem:[#allocation40_spill] sm:$0xff] %v7062_v45 }
 0x1f1   :  { %v1191_v62 = vadd.f32 %v1190_v60, %v1189_v21  ;;  %v1192_v44 = vmul.f32 0.001953125, %v994_v40  ;;  %v7051_v42 = vpop.f32.mrf.mxu0  ;;  %v2226_v56 = vadd.f32 %v2225_v52, %v2224_v46  ;;  %v2031_v53 = vadd.f32 %v2030_v18, %v2029_v50  ;;  %v7071_v18 = vpop.f32.mrf.mxu1 }
 0x1f2   :  { %11750 = vst [vmem:[#allocation37_spill] sm:$0xff] %v7051_v42  ;;  %v2162_v60 = vmul.f32 %v7044_v54, %v7044_v54  ;;  %v2032_v40 = vsel %vm2024_vm1, %v7044_v54, 0.0  ;;  %11755 = vst [vmem:[#allocation42_spill] sm:$0xff] %v7071_v18 }
 0x1f3   :  { %v1193_v0 = vmul.f32 0.001953125, %v1191_v62  ;;  %v1194_v15 = vmul.f32 %v1192_v44, %v1192_v44  ;;  %v7060_v21 = vpop.f32.mrf.mxu0  ;;  %v2228_v26 = vadd.f32 %v2227_v10, %v2226_v56  ;;  %v2033_v62 = vadd.f32 %v2032_v40, %v2031_v53  ;;  %v7080_v40 = vpop.f32.mrf.mxu1 }
 0x1f4   :  { %11752 = vst [vmem:[#allocation39_spill] sm:$0xff] %v7060_v21  ;;  %v2229_v46 = vsel %vm2024_vm1, %v2162_v60, 0.0  ;;  %v2163_v52 = vmul.f32 %v7060_v21, %v7060_v21  ;;  %v2034_v48 = vsel %vm2024_vm1, %v7060_v21, 0.0  ;;  %v2036_v53 = vsel %vm2024_vm1, %v7039_v13, 0.0  ;;  %11757 = vst [vmem:[#allocation44_spill] sm:$0xff] %v7080_v40 }
 0x1f5   :  { %v1195_v34 = vsub.f32 %v1193_v0, %v1194_v15  ;;  %v7069_v50 = vpop.f32.mrf.mxu0  ;;  %v2230_v0 = vadd.f32 %v2229_v46, %v2228_v26  ;;  %v1202_v15 = vlaneseq  ;;  %v2035_v56 = vadd.f32 %v2034_v48, %v2033_v62 }
 0x1f6   :  { %11754 = vst [vmem:[#allocation41_spill] sm:$0xff] %v7069_v50  ;;  %v2231_v10 = vsel %vm2024_vm1, %v2163_v52, 0.0  ;;  %v2165_v26 = vmul.f32 %v7051_v42, %v7051_v42  ;;  %v2038_v62 = vsel %vm2024_vm1, %v7051_v42, 0.0  ;;  %v7089_v52 = vpop.f32.mrf.mxu1 }
 0x1f7   :  { %v1196_v5 = vadd.f32 1e-05, %v1195_v34  ;;  %v2164_v34 = vmul.f32 %v7039_v13, %v7039_v13  ;;  %v7078_v60 = vpop.f32.mrf.mxu0  ;;  %v1203_v54 = vshrl.u32 %v1202_v15, 7  ;;  %v2037_v46 = vadd.f32 %v2036_v53, %v2035_v56  ;;  %11759 = vst [vmem:[#allocation46_spill] sm:$0xff] %v7089_v52  ;;  %v860_v13 = vld [vmem:[%s11531_s2] sm:$0x1] }
 0x1f8   :  { %11756 = vst [vmem:[#allocation43_spill] sm:$0xff] %v7078_v60  ;;  %v2040_v53 = vsel %vm2024_vm1, %v7078_v60, 0.0  ;;  %v7103_v38 = vpop.f32.mrf.mxu1 }
 0x1f9   :  { %6098 = vrsqrt.f32 %v1196_v5  ;;  %v2232_v5 = vadd.f32 %v2231_v10, %v2230_v0  ;;  %v2233_v37 = vsel %vm2024_vm1, %v2164_v34, 0.0  ;;  %v7087_v48 = vpop.f32.mrf.mxu0  ;;  %v2166_v0 = vmul.f32 %v7078_v60, %v7078_v60  ;;  %11762 = vst [vmem:[#allocation49_spill] sm:$0xff] %v7103_v38 }
 0x1fa   :  { %11758 = vst [vmem:[#allocation45_spill] sm:$0xff] %v7087_v48  ;;  %v7096_v15 = vsub.s32 0, %v1203_v54  ;;  %v2235_v34 = vsel %vm2024_vm1, %v2165_v26, 0.0  ;;  %v2039_v56 = vadd.f32 %v2038_v62, %v2037_v46 }
 0x1fb   :  { %v2234_v21 = vadd.f32 %v2233_v37, %v2232_v5  ;;  %v7101_v42 = vpop.f32.mrf.mxu0  ;;  %v861_v37 = vld [vmem:[%s11532_s3] sm:$0x1]  ;;  %v2237_v54 = vsel %vm2024_vm1, %v2166_v0, 0.0 }
 0x1fc   :  { %11760 = vst [vmem:[#allocation47_spill] sm:$0xff] %v7096_v15  ;;  %11761 = vst [vmem:[#allocation48_spill] sm:$0xff] %v7101_v42  ;;  %v2041_v46 = vadd.f32 %v2040_v53, %v2039_v56  ;;  %v2167_v62 = vmul.f32 %v7101_v42, %v7101_v42  ;;  %v2042_v60 = vsel %vm2024_vm1, %v7101_v42, 0.0  ;;  %v2044_v53 = vsel %vm2024_vm1, %v7069_v50, 0.0 }
 0x1fd   :  { %v2236_v5 = vadd.f32 %v2235_v34, %v2234_v21  ;;  %v7116_v28 = vpop.f32.mrf.mxu0 }
 0x1fe   :  { %11764 = vst [vmem:[#allocation51_spill] sm:$0xff] %v7116_v28  ;;  %v2043_v34 = vadd.f32 %v2042_v60, %v2041_v46  ;;  %v2239_v56 = vsel %vm2024_vm1, %v2167_v62, 0.0  ;;  %v2046_v60 = vsel %vm2024_vm1, %v7087_v48, 0.0  ;;  %v2184_v62 = vmul.f32 %v7053_v29, %v7053_v29 }
 0x1ff   :  { %v2238_v0 = vadd.f32 %v2237_v54, %v2236_v5  ;;  %v7130_v42 = vpop.f32.mrf.mxu0  ;;  %v2169_v5 = vmul.f32 %v7087_v48, %v7087_v48 }
 0x200   :  { %11767 = vst [vmem:[#allocation54_spill] sm:$0xff] %v7130_v42  ;;  %v2045_v54 = vadd.f32 %v2044_v53, %v2043_v34  ;;  %v7154_v34 = vsel %vm2024_vm1, %v7053_v29, 0.0  ;;  %v2185_v53 = vmul.f32 %v7071_v18, %v7071_v18 }
 0x201   :  { %v7142_v46 = vpop.f32.mrf.mxu0  ;;  %11772 = vst [vmem:[#allocation59_spill] sm:$0xff] %v7154_v34  ;;  %v2243_v48 = vsel %vm2024_vm1, %v2169_v5, 0.0  ;;  %v2186_v5 = vmul.f32 %v7103_v38, %v7103_v38 }
 0x202   :  { %11770 = vst [vmem:[#allocation57_spill] sm:$0xff] %v7142_v46 }
 0x203   :  { %v7169_v29 = vpop.f32.mrf.mxu0 }
 0x204   :  { %11774 = vst [vmem:[#allocation61_spill] sm:$0xff] %v7169_v29 }
 0x206   :  { %v6099_v10 = vpop.eup %6098 }
 0x207   :  { %v1198_v36 = vmul.f32 %v6099_v10, %v860_v13  ;;  %v7118_v13 = vpop.f32.mrf.mxu1 }
 0x208   :  { %11765 = vst [vmem:[#allocation52_spill] sm:$0xff] %v7118_v13 }
 0x209   :  { %v1199_v30 = vmul.f32 %v1198_v36, %v1192_v44  ;;  %v7110_v26 = vrot.slane %v1198_v36, %v7096_v15  ;;  %v2168_v36 = vmul.f32 %v7069_v50, %v7069_v50  ;;  %v7132_v22 = vpop.f32.mrf.mxu1  ;;  %v2047_v50 = vadd.f32 %v2046_v60, %v2045_v54 }
 0x20a   :  { %11768 = vst [vmem:[#allocation55_spill] sm:$0xff] %v7132_v22  ;;  %v7183_v60 = vsel %vm2024_vm1, %v7071_v18, 0.0  ;;  %v7203_v18 = vsel %vm2024_vm1, %v7103_v38, 0.0  ;;  %v7247_v38 = vmul.f32 %v7116_v28, %v7116_v28 }
 0x20b   :  { %11763 = vst [vmem:[#allocation50_spill] sm:$0xff] %v7110_v26  ;;  %v1200_v10 = vsub.f32 %v861_v37, %v1199_v30  ;;  %v1270_v21 = vmul.f32 %v7110_v26, %v7013_v2  ;;  %v2240_v2 = vadd.f32 %v2239_v56, %v2238_v0  ;;  %v2241_v37 = vsel %vm2024_vm1, %v2168_v36, 0.0  ;;  %11778 = vst [vmem:[#allocation65_spill] sm:$0xff] %v7183_v60 }
 0x20c   :  { %v2183_v0 = vmul.f32 %v7080_v40, %v7080_v40  ;;  %v7158_v56 = vsel %vm2024_vm1, %v7062_v45, 0.0  ;;  %11782 = vst [vmem:[#allocation69_spill] sm:$0xff] %v7203_v18  ;;  %v11825_v18 = vld [vmem:[#allocation9_spill] sm:$0xff] }
 0x20d   :  { %v7123_v44 = vrot.slane %v1200_v10, %v7096_v15  ;;  %v2182_v10 = vmul.f32 %v7062_v45, %v7062_v45  ;;  %v2242_v36 = vadd.f32 %v2241_v37, %v2240_v2  ;;  %11773 = vst [vmem:[#allocation60_spill] sm:$0xff] %v7158_v56  ;;  %v2170_v15 = vmul.f32 %v7130_v42, %v7130_v42 }
 0x20e   :  { %v2188_v2 = vmul.f32 %v7089_v52, %v7089_v52  ;;  %v2048_v37 = vsel %vm2024_vm1, %v7130_v42, 0.0  ;;  %v7172_v45 = vsel %vm2024_vm1, %v2184_v62, 0.0  ;;  %v7187_v42 = vsel %vm2024_vm1, %v7080_v40, 0.0 }
 0x20f   :  { %11766 = vst [vmem:[#allocation53_spill] sm:$0xff] %v7123_v44  ;;  %v7135_v30 = vadd.f32 %v7123_v44, %v1270_v21  ;;  %v7148_v21 = vpop.f32.mrf.mxu1  ;;  %11775 = vst [vmem:[#allocation62_spill] sm:$0xff] %v7172_v45  ;;  %v7175_v34 = vsel %vm2024_vm1, %v2182_v10, 0.0  ;;  %v7190_v56 = vsel %vm2024_vm1, %v2183_v0, 0.0  ;;  %v2187_v62 = vmul.f32 %v7132_v22, %v7132_v22 }
 0x210   :  { %11771 = vst [vmem:[#allocation58_spill] sm:$0xff] %v7148_v21  ;;  %11776 = vst [vmem:[#allocation63_spill] sm:$0xff] %v7175_v34  ;;  %v2244_v10 = vadd.f32 %v2243_v48, %v2242_v36  ;;  %v7195_v45 = vsel %vm2024_vm1, %v2185_v53, 0.0  ;;  %v7199_v34 = vsel %vm2024_vm1, %v7089_v52, 0.0  ;;  %v2049_v40 = vadd.f32 %v2048_v37, %v2047_v50 }
 0x211   :  { %11769 = vst [vmem:[#allocation56_spill] sm:$0xff] %v7135_v30  ;;  %v7179_v54 = vpop.f32.mrf.mxu1  ;;  %11779 = vst [vmem:[#allocation66_spill] sm:$0xff] %v7190_v56  ;;  %v2245_v60 = vsel %vm2024_vm1, %v2170_v15, 0.0  ;;  %v2171_v0 = vmul.f32 %v7169_v29, %v7169_v29  ;;  %v7209_v56 = vsel %vm2024_vm1, %v2188_v2, 0.0  ;;  %v2050_v48 = vsel %vm2024_vm1, %v7169_v29, 0.0 }
 0x212   :  { %11777 = vst [vmem:[#allocation64_spill] sm:$0xff] %v7179_v54  ;;  %11780 = vst [vmem:[#allocation67_spill] sm:$0xff] %v7195_v45  ;;  %v7214_v36 = vsel %vm2024_vm1, %v2186_v5, 0.0  ;;  %v7218_v53 = vsel %vm2024_vm1, %v7118_v13, 0.0  ;;  %v7222_v50 = vsel %vm2024_vm1, %v7132_v22, 0.0  ;;  %v7228_v2 = vmul.f32 %v7110_v26, %v7005_v25  ;;  %v11824_v45 = vld [vmem:[#allocation8_spill] sm:$0xff] }
 0x213   :  { %11781 = vst [vmem:[#allocation68_spill] sm:$0xff] %v7199_v34  ;;  %11783 = vst [vmem:[#allocation70_spill] sm:$0xff] %v7209_v56  ;;  %v7224_v15 = vpop.f32.mrf.mxu1  ;;  %v7232_v37 = vmul.f32 %v7118_v13, %v7118_v13  ;;  %v7235_v5 = vsel %vm2024_vm1, %v2187_v62, 0.0  ;;  %v7239_v52 = vmul.f32 %v7148_v21, %v7148_v21  ;;  %v7243_v22 = vsel %vm2024_vm1, %v7116_v28, 0.0 }
 0x214   :  { %11784 = vst [vmem:[#allocation71_spill] sm:$0xff] %v7214_v36  ;;  %11785 = vst [vmem:[#allocation72_spill] sm:$0xff] %v7218_v53  ;;  %v7249_v25 = vadd.f32 %v2245_v60, %v2244_v10  ;;  %v7253_v13 = vmul.f32 %v7179_v54, %v7179_v54  ;;  %v1241_v62 = vmul.f32 %v7110_v26, %v6671_v51  ;;  %v7262_v53 = vsel %vm2024_vm1, %v2171_v0, 0.0 }
 0x215   :  { %11786 = vst [vmem:[#allocation73_spill] sm:$0xff] %v7222_v50  ;;  %11787 = vst [vmem:[#allocation74_spill] sm:$0xff] %v7224_v15  ;;  %v1242_v29 = vmul.f32 %v7110_v26, %v6683_v11  ;;  %v7259_v56 = vadd.f32 %v2050_v48, %v2049_v40  ;;  %v1243_v28 = vmul.f32 %v7110_v26, %v6695_v39  ;;  %v7306_v48 = vpop.f32.mrf.mxu0 }
 0x216   :  { %11788 = vst [vmem:[#allocation75_spill] sm:$0xff] %v7235_v5  ;;  %v1244_v60 = vmul.f32 %v7110_v26, %v6707_v1  ;;  %v1245_v10 = vmul.f32 %v7110_v26, %v6719_v31  ;;  %v1246_v51 = vmul.f32 %v7110_v26, %v6731_v59  ;;  %v7272_v5 = vpop.f32.mrf.mxu1  ;;  %v1247_v11 = vmul.f32 %v7110_v26, %v6743_v24 }
 0x217   :  { %11789 = vst [vmem:[#allocation76_spill] sm:$0xff] %v7272_v5  ;;  %v1248_v40 = vmul.f32 %v7110_v26, %v6755_v58  ;;  %v1249_v39 = vmul.f32 %v7110_v26, %v6767_v27  ;;  %v1250_v1 = vmul.f32 %v7110_v26, %v6779_v63  ;;  %v1251_v31 = vmul.f32 %v7110_v26, %v6791_v35 }
 0x218   :  { %v1252_v59 = vmul.f32 %v7110_v26, %v6803_v8  ;;  %v1253_v0 = vmul.f32 %v7110_v26, %v6815_v43  ;;  %v1254_v24 = vmul.f32 %v7110_v26, %v6827_v17  ;;  %v1255_v58 = vmul.f32 %v7110_v26, %v6839_v57  ;;  %11790 = vst [vmem:[#allocation77_spill] sm:$0xff] %v7306_v48 }
 0x219   :  { %v1256_v27 = vmul.f32 %v7110_v26, %v6851_v33  ;;  %v1257_v63 = vmul.f32 %v7110_v26, %v6863_v9  ;;  %v1258_v35 = vmul.f32 %v7110_v26, %v6875_v47  ;;  %v1259_v8 = vmul.f32 %v7110_v26, %v6887_v19  ;;  %v7308_v33 = vpop.f32.mrf.mxu1 }
 0x21a   :  { %v1260_v43 = vmul.f32 %v7110_v26, %v6899_v61  ;;  %v1261_v17 = vmul.f32 %v7110_v26, %v6911_v55  ;;  %v1262_v57 = vmul.f32 %v7110_v26, %v6923_v32  ;;  %11791 = vst [vmem:[#allocation78_spill] sm:$0xff] %v7308_v33  ;;  %v1263_v9 = vmul.f32 %v7110_v26, %v6935_v7 }
 0x21b   :  { %v1264_v47 = vmul.f32 %v7110_v26, %v6947_v41  ;;  %v1265_v19 = vmul.f32 %v7110_v26, %v6959_v16  ;;  %v1266_v61 = vmul.f32 %v7110_v26, %v6971_v49  ;;  %v1267_v55 = vmul.f32 %v7110_v26, %v6983_v23  ;;  %v7354_v34 = vpop.f32.mrf.mxu1 }
 0x21c   :  { %v1268_v32 = vmul.f32 %v7110_v26, %v6995_v3  ;;  %v7323_v33 = vadd.f32 %v7123_v44, %v1241_v62  ;;  %v7326_v7 = vadd.f32 %v7123_v44, %v1242_v29  ;;  %v7329_v41 = vadd.f32 %v7123_v44, %v1243_v28  ;;  %11793 = vst [vmem:[#allocation80_spill] sm:$0xff] %v7354_v34 }
 0x21d   :  { %v7332_v16 = vadd.f32 %v7123_v44, %v1244_v60  ;;  %v7335_v49 = vadd.f32 %v7123_v44, %v1245_v10  ;;  %v7338_v23 = vadd.f32 %v7123_v44, %v1246_v51  ;;  %v7341_v3 = vadd.f32 %v7123_v44, %v1247_v11  ;;  %v7352_v60 = vpop.f32.mrf.mxu0  ;;  %v7406_v36 = vpop.f32.mrf.mxu1 }
 0x21e   :  { %v7344_v62 = vadd.f32 %v7123_v44, %v1248_v40  ;;  %v7347_v29 = vadd.f32 %v7123_v44, %v1249_v39  ;;  %v7350_v28 = vadd.f32 %v7123_v44, %v1250_v1  ;;  %11792 = vst [vmem:[#allocation79_spill] sm:$0xff] %v7352_v60  ;;  %v7357_v10 = vadd.f32 %v7123_v44, %v1251_v31 }
 0x21f   :  { %v7360_v51 = vadd.f32 %v7123_v44, %v1252_v59  ;;  %v7363_v11 = vadd.f32 %v7123_v44, %v1253_v0  ;;  %v7366_v40 = vadd.f32 %v7123_v44, %v1254_v24  ;;  %v7369_v39 = vadd.f32 %v7123_v44, %v1255_v58  ;;  %11802 = vst [vmem:[#allocation89_spill] sm:$0xff] %v7406_v36 }
 0x220   :  { %v7372_v1 = vadd.f32 %v7123_v44, %v1256_v27  ;;  %v7375_v34 = vadd.f32 %v7123_v44, %v1257_v63  ;;  %v7378_v31 = vadd.f32 %v7123_v44, %v1258_v35  ;;  %v7381_v59 = vadd.f32 %v7123_v44, %v1259_v8 }
 0x221   :  { %v7384_v0 = vadd.f32 %v7123_v44, %v1260_v43  ;;  %v7387_v24 = vadd.f32 %v7123_v44, %v1261_v17  ;;  %v7390_v58 = vadd.f32 %v7123_v44, %v1262_v57  ;;  %v7393_v27 = vadd.f32 %v7123_v44, %v1263_v9  ;;  %v7404_v43 = vpop.f32.mrf.mxu0 }
 0x222   :  { %v7396_v63 = vadd.f32 %v7123_v44, %v1264_v47  ;;  %v7399_v35 = vadd.f32 %v7123_v44, %v1265_v19  ;;  %v7402_v8 = vadd.f32 %v7123_v44, %v1266_v61  ;;  %11801 = vst [vmem:[#allocation88_spill] sm:$0xff] %v7404_v43  ;;  %v7409_v17 = vadd.f32 %v7123_v44, %v1267_v55 }
 0x223   :  { %11794 = vst [vmem:[#allocation81_spill] sm:$0xff] %v7384_v0  ;;  %11795 = vst [vmem:[#allocation82_spill] sm:$0xff] %v7387_v24  ;;  %v7412_v57 = vadd.f32 %v7123_v44, %v1268_v32  ;;  %v7416_v9 = vadd.f32 %v7123_v44, %v7228_v2  ;;  %v2173_v47 = vmul.f32 %v7142_v46, %v7142_v46  ;;  %v7428_v32 = vsel %vm2024_vm1, %v7232_v37, 0.0 }
 0x224   :  { %11796 = vst [vmem:[#allocation83_spill] sm:$0xff] %v7390_v58  ;;  %11797 = vst [vmem:[#allocation84_spill] sm:$0xff] %v7393_v27  ;;  %v2053_v19 = vadd.f32 %v7243_v22, %v7259_v56  ;;  %v2248_v61 = vadd.f32 %v7262_v53, %v7249_v25  ;;  %v2176_v55 = vmul.f32 %v7306_v48, %v7306_v48  ;;  %v2249_v2 = vsel %vm2024_vm1, %v7247_v38, 0.0  ;;  %v7440_v56 = vpop.f32.mrf.mxu0 }
 0x225   :  { %11798 = vst [vmem:[#allocation85_spill] sm:$0xff] %v7396_v63  ;;  %11799 = vst [vmem:[#allocation86_spill] sm:$0xff] %v7399_v35  ;;  %v2054_v36 = vsel %vm2024_vm1, %v7142_v46, 0.0  ;;  %v2174_v50 = vmul.f32 %v7352_v60, %v7352_v60  ;;  %v7438_v22 = vsel %vm2024_vm1, %v7148_v21, 0.0  ;;  %v7444_v53 = vsel %vm2024_vm1, %v7239_v52, 0.0  ;;  %v7458_v46 = vpop.f32.mrf.mxu1  ;;  %v11830_v35 = vld [vmem:[#allocation14_spill] sm:$0xff] }
 0x226   :  { %11800 = vst [vmem:[#allocation87_spill] sm:$0xff] %v7402_v8  ;;  %11803 = vst [vmem:[#allocation90_spill] sm:$0xff] %v7409_v17  ;;  %v7448_v37 = vsel %vm2024_vm1, %v7179_v54, 0.0  ;;  %v7452_v38 = vsel %vm2024_vm1, %v7253_v13, 0.0  ;;  %v7456_v25 = vsel %vm2024_vm1, %v7272_v5, 0.0  ;;  %v2251_v21 = vsel %vm2024_vm1, %v2173_v47, 0.0 }
 0x227   :  { %11804 = vst [vmem:[#allocation91_spill] sm:$0xff] %v7412_v57  ;;  %11805 = vst [vmem:[#allocation92_spill] sm:$0xff] %v7416_v9  ;;  %v7463_v52 = vsel %vm2024_vm1, %v7306_v48, 0.0  ;;  %v7467_v54 = vmul.f32 %v7224_v15, %v7224_v15  ;;  %v7471_v13 = vmul.f32 %v7272_v5, %v7272_v5  ;;  %v2056_v47 = vsel %vm2024_vm1, %v7352_v60, 0.0  ;;  %v11819_v60 = vld [vmem:[#allocation3_spill] sm:$0xff]  ;;  %v11826_v9 = vld [vmem:[#allocation10_spill] sm:$0xff] }
 0x228   :  { %11806 = vst [vmem:[#allocation93_spill] sm:$0xff] %v7428_v32  ;;  %11807 = vst [vmem:[#allocation94_spill] sm:$0xff] %v7438_v22  ;;  %v7474_v22 = vsel %vm2024_vm1, %v2176_v55, 0.0  ;;  %v1207_v48 = vmul.f32 %v7110_v26, %v6418_v4  ;;  %v7487_v5 = vmul.f32 %v7404_v43, %v7404_v43  ;;  %v1211_v4 = vmul.f32 %v7110_v26, %v6456_v20  ;;  %v7499_v55 = vpop.f32.mrf.mxu1  ;;  %v11823_v20 = vld [vmem:[#allocation7_spill] sm:$0xff]  ;;  %v11828_v17 = vld [vmem:[#allocation12_spill] sm:$0xff] }
 0x229   :  { %11808 = vst [vmem:[#allocation95_spill] sm:$0xff] %v7440_v56  ;;  %11809 = vst [vmem:[#allocation96_spill] sm:$0xff] %v7444_v53  ;;  %v2250_v53 = vadd.f32 %v2249_v2, %v2248_v61  ;;  %v1208_v61 = vmul.f32 %v7110_v26, %v6422_v6  ;;  %v11818_v2 = vld [vmem:[#allocation2_spill] sm:$0xff]  ;;  %v1213_v32 = vmul.f32 %v7110_v26, %v11819_v60  ;;  %v11820_v6 = vld [vmem:[#allocation4_spill] sm:$0xff] }
 0x22a   :  { %11810 = vst [vmem:[#allocation97_spill] sm:$0xff] %v7448_v37  ;;  %11811 = vst [vmem:[#allocation98_spill] sm:$0xff] %v7452_v38  ;;  %v2055_v38 = vadd.f32 %v2054_v36, %v2053_v19  ;;  %v1209_v36 = vmul.f32 %v7110_v26, %v6437_v12  ;;  %v1210_v19 = vmul.f32 %v7110_v26, %v6441_v14  ;;  %v11821_v12 = vld [vmem:[#allocation5_spill] sm:$0xff]  ;;  %v11822_v14 = vld [vmem:[#allocation6_spill] sm:$0xff] }
 0x22b   :  { %11812 = vst [vmem:[#allocation99_spill] sm:$0xff] %v7456_v25  ;;  %11813 = vst [vmem:[#allocation100_spill] sm:$0xff] %v7458_v46  ;;  %v2253_v46 = vsel %vm2024_vm1, %v2174_v50, 0.0  ;;  %v7483_v25 = vsel %vm2024_vm1, %v7404_v43, 0.0  ;;  %v7497_v50 = vpop.f32.mrf.mxu0  ;;  %v1212_v43 = vmul.f32 %v7110_v26, %v11818_v2  ;;  %v1216_v15 = vmul.f32 %v7110_v26, %v11822_v14  ;;  %v11827_v57 = vld [vmem:[#allocation11_spill] sm:$0xff]  ;;  %v11829_v8 = vld [vmem:[#allocation13_spill] sm:$0xff] }
 0x22c   :  { %11814 = vst [vmem:[#allocation101_spill] sm:$0xff] %v7467_v54  ;;  %11815 = vst [vmem:[#allocation102_spill] sm:$0xff] %v7471_v13  ;;  %v1214_v13 = vmul.f32 %v7110_v26, %v11820_v6  ;;  %v1215_v54 = vmul.f32 %v7110_v26, %v11821_v12  ;;  %v1217_v37 = vmul.f32 %v7110_v26, %v11823_v20 }
 0x22d   :  { %11816 = vst [vmem:[#allocation103_spill] sm:$0xff] %v7497_v50  ;;  %11817 = vst [vmem:[#allocation104_spill] sm:$0xff] %v7499_v55  ;;  %v1218_v55 = vmul.f32 %v7110_v26, %v11824_v45  ;;  %v1219_v2 = vmul.f32 %v7110_v26, %v11825_v18  ;;  %v1220_v60 = vmul.f32 %v7110_v26, %v11826_v9  ;;  %v7530_v27 = vpop.f32.mrf.mxu0  ;;  %v7532_v9 = vpop.f32.mrf.mxu1 }
 0x22e   :  { %v1221_v6 = vmul.f32 %v7110_v26, %v11827_v57  ;;  %v1222_v12 = vmul.f32 %v7110_v26, %v11828_v17  ;;  %v1223_v14 = vmul.f32 %v7110_v26, %v11829_v8  ;;  %v1224_v45 = vmul.f32 %v7110_v26, %v11830_v35  ;;  %11831 = vst [vmem:[#allocation2_spill] sm:$0xff] %v7530_v27 }
 0x22f   :  { %v1277_v63 = vadd.f32 %v7123_v44, %v1207_v48  ;;  %v1278_v18 = vadd.f32 %v7123_v44, %v1208_v61  ;;  %11832 = vst [vmem:[#allocation3_spill] sm:$0xff] %v7532_v9  ;;  %v1279_v57 = vadd.f32 %v7123_v44, %v1209_v36  ;;  %v1280_v17 = vadd.f32 %v7123_v44, %v1210_v19 }
 0x230   :  { %v1281_v58 = vadd.f32 %v7123_v44, %v1211_v4  ;;  %v1282_v8 = vadd.f32 %v7123_v44, %v1212_v43  ;;  %v7539_v20 = vadd.f32 %v7123_v44, %v1213_v32  ;;  %v7542_v35 = vadd.f32 %v7123_v44, %v1214_v13  ;;  %v7574_v4 = vpop.f32.mrf.mxu0 }
 0x231   :  { %v7545_v48 = vadd.f32 %v7123_v44, %v1215_v54  ;;  %v7548_v61 = vadd.f32 %v7123_v44, %v1216_v15  ;;  %v7551_v36 = vadd.f32 %v7123_v44, %v1217_v37  ;;  %v7554_v19 = vadd.f32 %v7123_v44, %v1218_v55  ;;  %11834 = vst [vmem:[#allocation5_spill] sm:$0xff] %v7574_v4  ;;  %v7576_v55 = vpop.f32.mrf.mxu1 }
 0x232   :  { %v7557_v43 = vadd.f32 %v7123_v44, %v1219_v2  ;;  %v7560_v32 = vadd.f32 %v7123_v44, %v1220_v60  ;;  %v7563_v13 = vadd.f32 %v7123_v44, %v1221_v6  ;;  %v7566_v54 = vadd.f32 %v7123_v44, %v1222_v12 }
 0x233   :  { %v7569_v15 = vadd.f32 %v7123_v44, %v1223_v14  ;;  %v7572_v37 = vadd.f32 %v7123_v44, %v1224_v45  ;;  %v1341_v2 = vmax.f32 %v1277_v63, 0.0  ;;  %v1343_v9 = vmax.f32 %v1279_v57, 0.0 }
 0x234   :  { %v1344_v60 = vmax.f32 %v1280_v17, 0.0  ;;  %v2057_v30 = vadd.f32 %v2056_v47, %v2055_v38  ;;  %v1342_v26 = vmax.f32 %v1278_v18, 0.0  ;;  %v2252_v6 = vadd.f32 %v2251_v21, %v2250_v53  ;;  %v7586_v47 = vpop.f32.mrf.mxu0  ;;  %v7588_v21 = vpop.f32.mrf.mxu1 }
 0x235   :  { %11833 = vst [vmem:[#allocation4_spill] sm:$0xff] %v7572_v37  ;;  %v2058_v12 = vsel %vm2024_vm1, %v7440_v56, 0.0  ;;  %v2175_v14 = vmul.f32 %v7440_v56, %v7440_v56  ;;  %v1345_v24 = vmax.f32 %v1281_v58, 0.0  ;;  %v1346_v0 = vmax.f32 %v1282_v8, 0.0  ;;  %11835 = vst [vmem:[#allocation6_spill] sm:$0xff] %v7586_v47 }
 0x236   :  { %v1347_v45 = vmax.f32 %v7539_v20, 0.0  ;;  %v2059_v44 = vadd.f32 %v2058_v12, %v2057_v30  ;;  %v1348_v37 = vmax.f32 %v7542_v35, 0.0  ;;  %v1349_v63 = vmax.f32 %v7545_v48, 0.0 }
 0x237   :  { %v2254_v57 = vadd.f32 %v2253_v46, %v2252_v6  ;;  %v2255_v38 = vsel %vm2024_vm1, %v2175_v14, 0.0  ;;  %v1350_v53 = vmax.f32 %v7548_v61, 0.0  ;;  %v2505_v18 = vpack.c.bf16 %v1344_v60, %v1343_v9 }
 0x238   :  { %v2061_v58 = vadd.f32 %v7463_v52, %v2059_v44  ;;  %v2178_v20 = vmul.f32 %v7530_v27, %v7530_v27  ;;  %v1351_v30 = vmax.f32 %v7551_v36, 0.0  ;;  %v2064_v46 = vsel %vm2024_vm1, %v7530_v27, 0.0 }
 0x239   :  { %v2256_v17 = vadd.f32 %v2255_v38, %v2254_v57  ;;  %v2504_v8 = vpack.c.bf16 %v1342_v26, %v1341_v2  ;;  %v1352_v35 = vmax.f32 %v7554_v19, 0.0  ;;  %v2259_v48 = vsel %vm2024_vm1, %v7487_v5, 0.0  ;;  %v7608_v2 = vpop.f32.mrf.mxu1 }
 0x23a   :  { %v2063_v61 = vadd.f32 %v7483_v25, %v2061_v58  ;;  %v2179_v44 = vmul.f32 %v7586_v47, %v7586_v47  ;;  %v1353_v52 = vmax.f32 %v7557_v43, 0.0  ;;  %v2066_v60 = vsel %vm2024_vm1, %v7586_v47, 0.0  ;;  %v11889_v47 = vld [vmem:[#allocation96_spill] sm:$0xff] }
 0x23b   :  { %v2258_v9 = vadd.f32 %v7474_v22, %v2256_v17  ;;  %5816 = vmatprep.mubr.msk.bf16.mxu1 %vm474_vm0, %v2504_v8  ;;  %v2506_v26 = vpack.c.bf16 %v1346_v0, %v1345_v24  ;;  %v2180_v5 = vmul.f32 %v7497_v50, %v7497_v50  ;;  %v2261_v12 = vsel %vm2024_vm1, %v2178_v20, 0.0 }
 0x23c   :  { %v2065_v25 = vadd.f32 %v2064_v46, %v2063_v61  ;;  %5817 = vmatmul.mubr.msk.bf16.vlgmr.msra.gmra.mxu1 %vm474_vm0, %v2505_v18  ;;  %v2068_v57 = vsel %vm2024_vm1, %v7497_v50, 0.0  ;;  %v2181_v38 = vmul.f32 %v7574_v4, %v7574_v4  ;;  %v2263_v20 = vsel %vm2024_vm1, %v2179_v44, 0.0  ;;  %v7628_v61 = vpop.f32.mrf.mxu1 }
 0x23d   :  { %v2260_v0 = vadd.f32 %v2259_v48, %v2258_v9  ;;  %5820 = vmatprep.mubr.msk.bf16.mxu1 %vm474_vm0, %v2506_v26  ;;  %v1375_v18 = vmax.f32 %v7323_v33, 0.0  ;;  %v1376_v17 = vmax.f32 %v7326_v7, 0.0  ;;  %v2070_v8 = vsel %vm2024_vm1, %v7574_v4, 0.0 }
 0x23e   :  { %v2067_v58 = vadd.f32 %v2066_v60, %v2065_v25  ;;  %v1377_v48 = vmax.f32 %v7329_v41, 0.0  ;;  %v1378_v9 = vmax.f32 %v7332_v16, 0.0  ;;  %v2265_v26 = vsel %vm2024_vm1, %v2180_v5, 0.0  ;;  %v7639_v6 = vpop.f32.mrf.mxu1 }
 0x23f   :  { %v2262_v46 = vadd.f32 %v2261_v12, %v2260_v0  ;;  %v1379_v60 = vmax.f32 %v7335_v49, 0.0  ;;  %v1380_v44 = vmax.f32 %v7338_v23, 0.0  ;;  %v1381_v33 = vmax.f32 %v7341_v3, 0.0 }
 0x240   :  { %v2069_v24 = vadd.f32 %v2068_v57, %v2067_v58  ;;  %v1382_v25 = vmax.f32 %v7344_v62, 0.0  ;;  %v2267_v12 = vsel %vm2024_vm1, %v2181_v38, 0.0  ;;  %v2507_v14 = vpack.c.bf16 %v1348_v37, %v1347_v45  ;;  %v11836_v57 = vld [vmem:[#allocation60_spill] sm:$0xff]  ;;  %v7661_v58 = vpop.f32.mrf.mxu1 }
 0x241   :  { %v2264_v7 = vadd.f32 %v2263_v20, %v2262_v46  ;;  %v1383_v41 = vmax.f32 %v7347_v29, 0.0  ;;  %v2508_v16 = vpack.c.bf16 %v1350_v53, %v1349_v63  ;;  %v7641_v5 = vpack.c.bf16 %v1376_v17, %v1375_v18  ;;  %v11839_v20 = vld [vmem:[#allocation82_spill] sm:$0xff]  ;;  %v11840_v17 = vld [vmem:[#allocation83_spill] sm:$0xff] }
 0x242   :  { %v2071_v0 = vadd.f32 %v2070_v8, %v2069_v24  ;;  %v1384_v49 = vmax.f32 %v7350_v28, 0.0  ;;  %v1385_v23 = vmax.f32 %v7357_v10, 0.0  ;;  %v1386_v3 = vmax.f32 %v7360_v51, 0.0  ;;  %v11841_v46 = vld [vmem:[#allocation59_spill] sm:$0xff] }
 0x243   :  { %v2266_v22 = vadd.f32 %v2265_v26, %v2264_v7  ;;  %v1387_v37 = vmax.f32 %v7363_v11, 0.0  ;;  %v1388_v29 = vmax.f32 %v7366_v40, 0.0  ;;  %v7651_v63 = vpack.c.bf16 %v1378_v9, %v1377_v48  ;;  %v11837_v11 = vld [vmem:[#allocation81_spill] sm:$0xff]  ;;  %v11838_v40 = vld [vmem:[#allocation63_spill] sm:$0xff]  ;;  %v11844_v9 = vld [vmem:[#allocation86_spill] sm:$0xff] }
 0x244   :  { %v2073_v62 = vadd.f32 %v11836_v57, %v2071_v0  ;;  %5821 = vmatmul.mubr.msk.bf16.gmra.mxu1 %vm474_vm0, %v2507_v14  ;;  %v1389_v53 = vmax.f32 %v7369_v39, 0.0  ;;  %v1390_v28 = vmax.f32 %v7372_v1, 0.0  ;;  %v1391_v10 = vmax.f32 %v7375_v34, 0.0  ;;  %v11842_v34 = vld [vmem:[#allocation84_spill] sm:$0xff]  ;;  %v11843_v48 = vld [vmem:[#allocation85_spill] sm:$0xff]  ;;  %v11845_v26 = vld [vmem:[#allocation66_spill] sm:$0xff] }
 0x245   :  { %v2268_v45 = vadd.f32 %v2267_v12, %v2266_v22  ;;  %5824 = vmatprep.mubr.msk.bf16.mxu1 %vm474_vm0, %v2508_v16  ;;  %v1392_v24 = vmax.f32 %v7378_v31, 0.0  ;;  %v1393_v14 = vmax.f32 %v7381_v59, 0.0  ;;  %v1394_v38 = vmax.f32 %v11837_v11, 0.0  ;;  %v11846_v12 = vld [vmem:[#allocation87_spill] sm:$0xff]  ;;  %v11847_v16 = vld [vmem:[#allocation65_spill] sm:$0xff] }
 0x246   :  { %v2075_v51 = vadd.f32 %v7187_v42, %v2073_v62  ;;  %v1395_v18 = vmax.f32 %v11839_v20, 0.0  ;;  %v1396_v39 = vmax.f32 %v11840_v17, 0.0  ;;  %v7666_v8 = vpack.c.bf16 %v1380_v44, %v1379_v60  ;;  %v11848_v60 = vld [vmem:[#allocation90_spill] sm:$0xff] }
 0x247   :  { %v2270_v22 = vadd.f32 %v11838_v40, %v2268_v45  ;;  %v1397_v42 = vmax.f32 %v11842_v34, 0.0  ;;  %v1398_v31 = vmax.f32 %v11843_v48, 0.0  ;;  %v1399_v59 = vmax.f32 %v11844_v9, 0.0  ;;  %v11850_v40 = vld [vmem:[#allocation62_spill] sm:$0xff]  ;;  %v11853_v34 = vld [vmem:[#allocation69_spill] sm:$0xff]  ;;  %v11855_v48 = vld [vmem:[#allocation67_spill] sm:$0xff] }
 0x248   :  { %v2077_v1 = vadd.f32 %v11841_v46, %v2075_v51  ;;  %v1400_v0 = vmax.f32 %v11846_v12, 0.0  ;;  %v2509_v62 = vpack.c.bf16 %v1352_v35, %v1351_v30  ;;  %v7678_v45 = vpack.c.bf16 %v1382_v25, %v1381_v33  ;;  %v11849_v51 = vld [vmem:[#allocation91_spill] sm:$0xff]  ;;  %v7687_v46 = vpop.f32.mrf.mxu1  ;;  %v11854_v33 = vld [vmem:[#allocation4_spill] sm:$0xff] }
 0x249   :  { %v2272_v7 = vadd.f32 %v11845_v26, %v2270_v22  ;;  %v1401_v44 = vmax.f32 %v11848_v60, 0.0  ;;  %v1402_v11 = vmax.f32 %v11849_v51, 0.0  ;;  %v11851_v22 = vmax.f32 %v7560_v32, 0.0  ;;  %v11864_v60 = vld [vmem:[#allocation17_spill] sm:$0xff]  ;;  %v11867_v51 = vld [vmem:[#allocation78_spill] sm:$0xff] }
 0x24a   :  { %v2079_v57 = vadd.f32 %v11847_v16, %v2077_v1  ;;  %v11852_v1 = vld [vmem:[#allocation92_spill] sm:$0xff]  ;;  %v7692_v30 = vpack.c.bf16 %v1384_v49, %v1383_v41  ;;  %v7694_v35 = vpack.c.bf16 %v1386_v3, %v1385_v23  ;;  %v1358_v25 = vmax.f32 %v11854_v33, 0.0  ;;  %v11857_v49 = vld [vmem:[#allocation71_spill] sm:$0xff]  ;;  %v7711_v3 = vpop.f32.mrf.mxu1 }
 0x24b   :  { %v2274_v20 = vadd.f32 %v11850_v40, %v2272_v7  ;;  %v2510_v17 = vpack.c.bf16 %v11851_v22, %v1353_v52  ;;  %v1403_v36 = vmax.f32 %v11852_v1, 0.0  ;;  %v7699_v43 = vpack.c.bf16 %v1388_v29, %v1387_v37  ;;  %v11856_v52 = vld [vmem:[#allocation73_spill] sm:$0xff]  ;;  %v11858_v29 = vld [vmem:[#allocation15_spill] sm:$0xff] }
 0x24c   :  { %v2081_v19 = vadd.f32 %v11853_v34, %v2079_v57  ;;  %5825 = vmatmul.mubr.msk.bf16.gmra.mxu1 %vm474_vm0, %v2509_v62  ;;  %v7701_v32 = vpack.c.bf16 %v1390_v28, %v1389_v53  ;;  %v7704_v7 = vpack.c.bf16 %v1392_v24, %v1391_v10  ;;  %v7706_v12 = vpack.c.bf16 %v1394_v38, %v1393_v14  ;;  %v11859_v53 = vld [vmem:[#allocation50_spill] sm:$0xff]  ;;  %v11860_v62 = vld [vmem:[#allocation16_spill] sm:$0xff]  ;;  %v11868_v40 = vld [vmem:[#allocation53_spill] sm:$0xff] }
 0x24d   :  { %v2276_v9 = vadd.f32 %v11855_v48, %v2274_v20  ;;  %5828 = vmatprep.mubr.msk.bf16.mxu1 %vm474_vm0, %v2510_v17  ;;  %v7708_v41 = vpack.c.bf16 %v1396_v39, %v1395_v18  ;;  %v7713_v16 = vpack.c.bf16 %v1398_v31, %v1397_v42  ;;  %v7715_v57 = vpack.c.bf16 %v1400_v0, %v1399_v59  ;;  %v11861_v24 = vld [vmem:[#allocation68_spill] sm:$0xff]  ;;  %v11865_v31 = vld [vmem:[#allocation18_spill] sm:$0xff]  ;;  %v11866_v0 = vld [vmem:[#allocation75_spill] sm:$0xff] }
 0x24e   :  { %v2083_v26 = vadd.f32 %v11856_v52, %v2081_v19  ;;  %v7717_v37 = vpack.c.bf16 %v1402_v11, %v1401_v44  ;;  %v1225_v28 = vmul.f32 %v11859_v53, %v11858_v29  ;;  %v1226_v10 = vmul.f32 %v11859_v53, %v11860_v62  ;;  %v11862_v38 = vld [vmem:[#allocation56_spill] sm:$0xff]  ;;  %v11874_v29 = vld [vmem:[#allocation97_spill] sm:$0xff]  ;;  %v11875_v62 = vld [vmem:[#allocation74_spill] sm:$0xff] }
 0x24f   :  { %v2278_v23 = vadd.f32 %v11857_v49, %v2276_v9  ;;  %v11863_v18 = vmax.f32 %v11862_v38, 0.0  ;;  %v1227_v42 = vmul.f32 %v11859_v53, %v11864_v60  ;;  %v1228_v59 = vmul.f32 %v11859_v53, %v11865_v31  ;;  %v11869_v17 = vld [vmem:[#allocation72_spill] sm:$0xff]  ;;  %v11872_v9 = vld [vmem:[#allocation70_spill] sm:$0xff]  ;;  %v11878_v38 = vld [vmem:[#allocation93_spill] sm:$0xff] }
 0x250   :  { %v2085_v14 = vadd.f32 %v11861_v24, %v2083_v26  ;;  %v2196_v11 = vmul.f32 %v11867_v51, %v11867_v51  ;;  %v1295_v20 = vadd.f32 %v11868_v40, %v1225_v28  ;;  %v1296_v22 = vadd.f32 %v11868_v40, %v1226_v10  ;;  %v11877_v24 = vld [vmem:[#allocation102_spill] sm:$0xff]  ;;  %v11879_v60 = vld [vmem:[#allocation80_spill] sm:$0xff] }
 0x251   :  { %v7726_v39 = vpack.c.bf16 %v11863_v18, %v1403_v36  ;;  %v2280_v44 = vadd.f32 %v11866_v0, %v2278_v23  ;;  %v11870_v36 = vmax.f32 %v7563_v13, 0.0  ;;  %v11871_v34 = vmax.f32 %v7566_v54, 0.0  ;;  %v7747_v23 = vpop.f32.mrf.mxu1  ;;  %v11876_v13 = vld [vmem:[#allocation101_spill] sm:$0xff]  ;;  %v11880_v0 = vld [vmem:[#allocation99_spill] sm:$0xff] }
 0x252   :  { %v2087_v1 = vadd.f32 %v11869_v17, %v2085_v14  ;;  %v1297_v33 = vadd.f32 %v11868_v40, %v1227_v42  ;;  %v1298_v48 = vadd.f32 %v11868_v40, %v1228_v59  ;;  %v11873_v26 = vmax.f32 %v7569_v15, 0.0 }
 0x253   :  { %v2511_v19 = vpack.c.bf16 %v11871_v34, %v11870_v36  ;;  %v2282_v52 = vadd.f32 %v11872_v9, %v2280_v44  ;;  %v2094_v10 = vsel %vm2024_vm1, %v11875_v62, 0.0  ;;  %v2291_v54 = vsel %vm2024_vm1, %v11876_v13, 0.0  ;;  %v11881_v34 = vld [vmem:[#allocation98_spill] sm:$0xff]  ;;  %v11882_v9 = vld [vmem:[#allocation100_spill] sm:$0xff]  ;;  %v11886_v13 = vld [vmem:[#allocation89_spill] sm:$0xff] }
 0x254   :  { %v2512_v49 = vpack.c.bf16 %v1358_v25, %v11873_v26  ;;  %v2089_v28 = vadd.f32 %v11874_v29, %v2087_v1  ;;  %v2287_v14 = vsel %vm2024_vm1, %v11877_v24, 0.0  ;;  %v2100_v15 = vsel %vm2024_vm1, %v11867_v51, 0.0  ;;  %v11883_v26 = vld [vmem:[#allocation19_spill] sm:$0xff] }
 0x255   :  { %5829 = vmatmul.mubr.msk.bf16.gmra.mxu1 %vm474_vm0, %v2511_v19  ;;  %v2284_v18 = vadd.f32 %v11878_v38, %v2282_v52  ;;  %v2297_v25 = vsel %vm2024_vm1, %v2196_v11, 0.0  ;;  %v2096_v42 = vsel %vm2024_vm1, %v11879_v60, 0.0  ;;  %v1359_v31 = vmax.f32 %v1295_v20, 0.0  ;;  %v7770_v11 = vpop.f32.mrf.mxu1  ;;  %v11888_v38 = vld [vmem:[#allocation22_spill] sm:$0xff] }
 0x256   :  { %5832 = vmatprep.mubr.msk.bf16.mxu1 %vm474_vm0, %v2512_v49  ;;  %v1360_v59 = vmax.f32 %v1296_v22, 0.0  ;;  %v2091_v44 = vadd.f32 %v11880_v0, %v2089_v28  ;;  %v2194_v17 = vmul.f32 %v11879_v60, %v11879_v60  ;;  %v1361_v1 = vmax.f32 %v1297_v33, 0.0  ;;  %v11884_v49 = vld [vmem:[#allocation20_spill] sm:$0xff]  ;;  %v11885_v22 = vld [vmem:[#allocation94_spill] sm:$0xff]  ;;  %v11887_v33 = vld [vmem:[#allocation21_spill] sm:$0xff] }
 0x257   :  { %v1362_v36 = vmax.f32 %v1298_v48, 0.0  ;;  %v2286_v19 = vadd.f32 %v11881_v34, %v2284_v18  ;;  %v2098_v52 = vsel %vm2024_vm1, %v11882_v9, 0.0  ;;  %v1229_v29 = vmul.f32 %v11859_v53, %v11883_v26  ;;  %v7790_v56 = vpop.f32.mrf.mxu1 }
 0x258   :  { %v1230_v20 = vmul.f32 %v11859_v53, %v11884_v49  ;;  %v2093_v28 = vadd.f32 %v11885_v22, %v2091_v44  ;;  %v2197_v24 = vmul.f32 %v11886_v13, %v11886_v13  ;;  %v1231_v48 = vmul.f32 %v11859_v53, %v11887_v33 }
 0x259   :  { %v1232_v18 = vmul.f32 %v11859_v53, %v11888_v38  ;;  %v2288_v0 = vadd.f32 %v2287_v14, %v2286_v19  ;;  %v2195_v34 = vmul.f32 %v11882_v9, %v11882_v9  ;;  %v1299_v26 = vadd.f32 %v11868_v40, %v1229_v29 }
 0x25a   :  { %v1300_v4 = vadd.f32 %v11868_v40, %v1230_v20  ;;  %v2095_v49 = vadd.f32 %v2094_v10, %v2093_v28  ;;  %v2513_v50 = vpack.c.bf16 %v1360_v59, %v1359_v31  ;;  %v1301_v44 = vadd.f32 %v11868_v40, %v1231_v48  ;;  %v11890_v59 = vld [vmem:[#allocation104_spill] sm:$0xff] }
 0x25b   :  { %v1302_v22 = vadd.f32 %v11868_v40, %v1232_v18  ;;  %v2290_v27 = vadd.f32 %v11889_v47, %v2288_v0  ;;  %v2514_v33 = vpack.c.bf16 %v1362_v36, %v1361_v1  ;;  %v2293_v14 = vsel %vm2024_vm1, %v2194_v17, 0.0  ;;  %v11891_v47 = vld [vmem:[#allocation3_spill] sm:$0xff] }
 0x25c   :  { %v2097_v38 = vadd.f32 %v2096_v42, %v2095_v49  ;;  %v2102_v19 = vsel %vm2024_vm1, %v11886_v13, 0.0  ;;  %v2299_v29 = vsel %vm2024_vm1, %v2197_v24, 0.0  ;;  %v2295_v31 = vsel %vm2024_vm1, %v2195_v34, 0.0  ;;  %v11892_v18 = vld [vmem:[#allocation23_spill] sm:$0xff]  ;;  %v11893_v34 = vld [vmem:[#allocation24_spill] sm:$0xff] }
 0x25d   :  { %5833 = vmatmul.mubr.msk.bf16.gmra.mxu1 %vm474_vm0, %v2513_v50  ;;  %v2292_v10 = vadd.f32 %v2291_v54, %v2290_v27  ;;  %v2200_v20 = vmul.f32 %v11890_v59, %v11890_v59  ;;  %v2104_v1 = vsel %vm2024_vm1, %v11891_v47, 0.0  ;;  %v1363_v42 = vmax.f32 %v1299_v26, 0.0  ;;  %v7807_v54 = vpop.f32.mrf.mxu1 }
 0x25e   :  { %5836 = vmatprep.mubr.msk.bf16.mxu1 %vm474_vm0, %v2514_v33  ;;  %v1364_v17 = vmax.f32 %v1300_v4, 0.0  ;;  %v2099_v36 = vadd.f32 %v2098_v52, %v2097_v38  ;;  %v2198_v28 = vmul.f32 %v11891_v47, %v11891_v47  ;;  %v1365_v24 = vmax.f32 %v1301_v44, 0.0  ;;  %v11894_v52 = vld [vmem:[#allocation25_spill] sm:$0xff] }
 0x25f   :  { %v1366_v48 = vmax.f32 %v1302_v22, 0.0  ;;  %v2294_v50 = vadd.f32 %v2293_v14, %v2292_v10  ;;  %v2201_v27 = vmul.f32 %v7576_v55, %v7576_v55  ;;  %v1233_v0 = vmul.f32 %v11859_v53, %v11892_v18  ;;  %v11895_v22 = vld [vmem:[#allocation26_spill] sm:$0xff] }
 0x260   :  { %v1234_v49 = vmul.f32 %v11859_v53, %v11893_v34  ;;  %v2101_v26 = vadd.f32 %v2100_v15, %v2099_v36  ;;  %v2106_v4 = vsel %vm2024_vm1, %v7588_v21, 0.0  ;;  %v1235_v44 = vmul.f32 %v11859_v53, %v11894_v52  ;;  %v7825_v52 = vpop.f32.mrf.mxu1 }
 0x261   :  { %v1236_v33 = vmul.f32 %v11859_v53, %v11895_v22  ;;  %v2296_v38 = vadd.f32 %v2295_v31, %v2294_v50  ;;  %v2199_v14 = vmul.f32 %v7588_v21, %v7588_v21  ;;  %v1303_v10 = vadd.f32 %v11868_v40, %v1233_v0 }
 0x262   :  { %v1304_v18 = vadd.f32 %v11868_v40, %v1234_v49  ;;  %v2103_v47 = vadd.f32 %v2102_v19, %v2101_v26  ;;  %v2515_v34 = vpack.c.bf16 %v1364_v17, %v1363_v42  ;;  %v1305_v15 = vadd.f32 %v11868_v40, %v1235_v44  ;;  %v11896_v26 = vld [vmem:[#allocation27_spill] sm:$0xff]  ;;  %v11897_v44 = vld [vmem:[#allocation28_spill] sm:$0xff] }
 0x263   :  { %v1306_v36 = vadd.f32 %v11868_v40, %v1236_v33  ;;  %v2298_v13 = vadd.f32 %v2297_v25, %v2296_v38  ;;  %v2516_v51 = vpack.c.bf16 %v1366_v48, %v1365_v24  ;;  %v2108_v31 = vsel %vm2024_vm1, %v11890_v59, 0.0  ;;  %v11898_v38 = vld [vmem:[#allocation29_spill] sm:$0xff] }
 0x264   :  { %v2305_v50 = vsel %vm2024_vm1, %v2200_v20, 0.0  ;;  %v2105_v22 = vadd.f32 %v2104_v1, %v2103_v47  ;;  %v2301_v0 = vsel %vm2024_vm1, %v2198_v28, 0.0  ;;  %v2110_v42 = vsel %vm2024_vm1, %v7576_v55, 0.0 }
 0x265   :  { %5837 = vmatmul.mubr.msk.bf16.gmra.mxu1 %vm474_vm0, %v2515_v34  ;;  %v2300_v19 = vadd.f32 %v2299_v29, %v2298_v13  ;;  %v2307_v17 = vsel %vm2024_vm1, %v2201_v27, 0.0  ;;  %v2303_v25 = vsel %vm2024_vm1, %v2199_v14, 0.0  ;;  %v1367_v24 = vmax.f32 %v1303_v10, 0.0  ;;  %v7841_v29 = vpop.f32.mrf.mxu1  ;;  %v11899_v10 = vld [vmem:[#allocation30_spill] sm:$0xff] }
 0x266   :  { %5840 = vmatprep.mubr.msk.bf16.mxu1 %vm474_vm0, %v2516_v51  ;;  %v1368_v48 = vmax.f32 %v1304_v18, 0.0  ;;  %v2107_v49 = vadd.f32 %v2106_v4, %v2105_v22  ;;  %v2112_v20 = vsel %vm2024_vm1, %v7628_v61, 0.0  ;;  %v1369_v47 = vmax.f32 %v1305_v15, 0.0 }
 0x267   :  { %v1370_v1 = vmax.f32 %v1306_v36, 0.0  ;;  %v2302_v28 = vadd.f32 %v2301_v0, %v2300_v19  ;;  %v2202_v13 = vmul.f32 %v7628_v61, %v7628_v61  ;;  %v1237_v27 = vmul.f32 %v11859_v53, %v11896_v26 }
 0x268   :  { %v1238_v51 = vmul.f32 %v11859_v53, %v11897_v44  ;;  %v2109_v33 = vadd.f32 %v2108_v31, %v2107_v49  ;;  %v2114_v4 = vsel %vm2024_vm1, %v7661_v58, 0.0  ;;  %v1239_v14 = vmul.f32 %v11859_v53, %v11898_v38  ;;  %v7859_v38 = vpop.f32.mrf.mxu1 }
 0x269   :  { %v1240_v18 = vmul.f32 %v11859_v53, %v11899_v10  ;;  %v2304_v34 = vadd.f32 %v2303_v25, %v2302_v28  ;;  %v2203_v15 = vmul.f32 %v7661_v58, %v7661_v58  ;;  %v1307_v36 = vadd.f32 %v11868_v40, %v1237_v27 }
 0x26a   :  { %v1308_v22 = vadd.f32 %v11868_v40, %v1238_v51  ;;  %v2111_v0 = vadd.f32 %v2110_v42, %v2109_v33  ;;  %v2517_v19 = vpack.c.bf16 %v1368_v48, %v1367_v24  ;;  %v1309_v31 = vadd.f32 %v11868_v40, %v1239_v14  ;;  %v7873_v33 = vpop.f32.mrf.mxu1 }
 0x26b   :  { %v1310_v49 = vadd.f32 %v11868_v40, %v1240_v18  ;;  %v2306_v26 = vadd.f32 %v2305_v50, %v2304_v34  ;;  %v2518_v44 = vpack.c.bf16 %v1370_v1, %v1369_v47  ;;  %v2204_v53 = vmul.f32 %v7608_v2, %v7608_v2 }
 0x26c   :  { %v2113_v25 = vadd.f32 %v2112_v20, %v2111_v0  ;;  %v2309_v28 = vsel %vm2024_vm1, %v2202_v13, 0.0  ;;  %v2116_v42 = vsel %vm2024_vm1, %v7608_v2, 0.0  ;;  %v2205_v48 = vmul.f32 %v7639_v6, %v7639_v6 }
 0x26d   :  { %5841 = vmatmul.mubr.msk.bf16.gmra.mxu1 %vm474_vm0, %v2517_v19  ;;  %v2308_v24 = vadd.f32 %v2307_v17, %v2306_v26  ;;  %v1371_v40 = vmax.f32 %v1307_v36, 0.0  ;;  %v1372_v50 = vmax.f32 %v1308_v22, 0.0  ;;  %v2311_v1 = vsel %vm2024_vm1, %v2203_v15, 0.0 }
 0x26e   :  { %5844 = vmatprep.mubr.msk.bf16.mxu1 %vm474_vm0, %v2518_v44  ;;  %v2115_v47 = vadd.f32 %v2114_v4, %v2113_v25  ;;  %v1373_v27 = vmax.f32 %v1309_v31, 0.0  ;;  %v1374_v20 = vmax.f32 %v1310_v49, 0.0  ;;  %v2118_v13 = vsel %vm2024_vm1, %v7639_v6, 0.0  ;;  %v7885_v49 = vpop.f32.mrf.mxu1 }
 0x26f   :  { %v2310_v51 = vadd.f32 %v2309_v28, %v2308_v24  ;;  %v2313_v17 = vsel %vm2024_vm1, %v2204_v53, 0.0  ;;  %v2206_v10 = vmul.f32 %v7711_v3, %v7711_v3  ;;  %v2120_v4 = vsel %vm2024_vm1, %v7711_v3, 0.0 }
 0x270   :  { %v2117_v14 = vadd.f32 %v2116_v42, %v2115_v47  ;;  %v2315_v34 = vsel %vm2024_vm1, %v2205_v48, 0.0  ;;  %v2207_v36 = vmul.f32 %v7770_v11, %v7770_v11  ;;  %v2519_v22 = vpack.c.bf16 %v1372_v50, %v1371_v40  ;;  %v7899_v47 = vpop.f32.mrf.mxu1 }
 0x271   :  { %v2312_v18 = vadd.f32 %v2311_v1, %v2310_v51  ;;  %v2122_v19 = vsel %vm2024_vm1, %v7770_v11, 0.0  ;;  %v2520_v31 = vpack.c.bf16 %v1374_v20, %v1373_v27  ;;  %v2208_v26 = vmul.f32 %v7687_v46, %v7687_v46 }
 0x272   :  { %v2119_v15 = vadd.f32 %v2118_v13, %v2117_v14  ;;  %v2317_v53 = vsel %vm2024_vm1, %v2206_v10, 0.0  ;;  %v2124_v25 = vsel %vm2024_vm1, %v7687_v46, 0.0  ;;  %v2209_v42 = vmul.f32 %v7747_v23, %v7747_v23 }
 0x273   :  { %v2314_v0 = vadd.f32 %v2313_v17, %v2312_v18  ;;  %v2319_v48 = vsel %vm2024_vm1, %v2207_v36, 0.0  ;;  %v2126_v50 = vsel %vm2024_vm1, %v7747_v23, 0.0  ;;  %v2321_v1 = vsel %vm2024_vm1, %v2208_v26, 0.0 }
 0x274   :  { %v2121_v44 = vadd.f32 %v2120_v4, %v2119_v15  ;;  %v2210_v20 = vmul.f32 %v7807_v54, %v7807_v54  ;;  %v2128_v13 = vsel %vm2024_vm1, %v7807_v54, 0.0  ;;  %v2323_v17 = vsel %vm2024_vm1, %v2209_v42, 0.0 }
 0x275   :  { %5845 = vmatmul.mubr.msk.bf16.gmra.mxu1 %vm474_vm0, %v2519_v22  ;;  %v2316_v28 = vadd.f32 %v2315_v34, %v2314_v0  ;;  %v2211_v10 = vmul.f32 %v7841_v29, %v7841_v29  ;;  %v2130_v4 = vsel %vm2024_vm1, %v7841_v29, 0.0  ;;  %v7911_v34 = vpop.f32.mrf.mxu1  ;;  %v2212_v15 = vmul.f32 %v7790_v56, %v7790_v56 }
 0x276   :  { %5848 = vmatprep.mubr.msk.bf16.mxu1 %vm474_vm0, %v2520_v31  ;;  %v2123_v24 = vadd.f32 %v2122_v19, %v2121_v44  ;;  %v2325_v22 = vsel %vm2024_vm1, %v2210_v20, 0.0  ;;  %v2132_v0 = vsel %vm2024_vm1, %v7790_v56, 0.0  ;;  %v2213_v31 = vmul.f32 %v7825_v52, %v7825_v52 }
 0x277   :  { %v2318_v40 = vadd.f32 %v2317_v53, %v2316_v28  ;;  %v2327_v44 = vsel %vm2024_vm1, %v2211_v10, 0.0  ;;  %v7927_v28 = vpop.f32.mrf.mxu1  ;;  %v2138_v20 = vsel %vm2024_vm1, %v7899_v47, 0.0  ;;  %v2140_v10 = vsel %vm2024_vm1, %v7859_v38, 0.0 }
 0x278   :  { %v2125_v27 = vadd.f32 %v2124_v25, %v2123_v24  ;;  %v2134_v25 = vsel %vm2024_vm1, %v7825_v52, 0.0  ;;  %v2214_v24 = vmul.f32 %v7873_v33, %v7873_v33 }
 0x279   :  { %v2320_v51 = vadd.f32 %v2319_v48, %v2318_v40  ;;  %v2331_v40 = vsel %vm2024_vm1, %v2213_v31, 0.0 }
 0x27a   :  { %v2127_v14 = vadd.f32 %v2126_v50, %v2125_v27 }
 0x27b   :  { %v2322_v18 = vadd.f32 %v2321_v1, %v2320_v51  ;;  %v2215_v1 = vmul.f32 %v7899_v47, %v7899_v47  ;;  %v7939_v51 = vpop.f32.mrf.mxu1 }
 0x27c   :  { %v2129_v36 = vadd.f32 %v2128_v13, %v2127_v14  ;;  %v2216_v13 = vmul.f32 %v7859_v38, %v7859_v38  ;;  %v2333_v14 = vsel %vm2024_vm1, %v2214_v24, 0.0 }
 0x27d   :  { %5849 = vmatmul.mubr.msk.bf16.gmra.mxu1 %vm474_vm0, %v7641_v5  ;;  %v2324_v19 = vadd.f32 %v2323_v17, %v2322_v18  ;;  %v2329_v5 = vsel %vm2024_vm1, %v2212_v15, 0.0 }
 0x27e   :  { %5852 = vmatprep.mubr.msk.bf16.mxu1 %vm474_vm0, %v7651_v63  ;;  %v2131_v26 = vadd.f32 %v2130_v4, %v2129_v36  ;;  %v2136_v63 = vsel %vm2024_vm1, %v7873_v33, 0.0  ;;  %v2217_v4 = vmul.f32 %v7885_v49, %v7885_v49  ;;  %v2335_v36 = vsel %vm2024_vm1, %v2215_v1, 0.0 }
 0x27f   :  { %v2326_v53 = vadd.f32 %v2325_v22, %v2324_v19  ;;  %v7955_v19 = vpop.f32.mrf.mxu1 }
 0x280   :  { %v2133_v42 = vadd.f32 %v2132_v0, %v2131_v26  ;;  %v2142_v0 = vsel %vm2024_vm1, %v7885_v49, 0.0  ;;  %v2218_v26 = vmul.f32 %v7927_v28, %v7927_v28  ;;  %v2146_v24 = vsel %vm2024_vm1, %v7955_v19, 0.0 }
 0x281   :  { %v2328_v48 = vadd.f32 %v2327_v44, %v2326_v53  ;;  %v2339_v53 = vsel %vm2024_vm1, %v2217_v4, 0.0 }
 0x282   :  { %v2135_v50 = vadd.f32 %v2134_v25, %v2133_v42 }
 0x283   :  { %v2330_v27 = vadd.f32 %v2329_v5, %v2328_v48  ;;  %v2219_v5 = vmul.f32 %v7955_v19, %v7955_v19  ;;  %v2220_v48 = vmul.f32 %v7911_v34, %v7911_v34 }
 0x284   :  { %v2137_v17 = vadd.f32 %v2136_v63, %v2135_v50  ;;  %v2148_v50 = vsel %vm2024_vm1, %v7911_v34, 0.0 }
 0x285   :  { %5853 = vmatmul.mubr.msk.bf16.gmra.mxu1 %vm474_vm0, %v7666_v8  ;;  %v2332_v18 = vadd.f32 %v2331_v40, %v2330_v27  ;;  %v2337_v8 = vsel %vm2024_vm1, %v2216_v13, 0.0  ;;  %v2341_v40 = vsel %vm2024_vm1, %v2218_v26, 0.0  ;;  %v2221_v27 = vmul.f32 %v7939_v51, %v7939_v51 }
 0x286   :  { %5856 = vmatprep.mubr.msk.bf16.mxu1 %vm474_vm0, %v7678_v45  ;;  %v2139_v15 = vadd.f32 %v2138_v20, %v2137_v17  ;;  %v2144_v45 = vsel %vm2024_vm1, %v7927_v28, 0.0  ;;  %v2343_v13 = vsel %vm2024_vm1, %v2219_v5, 0.0 }
 0x287   :  { %v2334_v22 = vadd.f32 %v2333_v14, %v2332_v18  ;;  %v2150_v14 = vsel %vm2024_vm1, %v7939_v51, 0.0  ;;  %v2347_v4 = vsel %vm2024_vm1, %v2221_v27, 0.0  ;;  %v11901_v27 = vld [vmem:[#allocation34_spill] sm:$0xff] }
 0x288   :  { %v2141_v31 = vadd.f32 %v2140_v10, %v2139_v15  ;;  %v2345_v10 = vsel %vm2024_vm1, %v2220_v48, 0.0 }
 0x289   :  { %v2336_v44 = vadd.f32 %v2335_v36, %v2334_v22 }
 0x28a   :  { %v2143_v25 = vadd.f32 %v2142_v0, %v2141_v31 }
 0x28b   :  { %v2338_v42 = vadd.f32 %v2337_v8, %v2336_v44 }
 0x28c   :  { %v2145_v63 = vadd.f32 %v2144_v45, %v2143_v25 }
 0x28d   :  { %5857 = vmatmul.mubr.msk.bf16.gmra.mxu1 %vm474_vm0, %v7692_v30  ;;  %v2340_v1 = vadd.f32 %v2339_v53, %v2338_v42 }
 0x28e   :  { %5860 = vmatprep.mubr.msk.bf16.mxu1 %vm474_vm0, %v7694_v35  ;;  %v2147_v20 = vadd.f32 %v2146_v24, %v2145_v63 }
 0x28f   :  { %v2342_v17 = vadd.f32 %v2341_v40, %v2340_v1  ;;  %v11900_v1 = vld [vmem:[#allocation47_spill] sm:$0xff] }
 0x290   :  { %v2149_v30 = vadd.f32 %v2148_v50, %v2147_v20 }
 0x291   :  { %v2344_v18 = vadd.f32 %v2343_v13, %v2342_v17  ;;  %v11902_v17 = vld [vmem:[#allocation39_spill] sm:$0xff] }
 0x292   :  { %v2151_v15 = vadd.f32 %v2150_v14, %v2149_v30 }
 0x293   :  { %v2346_v36 = vadd.f32 %v2345_v10, %v2344_v18  ;;  %v11903_v10 = vld [vmem:[#allocation48_spill] sm:$0xff]  ;;  %v11904_v18 = vld [vmem:[#allocation61_spill] sm:$0xff] }
 0x294   :  { %v2152_v22 = vrot.slane %v2151_v15, 4 }
 0x295   :  { %5861 = vmatmul.mubr.msk.bf16.gmra.mxu1 %vm474_vm0, %v7699_v43  ;;  %v2348_v35 = vadd.f32 %v2347_v4, %v2346_v36 }
 0x296   :  { %5864 = vmatprep.mubr.msk.bf16.mxu1 %vm474_vm0, %v7701_v32  ;;  %v2153_v0 = vadd.f32 %v2152_v22, %v2151_v15  ;;  %v11905_v15 = vld [vmem:[#allocation38_spill] sm:$0xff] }
 0x297   :  { %v2349_v8 = vrot.slane %v2348_v35, 4  ;;  %v11906_v22 = vld [vmem:[#allocation42_spill] sm:$0xff] }
 0x298   :  { %v2154_v31 = vrot.slane %v2153_v0, 2 }
 0x299   :  { %v2350_v26 = vadd.f32 %v2349_v8, %v2348_v35 }
 0x29a   :  { %v2155_v44 = vadd.f32 %v2154_v31, %v2153_v0  ;;  %v11907_v0 = vld [vmem:[#allocation49_spill] sm:$0xff]  ;;  %v11908_v31 = vld [vmem:[#allocation55_spill] sm:$0xff] }
 0x29b   :  { %v2351_v45 = vrot.slane %v2350_v26, 2 }
 0x29c   :  { %v2156_v53 = vrot.slane %v2155_v44, 1 }
 0x29d   :  { %5865 = vmatmul.mubr.msk.bf16.gmra.mxu1 %vm474_vm0, %v7704_v7  ;;  %v2352_v25 = vadd.f32 %v2351_v45, %v2350_v26 }
 0x29e   :  { %5868 = vmatprep.mubr.msk.bf16.mxu1 %vm474_vm0, %v7706_v12  ;;  %v2157_v5 = vadd.f32 %v2156_v53, %v2155_v44  ;;  %v2022_v12 = vld [vmem:[%s11533_s9] sm:$0x1]  ;;  %v11910_v53 = vld [vmem:[#allocation52_spill] sm:$0xff] }
 0x29f   :  { %v2353_v43 = vrot.slane %v2352_v25, 1  ;;  %v11909_v44 = vld [vmem:[#allocation46_spill] sm:$0xff] }
 0x2a0   :  { %v2355_v42 = vmul.f32 0.001953125, %v2157_v5  ;;  %v11911_v5 = vld [vmem:[#allocation64_spill] sm:$0xff] }
 0x2a1   :  { %v2354_v24 = vadd.f32 %v2353_v43, %v2352_v25 }
 0x2a2   :  { %v2357_v48 = vmul.f32 %v2355_v42, %v2355_v42 }
 0x2a3   :  { %v2356_v32 = vmul.f32 0.001953125, %v2354_v24 }
 0x2a5   :  { %5869 = vmatmul.mubr.msk.bf16.gmra.mxu1 %vm474_vm0, %v7708_v41  ;;  %v2358_v63 = vsub.f32 %v2356_v32, %v2357_v48  ;;  %v6094_v41 = vld [vmem:[%s11534_s11 + $0x18] sm:$0xff]   ;;  %v11913_v48 = vld [vmem:[#allocation58_spill] sm:$0xff] }
 0x2a6   :  { %5872 = vmatprep.mubr.msk.bf16.mxu1 %vm474_vm0, %v7713_v16  ;;  %5880 = vmatprep.subr.bf16.mxu1 %v6094_v41 }
 0x2a7   :  { %v2359_v40 = vadd.f32 1e-05, %v2358_v63  ;;  %5881 = vmatpush3.bf16.msra.mxu1 %v6094_v41 }
 0x2a9   :  { %6100 = vrsqrt.f32 %v2359_v40 }
 0x2ad   :  { %5873 = vmatmul.mubr.msk.bf16.gmra.mxu1 %vm474_vm0, %v7715_v57  ;;  %v2023_v57 = vld [vmem:[%s11535_s10] sm:$0x1] }
 0x2ae   :  { %5876 = vmatprep.mubr.msk.bf16.mxu1 %vm474_vm0, %v7717_v37 }
 0x2b5   :  { %5877 = vmatmul.mubr.msk.bf16.gmra.mxu1 %vm474_vm0, %v7726_v39 }
 0x2b6   :  { %v6101_v7 = vpop.eup %6100 }
 0x2b7   :  { %v2361_v16 = vmul.f32 %v6101_v7, %v2022_v12  ;;  %v11914_v12 = vld [vmem:[#allocation78_spill] sm:$0xff] }
 0x2b9   :  { %v2362_v50 = vmul.f32 %v2361_v16, %v2355_v42  ;;  %v8011_v39 = vrot.slane %v2361_v16, %v11900_v1  ;;  %v11912_v42 = vld [vmem:[#allocation76_spill] sm:$0xff]  ;;  %v11915_v16 = vld [vmem:[#allocation89_spill] sm:$0xff] }
 0x2bb   :  { %v2363_v37 = vsub.f32 %v2023_v57, %v2362_v50  ;;  %v2371_v20 = vmul.f32 %v8011_v39, %v11901_v27  ;;  %v2375_v14 = vmul.f32 %v8011_v39, %v11902_v17  ;;  %v2379_v30 = vmul.f32 %v8011_v39, %v11903_v10  ;;  %v11916_v57 = vld [vmem:[#allocation3_spill] sm:$0xff] }
 0x2bc   :  { %v2383_v4 = vmul.f32 %v8011_v39, %v11904_v18  ;;  %v2396_v36 = vmul.f32 %v11905_v15, %v8011_v39  ;;  %v2397_v35 = vmul.f32 %v11906_v22, %v8011_v39  ;;  %v2398_v8 = vmul.f32 %v8011_v39, %v11907_v0 }
 0x2bd   :  { %v8016_v13 = vrot.slane %v2363_v37, %v11900_v1  ;;  %v2399_v26 = vmul.f32 %v8011_v39, %v11908_v31  ;;  %v2400_v45 = vmul.f32 %v11909_v44, %v8011_v39  ;;  %v2401_v25 = vmul.f32 %v11910_v53, %v8011_v39 }
 0x2be   :  { %v2402_v43 = vmul.f32 %v8011_v39, %v11911_v5  ;;  %v2403_v24 = vmul.f32 %v8011_v39, %v11912_v42  ;;  %v2404_v32 = vmul.f32 %v11913_v48, %v8011_v39  ;;  %v2405_v63 = vmul.f32 %v11875_v62, %v8011_v39 }
 0x2bf   :  { %v2406_v40 = vmul.f32 %v8011_v39, %v11879_v60  ;;  %v2407_v7 = vmul.f32 %v8011_v39, %v11882_v9  ;;  %v2408_v41 = vmul.f32 %v11914_v12, %v8011_v39  ;;  %v2409_v50 = vmul.f32 %v11915_v16, %v8011_v39 }
 0x2c0   :  { %v2410_v37 = vmul.f32 %v8011_v39, %v11916_v57  ;;  %v2411_v27 = vmul.f32 %v8011_v39, %v7588_v21  ;;  %v2412_v62 = vmul.f32 %v11890_v59, %v8011_v39  ;;  %v2413_v60 = vmul.f32 %v7576_v55, %v8011_v39 }
 0x2c1   :  { %v2414_v9 = vmul.f32 %v8011_v39, %v7628_v61  ;;  %v8063_v17 = vadd.f32 %v8016_v13, %v2371_v20  ;;  %v2415_v10 = vmul.f32 %v8011_v39, %v7661_v58  ;;  %v2416_v18 = vmul.f32 %v7608_v2, %v8011_v39 }
 0x2c2   :  { %v2417_v21 = vmul.f32 %v7639_v6, %v8011_v39  ;;  %v8072_v59 = vadd.f32 %v8016_v13, %v2375_v14  ;;  %v2418_v55 = vmul.f32 %v8011_v39, %v7711_v3  ;;  %v2419_v61 = vmul.f32 %v8011_v39, %v7770_v11 }
 0x2c3   :  { %11917 = vst [vmem:[#allocation7_spill] sm:$0xff] %v8063_v17  ;;  %v2420_v20 = vmul.f32 %v7687_v46, %v8011_v39  ;;  %v8081_v58 = vadd.f32 %v8016_v13, %v2379_v30  ;;  %v2421_v2 = vmul.f32 %v7747_v23, %v8011_v39  ;;  %v2422_v6 = vmul.f32 %v8011_v39, %v7807_v54 }
 0x2c4   :  { %11918 = vst [vmem:[#allocation8_spill] sm:$0xff] %v8072_v59  ;;  %v2423_v14 = vmul.f32 %v8011_v39, %v7841_v29  ;;  %v8090_v3 = vadd.f32 %v8016_v13, %v2383_v4  ;;  %v2424_v11 = vmul.f32 %v7790_v56, %v8011_v39  ;;  %v2425_v46 = vmul.f32 %v7825_v52, %v8011_v39 }
 0x2c5   :  { %11919 = vst [vmem:[#allocation9_spill] sm:$0xff] %v8081_v58  ;;  %v2426_v30 = vmul.f32 %v8011_v39, %v7873_v33  ;;  %v2427_v23 = vmul.f32 %v8011_v39, %v7899_v47  ;;  %v2428_v54 = vmul.f32 %v7859_v38, %v8011_v39  ;;  %v2429_v29 = vmul.f32 %v7885_v49, %v8011_v39 }
 0x2c6   :  { %11920 = vst [vmem:[#allocation10_spill] sm:$0xff] %v8090_v3  ;;  %v2430_v4 = vmul.f32 %v8011_v39, %v7927_v28  ;;  %v2432_v56 = vmul.f32 %v7911_v34, %v8011_v39  ;;  %v2433_v52 = vmul.f32 %v7939_v51, %v8011_v39  ;;  %v8111_v33 = vadd.f32 %v8016_v13, %v2396_v36 }
 0x2c7   :  { %v8114_v47 = vadd.f32 %v8016_v13, %v2397_v35  ;;  %v8117_v38 = vadd.f32 %v8016_v13, %v2398_v8  ;;  %v8120_v49 = vadd.f32 %v8016_v13, %v2399_v26  ;;  %v8123_v28 = vadd.f32 %v8016_v13, %v2400_v45 }
 0x2c8   :  { %11921 = vst [vmem:[#allocation11_spill] sm:$0xff] %v8111_v33  ;;  %v8126_v34 = vadd.f32 %v8016_v13, %v2401_v25  ;;  %v8129_v51 = vadd.f32 %v8016_v13, %v2402_v43  ;;  %v8132_v15 = vadd.f32 %v8016_v13, %v2403_v24  ;;  %v8135_v36 = vadd.f32 %v8016_v13, %v2404_v32 }
 0x2c9   :  { %11922 = vst [vmem:[#allocation12_spill] sm:$0xff] %v8114_v47  ;;  %11923 = vst [vmem:[#allocation13_spill] sm:$0xff] %v8117_v38  ;;  %v8138_v22 = vadd.f32 %v8016_v13, %v2405_v63  ;;  %v8141_v35 = vadd.f32 %v8016_v13, %v2406_v40  ;;  %v8144_v0 = vadd.f32 %v8016_v13, %v2407_v7  ;;  %v6095_v7 = vld [vmem:[%s11534_s11 + $0x10] sm:$0xff]  }
 0x2ca   :  { %11924 = vst [vmem:[#allocation14_spill] sm:$0xff] %v8120_v49  ;;  %11925 = vst [vmem:[#allocation60_spill] sm:$0xff] %v8123_v28  ;;  %v8147_v8 = vadd.f32 %v8016_v13, %v2408_v41  ;;  %v8150_v31 = vadd.f32 %v8016_v13, %v2409_v50  ;;  %v8153_v26 = vadd.f32 %v8016_v13, %v2410_v37  ;;  %5882 = vmatprep.subr.bf16.mxu1 %v6095_v7 }
 0x2cb   :  { %11926 = vst [vmem:[#allocation81_spill] sm:$0xff] %v8126_v34  ;;  %11927 = vst [vmem:[#allocation63_spill] sm:$0xff] %v8129_v51  ;;  %v8156_v44 = vadd.f32 %v8016_v13, %v2411_v27  ;;  %v8159_v45 = vadd.f32 %v8016_v13, %v2412_v62  ;;  %v8162_v53 = vadd.f32 %v8016_v13, %v2413_v60  ;;  %5883 = vmatpush3.bf16.msra.mxu1 %v6095_v7 }
 0x2cc   :  { %11928 = vst [vmem:[#allocation82_spill] sm:$0xff] %v8132_v15  ;;  %11929 = vst [vmem:[#allocation83_spill] sm:$0xff] %v8135_v36  ;;  %v8165_v25 = vadd.f32 %v8016_v13, %v2414_v9  ;;  %v8168_v5 = vadd.f32 %v8016_v13, %v2415_v10  ;;  %v8171_v43 = vadd.f32 %v8016_v13, %v2416_v18  ;;  %v6096_v10 = vld [vmem:[%s11534_s11 + $0x8] sm:$0xff]  }
 0x2cd   :  { %11930 = vst [vmem:[#allocation59_spill] sm:$0xff] %v8138_v22  ;;  %11931 = vst [vmem:[#allocation84_spill] sm:$0xff] %v8141_v35  ;;  %v8174_v42 = vadd.f32 %v8016_v13, %v2417_v21  ;;  %v8177_v24 = vadd.f32 %v8016_v13, %v2418_v55  ;;  %v8180_v48 = vadd.f32 %v8016_v13, %v2419_v61  ;;  %5884 = vmatprep.subr.bf16.mxu1 %v6096_v10 }
 0x2ce   :  { %11932 = vst [vmem:[#allocation85_spill] sm:$0xff] %v8144_v0  ;;  %11933 = vst [vmem:[#allocation86_spill] sm:$0xff] %v8147_v8  ;;  %v8183_v32 = vadd.f32 %v8016_v13, %v2420_v20  ;;  %v8186_v63 = vadd.f32 %v8016_v13, %v2421_v2  ;;  %v8189_v40 = vadd.f32 %v8016_v13, %v2422_v6 }
 0x2cf   :  { %11934 = vst [vmem:[#allocation66_spill] sm:$0xff] %v8150_v31  ;;  %11935 = vst [vmem:[#allocation87_spill] sm:$0xff] %v8153_v26  ;;  %v8195_v12 = vadd.f32 %v8016_v13, %v2423_v14  ;;  %v8198_v41 = vadd.f32 %v8016_v13, %v2424_v11  ;;  %v8201_v16 = vadd.f32 %v8016_v13, %v2425_v46  ;;  %5885 = vmatpush3.bf16.msra.mxu1 %v6096_v10 }
 0x2d0   :  { %11936 = vst [vmem:[#allocation65_spill] sm:$0xff] %v8156_v44  ;;  %11937 = vst [vmem:[#allocation90_spill] sm:$0xff] %v8159_v45  ;;  %v8204_v50 = vadd.f32 %v8016_v13, %v2426_v30  ;;  %v8207_v57 = vadd.f32 %v8016_v13, %v2427_v23  ;;  %v8210_v37 = vadd.f32 %v8016_v13, %v2428_v54 }
 0x2d1   :  { %11938 = vst [vmem:[#allocation91_spill] sm:$0xff] %v8162_v53  ;;  %11939 = vst [vmem:[#allocation62_spill] sm:$0xff] %v8165_v25  ;;  %v8213_v27 = vadd.f32 %v8016_v13, %v2429_v29  ;;  %v8216_v62 = vadd.f32 %v8016_v13, %v2430_v4  ;;  %v8219_v60 = vadd.f32 %v8016_v13, %v2432_v56 }
 0x2d2   :  { %11940 = vst [vmem:[#allocation92_spill] sm:$0xff] %v8168_v5  ;;  %11941 = vst [vmem:[#allocation69_spill] sm:$0xff] %v8171_v43  ;;  %v8222_v9 = vadd.f32 %v8016_v13, %v2433_v52 }
 0x2d3   :  { %11942 = vst [vmem:[#allocation4_spill] sm:$0xff] %v8174_v42  ;;  %11943 = vst [vmem:[#allocation67_spill] sm:$0xff] %v8177_v24 }
 0x2d4   :  { %11944 = vst [vmem:[#allocation73_spill] sm:$0xff] %v8180_v48  ;;  %11945 = vst [vmem:[#allocation71_spill] sm:$0xff] %v8183_v32 }
 0x2d5   :  { %11946 = vst [vmem:[#allocation15_spill] sm:$0xff] %v8186_v63  ;;  %11947 = vst [vmem:[#allocation50_spill] sm:$0xff] %v8189_v40 }
 0x2d6   :  { %11948 = vst [vmem:[#allocation16_spill] sm:$0xff] %v8195_v12  ;;  %11949 = vst [vmem:[#allocation68_spill] sm:$0xff] %v8198_v41 }
 0x2d7   :  { %11950 = vst [vmem:[#allocation56_spill] sm:$0xff] %v8201_v16  ;;  %11951 = vst [vmem:[#allocation17_spill] sm:$0xff] %v8204_v50 }
 0x2d8   :  { %11952 = vst [vmem:[#allocation18_spill] sm:$0xff] %v8207_v57  ;;  %11953 = vst [vmem:[#allocation75_spill] sm:$0xff] %v8210_v37 }
 0x2d9   :  { %11954 = vst [vmem:[#allocation53_spill] sm:$0xff] %v8213_v27  ;;  %11955 = vst [vmem:[#allocation72_spill] sm:$0xff] %v8216_v62 }
 0x2da   :  { %11956 = vst [vmem:[#allocation70_spill] sm:$0xff] %v8219_v60  ;;  %11957 = vst [vmem:[#allocation97_spill] sm:$0xff] %v8222_v9 }
 0x2fc   :  { %v8227_v18 = vpop.f32.mrf.mxu1 }
 0x2fd   :  { %v3066_v2 = vmul.f32 %v8227_v18, %v8227_v18  ;;  %v2934_v23 = vsel %vm2024_vm1, %v8227_v18, 0.0 }
 0x2fe   :  { %v8229_v21 = vpop.f32.mrf.mxu1 }
 0x2ff   :  { %v3064_v61 = vmul.f32 %v8229_v21, %v8229_v21  ;;  %v2931_v6 = vsel %vm2024_vm1, %v8229_v21, 0.0  ;;  %v3131_v10 = vsel %vm2024_vm1, %v3066_v2, 0.0 }
 0x300   :  { %v8231_v55 = vpop.f32.mrf.mxu1 }
 0x301   :  { %v3128_v54 = vsel %vm2024_vm1, %v3064_v61, 0.0  ;;  %v3067_v29 = vmul.f32 %v8231_v55, %v8231_v55 }
 0x302   :  { %v8235_v20 = vpop.f32.mrf.mxu1 }
 0x303   :  { %v2932_v14 = vsel %vm2024_vm1, %v8235_v20, 0.0  ;;  %v3065_v11 = vmul.f32 %v8235_v20, %v8235_v20  ;;  %v3133_v62 = vsel %vm2024_vm1, %v3067_v29, 0.0 }
 0x304   :  { %v2933_v46 = vadd.f32 %v2932_v14, %v2931_v6  ;;  %v8245_v30 = vpop.f32.mrf.mxu1  ;;  %v2936_v6 = vsel %vm2024_vm1, %v8231_v55, 0.0 }
 0x305   :  { %v3129_v4 = vsel %vm2024_vm1, %v3065_v11, 0.0  ;;  %v3070_v2 = vmul.f32 %v8245_v30, %v8245_v30 }
 0x306   :  { %v3130_v56 = vadd.f32 %v3129_v4, %v3128_v54  ;;  %v8253_v52 = vpop.f32.mrf.mxu1  ;;  %v2935_v7 = vadd.f32 %v2934_v23, %v2933_v46 }
 0x307   :  { %v3068_v14 = vmul.f32 %v8253_v52, %v8253_v52  ;;  %v2938_v11 = vsel %vm2024_vm1, %v8253_v52, 0.0  ;;  %v3139_v37 = vsel %vm2024_vm1, %v3070_v2, 0.0 }
 0x308   :  { %v2937_v9 = vadd.f32 %v2936_v6, %v2935_v7  ;;  %v3132_v60 = vadd.f32 %v3131_v10, %v3130_v56  ;;  %v8260_v61 = vpop.f32.mrf.mxu1 }
 0x309   :  { %v3135_v23 = vsel %vm2024_vm1, %v3068_v14, 0.0 }
 0x30a   :  { %v2939_v54 = vadd.f32 %v2938_v11, %v2937_v9  ;;  %v3134_v4 = vadd.f32 %v3133_v62, %v3132_v60  ;;  %v8265_v46 = vpop.f32.mrf.mxu1  ;;  %v2942_v62 = vsel %vm2024_vm1, %v8245_v30, 0.0  ;;  %v3071_v60 = vmul.f32 %v8260_v61, %v8260_v61 }
 0x30b   :  { %v2940_v7 = vsel %vm2024_vm1, %v8265_v46, 0.0  ;;  %v3069_v56 = vmul.f32 %v8265_v46, %v8265_v46 }
 0x30c   :  { %v3136_v10 = vadd.f32 %v3135_v23, %v3134_v4  ;;  %v2941_v29 = vadd.f32 %v2940_v7, %v2939_v54  ;;  %v8274_v6 = vpop.f32.mrf.mxu1  ;;  %v2944_v4 = vsel %vm2024_vm1, %v8260_v61, 0.0  ;;  %v3141_v50 = vsel %vm2024_vm1, %v3071_v60, 0.0 }
 0x30d   :  { %v3137_v9 = vsel %vm2024_vm1, %v3069_v56, 0.0  ;;  %v3074_v2 = vmul.f32 %v8274_v6, %v8274_v6 }
 0x30e   :  { %v3138_v11 = vadd.f32 %v3137_v9, %v3136_v10  ;;  %v8281_v14 = vpop.f32.mrf.mxu1  ;;  %v2943_v27 = vadd.f32 %v2942_v62, %v2941_v29 }
 0x30f   :  { %v3072_v54 = vmul.f32 %v8281_v14, %v8281_v14  ;;  %v2946_v56 = vsel %vm2024_vm1, %v8281_v14, 0.0  ;;  %v3147_v41 = vsel %vm2024_vm1, %v3074_v2, 0.0 }
 0x310   :  { %v2945_v23 = vadd.f32 %v2944_v4, %v2943_v27  ;;  %v3140_v7 = vadd.f32 %v3139_v37, %v3138_v11  ;;  %v8288_v57 = vpop.f32.mrf.mxu1 }
 0x311   :  { %v3143_v62 = vsel %vm2024_vm1, %v3072_v54, 0.0 }
 0x312   :  { %v2947_v10 = vadd.f32 %v2946_v56, %v2945_v23  ;;  %v3142_v9 = vadd.f32 %v3141_v50, %v3140_v7  ;;  %v8293_v29 = vpop.f32.mrf.mxu1  ;;  %v2950_v50 = vsel %vm2024_vm1, %v8274_v6, 0.0  ;;  %v3075_v23 = vmul.f32 %v8288_v57, %v8288_v57 }
 0x313   :  { %v2948_v27 = vsel %vm2024_vm1, %v8293_v29, 0.0  ;;  %v3073_v37 = vmul.f32 %v8293_v29, %v8293_v29 }
 0x314   :  { %v3144_v11 = vadd.f32 %v3143_v62, %v3142_v9  ;;  %v2949_v60 = vadd.f32 %v2948_v27, %v2947_v10  ;;  %v2952_v9 = vsel %vm2024_vm1, %v8288_v57, 0.0  ;;  %v3149_v40 = vsel %vm2024_vm1, %v3075_v23, 0.0 }
 0x315   :  { %v8302_v4 = vpop.f32.mrf.mxu1  ;;  %v3145_v7 = vsel %vm2024_vm1, %v3073_v37, 0.0 }
 0x316   :  { %v3146_v56 = vadd.f32 %v3145_v7, %v3144_v11  ;;  %v2951_v16 = vadd.f32 %v2950_v50, %v2949_v60  ;;  %v3078_v2 = vmul.f32 %v8302_v4, %v8302_v4 }
 0x317   :  { %v8309_v54 = vpop.f32.mrf.mxu1 }
 0x318   :  { %v3076_v10 = vmul.f32 %v8309_v54, %v8309_v54  ;;  %v2953_v62 = vadd.f32 %v2952_v9, %v2951_v16  ;;  %v3148_v27 = vadd.f32 %v3147_v41, %v3146_v56  ;;  %v2954_v37 = vsel %vm2024_vm1, %v8309_v54, 0.0 }
 0x319   :  { %v8316_v12 = vpop.f32.mrf.mxu1  ;;  %v3155_v32 = vsel %vm2024_vm1, %v3078_v2, 0.0 }
 0x31a   :  { %v2955_v11 = vadd.f32 %v2954_v37, %v2953_v62  ;;  %v3150_v7 = vadd.f32 %v3149_v40, %v3148_v27  ;;  %v3151_v50 = vsel %vm2024_vm1, %v3076_v10, 0.0  ;;  %v2958_v40 = vsel %vm2024_vm1, %v8302_v4, 0.0 }
 0x31b   :  { %v8321_v60 = vpop.f32.mrf.mxu1  ;;  %v3079_v62 = vmul.f32 %v8316_v12, %v8316_v12 }
 0x31c   :  { %v2956_v16 = vsel %vm2024_vm1, %v8321_v60, 0.0  ;;  %v3077_v41 = vmul.f32 %v8321_v60, %v8321_v60  ;;  %v3152_v56 = vadd.f32 %v3151_v50, %v3150_v7  ;;  %v2960_v7 = vsel %vm2024_vm1, %v8316_v12, 0.0 }
 0x31d   :  { %v2957_v23 = vadd.f32 %v2956_v16, %v2955_v11  ;;  %v8330_v9 = vpop.f32.mrf.mxu1  ;;  %v3157_v24 = vsel %vm2024_vm1, %v3079_v62, 0.0 }
 0x31e   :  { %v3153_v27 = vsel %vm2024_vm1, %v3077_v41, 0.0  ;;  %v3082_v2 = vmul.f32 %v8330_v9, %v8330_v9 }
 0x31f   :  { %v3154_v37 = vadd.f32 %v3153_v27, %v3152_v56  ;;  %v8337_v10 = vpop.f32.mrf.mxu1  ;;  %v2959_v63 = vadd.f32 %v2958_v40, %v2957_v23 }
 0x320   :  { %v3080_v11 = vmul.f32 %v8337_v10, %v8337_v10  ;;  %v2962_v41 = vsel %vm2024_vm1, %v8337_v10, 0.0  ;;  %v3163_v43 = vsel %vm2024_vm1, %v3082_v2, 0.0 }
 0x321   :  { %v2961_v50 = vadd.f32 %v2960_v7, %v2959_v63  ;;  %v3156_v16 = vadd.f32 %v3155_v32, %v3154_v37  ;;  %v8344_v48 = vpop.f32.mrf.mxu1 }
 0x322   :  { %v3159_v40 = vsel %vm2024_vm1, %v3080_v11, 0.0 }
 0x323   :  { %v2963_v56 = vadd.f32 %v2962_v41, %v2961_v50  ;;  %v3158_v27 = vadd.f32 %v3157_v24, %v3156_v16  ;;  %v8349_v23 = vpop.f32.mrf.mxu1  ;;  %v2966_v24 = vsel %vm2024_vm1, %v8330_v9, 0.0  ;;  %v3083_v50 = vmul.f32 %v8344_v48, %v8344_v48 }
 0x324   :  { %v2964_v63 = vsel %vm2024_vm1, %v8349_v23, 0.0  ;;  %v3081_v32 = vmul.f32 %v8349_v23, %v8349_v23 }
 0x325   :  { %v3160_v37 = vadd.f32 %v3159_v40, %v3158_v27  ;;  %v2965_v62 = vadd.f32 %v2964_v63, %v2963_v56  ;;  %v8358_v7 = vpop.f32.mrf.mxu1  ;;  %v2968_v27 = vsel %vm2024_vm1, %v8344_v48, 0.0  ;;  %v3165_v25 = vsel %vm2024_vm1, %v3083_v50, 0.0 }
 0x326   :  { %v3161_v16 = vsel %vm2024_vm1, %v3081_v32, 0.0  ;;  %v3086_v2 = vmul.f32 %v8358_v7, %v8358_v7 }
 0x327   :  { %v2967_v41 = vadd.f32 %v2966_v24, %v2965_v62  ;;  %v3162_v11 = vadd.f32 %v3161_v16, %v3160_v37  ;;  %v8365_v42 = vpop.f32.mrf.mxu1 }
 0x328   :  { %v3084_v56 = vmul.f32 %v8365_v42, %v8365_v42  ;;  %v2970_v32 = vsel %vm2024_vm1, %v8365_v42, 0.0  ;;  %v3171_v45 = vsel %vm2024_vm1, %v3086_v2, 0.0 }
 0x329   :  { %v3164_v40 = vadd.f32 %v3163_v43, %v3162_v11  ;;  %v2969_v63 = vadd.f32 %v2968_v27, %v2967_v41  ;;  %v8372_v5 = vpop.f32.mrf.mxu1 }
 0x32a   :  { %v3167_v16 = vsel %vm2024_vm1, %v3084_v56, 0.0 }
 0x32b   :  { %v2971_v37 = vadd.f32 %v2970_v32, %v2969_v63  ;;  %v3166_v62 = vadd.f32 %v3165_v25, %v3164_v40  ;;  %v8377_v24 = vpop.f32.mrf.mxu1  ;;  %v2974_v25 = vsel %vm2024_vm1, %v8358_v7, 0.0  ;;  %v3087_v40 = vmul.f32 %v8372_v5, %v8372_v5 }
 0x32c   :  { %v2972_v43 = vsel %vm2024_vm1, %v8377_v24, 0.0  ;;  %v3085_v41 = vmul.f32 %v8377_v24, %v8377_v24 }
 0x32d   :  { %v3168_v11 = vadd.f32 %v3167_v16, %v3166_v62  ;;  %v2973_v50 = vadd.f32 %v2972_v43, %v2971_v37  ;;  %v8386_v27 = vpop.f32.mrf.mxu1  ;;  %v2976_v62 = vsel %vm2024_vm1, %v8372_v5, 0.0  ;;  %v3173_v26 = vsel %vm2024_vm1, %v3087_v40, 0.0 }
 0x32e   :  { %v3169_v63 = vsel %vm2024_vm1, %v3085_v41, 0.0  ;;  %v3090_v2 = vmul.f32 %v8386_v27, %v8386_v27 }
 0x32f   :  { %v2975_v32 = vadd.f32 %v2974_v25, %v2973_v50  ;;  %v3170_v56 = vadd.f32 %v3169_v63, %v3168_v11  ;;  %v8393_v53 = vpop.f32.mrf.mxu1 }
 0x330   :  { %v3088_v37 = vmul.f32 %v8393_v53, %v8393_v53  ;;  %v2978_v41 = vsel %vm2024_vm1, %v8393_v53, 0.0  ;;  %v3179_v8 = vsel %vm2024_vm1, %v3090_v2, 0.0 }
 0x331   :  { %v3172_v16 = vadd.f32 %v3171_v45, %v3170_v56  ;;  %v2977_v43 = vadd.f32 %v2976_v62, %v2975_v32  ;;  %v8400_v44 = vpop.f32.mrf.mxu1 }
 0x332   :  { %11958 = vst [vmem:[#allocation74_spill] sm:$0xff] %v8400_v44  ;;  %v3175_v63 = vsel %vm2024_vm1, %v3088_v37, 0.0 }
 0x333   :  { %v2979_v11 = vadd.f32 %v2978_v41, %v2977_v43  ;;  %v3174_v50 = vadd.f32 %v3173_v26, %v3172_v16  ;;  %v8405_v25 = vpop.f32.mrf.mxu1  ;;  %v2982_v26 = vsel %vm2024_vm1, %v8386_v27, 0.0  ;;  %v3091_v16 = vmul.f32 %v8400_v44, %v8400_v44 }
 0x334   :  { %v2980_v45 = vsel %vm2024_vm1, %v8405_v25, 0.0  ;;  %v3089_v32 = vmul.f32 %v8405_v25, %v8405_v25 }
 0x335   :  { %v3176_v56 = vadd.f32 %v3175_v63, %v3174_v50  ;;  %v2981_v40 = vadd.f32 %v2980_v45, %v2979_v11  ;;  %v8414_v62 = vpop.f32.mrf.mxu1  ;;  %v2984_v50 = vsel %vm2024_vm1, %v8400_v44, 0.0  ;;  %v3181_v35 = vsel %vm2024_vm1, %v3091_v16, 0.0 }
 0x336   :  { %11959 = vst [vmem:[#allocation101_spill] sm:$0xff] %v8414_v62  ;;  %v3177_v43 = vsel %vm2024_vm1, %v3089_v32, 0.0  ;;  %v3094_v2 = vmul.f32 %v8414_v62, %v8414_v62 }
 0x337   :  { %v2983_v41 = vadd.f32 %v2982_v26, %v2981_v40  ;;  %v3178_v37 = vadd.f32 %v3177_v43, %v3176_v56  ;;  %v8421_v31 = vpop.f32.mrf.mxu1 }
 0x338   :  { %11960 = vst [vmem:[#allocation102_spill] sm:$0xff] %v8421_v31  ;;  %v3092_v11 = vmul.f32 %v8421_v31, %v8421_v31  ;;  %v2986_v32 = vsel %vm2024_vm1, %v8421_v31, 0.0  ;;  %v3187_v36 = vsel %vm2024_vm1, %v3094_v2, 0.0 }
 0x339   :  { %v3180_v63 = vadd.f32 %v3179_v8, %v3178_v37  ;;  %v2985_v45 = vadd.f32 %v2984_v50, %v2983_v41  ;;  %v8428_v0 = vpop.f32.mrf.mxu1 }
 0x33a   :  { %11961 = vst [vmem:[#allocation93_spill] sm:$0xff] %v8428_v0  ;;  %v3183_v43 = vsel %vm2024_vm1, %v3092_v11, 0.0 }
 0x33b   :  { %v2987_v56 = vadd.f32 %v2986_v32, %v2985_v45  ;;  %v3182_v40 = vadd.f32 %v3181_v35, %v3180_v63  ;;  %v8433_v26 = vpop.f32.mrf.mxu1  ;;  %v2990_v35 = vsel %vm2024_vm1, %v8414_v62, 0.0  ;;  %v3095_v63 = vmul.f32 %v8428_v0, %v8428_v0 }
 0x33c   :  { %11962 = vst [vmem:[#allocation80_spill] sm:$0xff] %v8433_v26  ;;  %v2988_v8 = vsel %vm2024_vm1, %v8433_v26, 0.0  ;;  %v3093_v41 = vmul.f32 %v8433_v26, %v8433_v26 }
 0x33d   :  { %v3184_v37 = vadd.f32 %v3183_v43, %v3182_v40  ;;  %v2989_v16 = vadd.f32 %v2988_v8, %v2987_v56  ;;  %v8442_v50 = vpop.f32.mrf.mxu1  ;;  %v2992_v40 = vsel %vm2024_vm1, %v8428_v0, 0.0  ;;  %v3189_v51 = vsel %vm2024_vm1, %v3095_v63, 0.0 }
 0x33e   :  { %11963 = vst [vmem:[#allocation99_spill] sm:$0xff] %v8442_v50  ;;  %v3185_v45 = vsel %vm2024_vm1, %v3093_v41, 0.0  ;;  %v3098_v2 = vmul.f32 %v8442_v50, %v8442_v50 }
 0x33f   :  { %v2991_v32 = vadd.f32 %v2990_v35, %v2989_v16  ;;  %v3186_v11 = vadd.f32 %v3185_v45, %v3184_v37  ;;  %v8449_v22 = vpop.f32.mrf.mxu1 }
 0x340   :  { %11964 = vst [vmem:[#allocation98_spill] sm:$0xff] %v8449_v22  ;;  %v3096_v56 = vmul.f32 %v8449_v22, %v8449_v22  ;;  %v2994_v41 = vsel %vm2024_vm1, %v8449_v22, 0.0  ;;  %v3195_v28 = vsel %vm2024_vm1, %v3098_v2, 0.0 }
 0x341   :  { %v3188_v43 = vadd.f32 %v3187_v36, %v3186_v11  ;;  %v2993_v8 = vadd.f32 %v2992_v40, %v2991_v32  ;;  %v8456_v15 = vpop.f32.mrf.mxu1 }
 0x342   :  { %11965 = vst [vmem:[#allocation100_spill] sm:$0xff] %v8456_v15  ;;  %v3191_v45 = vsel %vm2024_vm1, %v3096_v56, 0.0 }
 0x343   :  { %v2995_v37 = vadd.f32 %v2994_v41, %v2993_v8  ;;  %v3190_v16 = vadd.f32 %v3189_v51, %v3188_v43  ;;  %v8461_v35 = vpop.f32.mrf.mxu1  ;;  %v2998_v51 = vsel %vm2024_vm1, %v8442_v50, 0.0  ;;  %v3099_v43 = vmul.f32 %v8456_v15, %v8456_v15  ;;  %v12010_v50 = vld [vmem:[#allocation2_spill] sm:$0xff] }
 0x344   :  { %11966 = vst [vmem:[#allocation19_spill] sm:$0xff] %v8461_v35  ;;  %v2996_v36 = vsel %vm2024_vm1, %v8461_v35, 0.0  ;;  %v3097_v32 = vmul.f32 %v8461_v35, %v8461_v35  ;;  %v12011_v35 = vld [vmem:[#allocation6_spill] sm:$0xff] }
 0x345   :  { %v3192_v11 = vadd.f32 %v3191_v45, %v3190_v16  ;;  %v2997_v63 = vadd.f32 %v2996_v36, %v2995_v37  ;;  %v8470_v40 = vpop.f32.mrf.mxu1  ;;  %v3000_v16 = vsel %vm2024_vm1, %v8456_v15, 0.0  ;;  %v3197_v38 = vsel %vm2024_vm1, %v3099_v43, 0.0 }
 0x346   :  { %11967 = vst [vmem:[#allocation20_spill] sm:$0xff] %v8470_v40  ;;  %v3193_v8 = vsel %vm2024_vm1, %v3097_v32, 0.0  ;;  %v3102_v2 = vmul.f32 %v8470_v40, %v8470_v40 }
 0x347   :  { %v2999_v41 = vadd.f32 %v2998_v51, %v2997_v63  ;;  %v3194_v56 = vadd.f32 %v3193_v8, %v3192_v11  ;;  %v8477_v34 = vpop.f32.mrf.mxu1 }
 0x348   :  { %11968 = vst [vmem:[#allocation94_spill] sm:$0xff] %v8477_v34  ;;  %v3100_v37 = vmul.f32 %v8477_v34, %v8477_v34  ;;  %v3002_v32 = vsel %vm2024_vm1, %v8477_v34, 0.0  ;;  %v3203_v33 = vsel %vm2024_vm1, %v3102_v2, 0.0 }
 0x349   :  { %v3196_v45 = vadd.f32 %v3195_v28, %v3194_v56  ;;  %v3001_v36 = vadd.f32 %v3000_v16, %v2999_v41  ;;  %v8484_v49 = vpop.f32.mrf.mxu1 }
 0x34a   :  { %11969 = vst [vmem:[#allocation21_spill] sm:$0xff] %v8484_v49  ;;  %v3199_v8 = vsel %vm2024_vm1, %v3100_v37, 0.0 }
 0x34b   :  { %v3003_v11 = vadd.f32 %v3002_v32, %v3001_v36  ;;  %v3198_v63 = vadd.f32 %v3197_v38, %v3196_v45  ;;  %v8489_v51 = vpop.f32.mrf.mxu1  ;;  %v3006_v38 = vsel %vm2024_vm1, %v8470_v40, 0.0  ;;  %v3103_v45 = vmul.f32 %v8484_v49, %v8484_v49 }
 0x34c   :  { %11970 = vst [vmem:[#allocation22_spill] sm:$0xff] %v8489_v51  ;;  %v3004_v28 = vsel %vm2024_vm1, %v8489_v51, 0.0  ;;  %v3101_v41 = vmul.f32 %v8489_v51, %v8489_v51 }
 0x34d   :  { %v3200_v56 = vadd.f32 %v3199_v8, %v3198_v63  ;;  %v3005_v43 = vadd.f32 %v3004_v28, %v3003_v11  ;;  %v8498_v16 = vpop.f32.mrf.mxu1  ;;  %v3008_v63 = vsel %vm2024_vm1, %v8484_v49, 0.0  ;;  %v3205_v58 = vsel %vm2024_vm1, %v3103_v45, 0.0 }
 0x34e   :  { %11971 = vst [vmem:[#allocation96_spill] sm:$0xff] %v8498_v16  ;;  %v3201_v36 = vsel %vm2024_vm1, %v3101_v41, 0.0  ;;  %v3106_v2 = vmul.f32 %v8498_v16, %v8498_v16 }
 0x34f   :  { %v3007_v32 = vadd.f32 %v3006_v38, %v3005_v43  ;;  %v3202_v37 = vadd.f32 %v3201_v36, %v3200_v56  ;;  %v8505_v47 = vpop.f32.mrf.mxu1 }
 0x350   :  { %11972 = vst [vmem:[#allocation104_spill] sm:$0xff] %v8505_v47  ;;  %v3104_v11 = vmul.f32 %v8505_v47, %v8505_v47  ;;  %v3010_v41 = vsel %vm2024_vm1, %v8505_v47, 0.0  ;;  %v3211_v17 = vsel %vm2024_vm1, %v3106_v2, 0.0 }
 0x351   :  { %v3204_v8 = vadd.f32 %v3203_v33, %v3202_v37  ;;  %v3009_v28 = vadd.f32 %v3008_v63, %v3007_v32  ;;  %v8512_v3 = vpop.f32.mrf.mxu1 }
 0x352   :  { %11973 = vst [vmem:[#allocation23_spill] sm:$0xff] %v8512_v3  ;;  %v3207_v36 = vsel %vm2024_vm1, %v3104_v11, 0.0 }
 0x353   :  { %v3011_v56 = vadd.f32 %v3010_v41, %v3009_v28  ;;  %v3206_v43 = vadd.f32 %v3205_v58, %v3204_v8  ;;  %v8517_v38 = vpop.f32.mrf.mxu1  ;;  %v3014_v58 = vsel %vm2024_vm1, %v8498_v16, 0.0  ;;  %v3107_v8 = vmul.f32 %v8512_v3, %v8512_v3 }
 0x354   :  { %11974 = vst [vmem:[#allocation24_spill] sm:$0xff] %v8517_v38  ;;  %v3012_v33 = vsel %vm2024_vm1, %v8517_v38, 0.0  ;;  %v3105_v32 = vmul.f32 %v8517_v38, %v8517_v38 }
 0x355   :  { %v3208_v37 = vadd.f32 %v3207_v36, %v3206_v43  ;;  %v3013_v45 = vadd.f32 %v3012_v33, %v3011_v56  ;;  %v8526_v63 = vpop.f32.mrf.mxu1  ;;  %v3016_v43 = vsel %vm2024_vm1, %v8512_v3, 0.0  ;;  %v3213_v38 = vsel %vm2024_vm1, %v3107_v8, 0.0 }
 0x356   :  { %11975 = vst [vmem:[#allocation25_spill] sm:$0xff] %v8526_v63  ;;  %v3209_v28 = vsel %vm2024_vm1, %v3105_v32, 0.0  ;;  %v3110_v2 = vmul.f32 %v8526_v63, %v8526_v63 }
 0x357   :  { %v3015_v41 = vadd.f32 %v3014_v58, %v3013_v45  ;;  %v3210_v11 = vadd.f32 %v3209_v28, %v3208_v37  ;;  %v8533_v59 = vpop.f32.mrf.mxu1 }
 0x358   :  { %11976 = vst [vmem:[#allocation26_spill] sm:$0xff] %v8533_v59  ;;  %v3108_v56 = vmul.f32 %v8533_v59, %v8533_v59  ;;  %v3018_v32 = vsel %vm2024_vm1, %v8533_v59, 0.0  ;;  %v3219_v3 = vsel %vm2024_vm1, %v3110_v2, 0.0 }
 0x359   :  { %v3212_v36 = vadd.f32 %v3211_v17, %v3210_v11  ;;  %v3017_v33 = vadd.f32 %v3016_v43, %v3015_v41  ;;  %v8540_v16 = vpop.f32.mrf.mxu1 }
 0x35a   :  { %11977 = vst [vmem:[#allocation27_spill] sm:$0xff] %v8540_v16  ;;  %v3215_v28 = vsel %vm2024_vm1, %v3108_v56, 0.0 }
 0x35b   :  { %v3019_v37 = vadd.f32 %v3018_v32, %v3017_v33  ;;  %v3214_v45 = vadd.f32 %v3213_v38, %v3212_v36  ;;  %v8545_v58 = vpop.f32.mrf.mxu1  ;;  %v3022_v38 = vsel %vm2024_vm1, %v8526_v63, 0.0  ;;  %v3111_v36 = vmul.f32 %v8540_v16, %v8540_v16 }
 0x35c   :  { %11978 = vst [vmem:[#allocation28_spill] sm:$0xff] %v8545_v58  ;;  %v3020_v17 = vsel %vm2024_vm1, %v8545_v58, 0.0  ;;  %v3109_v41 = vmul.f32 %v8545_v58, %v8545_v58 }
 0x35d   :  { %v3216_v11 = vadd.f32 %v3215_v28, %v3214_v45  ;;  %v3021_v8 = vadd.f32 %v3020_v17, %v3019_v37  ;;  %v8554_v43 = vpop.f32.mrf.mxu1  ;;  %v3024_v45 = vsel %vm2024_vm1, %v8540_v16, 0.0  ;;  %v3221_v58 = vsel %vm2024_vm1, %v3111_v36, 0.0 }
 0x35e   :  { %11979 = vst [vmem:[#allocation29_spill] sm:$0xff] %v8554_v43  ;;  %v3217_v33 = vsel %vm2024_vm1, %v3109_v41, 0.0  ;;  %v3114_v2 = vmul.f32 %v8554_v43, %v8554_v43 }
 0x35f   :  { %v3023_v32 = vadd.f32 %v3022_v38, %v3021_v8  ;;  %v3218_v56 = vadd.f32 %v3217_v33, %v3216_v11  ;;  %v8561_v59 = vpop.f32.mrf.mxu1 }
 0x360   :  { %11980 = vst [vmem:[#allocation30_spill] sm:$0xff] %v8561_v59  ;;  %v3112_v37 = vmul.f32 %v8561_v59, %v8561_v59  ;;  %v3026_v41 = vsel %vm2024_vm1, %v8561_v59, 0.0  ;;  %v3227_v16 = vsel %vm2024_vm1, %v3114_v2, 0.0 }
 0x361   :  { %v3220_v28 = vadd.f32 %v3219_v3, %v3218_v56  ;;  %v3025_v17 = vadd.f32 %v3024_v45, %v3023_v32  ;;  %v8568_v63 = vpop.f32.mrf.mxu1 }
 0x362   :  { %11981 = vst [vmem:[#allocation34_spill] sm:$0xff] %v8568_v63  ;;  %v3223_v33 = vsel %vm2024_vm1, %v3112_v37, 0.0 }
 0x363   :  { %v3027_v11 = vadd.f32 %v3026_v41, %v3025_v17  ;;  %v3222_v8 = vadd.f32 %v3221_v58, %v3220_v28  ;;  %v8573_v38 = vpop.f32.mrf.mxu1  ;;  %v3030_v58 = vsel %vm2024_vm1, %v8554_v43, 0.0  ;;  %v3115_v28 = vmul.f32 %v8568_v63, %v8568_v63 }
 0x364   :  { %11982 = vst [vmem:[#allocation39_spill] sm:$0xff] %v8573_v38  ;;  %v3028_v3 = vsel %vm2024_vm1, %v8573_v38, 0.0  ;;  %v3113_v32 = vmul.f32 %v8573_v38, %v8573_v38 }
 0x365   :  { %v3224_v56 = vadd.f32 %v3223_v33, %v3222_v8  ;;  %v3029_v36 = vadd.f32 %v3028_v3, %v3027_v11  ;;  %v8582_v45 = vpop.f32.mrf.mxu1  ;;  %v3032_v8 = vsel %vm2024_vm1, %v8568_v63, 0.0  ;;  %v3229_v38 = vsel %vm2024_vm1, %v3115_v28, 0.0 }
 0x366   :  { %11983 = vst [vmem:[#allocation48_spill] sm:$0xff] %v8582_v45  ;;  %v3225_v17 = vsel %vm2024_vm1, %v3113_v32, 0.0  ;;  %v3118_v2 = vmul.f32 %v8582_v45, %v8582_v45 }
 0x367   :  { %v3031_v41 = vadd.f32 %v3030_v58, %v3029_v36  ;;  %v3226_v37 = vadd.f32 %v3225_v17, %v3224_v56  ;;  %v8589_v59 = vpop.f32.mrf.mxu1 }
 0x368   :  { %11984 = vst [vmem:[#allocation61_spill] sm:$0xff] %v8589_v59  ;;  %v3116_v11 = vmul.f32 %v8589_v59, %v8589_v59  ;;  %v3034_v32 = vsel %vm2024_vm1, %v8589_v59, 0.0  ;;  %v3235_v63 = vsel %vm2024_vm1, %v3118_v2, 0.0 }
 0x369   :  { %v3228_v33 = vadd.f32 %v3227_v16, %v3226_v37  ;;  %v3033_v3 = vadd.f32 %v3032_v8, %v3031_v41  ;;  %v8596_v43 = vpop.f32.mrf.mxu1 }
 0x36a   :  { %11985 = vst [vmem:[#allocation38_spill] sm:$0xff] %v8596_v43  ;;  %v3231_v17 = vsel %vm2024_vm1, %v3116_v11, 0.0 }
 0x36b   :  { %v3035_v56 = vadd.f32 %v3034_v32, %v3033_v3  ;;  %v3230_v36 = vadd.f32 %v3229_v38, %v3228_v33  ;;  %v8601_v58 = vpop.f32.mrf.mxu1  ;;  %v3038_v38 = vsel %vm2024_vm1, %v8582_v45, 0.0  ;;  %v3119_v33 = vmul.f32 %v8596_v43, %v8596_v43 }
 0x36c   :  { %11986 = vst [vmem:[#allocation42_spill] sm:$0xff] %v8601_v58  ;;  %v3036_v16 = vsel %vm2024_vm1, %v8601_v58, 0.0  ;;  %v3117_v41 = vmul.f32 %v8601_v58, %v8601_v58 }
 0x36d   :  { %v3232_v37 = vadd.f32 %v3231_v17, %v3230_v36  ;;  %v3037_v28 = vadd.f32 %v3036_v16, %v3035_v56  ;;  %v8610_v8 = vpop.f32.mrf.mxu1  ;;  %v3040_v36 = vsel %vm2024_vm1, %v8596_v43, 0.0  ;;  %v3237_v58 = vsel %vm2024_vm1, %v3119_v33, 0.0 }
 0x36e   :  { %11987 = vst [vmem:[#allocation49_spill] sm:$0xff] %v8610_v8  ;;  %v3233_v3 = vsel %vm2024_vm1, %v3117_v41, 0.0  ;;  %v3122_v2 = vmul.f32 %v8610_v8, %v8610_v8 }
 0x36f   :  { %v3039_v32 = vadd.f32 %v3038_v38, %v3037_v28  ;;  %v3234_v11 = vadd.f32 %v3233_v3, %v3232_v37  ;;  %v8617_v59 = vpop.f32.mrf.mxu1 }
 0x370   :  { %11988 = vst [vmem:[#allocation55_spill] sm:$0xff] %v8617_v59  ;;  %v3120_v56 = vmul.f32 %v8617_v59, %v8617_v59  ;;  %v3042_v41 = vsel %vm2024_vm1, %v8617_v59, 0.0  ;;  %v3243_v43 = vsel %vm2024_vm1, %v3122_v2, 0.0 }
 0x371   :  { %v3236_v17 = vadd.f32 %v3235_v63, %v3234_v11  ;;  %v3041_v16 = vadd.f32 %v3040_v36, %v3039_v32  ;;  %v8624_v45 = vpop.f32.mrf.mxu1 }
 0x372   :  { %11989 = vst [vmem:[#allocation46_spill] sm:$0xff] %v8624_v45  ;;  %v3239_v3 = vsel %vm2024_vm1, %v3120_v56, 0.0 }
 0x373   :  { %v3043_v37 = vadd.f32 %v3042_v41, %v3041_v16  ;;  %v3238_v28 = vadd.f32 %v3237_v58, %v3236_v17  ;;  %v8629_v38 = vpop.f32.mrf.mxu1  ;;  %v3046_v58 = vsel %vm2024_vm1, %v8610_v8, 0.0  ;;  %v3123_v17 = vmul.f32 %v8624_v45, %v8624_v45 }
 0x374   :  { %11990 = vst [vmem:[#allocation52_spill] sm:$0xff] %v8629_v38  ;;  %v3044_v63 = vsel %vm2024_vm1, %v8629_v38, 0.0  ;;  %v3121_v32 = vmul.f32 %v8629_v38, %v8629_v38 }
 0x375   :  { %v3240_v11 = vadd.f32 %v3239_v3, %v3238_v28  ;;  %v3045_v33 = vadd.f32 %v3044_v63, %v3043_v37  ;;  %v8638_v36 = vpop.f32.mrf.mxu1  ;;  %v3048_v28 = vsel %vm2024_vm1, %v8624_v45, 0.0  ;;  %v6097_v3 = vld [vmem:[%s11534_s11] sm:$0xff]  }
 0x376   :  { %11991 = vst [vmem:[#allocation64_spill] sm:$0xff] %v8638_v36  ;;  %v3241_v16 = vsel %vm2024_vm1, %v3121_v32, 0.0  ;;  %v3245_v32 = vsel %vm2024_vm1, %v3123_v17, 0.0  ;;  %5886 = vmatprep.subr.bf16.mxu1 %v6097_v3 }
 0x377   :  { %v3047_v41 = vadd.f32 %v3046_v58, %v3045_v33  ;;  %v3242_v56 = vadd.f32 %v3241_v16, %v3240_v11  ;;  %v8645_v59 = vpop.f32.mrf.mxu1  ;;  %5887 = vmatpush3.bf16.msra.mxu1 %v6097_v3  ;;  %v3126_v16 = vmul.f32 %v8638_v36, %v8638_v36 }
 0x378   :  { %11992 = vst [vmem:[#allocation76_spill] sm:$0xff] %v8645_v59  ;;  %v3124_v37 = vmul.f32 %v8645_v59, %v8645_v59  ;;  %v3050_v11 = vsel %vm2024_vm1, %v8645_v59, 0.0 }
 0x379   :  { %v3244_v63 = vadd.f32 %v3243_v43, %v3242_v56  ;;  %v3049_v8 = vadd.f32 %v3048_v28, %v3047_v41  ;;  %v8655_v38 = vpop.f32.mrf.mxu1 }
 0x37a   :  { %11993 = vst [vmem:[#allocation58_spill] sm:$0xff] %v8655_v38  ;;  %v3247_v45 = vsel %vm2024_vm1, %v3124_v37, 0.0  ;;  %v3127_v28 = vmul.f32 %v8655_v38, %v8655_v38  ;;  %v3251_v37 = vsel %vm2024_vm1, %v3126_v16, 0.0 }
 0x37b   :  { %v3051_v2 = vadd.f32 %v3050_v11, %v3049_v8  ;;  %v3246_v33 = vadd.f32 %v3245_v32, %v3244_v63  ;;  %v8660_v58 = vpop.f32.mrf.mxu1  ;;  %v3054_v8 = vsel %vm2024_vm1, %v8638_v36, 0.0  ;;  %v3056_v11 = vsel %vm2024_vm1, %v8655_v38, 0.0 }
 0x37c   :  { %v3052_v43 = vsel %vm2024_vm1, %v8660_v58, 0.0  ;;  %v3125_v17 = vmul.f32 %v8660_v58, %v8660_v58 }
 0x37d   :  { %v3248_v41 = vadd.f32 %v3247_v45, %v3246_v33  ;;  %v3053_v56 = vadd.f32 %v3052_v43, %v3051_v2  ;;  %v3253_v45 = vsel %vm2024_vm1, %v3127_v28, 0.0 }
 0x37e   :  { %v3249_v3 = vsel %vm2024_vm1, %v3125_v17, 0.0 }
 0x37f   :  { %v3055_v63 = vadd.f32 %v3054_v8, %v3053_v56  ;;  %v3250_v32 = vadd.f32 %v3249_v3, %v3248_v41 }
 0x381   :  { %v3057_v59 = vadd.f32 %v3056_v11, %v3055_v63  ;;  %v3252_v47 = vadd.f32 %v3251_v37, %v3250_v32  ;;  %v11998_v11 = vld [vmem:[#allocation35_spill] sm:$0xff] }
 0x383   :  { %v3058_v2 = vrot.slane %v3057_v59, 4  ;;  %v3254_v33 = vadd.f32 %v3253_v45, %v3252_v47  ;;  %v2431_v47 = vmul.f32 %v8011_v39, %v7955_v19 }
 0x385   :  { %v3059_v43 = vadd.f32 %v3058_v2, %v3057_v59  ;;  %v3255_v36 = vrot.slane %v3254_v33, 4  ;;  %v11994_v59 = vld [vmem:[#allocation32_spill] sm:$0xff]  ;;  %v12000_v2 = vld [vmem:[#allocation43_spill] sm:$0xff] }
 0x386   :  { %v2370_v28 = vmul.f32 %v8011_v39, %v11994_v59  ;;  %v2378_v19 = vmul.f32 %v8011_v39, %v12000_v2  ;;  %v12005_v59 = vld [vmem:[#allocation57_spill] sm:$0xff] }
 0x387   :  { %v3060_v49 = vrot.slane %v3059_v43, 2  ;;  %v3256_v40 = vadd.f32 %v3255_v36, %v3254_v33  ;;  %v8695_v33 = vadd.f32 %v8016_v13, %v2431_v47  ;;  %v12007_v47 = vld [vmem:[#allocation95_spill] sm:$0xff] }
 0x388   :  { %v8731_v31 = vadd.f32 %v8016_v13, %v2370_v28 }
 0x389   :  { %v3061_v51 = vadd.f32 %v3060_v49, %v3059_v43  ;;  %v3257_v34 = vrot.slane %v3256_v40, 2  ;;  %v11995_v49 = vld [vmem:[#allocation31_spill] sm:$0xff]  ;;  %v12001_v43 = vld [vmem:[#allocation41_spill] sm:$0xff] }
 0x38a   :  { %v2372_v36 = vmul.f32 %v11995_v49, %v8011_v39  ;;  %v2385_v49 = vmul.f32 %v12005_v59, %v8011_v39  ;;  %v2929_v59 = vld [vmem:[%s11536_s5] sm:$0x1]  ;;  %12016 = vst [vmem:[#allocation78_spill] sm:$0xff] %v8731_v31 }
 0x38b   :  { %v3062_v17 = vrot.slane %v3061_v51, 1  ;;  %v3258_v56 = vadd.f32 %v3257_v34, %v3256_v40  ;;  %v11996_v34 = vld [vmem:[#allocation33_spill] sm:$0xff] }
 0x38c   :  { %v2373_v40 = vmul.f32 %v11996_v34, %v8011_v39  ;;  %v12006_v34 = vld [vmem:[#allocation79_spill] sm:$0xff] }
 0x38d   :  { %v3063_v41 = vadd.f32 %v3062_v17, %v3061_v51  ;;  %v3259_v8 = vrot.slane %v3258_v56, 1  ;;  %v11997_v51 = vld [vmem:[#allocation36_spill] sm:$0xff]  ;;  %v2380_v17 = vmul.f32 %v12001_v43, %v8011_v39 }
 0x38e   :  { %v2374_v37 = vmul.f32 %v8011_v39, %v11997_v51  ;;  %v2386_v51 = vmul.f32 %v8011_v39, %v12006_v34  ;;  %v12009_v43 = vld [vmem:[#allocation88_spill] sm:$0xff]  ;;  %v12012_v34 = vld [vmem:[#allocation103_spill] sm:$0xff]  ;;  %v8737_v44 = vadd.f32 %v8016_v13, %v2373_v40 }
 0x38f   :  { %v3260_v16 = vadd.f32 %v3259_v8, %v3258_v56  ;;  %v3261_v3 = vmul.f32 0.001953125, %v3063_v41  ;;  %v12002_v56 = vld [vmem:[#allocation45_spill] sm:$0xff]  ;;  %v12003_v8 = vld [vmem:[#allocation54_spill] sm:$0xff]  ;;  %v2392_v22 = vmul.f32 %v12012_v34, %v8011_v39 }
 0x390   :  { %v2381_v41 = vmul.f32 %v12002_v56, %v8011_v39  ;;  %v2389_v56 = vmul.f32 %v12009_v43, %v8011_v39  ;;  %v12015_v43 = vld [vmem:[#allocation44_spill] sm:$0xff]  ;;  %12018 = vst [vmem:[#allocation3_spill] sm:$0xff] %v8737_v44  ;;  %v8740_v34 = vadd.f32 %v8016_v13, %v2374_v37  ;;  %v12070_v44 = vld [vmem:[#allocation61_spill] sm:$0xff] }
 0x391   :  { %v3262_v15 = vmul.f32 0.001953125, %v3260_v16  ;;  %v3263_v38 = vmul.f32 %v3261_v3, %v3261_v3  ;;  %v2382_v16 = vmul.f32 %v8011_v39, %v12003_v8  ;;  %v2390_v8 = vmul.f32 %v8011_v39, %v12010_v50 }
 0x392   :  { %v2395_v26 = vmul.f32 %v8011_v39, %v12015_v43  ;;  %12019 = vst [vmem:[#allocation32_spill] sm:$0xff] %v8740_v34  ;;  %v8752_v43 = vadd.f32 %v8016_v13, %v2380_v17 }
 0x393   :  { %v3264_v63 = vsub.f32 %v3262_v15, %v3263_v38  ;;  %v2376_v15 = vmul.f32 %v11998_v11, %v8011_v39  ;;  %v11999_v38 = vld [vmem:[#allocation37_spill] sm:$0xff]  ;;  %v2387_v11 = vmul.f32 %v8011_v39, %v12007_v47  ;;  %v8758_v40 = vadd.f32 %v8016_v13, %v2382_v16 }
 0x394   :  { %v2377_v45 = vmul.f32 %v11999_v38, %v8011_v39  ;;  %v12008_v38 = vld [vmem:[#allocation77_spill] sm:$0xff]  ;;  %12023 = vst [vmem:[#allocation35_spill] sm:$0xff] %v8752_v43 }
 0x395   :  { %v3265_v32 = vadd.f32 1e-05, %v3264_v63  ;;  %v12004_v63 = vld [vmem:[#allocation51_spill] sm:$0xff]  ;;  %v2388_v2 = vmul.f32 %v12008_v38, %v8011_v39  ;;  %v12013_v47 = vld [vmem:[#allocation5_spill] sm:$0xff]  ;;  %v12014_v38 = vld [vmem:[#allocation40_spill] sm:$0xff]  ;;  %12025 = vst [vmem:[#allocation43_spill] sm:$0xff] %v8758_v40  ;;  %v8776_v16 = vadd.f32 %v8016_v13, %v2387_v11 }
 0x396   :  { %v2393_v0 = vmul.f32 %v12013_v47, %v8011_v39  ;;  %v2394_v62 = vmul.f32 %v8011_v39, %v12014_v38  ;;  %v8743_v47 = vadd.f32 %v8016_v13, %v2376_v15  ;;  %v8746_v38 = vadd.f32 %v8016_v13, %v2377_v45  ;;  %v2930_v15 = vld [vmem:[%s11537_s6] sm:$0x1]  ;;  %v12063_v40 = vld [vmem:[#allocation28_spill] sm:$0xff] }
 0x397   :  { %6102 = vrsqrt.f32 %v3265_v32  ;;  %v2384_v32 = vmul.f32 %v12004_v63, %v8011_v39  ;;  %v2391_v63 = vmul.f32 %v8011_v39, %v12011_v35  ;;  %v8734_v35 = vadd.f32 %v8016_v13, %v2372_v36  ;;  %12029 = vst [vmem:[#allocation51_spill] sm:$0xff] %v8776_v16 }
 0x398   :  { %12020 = vst [vmem:[#allocation31_spill] sm:$0xff] %v8743_v47  ;;  %12021 = vst [vmem:[#allocation33_spill] sm:$0xff] %v8746_v38  ;;  %v8749_v39 = vadd.f32 %v8016_v13, %v2378_v19  ;;  %v8755_v36 = vadd.f32 %v8016_v13, %v2381_v41  ;;  %v8767_v45 = vadd.f32 %v8016_v13, %v2385_v49  ;;  %v12067_v38 = vld [vmem:[#allocation39_spill] sm:$0xff] }
 0x399   :  { %12017 = vst [vmem:[#allocation89_spill] sm:$0xff] %v8734_v35  ;;  %v8761_v37 = vadd.f32 %v8016_v13, %v2384_v32  ;;  %v8770_v19 = vadd.f32 %v8016_v13, %v2386_v51  ;;  %v8779_v32 = vadd.f32 %v8016_v13, %v2388_v2  ;;  %v8788_v49 = vadd.f32 %v8016_v13, %v2391_v63  ;;  %v12071_v35 = vld [vmem:[#allocation42_spill] sm:$0xff] }
 0x39a   :  { %12022 = vst [vmem:[#allocation36_spill] sm:$0xff] %v8749_v39  ;;  %12024 = vst [vmem:[#allocation37_spill] sm:$0xff] %v8755_v36  ;;  %v8794_v51 = vadd.f32 %v8016_v13, %v2393_v0  ;;  %v8800_v2 = vadd.f32 %v8016_v13, %v2395_v26  ;;  %v12066_v39 = vld [vmem:[#allocation30_spill] sm:$0xff] }
 0x39b   :  { %12026 = vst [vmem:[#allocation41_spill] sm:$0xff] %v8761_v37  ;;  %12027 = vst [vmem:[#allocation45_spill] sm:$0xff] %v8767_v45  ;;  %v12062_v37 = vld [vmem:[#allocation26_spill] sm:$0xff] }
 0x39c   :  { %12028 = vst [vmem:[#allocation54_spill] sm:$0xff] %v8770_v19  ;;  %12030 = vst [vmem:[#allocation57_spill] sm:$0xff] %v8779_v32  ;;  %v12059_v32 = vld [vmem:[#allocation24_spill] sm:$0xff] }
 0x39d   :  { %12033 = vst [vmem:[#allocation77_spill] sm:$0xff] %v8788_v49  ;;  %12035 = vst [vmem:[#allocation2_spill] sm:$0xff] %v8794_v51  ;;  %v12056_v49 = vld [vmem:[#allocation20_spill] sm:$0xff] }
 0x39e   :  { %12037 = vst [vmem:[#allocation103_spill] sm:$0xff] %v8800_v2  ;;  %v12050_v2 = vld [vmem:[#allocation98_spill] sm:$0xff] }
 0x3a4   :  { %v6103_v50 = vpop.eup %6102 }
 0x3a5   :  { %v3267_v28 = vmul.f32 %v6103_v50, %v2929_v59  ;;  %v8782_v59 = vadd.f32 %v8016_v13, %v2389_v56  ;;  %v8785_v50 = vadd.f32 %v8016_v13, %v2390_v8 }
 0x3a7   :  { %v3268_v17 = vmul.f32 %v3267_v28, %v3261_v3  ;;  %v8773_v41 = vrot.slane %v3267_v28, %v11900_v1  ;;  %12031 = vst [vmem:[#allocation79_spill] sm:$0xff] %v8782_v59  ;;  %12032 = vst [vmem:[#allocation95_spill] sm:$0xff] %v8785_v50  ;;  %v8791_v3 = vadd.f32 %v8016_v13, %v2392_v22  ;;  %v12057_v50 = vld [vmem:[#allocation21_spill] sm:$0xff]  ;;  %v12058_v59 = vld [vmem:[#allocation104_spill] sm:$0xff] }
 0x3a8   :  { %v8797_v28 = vadd.f32 %v8016_v13, %v2394_v62 }
 0x3a9   :  { %12034 = vst [vmem:[#allocation88_spill] sm:$0xff] %v8791_v3  ;;  %v3269_v11 = vsub.f32 %v2930_v15, %v3268_v17  ;;  %v3337_v56 = vmul.f32 %v8773_v41, %v8660_v58  ;;  %v8806_v8 = vmul.f32 %v8773_v41, %v8229_v21  ;;  %v8813_v0 = vmul.f32 %v8773_v41, %v8235_v20  ;;  %v12045_v15 = vld [vmem:[#allocation74_spill] sm:$0xff] }
 0x3aa   :  { %12036 = vst [vmem:[#allocation6_spill] sm:$0xff] %v8797_v28  ;;  %v8817_v62 = vmul.f32 %v8227_v18, %v8773_v41  ;;  %v8821_v13 = vmul.f32 %v8231_v55, %v8773_v41  ;;  %v8825_v26 = vmul.f32 %v8773_v41, %v8253_v52  ;;  %v8829_v21 = vmul.f32 %v8773_v41, %v8265_v46  ;;  %v12051_v28 = vld [vmem:[#allocation19_spill] sm:$0xff] }
 0x3ab   :  { %v8809_v22 = vrot.slane %v3269_v11, %v11900_v1  ;;  %v8833_v20 = vmul.f32 %v8245_v30, %v8773_v41  ;;  %v8837_v18 = vmul.f32 %v8260_v61, %v8773_v41  ;;  %v8842_v55 = vmul.f32 %v8773_v41, %v8281_v14 }
 0x3ac   :  { %v8846_v52 = vmul.f32 %v8773_v41, %v8293_v29  ;;  %v8850_v46 = vmul.f32 %v8274_v6, %v8773_v41  ;;  %v8854_v30 = vmul.f32 %v8288_v57, %v8773_v41  ;;  %v8858_v61 = vmul.f32 %v8773_v41, %v8309_v54 }
 0x3ad   :  { %v3407_v58 = vadd.f32 %v8809_v22, %v3337_v56  ;;  %v8862_v14 = vmul.f32 %v8773_v41, %v8321_v60  ;;  %v8866_v29 = vmul.f32 %v8302_v4, %v8773_v41  ;;  %v8871_v6 = vmul.f32 %v8316_v12, %v8773_v41  ;;  %v12047_v56 = vld [vmem:[#allocation80_spill] sm:$0xff] }
 0x3ae   :  { %v8875_v57 = vmul.f32 %v8773_v41, %v8337_v10  ;;  %v8879_v54 = vmul.f32 %v8773_v41, %v8349_v23  ;;  %v8883_v60 = vmul.f32 %v8330_v9, %v8773_v41  ;;  %v8887_v4 = vmul.f32 %v8344_v48, %v8773_v41 }
 0x3af   :  { %v3471_v63 = vadd.f32 %v3407_v58, %v8695_v33  ;;  %v8891_v12 = vmul.f32 %v8773_v41, %v8365_v42  ;;  %v8895_v10 = vmul.f32 %v8773_v41, %v8377_v24  ;;  %v8901_v23 = vmul.f32 %v8358_v7, %v8773_v41  ;;  %v12046_v7 = vld [vmem:[#allocation102_spill] sm:$0xff]  ;;  %v12048_v58 = vld [vmem:[#allocation101_spill] sm:$0xff] }
 0x3b0   :  { %v8905_v9 = vmul.f32 %v8372_v5, %v8773_v41  ;;  %v8909_v48 = vmul.f32 %v8773_v41, %v8393_v53  ;;  %v8913_v42 = vmul.f32 %v8773_v41, %v8405_v25  ;;  %v3302_v24 = vmul.f32 %v8386_v27, %v8773_v41  ;;  %v12049_v25 = vld [vmem:[#allocation93_spill] sm:$0xff] }
 0x3b1   :  { %12038 = vst [vmem:[#allocation5_spill] sm:$0xff] %v8891_v12  ;;  %12039 = vst [vmem:[#allocation40_spill] sm:$0xff] %v8895_v10  ;;  %v8897_v33 = vmax.f32 %v3471_v63, 0.0  ;;  %v3303_v17 = vmul.f32 %v12045_v15, %v8773_v41  ;;  %v3304_v11 = vmul.f32 %v8773_v41, %v12046_v7  ;;  %v3305_v53 = vmul.f32 %v8773_v41, %v12047_v56  ;;  %v12052_v7 = vld [vmem:[#allocation99_spill] sm:$0xff]  ;;  %v12054_v56 = vld [vmem:[#allocation94_spill] sm:$0xff] }
 0x3b2   :  { %12041 = vst [vmem:[#allocation105_spill] sm:$0xff] %v8901_v23  ;;  %12042 = vst [vmem:[#allocation106_spill] sm:$0xff] %v8905_v9  ;;  %v3306_v63 = vmul.f32 %v12048_v58, %v8773_v41  ;;  %v3307_v1 = vmul.f32 %v12049_v25, %v8773_v41  ;;  %v3308_v27 = vmul.f32 %v8773_v41, %v12050_v2  ;;  %v12055_v25 = vld [vmem:[#allocation22_spill] sm:$0xff]  ;;  %v12075_v9 = vld [vmem:[#allocation52_spill] sm:$0xff] }
 0x3b3   :  { %12040 = vst [vmem:[#allocation44_spill] sm:$0xff] %v8897_v33  ;;  %12043 = vst [vmem:[#allocation107_spill] sm:$0xff] %v8909_v48  ;;  %v5579_v5 = vpack.c.bf16 %v8897_v33, %v8897_v33  ;;  %v3309_v15 = vmul.f32 %v8773_v41, %v12051_v28  ;;  %v3310_v51 = vmul.f32 %v12052_v7, %v8773_v41  ;;  %v12053_v33 = vld [vmem:[#allocation100_spill] sm:$0xff]  ;;  %v12074_v48 = vld [vmem:[#allocation55_spill] sm:$0xff] }
 0x3b4   :  { %12044 = vst [vmem:[#allocation108_spill] sm:$0xff] %v8913_v42  ;;  %v3311_v3 = vmul.f32 %v12053_v33, %v8773_v41  ;;  %v3312_v58 = vmul.f32 %v8773_v41, %v12054_v56  ;;  %v3313_v2 = vmul.f32 %v8773_v41, %v12055_v25  ;;  %v3314_v28 = vmul.f32 %v12056_v49, %v8773_v41  ;;  %v12061_v56 = vld [vmem:[#allocation23_spill] sm:$0xff]  ;;  %v12079_v10 = vld [vmem:[#allocation46_spill] sm:$0xff]  ;;  %v12080_v12 = vld [vmem:[#allocation76_spill] sm:$0xff] }
 0x3b5   :  { %3856 = vst.msk [vmem:[%s11538_s14 + $0xf4] sm:$0xf] %vm3794_vm2, %v5579_v5  ;;  %v3315_v7 = vmul.f32 %v12057_v50, %v8773_v41  ;;  %v3316_v33 = vmul.f32 %v8773_v41, %v12058_v59  ;;  %v3317_v16 = vmul.f32 %v8773_v41, %v12059_v32  ;;  %v12060_v5 = vld [vmem:[#allocation96_spill] sm:$0xff]  ;;  %v3319_v45 = vmul.f32 %v12061_v56, %v8773_v41  ;;  %v12064_v50 = vld [vmem:[#allocation25_spill] sm:$0xff]  ;;  %v12065_v59 = vld [vmem:[#allocation27_spill] sm:$0xff] }
 0x3b6   :  { %v3318_v19 = vmul.f32 %v12060_v5, %v8773_v41  ;;  %v3320_v25 = vmul.f32 %v8773_v41, %v12062_v37  ;;  %v3321_v49 = vmul.f32 %v8773_v41, %v12063_v40  ;;  %v3322_v36 = vmul.f32 %v12064_v50, %v8773_v41  ;;  %v12068_v56 = vld [vmem:[#allocation29_spill] sm:$0xff]  ;;  %v12069_v37 = vld [vmem:[#allocation34_spill] sm:$0xff] }
 0x3b7   :  { %v3323_v43 = vmul.f32 %v12065_v59, %v8773_v41  ;;  %v3324_v32 = vmul.f32 %v8773_v41, %v12066_v39  ;;  %v3325_v5 = vmul.f32 %v8773_v41, %v12067_v38  ;;  %v3326_v47 = vmul.f32 %v12068_v56, %v8773_v41  ;;  %v12072_v59 = vld [vmem:[#allocation48_spill] sm:$0xff]  ;;  %v12073_v39 = vld [vmem:[#allocation38_spill] sm:$0xff] }
 0x3b8   :  { %v3327_v34 = vmul.f32 %v12069_v37, %v8773_v41  ;;  %v3328_v40 = vmul.f32 %v8773_v41, %v12070_v44  ;;  %v3329_v50 = vmul.f32 %v8773_v41, %v12071_v35  ;;  %v3330_v31 = vmul.f32 %v12072_v59, %v8773_v41  ;;  %v12076_v37 = vld [vmem:[#allocation58_spill] sm:$0xff]  ;;  %v12078_v35 = vld [vmem:[#allocation49_spill] sm:$0xff] }
 0x3b9   :  { %v3331_v42 = vmul.f32 %v12073_v39, %v8773_v41  ;;  %v3332_v38 = vmul.f32 %v8773_v41, %v12074_v48  ;;  %v3333_v56 = vmul.f32 %v8773_v41, %v12075_v9  ;;  %v8987_v23 = vmul.f32 %v12076_v37, %v8773_v41  ;;  %v12081_v37 = vld [vmem:[#allocation64_spill] sm:$0xff] }
 0x3ba   :  { %v8991_v44 = vadd.f32 %v8809_v22, %v8813_v0  ;;  %v3334_v59 = vmul.f32 %v12078_v35, %v8773_v41  ;;  %v3335_v39 = vmul.f32 %v12079_v10, %v8773_v41  ;;  %v3336_v48 = vmul.f32 %v8773_v41, %v12080_v12 }
 0x3bb   :  { %12077 = vst [vmem:[#allocation74_spill] sm:$0xff] %v8987_v23  ;;  %v9001_v9 = vadd.f32 %v8809_v22, %v8829_v21  ;;  %v3338_v23 = vmul.f32 %v12081_v37, %v8773_v41  ;;  %v9007_v0 = vadd.f32 %v8809_v22, %v8806_v8  ;;  %v9011_v35 = vadd.f32 %v8809_v22, %v8817_v62 }
 0x3bc   :  { %v9015_v10 = vadd.f32 %v8809_v22, %v8846_v52  ;;  %v3349_v12 = vadd.f32 %v8809_v22, %v8821_v13  ;;  %v9021_v21 = vadd.f32 %v8809_v22, %v8825_v26  ;;  %v9025_v41 = vadd.f32 %v8809_v22, %v8833_v20 }
 0x3bd   :  { %v9029_v8 = vadd.f32 %v8809_v22, %v8862_v14  ;;  %v3353_v62 = vadd.f32 %v8809_v22, %v8837_v18  ;;  %v9035_v52 = vadd.f32 %v8809_v22, %v8842_v55  ;;  %v9039_v13 = vadd.f32 %v8809_v22, %v8850_v46 }
 0x3be   :  { %v9043_v26 = vadd.f32 %v8809_v22, %v8854_v30  ;;  %v9047_v20 = vadd.f32 %v8809_v22, %v8858_v61  ;;  %v9051_v14 = vadd.f32 %v8809_v22, %v8866_v29  ;;  %v9055_v18 = vadd.f32 %v8809_v22, %v8871_v6  ;;  %v12083_v29 = vld [vmem:[#allocation5_spill] sm:$0xff] }
 0x3bf   :  { %v9059_v55 = vadd.f32 %v8809_v22, %v8875_v57  ;;  %v9063_v46 = vadd.f32 %v8809_v22, %v8879_v54  ;;  %v9067_v30 = vadd.f32 %v8809_v22, %v8883_v60  ;;  %v9071_v61 = vadd.f32 %v8809_v22, %v8887_v4 }
 0x3c0   :  { %v9075_v6 = vadd.f32 %v8809_v22, %v12083_v29  ;;  %v9078_v37 = vadd.f32 %v8809_v22, %v3302_v24  ;;  %v9081_v57 = vadd.f32 %v8809_v22, %v3303_v17  ;;  %v9084_v54 = vadd.f32 %v8809_v22, %v3304_v11 }
 0x3c1   :  { %12082 = vst [vmem:[#allocation102_spill] sm:$0xff] %v9067_v30  ;;  %v9087_v60 = vadd.f32 %v8809_v22, %v3305_v53  ;;  %v9090_v30 = vadd.f32 %v8809_v22, %v3306_v63  ;;  %v9093_v4 = vadd.f32 %v8809_v22, %v3307_v1  ;;  %v9096_v29 = vadd.f32 %v8809_v22, %v3308_v27 }
 0x3c2   :  { %v9099_v24 = vadd.f32 %v8809_v22, %v3309_v15  ;;  %v9102_v17 = vadd.f32 %v8809_v22, %v3310_v51  ;;  %v9105_v11 = vadd.f32 %v8809_v22, %v3311_v3  ;;  %v9108_v53 = vadd.f32 %v8809_v22, %v3312_v58 }
 0x3c3   :  { %v9111_v63 = vadd.f32 %v8809_v22, %v3313_v2  ;;  %v9114_v1 = vadd.f32 %v8809_v22, %v3314_v28  ;;  %v9117_v27 = vadd.f32 %v8809_v22, %v3315_v7  ;;  %v9120_v15 = vadd.f32 %v8809_v22, %v3316_v33 }
 0x3c4   :  { %v9123_v51 = vadd.f32 %v8809_v22, %v3317_v16  ;;  %v9126_v3 = vadd.f32 %v8809_v22, %v3318_v19  ;;  %v9129_v58 = vadd.f32 %v8809_v22, %v3319_v45  ;;  %v9132_v2 = vadd.f32 %v8809_v22, %v3320_v25 }
 0x3c5   :  { %v9135_v28 = vadd.f32 %v8809_v22, %v3321_v49  ;;  %v9138_v7 = vadd.f32 %v8809_v22, %v3322_v36  ;;  %v9141_v33 = vadd.f32 %v8809_v22, %v3323_v43  ;;  %v9144_v16 = vadd.f32 %v8809_v22, %v3324_v32 }
 0x3c6   :  { %v9147_v19 = vadd.f32 %v8809_v22, %v3325_v5  ;;  %v9150_v45 = vadd.f32 %v8809_v22, %v3326_v47  ;;  %v9153_v25 = vadd.f32 %v8809_v22, %v3327_v34  ;;  %v9156_v49 = vadd.f32 %v8809_v22, %v3328_v40 }
 0x3c7   :  { %v9159_v36 = vadd.f32 %v8809_v22, %v3329_v50  ;;  %v9162_v43 = vadd.f32 %v8809_v22, %v3330_v31  ;;  %v9165_v32 = vadd.f32 %v8809_v22, %v3331_v42  ;;  %v9168_v5 = vadd.f32 %v8809_v22, %v3332_v38  ;;  %v12093_v42 = vld [vmem:[#allocation40_spill] sm:$0xff]  ;;  %v12095_v38 = vld [vmem:[#allocation105_spill] sm:$0xff] }
 0x3c8   :  { %v9171_v47 = vadd.f32 %v8809_v22, %v3333_v56  ;;  %v9174_v34 = vadd.f32 %v8809_v22, %v3334_v59  ;;  %v9177_v40 = vadd.f32 %v8809_v22, %v3335_v39  ;;  %v9180_v50 = vadd.f32 %v8809_v22, %v3336_v48  ;;  %v12100_v48 = vld [vmem:[#allocation106_spill] sm:$0xff] }
 0x3c9   :  { %12084 = vst [vmem:[#allocation80_spill] sm:$0xff] %v9159_v36  ;;  %12085 = vst [vmem:[#allocation101_spill] sm:$0xff] %v9162_v43  ;;  %v9183_v31 = vadd.f32 %v8809_v22, %v3338_v23  ;;  %v9191_v56 = vadd.f32 %v8809_v22, %v12095_v38  ;;  %v12101_v23 = vld [vmem:[#allocation107_spill] sm:$0xff]  ;;  %v12108_v43 = vld [vmem:[#allocation9_spill] sm:$0xff] }
 0x3ca   :  { %12086 = vst [vmem:[#allocation93_spill] sm:$0xff] %v9165_v32  ;;  %12087 = vst [vmem:[#allocation98_spill] sm:$0xff] %v9168_v5  ;;  %v9187_v32 = vadd.f32 %v8809_v22, %v12093_v42  ;;  %v12106_v5 = vld [vmem:[#allocation89_spill] sm:$0xff] }
 0x3cb   :  { %12088 = vst [vmem:[#allocation19_spill] sm:$0xff] %v9171_v47  ;;  %12089 = vst [vmem:[#allocation99_spill] sm:$0xff] %v9174_v34  ;;  %v12097_v47 = vld [vmem:[#allocation74_spill] sm:$0xff]  ;;  %v12098_v34 = vld [vmem:[#allocation7_spill] sm:$0xff] }
 0x3cc   :  { %12090 = vst [vmem:[#allocation100_spill] sm:$0xff] %v9177_v40  ;;  %12091 = vst [vmem:[#allocation94_spill] sm:$0xff] %v9180_v50  ;;  %v3409_v59 = vadd.f32 %v8809_v22, %v12097_v47  ;;  %v9197_v39 = vadd.f32 %v8991_v44, %v12098_v34  ;;  %v3369_v50 = vadd.f32 %v8809_v22, %v12100_v48  ;;  %v12102_v40 = vld [vmem:[#allocation108_spill] sm:$0xff]  ;;  %v12107_v34 = vld [vmem:[#allocation3_spill] sm:$0xff] }
 0x3cd   :  { %12092 = vst [vmem:[#allocation22_spill] sm:$0xff] %v9183_v31  ;;  %12094 = vst [vmem:[#allocation20_spill] sm:$0xff] %v9187_v32  ;;  %v3370_v31 = vadd.f32 %v8809_v22, %v12101_v23  ;;  %v3371_v42 = vadd.f32 %v8809_v22, %v12102_v40  ;;  %v12103_v32 = vld [vmem:[#allocation8_spill] sm:$0xff]  ;;  %v3412_v44 = vadd.f32 %v9011_v35, %v12106_v5  ;;  %v12111_v22 = vld [vmem:[#allocation31_spill] sm:$0xff] }
 0x3ce   :  { %12096 = vst [vmem:[#allocation21_spill] sm:$0xff] %v9191_v56  ;;  %12099 = vst [vmem:[#allocation104_spill] sm:$0xff] %v9197_v39  ;;  %v9207_v38 = vadd.f32 %v9001_v9, %v12103_v32  ;;  %v12105_v56 = vld [vmem:[#allocation78_spill] sm:$0xff]  ;;  %v3413_v39 = vadd.f32 %v3349_v12, %v12107_v34  ;;  %v9216_v48 = vadd.f32 %v9015_v10, %v12108_v43  ;;  %v12110_v23 = vld [vmem:[#allocation32_spill] sm:$0xff] }
 0x3cf   :  { %v3410_v47 = vadd.f32 %v9007_v0, %v12105_v56  ;;  %v3414_v36 = vadd.f32 %v9021_v21, %v12110_v23  ;;  %v3416_v40 = vadd.f32 %v9025_v41, %v12111_v22  ;;  %v12112_v9 = vld [vmem:[#allocation33_spill] sm:$0xff]  ;;  %v12115_v56 = vld [vmem:[#allocation36_spill] sm:$0xff]  ;;  %v12116_v12 = vld [vmem:[#allocation35_spill] sm:$0xff] }
 0x3d0   :  { %12104 = vst [vmem:[#allocation24_spill] sm:$0xff] %v9207_v38  ;;  %12109 = vst [vmem:[#allocation96_spill] sm:$0xff] %v9216_v48  ;;  %v3417_v32 = vadd.f32 %v3353_v62, %v12112_v9  ;;  %v12113_v38 = vld [vmem:[#allocation10_spill] sm:$0xff]  ;;  %v3418_v35 = vadd.f32 %v9035_v52, %v12115_v56  ;;  %v3420_v5 = vadd.f32 %v9039_v13, %v12116_v12  ;;  %v12117_v10 = vld [vmem:[#allocation37_spill] sm:$0xff] }
 0x3d1   :  { %v9225_v0 = vadd.f32 %v9029_v8, %v12113_v38  ;;  %v3421_v43 = vadd.f32 %v9043_v26, %v12117_v10  ;;  %v12118_v34 = vld [vmem:[#allocation43_spill] sm:$0xff]  ;;  %v12119_v23 = vld [vmem:[#allocation41_spill] sm:$0xff]  ;;  %v12121_v8 = vld [vmem:[#allocation54_spill] sm:$0xff] }
 0x3d2   :  { %v3422_v21 = vadd.f32 %v9047_v20, %v12118_v34  ;;  %v3424_v41 = vadd.f32 %v9051_v14, %v12119_v23  ;;  %v12120_v62 = vld [vmem:[#allocation45_spill] sm:$0xff]  ;;  %v3426_v38 = vadd.f32 %v9059_v55, %v12121_v8  ;;  %v12122_v9 = vld [vmem:[#allocation51_spill] sm:$0xff]  ;;  %v12124_v13 = vld [vmem:[#allocation102_spill] sm:$0xff] }
 0x3d3   :  { %12114 = vst [vmem:[#allocation23_spill] sm:$0xff] %v9225_v0  ;;  %v3425_v22 = vadd.f32 %v9055_v18, %v12120_v62  ;;  %v3427_v52 = vadd.f32 %v9063_v46, %v12122_v9  ;;  %v12123_v56 = vld [vmem:[#allocation57_spill] sm:$0xff]  ;;  %v12125_v0 = vld [vmem:[#allocation79_spill] sm:$0xff]  ;;  %v12128_v18 = vld [vmem:[#allocation12_spill] sm:$0xff] }
 0x3d4   :  { %v3428_v12 = vadd.f32 %v12124_v13, %v12123_v56  ;;  %v3429_v26 = vadd.f32 %v9071_v61, %v12125_v0  ;;  %v12126_v10 = vld [vmem:[#allocation95_spill] sm:$0xff]  ;;  %v9255_v23 = vadd.f32 %v9081_v57, %v12128_v18  ;;  %v12129_v55 = vld [vmem:[#allocation13_spill] sm:$0xff]  ;;  %v12130_v62 = vld [vmem:[#allocation14_spill] sm:$0xff] }
 0x3d5   :  { %v3430_v20 = vadd.f32 %v9075_v6, %v12126_v10  ;;  %v12127_v34 = vld [vmem:[#allocation11_spill] sm:$0xff]  ;;  %v9259_v46 = vadd.f32 %v9084_v54, %v12129_v55  ;;  %v9263_v8 = vadd.f32 %v9087_v60, %v12130_v62  ;;  %v12131_v61 = vld [vmem:[#allocation60_spill] sm:$0xff]  ;;  %v12132_v6 = vld [vmem:[#allocation81_spill] sm:$0xff] }
 0x3d6   :  { %v9251_v14 = vadd.f32 %v9078_v37, %v12127_v34  ;;  %v9267_v0 = vadd.f32 %v9090_v30, %v12131_v61  ;;  %v9271_v37 = vadd.f32 %v9093_v4, %v12132_v6  ;;  %v12133_v9 = vld [vmem:[#allocation63_spill] sm:$0xff]  ;;  %v12134_v56 = vld [vmem:[#allocation82_spill] sm:$0xff]  ;;  %v12137_v34 = vld [vmem:[#allocation84_spill] sm:$0xff] }
 0x3d7   :  { %v9275_v57 = vadd.f32 %v9096_v29, %v12133_v9  ;;  %v9279_v54 = vadd.f32 %v9099_v24, %v12134_v56  ;;  %v12135_v13 = vld [vmem:[#allocation83_spill] sm:$0xff]  ;;  %v9291_v4 = vadd.f32 %v9108_v53, %v12137_v34  ;;  %v12138_v18 = vld [vmem:[#allocation85_spill] sm:$0xff]  ;;  %v12139_v55 = vld [vmem:[#allocation86_spill] sm:$0xff] }
 0x3d8   :  { %v9283_v60 = vadd.f32 %v9102_v17, %v12135_v13  ;;  %v12136_v10 = vld [vmem:[#allocation59_spill] sm:$0xff]  ;;  %v9295_v29 = vadd.f32 %v9111_v63, %v12138_v18  ;;  %v9299_v24 = vadd.f32 %v9114_v1, %v12139_v55  ;;  %v12140_v62 = vld [vmem:[#allocation66_spill] sm:$0xff]  ;;  %v12142_v6 = vld [vmem:[#allocation65_spill] sm:$0xff] }
 0x3d9   :  { %v9287_v30 = vadd.f32 %v9105_v11, %v12136_v10  ;;  %v9303_v17 = vadd.f32 %v9117_v27, %v12140_v62  ;;  %v12141_v61 = vld [vmem:[#allocation87_spill] sm:$0xff]  ;;  %v9311_v53 = vadd.f32 %v9123_v51, %v12142_v6  ;;  %v12143_v9 = vld [vmem:[#allocation90_spill] sm:$0xff]  ;;  %v12147_v10 = vld [vmem:[#allocation92_spill] sm:$0xff] }
 0x3da   :  { %v9307_v11 = vadd.f32 %v9120_v15, %v12141_v61  ;;  %v9315_v63 = vadd.f32 %v9126_v3, %v12143_v9  ;;  %v12144_v56 = vld [vmem:[#allocation91_spill] sm:$0xff]  ;;  %v12145_v13 = vld [vmem:[#allocation62_spill] sm:$0xff]  ;;  %v9327_v15 = vadd.f32 %v9135_v28, %v12147_v10  ;;  %v12149_v34 = vld [vmem:[#allocation69_spill] sm:$0xff] }
 0x3db   :  { %v9319_v1 = vadd.f32 %v9129_v58, %v12144_v56  ;;  %v9323_v27 = vadd.f32 %v9132_v2, %v12145_v13  ;;  %v9331_v51 = vadd.f32 %v9138_v7, %v12149_v34  ;;  %v12151_v18 = vld [vmem:[#allocation4_spill] sm:$0xff]  ;;  %v12153_v55 = vld [vmem:[#allocation67_spill] sm:$0xff]  ;;  %v12155_v62 = vld [vmem:[#allocation73_spill] sm:$0xff] }
 0x3dc   :  { %12148 = vst [vmem:[#allocation28_spill] sm:$0xff] %v9327_v15  ;;  %v9335_v3 = vadd.f32 %v9141_v33, %v12151_v18  ;;  %v9339_v58 = vadd.f32 %v9144_v16, %v12153_v55  ;;  %v9343_v2 = vadd.f32 %v9147_v19, %v12155_v62  ;;  %v12157_v61 = vld [vmem:[#allocation71_spill] sm:$0xff]  ;;  %v12161_v9 = vld [vmem:[#allocation50_spill] sm:$0xff]  ;;  %v12163_v56 = vld [vmem:[#allocation16_spill] sm:$0xff] }
 0x3dd   :  { %12146 = vst [vmem:[#allocation26_spill] sm:$0xff] %v9323_v27  ;;  %12150 = vst [vmem:[#allocation25_spill] sm:$0xff] %v9331_v51  ;;  %v9347_v28 = vadd.f32 %v9150_v45, %v12157_v61  ;;  %v12159_v6 = vld [vmem:[#allocation15_spill] sm:$0xff]  ;;  %v9355_v33 = vadd.f32 %v9156_v49, %v12161_v9  ;;  %v12164_v13 = vld [vmem:[#allocation80_spill] sm:$0xff]  ;;  %v9391_v27 = vmax.f32 %v3410_v47, 0.0  ;;  %v9413_v47 = vmax.f32 %v3425_v22, 0.0 }
 0x3de   :  { %12152 = vst [vmem:[#allocation27_spill] sm:$0xff] %v9335_v3  ;;  %12154 = vst [vmem:[#allocation30_spill] sm:$0xff] %v9339_v58  ;;  %v9351_v7 = vadd.f32 %v9153_v25, %v12159_v6  ;;  %v9359_v16 = vadd.f32 %v12164_v13, %v12163_v56  ;;  %v12166_v10 = vld [vmem:[#allocation68_spill] sm:$0xff]  ;;  %v12167_v34 = vld [vmem:[#allocation101_spill] sm:$0xff]  ;;  %v9436_v22 = vmax.f32 %v9251_v14, 0.0  ;;  %v9457_v14 = vmax.f32 %v9279_v54, 0.0 }
 0x3df   :  { %12156 = vst [vmem:[#allocation39_spill] sm:$0xff] %v9343_v2  ;;  %12158 = vst [vmem:[#allocation29_spill] sm:$0xff] %v9347_v28  ;;  %v3464_v19 = vadd.f32 %v12167_v34, %v12166_v10  ;;  %v12168_v18 = vld [vmem:[#allocation56_spill] sm:$0xff]  ;;  %v12169_v55 = vld [vmem:[#allocation93_spill] sm:$0xff]  ;;  %v9478_v54 = vmax.f32 %v9307_v11, 0.0 }
 0x3e0   :  { %12160 = vst [vmem:[#allocation34_spill] sm:$0xff] %v9351_v7  ;;  %12162 = vst [vmem:[#allocation61_spill] sm:$0xff] %v9355_v33  ;;  %v3465_v62 = vadd.f32 %v12169_v55, %v12168_v18  ;;  %v12170_v45 = vld [vmem:[#allocation17_spill] sm:$0xff]  ;;  %v12171_v61 = vld [vmem:[#allocation98_spill] sm:$0xff] }
 0x3e1   :  { %12165 = vst [vmem:[#allocation42_spill] sm:$0xff] %v9359_v16  ;;  %v9367_v48 = vadd.f32 %v12171_v61, %v12170_v45  ;;  %v12173_v25 = vld [vmem:[#allocation18_spill] sm:$0xff]  ;;  %v12174_v6 = vld [vmem:[#allocation19_spill] sm:$0xff]  ;;  %v12178_v28 = vld [vmem:[#allocation53_spill] sm:$0xff] }
 0x3e2   :  { %v9371_v7 = vadd.f32 %v12174_v6, %v12173_v25  ;;  %v12176_v49 = vld [vmem:[#allocation75_spill] sm:$0xff]  ;;  %v12179_v56 = vld [vmem:[#allocation100_spill] sm:$0xff]  ;;  %v12181_v2 = vld [vmem:[#allocation94_spill] sm:$0xff]  ;;  %12192 = vst [vmem:[#allocation55_spill] sm:$0xff] %v9391_v27 }
 0x3e3   :  { %12172 = vst [vmem:[#allocation48_spill] sm:$0xff] %v9367_v48  ;;  %v12177_v9 = vld [vmem:[#allocation99_spill] sm:$0xff]  ;;  %v3469_v13 = vadd.f32 %v12179_v56, %v12178_v28  ;;  %v12180_v16 = vld [vmem:[#allocation72_spill] sm:$0xff]  ;;  %v12182_v34 = vld [vmem:[#allocation70_spill] sm:$0xff] }
 0x3e4   :  { %12175 = vst [vmem:[#allocation38_spill] sm:$0xff] %v9371_v7  ;;  %v3468_v33 = vadd.f32 %v12177_v9, %v12176_v49  ;;  %v9379_v10 = vadd.f32 %v12181_v2, %v12180_v16  ;;  %v12183_v18 = vld [vmem:[#allocation22_spill] sm:$0xff]  ;;  %v12184_v58 = vld [vmem:[#allocation97_spill] sm:$0xff]  ;;  %v12186_v48 = vld [vmem:[#allocation20_spill] sm:$0xff]  ;;  %v9393_v2 = vmax.f32 %v3412_v44, 0.0  ;;  %v9395_v16 = vmax.f32 %v3413_v39, 0.0 }
 0x3e5   :  { %v3472_v55 = vadd.f32 %v12183_v18, %v12182_v34  ;;  %v3473_v45 = vadd.f32 %v3409_v59, %v12184_v58  ;;  %v12185_v61 = vld [vmem:[#allocation77_spill] sm:$0xff]  ;;  %v12187_v25 = vld [vmem:[#allocation88_spill] sm:$0xff]  ;;  %v12189_v51 = vld [vmem:[#allocation2_spill] sm:$0xff]  ;;  %v9397_v34 = vmax.f32 %v3414_v36, 0.0  ;;  %v9399_v59 = vmax.f32 %v3416_v40, 0.0 }
 0x3e6   :  { %v3431_v3 = vadd.f32 %v12186_v48, %v12185_v61  ;;  %v12188_v6 = vld [vmem:[#allocation21_spill] sm:$0xff]  ;;  %v3433_v49 = vadd.f32 %v3369_v50, %v12189_v51  ;;  %v12190_v9 = vld [vmem:[#allocation6_spill] sm:$0xff]  ;;  %v12191_v28 = vld [vmem:[#allocation103_spill] sm:$0xff]  ;;  %v9401_v48 = vmax.f32 %v3417_v32, 0.0  ;;  %v9403_v58 = vmax.f32 %v3418_v35, 0.0 }
 0x3e7   :  { %v3432_v7 = vadd.f32 %v12188_v6, %v12187_v25  ;;  %v3434_v15 = vadd.f32 %v3370_v31, %v12190_v9  ;;  %v3435_v56 = vadd.f32 %v3371_v42, %v12191_v28  ;;  %v9405_v18 = vmax.f32 %v3420_v5, 0.0  ;;  %v12205_v11 = vld [vmem:[#allocation27_spill] sm:$0xff]  ;;  %v12211_v9 = vld [vmem:[#allocation34_spill] sm:$0xff] }
 0x3e8   :  { %12193 = vst [vmem:[#allocation52_spill] sm:$0xff] %v9403_v58  ;;  %v9407_v50 = vmax.f32 %v3421_v43, 0.0  ;;  %v9409_v31 = vmax.f32 %v3422_v21, 0.0  ;;  %v9411_v42 = vmax.f32 %v3424_v41, 0.0  ;;  %v9415_v39 = vmax.f32 %v3426_v38, 0.0 }
 0x3e9   :  { %12194 = vst [vmem:[#allocation58_spill] sm:$0xff] %v9405_v18  ;;  %v9417_v36 = vmax.f32 %v3427_v52, 0.0  ;;  %v9419_v44 = vmax.f32 %v3428_v12, 0.0  ;;  %v9421_v40 = vmax.f32 %v3429_v26, 0.0  ;;  %v9423_v32 = vmax.f32 %v3430_v20, 0.0 }
 0x3ea   :  { %12195 = vst [vmem:[#allocation49_spill] sm:$0xff] %v9407_v50  ;;  %12196 = vst [vmem:[#allocation46_spill] sm:$0xff] %v9409_v31  ;;  %v9425_v35 = vmax.f32 %v3431_v3, 0.0  ;;  %v9427_v5 = vmax.f32 %v3432_v7, 0.0  ;;  %v9429_v43 = vmax.f32 %v3433_v49, 0.0  ;;  %v9431_v21 = vmax.f32 %v3434_v15, 0.0 }
 0x3eb   :  { %v9433_v41 = vmax.f32 %v3435_v56, 0.0  ;;  %v9439_v38 = vmax.f32 %v9255_v23, 0.0  ;;  %v9442_v52 = vmax.f32 %v9259_v46, 0.0  ;;  %v9445_v12 = vmax.f32 %v9263_v8, 0.0  ;;  %v12212_v56 = vld [vmem:[#allocation61_spill] sm:$0xff] }
 0x3ec   :  { %v9448_v26 = vmax.f32 %v9267_v0, 0.0  ;;  %v9451_v20 = vmax.f32 %v9271_v37, 0.0  ;;  %v9454_v15 = vmax.f32 %v9275_v57, 0.0  ;;  %v9460_v23 = vmax.f32 %v9283_v60, 0.0 }
 0x3ed   :  { %v9463_v46 = vmax.f32 %v9287_v30, 0.0  ;;  %v9466_v8 = vmax.f32 %v9291_v4, 0.0  ;;  %v9469_v0 = vmax.f32 %v9295_v29, 0.0  ;;  %v9472_v37 = vmax.f32 %v9299_v24, 0.0  ;;  %v12200_v29 = vld [vmem:[#allocation26_spill] sm:$0xff]  ;;  %v12201_v24 = vld [vmem:[#allocation28_spill] sm:$0xff] }
 0x3ee   :  { %v9475_v57 = vmax.f32 %v9303_v17, 0.0  ;;  %v9481_v60 = vmax.f32 %v9311_v53, 0.0  ;;  %v9484_v30 = vmax.f32 %v9315_v63, 0.0  ;;  %v9487_v4 = vmax.f32 %v9319_v1, 0.0  ;;  %v12203_v17 = vld [vmem:[#allocation25_spill] sm:$0xff]  ;;  %v12206_v53 = vld [vmem:[#allocation30_spill] sm:$0xff] }
 0x3ef   :  { %12197 = vst [vmem:[#allocation76_spill] sm:$0xff] %v9472_v37  ;;  %v9490_v51 = vmax.f32 %v12200_v29, 0.0  ;;  %v9493_v3 = vmax.f32 %v12201_v24, 0.0  ;;  %v9496_v7 = vmax.f32 %v12203_v17, 0.0  ;;  %v9499_v61 = vmax.f32 %v12205_v11, 0.0  ;;  %v12208_v63 = vld [vmem:[#allocation39_spill] sm:$0xff] }
 0x3f0   :  { %12198 = vst [vmem:[#allocation64_spill] sm:$0xff] %v9484_v30  ;;  %12199 = vst [vmem:[#allocation5_spill] sm:$0xff] %v9487_v4  ;;  %v9502_v25 = vmax.f32 %v12206_v53, 0.0  ;;  %v9505_v6 = vmax.f32 %v12208_v63, 0.0  ;;  %v12210_v1 = vld [vmem:[#allocation29_spill] sm:$0xff]  ;;  %v9511_v28 = vmax.f32 %v12211_v9, 0.0 }
 0x3f1   :  { %12202 = vst [vmem:[#allocation40_spill] sm:$0xff] %v9493_v3  ;;  %12204 = vst [vmem:[#allocation105_spill] sm:$0xff] %v9496_v7  ;;  %v9508_v49 = vmax.f32 %v12210_v1, 0.0  ;;  %v9514_v29 = vmax.f32 %v12212_v56, 0.0  ;;  %v9516_v24 = vmax.f32 %v3464_v19, 0.0  ;;  %v9518_v17 = vmax.f32 %v3465_v62, 0.0 }
 0x3f2   :  { %12207 = vst [vmem:[#allocation74_spill] sm:$0xff] %v9502_v25  ;;  %12209 = vst [vmem:[#allocation7_spill] sm:$0xff] %v9505_v6  ;;  %v9520_v11 = vmax.f32 %v3468_v33, 0.0  ;;  %v9522_v53 = vmax.f32 %v3469_v13, 0.0  ;;  %v9524_v25 = vmax.f32 %v3472_v55, 0.0  ;;  %v9526_v63 = vmax.f32 %v3473_v45, 0.0 }
 0x3f3   :  { %12213 = vst [vmem:[#allocation106_spill] sm:$0xff] %v9514_v29  ;;  %v12214_v1 = vld [vmem:[#allocation42_spill] sm:$0xff]  ;;  %v12215_v9 = vld [vmem:[#allocation48_spill] sm:$0xff]  ;;  %v9538_v19 = vmax.f32 %v9379_v10, 0.0  ;;  %v5518_v55 = vpack.c.bf16 %v9391_v27, %v9391_v27  ;;  %v5520_v45 = vpack.c.bf16 %v9393_v2, %v9393_v2  ;;  %v5522_v10 = vpack.c.bf16 %v9397_v34, %v9397_v34 }
 0x3f4   :  { %v9529_v6 = vmax.f32 %v12214_v1, 0.0  ;;  %v9532_v3 = vmax.f32 %v12215_v9, 0.0  ;;  %v12216_v56 = vld [vmem:[#allocation38_spill] sm:$0xff]  ;;  %v5521_v1 = vpack.c.bf16 %v9395_v16, %v9395_v16  ;;  %v5524_v9 = vpack.c.bf16 %v9399_v59, %v9399_v59 }
 0x3f5   :  { %v9535_v29 = vmax.f32 %v12216_v56, 0.0  ;;  %v5525_v56 = vpack.c.bf16 %v9401_v48, %v9401_v48  ;;  %v5526_v13 = vpack.c.bf16 %v9403_v58, %v9403_v58  ;;  %v5528_v62 = vpack.c.bf16 %v9405_v18, %v9405_v18  ;;  %3795 = vst.msk [vmem:[%s11538_s14] sm:$0xf] %vm3794_vm2, %v5518_v55  ;;  %3797 = vst.msk [vmem:[%s11538_s14 + $0x8] sm:$0xf] %vm3794_vm2, %v5520_v45 }
 0x3f6   :  { %v5529_v33 = vpack.c.bf16 %v9407_v50, %v9407_v50  ;;  %v5530_v27 = vpack.c.bf16 %v9409_v31, %v9409_v31  ;;  %v5532_v58 = vpack.c.bf16 %v9411_v42, %v9411_v42  ;;  %v5533_v18 = vpack.c.bf16 %v9413_v47, %v9413_v47  ;;  %3798 = vst.msk [vmem:[%s11538_s14 + $0xc] sm:$0xf] %vm3794_vm2, %v5521_v1 }
 0x3f7   :  { %v5534_v50 = vpack.c.bf16 %v9415_v39, %v9415_v39  ;;  %v5535_v31 = vpack.c.bf16 %v9417_v36, %v9417_v36  ;;  %3799 = vst.msk [vmem:[%s11538_s14 + $0x10] sm:$0xf] %vm3794_vm2, %v5522_v10  ;;  %3801 = vst.msk [vmem:[%s11538_s14 + $0x18] sm:$0xf] %vm3794_vm2, %v5524_v9  ;;  %v5536_v55 = vpack.c.bf16 %v9419_v44, %v9419_v44 }
 0x3f8   :  { %3802 = vst.msk [vmem:[%s11538_s14 + $0x1c] sm:$0xf] %vm3794_vm2, %v5525_v56  ;;  %v5537_v45 = vpack.c.bf16 %v9421_v40, %v9421_v40  ;;  %v5538_v1 = vpack.c.bf16 %v9423_v32, %v9423_v32  ;;  %v5539_v10 = vpack.c.bf16 %v9425_v35, %v9425_v35  ;;  %3803 = vst.msk [vmem:[%s11538_s14 + $0x20] sm:$0xf] %vm3794_vm2, %v5526_v13 }
 0x3f9   :  { %3805 = vst.msk [vmem:[%s11538_s14 + $0x28] sm:$0xf] %vm3794_vm2, %v5528_v62  ;;  %3806 = vst.msk [vmem:[%s11538_s14 + $0x2c] sm:$0xf] %vm3794_vm2, %v5529_v33  ;;  %v5540_v9 = vpack.c.bf16 %v9427_v5, %v9427_v5  ;;  %v5541_v13 = vpack.c.bf16 %v9429_v43, %v9429_v43  ;;  %v5542_v56 = vpack.c.bf16 %v9431_v21, %v9431_v21 }
 0x3fa   :  { %3807 = vst.msk [vmem:[%s11538_s14 + $0x30] sm:$0xf] %vm3794_vm2, %v5530_v27  ;;  %v5543_v62 = vpack.c.bf16 %v9433_v41, %v9433_v41  ;;  %3809 = vst.msk [vmem:[%s11538_s14 + $0x38] sm:$0xf] %vm3794_vm2, %v5532_v58  ;;  %v5544_v27 = vpack.c.bf16 %v9436_v22, %v9436_v22  ;;  %v5545_v58 = vpack.c.bf16 %v9439_v38, %v9439_v38 }
 0x3fb   :  { %3810 = vst.msk [vmem:[%s11538_s14 + $0x3c] sm:$0xf] %vm3794_vm2, %v5533_v18  ;;  %3811 = vst.msk [vmem:[%s11538_s14 + $0x40] sm:$0xf] %vm3794_vm2, %v5534_v50  ;;  %v5546_v33 = vpack.c.bf16 %v9442_v52, %v9442_v52  ;;  %v5547_v18 = vpack.c.bf16 %v9445_v12, %v9445_v12  ;;  %v5548_v50 = vpack.c.bf16 %v9448_v26, %v9448_v26 }
 0x3fc   :  { %3812 = vst.msk [vmem:[%s11538_s14 + $0x44] sm:$0xf] %vm3794_vm2, %v5535_v31  ;;  %3813 = vst.msk [vmem:[%s11538_s14 + $0x48] sm:$0xf] %vm3794_vm2, %v5536_v55  ;;  %v5549_v31 = vpack.c.bf16 %v9451_v20, %v9451_v20  ;;  %v5550_v55 = vpack.c.bf16 %v9454_v15, %v9454_v15 }
 0x3fd   :  { %3814 = vst.msk [vmem:[%s11538_s14 + $0x4c] sm:$0xf] %vm3794_vm2, %v5537_v45  ;;  %3815 = vst.msk [vmem:[%s11538_s14 + $0x50] sm:$0xf] %vm3794_vm2, %v5538_v1  ;;  %v5551_v45 = vpack.c.bf16 %v9457_v14, %v9457_v14  ;;  %v5552_v1 = vpack.c.bf16 %v9460_v23, %v9460_v23 }
 0x3fe   :  { %3816 = vst.msk [vmem:[%s11538_s14 + $0x54] sm:$0xf] %vm3794_vm2, %v5539_v10  ;;  %3817 = vst.msk [vmem:[%s11538_s14 + $0x58] sm:$0xf] %vm3794_vm2, %v5540_v9  ;;  %v5553_v10 = vpack.c.bf16 %v9463_v46, %v9463_v46  ;;  %v5554_v9 = vpack.c.bf16 %v9466_v8, %v9466_v8 }
 0x3ff   :  { %3818 = vst.msk [vmem:[%s11538_s14 + $0x5c] sm:$0xf] %vm3794_vm2, %v5541_v13  ;;  %3819 = vst.msk [vmem:[%s11538_s14 + $0x60] sm:$0xf] %vm3794_vm2, %v5542_v56  ;;  %v5555_v13 = vpack.c.bf16 %v9469_v0, %v9469_v0  ;;  %v5556_v56 = vpack.c.bf16 %v9472_v37, %v9472_v37 }
 0x400   :  { %3820 = vst.msk [vmem:[%s11538_s14 + $0x64] sm:$0xf] %vm3794_vm2, %v5543_v62  ;;  %3821 = vst.msk [vmem:[%s11538_s14 + $0x68] sm:$0xf] %vm3794_vm2, %v5544_v27  ;;  %v5557_v62 = vpack.c.bf16 %v9475_v57, %v9475_v57  ;;  %v5558_v27 = vpack.c.bf16 %v9478_v54, %v9478_v54 }
 0x401   :  { %3822 = vst.msk [vmem:[%s11538_s14 + $0x6c] sm:$0xf] %vm3794_vm2, %v5545_v58  ;;  %3823 = vst.msk [vmem:[%s11538_s14 + $0x70] sm:$0xf] %vm3794_vm2, %v5546_v33  ;;  %v5559_v58 = vpack.c.bf16 %v9481_v60, %v9481_v60  ;;  %v5560_v33 = vpack.c.bf16 %v9484_v30, %v9484_v30 }
 0x402   :  { %3824 = vst.msk [vmem:[%s11538_s14 + $0x74] sm:$0xf] %vm3794_vm2, %v5547_v18  ;;  %3825 = vst.msk [vmem:[%s11538_s14 + $0x78] sm:$0xf] %vm3794_vm2, %v5548_v50  ;;  %v5561_v18 = vpack.c.bf16 %v9487_v4, %v9487_v4  ;;  %v5562_v50 = vpack.c.bf16 %v9490_v51, %v9490_v51 }
 0x403   :  { %3826 = vst.msk [vmem:[%s11538_s14 + $0x7c] sm:$0xf] %vm3794_vm2, %v5549_v31  ;;  %3827 = vst.msk [vmem:[%s11538_s14 + $0x80] sm:$0xf] %vm3794_vm2, %v5550_v55  ;;  %v12217_v31 = vld [vmem:[#allocation40_spill] sm:$0xff]  ;;  %v5564_v55 = vpack.c.bf16 %v9496_v7, %v9496_v7 }
 0x404   :  { %3828 = vst.msk [vmem:[%s11538_s14 + $0x84] sm:$0xf] %vm3794_vm2, %v5551_v45  ;;  %v5563_v37 = vpack.c.bf16 %v12217_v31, %v12217_v31  ;;  %3829 = vst.msk [vmem:[%s11538_s14 + $0x88] sm:$0xf] %vm3794_vm2, %v5552_v1  ;;  %v5565_v45 = vpack.c.bf16 %v9499_v61, %v9499_v61  ;;  %v12218_v1 = vld [vmem:[#allocation74_spill] sm:$0xff] }
 0x405   :  { %3830 = vst.msk [vmem:[%s11538_s14 + $0x8c] sm:$0xf] %vm3794_vm2, %v5553_v10  ;;  %3831 = vst.msk [vmem:[%s11538_s14 + $0x90] sm:$0xf] %vm3794_vm2, %v5554_v9  ;;  %v5566_v30 = vpack.c.bf16 %v12218_v1, %v12218_v1  ;;  %v12219_v10 = vld [vmem:[#allocation7_spill] sm:$0xff]  ;;  %v5568_v9 = vpack.c.bf16 %v9508_v49, %v9508_v49 }
 0x406   :  { %3832 = vst.msk [vmem:[%s11538_s14 + $0x94] sm:$0xf] %vm3794_vm2, %v5555_v13  ;;  %v5567_v4 = vpack.c.bf16 %v12219_v10, %v12219_v10  ;;  %3833 = vst.msk [vmem:[%s11538_s14 + $0x98] sm:$0xf] %vm3794_vm2, %v5556_v56  ;;  %v5569_v13 = vpack.c.bf16 %v9511_v28, %v9511_v28  ;;  %v12220_v56 = vld [vmem:[#allocation106_spill] sm:$0xff] }
 0x407   :  { %3834 = vst.msk [vmem:[%s11538_s14 + $0x9c] sm:$0xf] %vm3794_vm2, %v5557_v62  ;;  %3835 = vst.msk [vmem:[%s11538_s14 + $0xa0] sm:$0xf] %vm3794_vm2, %v5558_v27  ;;  %v5570_v7 = vpack.c.bf16 %v12220_v56, %v12220_v56  ;;  %v5571_v62 = vpack.c.bf16 %v9529_v6, %v9529_v6  ;;  %v5572_v27 = vpack.c.bf16 %v9516_v24, %v9516_v24 }
 0x408   :  { %3836 = vst.msk [vmem:[%s11538_s14 + $0xa4] sm:$0xf] %vm3794_vm2, %v5559_v58  ;;  %3837 = vst.msk [vmem:[%s11538_s14 + $0xa8] sm:$0xf] %vm3794_vm2, %v5560_v33  ;;  %v5573_v58 = vpack.c.bf16 %v9518_v17, %v9518_v17  ;;  %v5574_v33 = vpack.c.bf16 %v9532_v3, %v9532_v3 }
 0x409   :  { %3838 = vst.msk [vmem:[%s11538_s14 + $0xac] sm:$0xf] %vm3794_vm2, %v5561_v18  ;;  %3839 = vst.msk [vmem:[%s11538_s14 + $0xb0] sm:$0xf] %vm3794_vm2, %v5562_v50  ;;  %v5575_v18 = vpack.c.bf16 %v9535_v29, %v9535_v29  ;;  %v5577_v50 = vpack.c.bf16 %v9522_v53, %v9522_v53 }
 0x40a   :  { %3840 = vst.msk [vmem:[%s11538_s14 + $0xb4] sm:$0xf] %vm3794_vm2, %v5563_v37  ;;  %3841 = vst.msk [vmem:[%s11538_s14 + $0xb8] sm:$0xf] %vm3794_vm2, %v5564_v55  ;;  %v5576_v37 = vpack.c.bf16 %v9520_v11, %v9520_v11  ;;  %v5578_v55 = vpack.c.bf16 %v9538_v19, %v9538_v19 }
 0x40b   :  { %3842 = vst.msk [vmem:[%s11538_s14 + $0xbc] sm:$0xf] %vm3794_vm2, %v5565_v45  ;;  %3843 = vst.msk [vmem:[%s11538_s14 + $0xc0] sm:$0xf] %vm3794_vm2, %v5566_v30  ;;  %v5580_v45 = vpack.c.bf16 %v9524_v25, %v9524_v25  ;;  %v5581_v30 = vpack.c.bf16 %v9526_v63, %v9526_v63 }
 0x40c   :  { %3844 = vst.msk [vmem:[%s11538_s14 + $0xc4] sm:$0xf] %vm3794_vm2, %v5567_v4  ;;  %3845 = vst.msk [vmem:[%s11538_s14 + $0xc8] sm:$0xf] %vm3794_vm2, %v5568_v9  ;;  %v12221_v4 = vld [vmem:[#allocation104_spill] sm:$0xff] }
 0x40d   :  { %3846 = vst.msk [vmem:[%s11538_s14 + $0xcc] sm:$0xf] %vm3794_vm2, %v5569_v13  ;;  %3847 = vst.msk [vmem:[%s11538_s14 + $0xd0] sm:$0xf] %vm3794_vm2, %v5570_v7  ;;  %v3475_v7 = vmax.f32 %v12221_v4, 0.0  ;;  %v12222_v9 = vld [vmem:[#allocation24_spill] sm:$0xff] }
 0x40e   :  { %3848 = vst.msk [vmem:[%s11538_s14 + $0xd4] sm:$0xf] %vm3794_vm2, %v5571_v62  ;;  %3849 = vst.msk [vmem:[%s11538_s14 + $0xd8] sm:$0xf] %vm3794_vm2, %v5572_v27  ;;  %v3479_v13 = vmax.f32 %v12222_v9, 0.0  ;;  %v3539_v62 = vpack.c.bf16 %v9395_v16, %v9393_v2  ;;  %v12223_v2 = vld [vmem:[#allocation96_spill] sm:$0xff]  ;;  %v3556_v9 = vpack.c.bf16 %v9469_v0, %v9466_v8  ;;  %v3541_v8 = vpack.c.bf16 %v9401_v48, %v9399_v59 }
 0x40f   :  { %3850 = vst.msk [vmem:[%s11538_s14 + $0xdc] sm:$0xf] %vm3794_vm2, %v5573_v58  ;;  %3851 = vst.msk [vmem:[%s11538_s14 + $0xe0] sm:$0xf] %vm3794_vm2, %v5574_v33  ;;  %v3483_v16 = vmax.f32 %v12223_v2, 0.0  ;;  %v12224_v27 = vld [vmem:[#allocation23_spill] sm:$0xff]  ;;  %v3546_v59 = vpack.c.bf16 %v9417_v36, %v9415_v39  ;;  %v3547_v48 = vpack.c.bf16 %v9421_v40, %v9419_v44  ;;  %v12230_v39 = vpack.c.bf16 %v9439_v38, %v9436_v22 }
 0x410   :  { %3852 = vst.msk [vmem:[%s11538_s14 + $0xe4] sm:$0xf] %vm3794_vm2, %v5575_v18  ;;  %3853 = vst.msk [vmem:[%s11538_s14 + $0xe8] sm:$0xf] %vm3794_vm2, %v5576_v37  ;;  %v3487_v58 = vmax.f32 %v12224_v27, 0.0  ;;  %v12225_v33 = vld [vmem:[#allocation55_spill] sm:$0xff]  ;;  %v5519_v37 = vpack.c.bf16 %v3475_v7, %v3475_v7  ;;  %v12231_v36 = vpack.c.bf16 %v9451_v20, %v9448_v26  ;;  %v12232_v44 = vpack.c.bf16 %v9463_v46, %v9460_v23 }
 0x411   :  { %3854 = vst.msk [vmem:[%s11538_s14 + $0xec] sm:$0xf] %vm3794_vm2, %v5577_v50  ;;  %3855 = vst.msk [vmem:[%s11538_s14 + $0xf0] sm:$0xf] %vm3794_vm2, %v5578_v55  ;;  %v3538_v18 = vpack.c.bf16 %v3475_v7, %v12225_v33  ;;  %v5523_v50 = vpack.c.bf16 %v3479_v13, %v3479_v13  ;;  %v5527_v4 = vpack.c.bf16 %v3483_v16, %v3483_v16  ;;  %v12226_v0 = vld [vmem:[#allocation52_spill] sm:$0xff] }
 0x412   :  { %3857 = vst.msk [vmem:[%s11538_s14 + $0xf8] sm:$0xf] %vm3794_vm2, %v5580_v45  ;;  %3858 = vst.msk [vmem:[%s11538_s14 + $0xfc] sm:$0xf] %vm3794_vm2, %v5581_v30  ;;  %v5531_v55 = vpack.c.bf16 %v3487_v58, %v3487_v58  ;;  %v3540_v45 = vpack.c.bf16 %v3479_v13, %v9397_v34  ;;  %v3552_v30 = vpack.c.bf16 %v9445_v12, %v9442_v52  ;;  %v12233_v40 = vld [vmem:[#allocation76_spill] sm:$0xff] }
 0x413   :  { %3796 = vst.msk [vmem:[%s11538_s14 + $0x4] sm:$0xf] %vm3794_vm2, %v5519_v37  ;;  %5888 = vmatprep.mubr.msk.bf16.mxu1 %vm2024_vm1, %v3538_v18  ;;  %3800 = vst.msk [vmem:[%s11538_s14 + $0x14] sm:$0xf] %vm3794_vm2, %v5523_v50  ;;  %v3554_v7 = vpack.c.bf16 %v9457_v14, %v9454_v15  ;;  %v3558_v34 = vpack.c.bf16 %v9481_v60, %v9478_v54  ;;  %v3560_v52 = vpack.c.bf16 %v12217_v31, %v9490_v51  ;;  %v12227_v54 = vld [vmem:[#allocation58_spill] sm:$0xff]  ;;  %v12228_v60 = vld [vmem:[#allocation49_spill] sm:$0xff] }
 0x414   :  { %5889 = vmatmul.mubr.msk.bf16.vlgmr.msra.gmra.mxu1 %vm2024_vm1, %v3539_v62  ;;  %3804 = vst.msk [vmem:[%s11538_s14 + $0x24] sm:$0xf] %vm3794_vm2, %v5527_v4  ;;  %3808 = vst.msk [vmem:[%s11538_s14 + $0x34] sm:$0xf] %vm3794_vm2, %v5531_v55  ;;  %v3562_v12 = vpack.c.bf16 %v12219_v10, %v12218_v1  ;;  %v3564_v15 = vpack.c.bf16 %v9529_v6, %v12220_v56  ;;  %v3566_v14 = vpack.c.bf16 %v9535_v29, %v9532_v3  ;;  %v12229_v31 = vld [vmem:[#allocation46_spill] sm:$0xff]  ;;  %v12242_v26 = vld [vmem:[#allocation44_spill] sm:$0xff] }
 0x415   :  { %5892 = vmatprep.mubr.msk.bf16.mxu1 %vm2024_vm1, %v3540_v45  ;;  %v3542_v13 = vpack.c.bf16 %v3483_v16, %v12226_v0  ;;  %v3543_v51 = vpack.c.bf16 %v12228_v60, %v12227_v54  ;;  %v3544_v1 = vpack.c.bf16 %v3487_v58, %v12229_v31  ;;  %v3545_v3 = vpack.c.bf16 %v9413_v47, %v9411_v42 }
 0x416   :  { %v3548_v6 = vpack.c.bf16 %v9425_v35, %v9423_v32  ;;  %v3549_v42 = vpack.c.bf16 %v9429_v43, %v9427_v5  ;;  %v3550_v47 = vpack.c.bf16 %v9433_v41, %v9431_v21  ;;  %v12234_v32 = vpack.c.bf16 %v9475_v57, %v12233_v40  ;;  %v12235_v35 = vld [vmem:[#allocation5_spill] sm:$0xff]  ;;  %v12236_v5 = vld [vmem:[#allocation64_spill] sm:$0xff] }
 0x417   :  { %v12237_v43 = vpack.c.bf16 %v12235_v35, %v12236_v5  ;;  %v12238_v21 = vld [vmem:[#allocation105_spill] sm:$0xff]  ;;  %v12240_v22 = vpack.c.bf16 %v9511_v28, %v9508_v49  ;;  %v12241_v38 = vpack.c.bf16 %v9518_v17, %v9516_v24  ;;  %v3568_v20 = vpack.c.bf16 %v12242_v26, %v9538_v19 }
 0x418   :  { %v12239_v41 = vpack.c.bf16 %v9499_v61, %v12238_v21  ;;  %v12243_v23 = vpack.c.bf16 %v9522_v53, %v9520_v11  ;;  %v12244_v46 = vpack.c.bf16 %v9526_v63, %v9524_v25 }
 0x41c   :  { %5893 = vmatmul.mubr.msk.bf16.gmra.mxu1 %vm2024_vm1, %v3541_v8 }
 0x41d   :  { %5896 = vmatprep.mubr.msk.bf16.mxu1 %vm2024_vm1, %v3542_v13 }
 0x424   :  { %5897 = vmatmul.mubr.msk.bf16.gmra.mxu1 %vm2024_vm1, %v3543_v51 }
 0x425   :  { %5900 = vmatprep.mubr.msk.bf16.mxu1 %vm2024_vm1, %v3544_v1 }
 0x42c   :  { %5901 = vmatmul.mubr.msk.bf16.gmra.mxu1 %vm2024_vm1, %v3545_v3 }
 0x42d   :  { %5904 = vmatprep.mubr.msk.bf16.mxu1 %vm2024_vm1, %v3546_v59 }
 0x434   :  { %5905 = vmatmul.mubr.msk.bf16.gmra.mxu1 %vm2024_vm1, %v3547_v48 }
 0x435   :  { %5908 = vmatprep.mubr.msk.bf16.mxu1 %vm2024_vm1, %v3548_v6 }
 0x43c   :  { %5909 = vmatmul.mubr.msk.bf16.gmra.mxu1 %vm2024_vm1, %v3549_v42 }
 0x43d   :  { %5912 = vmatprep.mubr.msk.bf16.mxu1 %vm2024_vm1, %v3550_v47 }
 0x444   :  { %5913 = vmatmul.mubr.msk.bf16.gmra.mxu1 %vm2024_vm1, %v12230_v39 }
 0x445   :  { %5916 = vmatprep.mubr.msk.bf16.mxu1 %vm2024_vm1, %v3552_v30 }
 0x44c   :  { %5917 = vmatmul.mubr.msk.bf16.gmra.mxu1 %vm2024_vm1, %v12231_v36 }
 0x44d   :  { %5920 = vmatprep.mubr.msk.bf16.mxu1 %vm2024_vm1, %v3554_v7 }
 0x454   :  { %5921 = vmatmul.mubr.msk.bf16.gmra.mxu1 %vm2024_vm1, %v12232_v44 }
 0x455   :  { %5924 = vmatprep.mubr.msk.bf16.mxu1 %vm2024_vm1, %v3556_v9 }
 0x45c   :  { %5925 = vmatmul.mubr.msk.bf16.gmra.mxu1 %vm2024_vm1, %v12234_v32 }
 0x45d   :  { %5928 = vmatprep.mubr.msk.bf16.mxu1 %vm2024_vm1, %v3558_v34 }
 0x464   :  { %5929 = vmatmul.mubr.msk.bf16.gmra.mxu1 %vm2024_vm1, %v12237_v43 }
 0x465   :  { %5932 = vmatprep.mubr.msk.bf16.mxu1 %vm2024_vm1, %v3560_v52 }
 0x46c   :  { %5933 = vmatmul.mubr.msk.bf16.gmra.mxu1 %vm2024_vm1, %v12239_v41 }
 0x46d   :  { %5936 = vmatprep.mubr.msk.bf16.mxu1 %vm2024_vm1, %v3562_v12 }
 0x474   :  { %5937 = vmatmul.mubr.msk.bf16.gmra.mxu1 %vm2024_vm1, %v12240_v22 }
 0x475   :  { %5940 = vmatprep.mubr.msk.bf16.mxu1 %vm2024_vm1, %v3564_v15 }
 0x47c   :  { %5941 = vmatmul.mubr.msk.bf16.gmra.mxu1 %vm2024_vm1, %v12241_v38 }
 0x47d   :  { %5944 = vmatprep.mubr.msk.bf16.mxu1 %vm2024_vm1, %v3566_v14 }
 0x484   :  { %5945 = vmatmul.mubr.msk.bf16.gmra.mxu1 %vm2024_vm1, %v12243_v23 }
 0x485   :  { %5948 = vmatprep.mubr.msk.bf16.mxu1 %vm2024_vm1, %v3568_v20 }
 0x48c   :  { %5949 = vmatmul.mubr.msk.bf16.gmra.mxu1 %vm2024_vm1, %v12244_v46 }
 0x4d4   :  { %v10036_v57 = vpop.f32.mrf.mxu1 }
 0x4d5   :  { %v4414_v24 = vmul.f32 %v10036_v57, %v10036_v57  ;;  %v4282_v19 = vsel %vm4278_vm3, %v10036_v57, 0.0 }
 0x4d6   :  { %v10038_v61 = vpop.f32.mrf.mxu1 }
 0x4d7   :  { %v4412_v28 = vmul.f32 %v10038_v61, %v10038_v61  ;;  %v4279_v25 = vsel %vm4278_vm3, %v10038_v61, 0.0  ;;  %v4479_v58 = vsel %vm4278_vm3, %v4414_v24, 0.0 }
 0x4d8   :  { %v10040_v49 = vpop.f32.mrf.mxu1 }
 0x4d9   :  { %v4476_v10 = vsel %vm4278_vm3, %v4412_v28, 0.0  ;;  %v4415_v56 = vmul.f32 %v10040_v49, %v10040_v49  ;;  %v4284_v33 = vsel %vm4278_vm3, %v10040_v49, 0.0 }
 0x4da   :  { %v10044_v29 = vpop.f32.mrf.mxu1 }
 0x4db   :  { %v4280_v17 = vsel %vm4278_vm3, %v10044_v29, 0.0  ;;  %v4413_v11 = vmul.f32 %v10044_v29, %v10044_v29  ;;  %v4481_v55 = vsel %vm4278_vm3, %v4415_v56, 0.0 }
 0x4dc   :  { %v4281_v53 = vadd.f32 %v4280_v17, %v4279_v25  ;;  %v10054_v63 = vpop.f32.mrf.mxu1 }
 0x4dd   :  { %v4477_v62 = vsel %vm4278_vm3, %v4413_v11, 0.0  ;;  %v4418_v34 = vmul.f32 %v10054_v63, %v10054_v63  ;;  %v4290_v13 = vsel %vm4278_vm3, %v10054_v63, 0.0 }
 0x4de   :  { %v4283_v2 = vadd.f32 %v4282_v19, %v4281_v53  ;;  %v4478_v16 = vadd.f32 %v4477_v62, %v4476_v10  ;;  %v10062_v27 = vpop.f32.mrf.mxu1 }
 0x4df   :  { %v4416_v18 = vmul.f32 %v10062_v27, %v10062_v27  ;;  %v4286_v45 = vsel %vm4278_vm3, %v10062_v27, 0.0  ;;  %v4487_v3 = vsel %vm4278_vm3, %v4418_v34, 0.0 }
 0x4e0   :  { %v4480_v37 = vadd.f32 %v4479_v58, %v4478_v16  ;;  %v4285_v50 = vadd.f32 %v4284_v33, %v4283_v2  ;;  %v10069_v4 = vpop.f32.mrf.mxu1 }
 0x4e1   :  { %v4483_v52 = vsel %vm4278_vm3, %v4416_v18, 0.0  ;;  %v4419_v54 = vmul.f32 %v10069_v4, %v10069_v4  ;;  %v4292_v59 = vsel %vm4278_vm3, %v10069_v4, 0.0 }
 0x4e2   :  { %v4287_v30 = vadd.f32 %v4286_v45, %v4285_v50  ;;  %v4482_v7 = vadd.f32 %v4481_v55, %v4480_v37  ;;  %v10074_v9 = vpop.f32.mrf.mxu1 }
 0x4e3   :  { %v4288_v12 = vsel %vm4278_vm3, %v10074_v9, 0.0  ;;  %v4417_v15 = vmul.f32 %v10074_v9, %v10074_v9  ;;  %v4489_v39 = vsel %vm4278_vm3, %v4419_v54, 0.0 }
 0x4e4   :  { %v4484_v14 = vadd.f32 %v4483_v52, %v4482_v7  ;;  %v4289_v8 = vadd.f32 %v4288_v12, %v4287_v30  ;;  %v10083_v0 = vpop.f32.mrf.mxu1 }
 0x4e5   :  { %v4485_v60 = vsel %vm4278_vm3, %v4417_v15, 0.0  ;;  %v4422_v35 = vmul.f32 %v10083_v0, %v10083_v0  ;;  %v4298_v26 = vsel %vm4278_vm3, %v10083_v0, 0.0 }
 0x4e6   :  { %v4291_v51 = vadd.f32 %v4290_v13, %v4289_v8  ;;  %v4486_v31 = vadd.f32 %v4485_v60, %v4484_v14  ;;  %v10090_v1 = vpop.f32.mrf.mxu1 }
 0x4e7   :  { %v4420_v48 = vmul.f32 %v10090_v1, %v10090_v1  ;;  %v4294_v36 = vsel %vm4278_vm3, %v10090_v1, 0.0  ;;  %v4495_v25 = vsel %vm4278_vm3, %v4422_v35, 0.0 }
 0x4e8   :  { %v4488_v6 = vadd.f32 %v4487_v3, %v4486_v31  ;;  %v4293_v42 = vadd.f32 %v4292_v59, %v4291_v51  ;;  %v10097_v47 = vpop.f32.mrf.mxu1 }
 0x4e9   :  { %v4491_v5 = vsel %vm4278_vm3, %v4420_v48, 0.0  ;;  %v4423_v20 = vmul.f32 %v10097_v47, %v10097_v47  ;;  %v4300_v17 = vsel %vm4278_vm3, %v10097_v47, 0.0 }
 0x4ea   :  { %v4295_v44 = vadd.f32 %v4294_v36, %v4293_v42  ;;  %v4490_v40 = vadd.f32 %v4489_v39, %v4488_v6  ;;  %v10102_v32 = vpop.f32.mrf.mxu1 }
 0x4eb   :  { %v4296_v43 = vsel %vm4278_vm3, %v10102_v32, 0.0  ;;  %v4421_v21 = vmul.f32 %v10102_v32, %v10102_v32  ;;  %v4497_v56 = vsel %vm4278_vm3, %v4423_v20, 0.0 }
 0x4ec   :  { %v4492_v41 = vadd.f32 %v4491_v5, %v4490_v40  ;;  %v4297_v22 = vadd.f32 %v4296_v43, %v4295_v44  ;;  %v10111_v38 = vpop.f32.mrf.mxu1 }
 0x4ed   :  { %v4493_v23 = vsel %vm4278_vm3, %v4421_v21, 0.0  ;;  %v4426_v33 = vmul.f32 %v10111_v38, %v10111_v38  ;;  %v4306_v7 = vsel %vm4278_vm3, %v10111_v38, 0.0 }
 0x4ee   :  { %v4299_v46 = vadd.f32 %v4298_v26, %v4297_v22  ;;  %v4494_v28 = vadd.f32 %v4493_v23, %v4492_v41  ;;  %v10118_v24 = vpop.f32.mrf.mxu1 }
 0x4ef   :  { %v4424_v11 = vmul.f32 %v10118_v24, %v10118_v24  ;;  %v4302_v62 = vsel %vm4278_vm3, %v10118_v24, 0.0  ;;  %v4503_v8 = vsel %vm4278_vm3, %v4426_v33, 0.0 }
 0x4f0   :  { %v4496_v53 = vadd.f32 %v4495_v25, %v4494_v28  ;;  %v4301_v19 = vadd.f32 %v4300_v17, %v4299_v46  ;;  %v10125_v10 = vpop.f32.mrf.mxu1 }
 0x4f1   :  { %v4499_v18 = vsel %vm4278_vm3, %v4424_v11, 0.0  ;;  %v4427_v34 = vmul.f32 %v10125_v10, %v10125_v10  ;;  %v4308_v13 = vsel %vm4278_vm3, %v10125_v10, 0.0 }
 0x4f2   :  { %v4303_v2 = vadd.f32 %v4302_v62, %v4301_v19  ;;  %v4498_v16 = vadd.f32 %v4497_v56, %v4496_v53  ;;  %v10130_v58 = vpop.f32.mrf.mxu1 }
 0x4f3   :  { %v4304_v37 = vsel %vm4278_vm3, %v10130_v58, 0.0  ;;  %v4425_v50 = vmul.f32 %v10130_v58, %v10130_v58  ;;  %v4505_v3 = vsel %vm4278_vm3, %v4427_v34, 0.0 }
 0x4f4   :  { %v4500_v55 = vadd.f32 %v4499_v18, %v4498_v16  ;;  %v4305_v45 = vadd.f32 %v4304_v37, %v4303_v2  ;;  %v10139_v30 = vpop.f32.mrf.mxu1 }
 0x4f5   :  { %v4501_v52 = vsel %vm4278_vm3, %v4425_v50, 0.0  ;;  %v4430_v39 = vmul.f32 %v10139_v30, %v10139_v30  ;;  %v4314_v21 = vsel %vm4278_vm3, %v10139_v30, 0.0 }
 0x4f6   :  { %v4307_v12 = vadd.f32 %v4306_v7, %v4305_v45  ;;  %v4502_v15 = vadd.f32 %v4501_v52, %v4500_v55  ;;  %v10146_v14 = vpop.f32.mrf.mxu1 }
 0x4f7   :  { %v4428_v54 = vmul.f32 %v10146_v14, %v10146_v14  ;;  %v4310_v59 = vsel %vm4278_vm3, %v10146_v14, 0.0  ;;  %v4511_v46 = vsel %vm4278_vm3, %v4430_v39, 0.0 }
 0x4f8   :  { %v4504_v60 = vadd.f32 %v4503_v8, %v4502_v15  ;;  %v4309_v51 = vadd.f32 %v4308_v13, %v4307_v12  ;;  %v10153_v31 = vpop.f32.mrf.mxu1 }
 0x4f9   :  { %v4507_v36 = vsel %vm4278_vm3, %v4428_v54, 0.0  ;;  %v4431_v41 = vmul.f32 %v10153_v31, %v10153_v31  ;;  %v4316_v28 = vsel %vm4278_vm3, %v10153_v31, 0.0 }
 0x4fa   :  { %v4311_v48 = vadd.f32 %v4310_v59, %v4309_v51  ;;  %v4506_v6 = vadd.f32 %v4505_v3, %v4504_v60  ;;  %v10158_v42 = vpop.f32.mrf.mxu1 }
 0x4fb   :  { %v4312_v44 = vsel %vm4278_vm3, %v10158_v42, 0.0  ;;  %v4429_v40 = vmul.f32 %v10158_v42, %v10158_v42  ;;  %v4513_v19 = vsel %vm4278_vm3, %v4431_v41, 0.0 }
 0x4fc   :  { %v4508_v35 = vadd.f32 %v4507_v36, %v4506_v6  ;;  %v4313_v5 = vadd.f32 %v4312_v44, %v4311_v48  ;;  %v10167_v43 = vpop.f32.mrf.mxu1 }
 0x4fd   :  { %v4509_v22 = vsel %vm4278_vm3, %v4429_v40, 0.0  ;;  %v4434_v33 = vmul.f32 %v10167_v43, %v10167_v43  ;;  %v4322_v34 = vsel %vm4278_vm3, %v10167_v43, 0.0 }
 0x4fe   :  { %v4315_v26 = vadd.f32 %v4314_v21, %v4313_v5  ;;  %v4510_v20 = vadd.f32 %v4509_v22, %v4508_v35  ;;  %v10174_v23 = vpop.f32.mrf.mxu1 }
 0x4ff   :  { %v4432_v25 = vmul.f32 %v10174_v23, %v10174_v23  ;;  %v4318_v56 = vsel %vm4278_vm3, %v10174_v23, 0.0  ;;  %v4519_v54 = vsel %vm4278_vm3, %v4434_v33, 0.0 }
 0x500   :  { %v4512_v17 = vadd.f32 %v4511_v46, %v4510_v20  ;;  %v4317_v11 = vadd.f32 %v4316_v28, %v4315_v26  ;;  %v10181_v53 = vpop.f32.mrf.mxu1 }
 0x501   :  { %v4515_v18 = vsel %vm4278_vm3, %v4432_v25, 0.0  ;;  %v4435_v52 = vmul.f32 %v10181_v53, %v10181_v53  ;;  %v4324_v60 = vsel %vm4278_vm3, %v10181_v53, 0.0 }
 0x502   :  { %v4319_v62 = vadd.f32 %v4318_v56, %v4317_v11  ;;  %v4514_v2 = vadd.f32 %v4513_v19, %v4512_v17  ;;  %v10186_v16 = vpop.f32.mrf.mxu1 }
 0x503   :  { %v4320_v37 = vsel %vm4278_vm3, %v10186_v16, 0.0  ;;  %v4433_v50 = vmul.f32 %v10186_v16, %v10186_v16  ;;  %v4521_v6 = vsel %vm4278_vm3, %v4435_v52, 0.0 }
 0x504   :  { %v4516_v55 = vadd.f32 %v4515_v18, %v4514_v2  ;;  %v4321_v45 = vadd.f32 %v4320_v37, %v4319_v62  ;;  %v10195_v7 = vpop.f32.mrf.mxu1 }
 0x505   :  { %v4517_v12 = vsel %vm4278_vm3, %v4433_v50, 0.0  ;;  %v4438_v35 = vmul.f32 %v10195_v7, %v10195_v7  ;;  %v4330_v46 = vsel %vm4278_vm3, %v10195_v7, 0.0 }
 0x506   :  { %v4323_v15 = vadd.f32 %v4322_v34, %v4321_v45  ;;  %v4518_v8 = vadd.f32 %v4517_v12, %v4516_v55  ;;  %v10202_v13 = vpop.f32.mrf.mxu1 }
 0x507   :  { %v4436_v51 = vmul.f32 %v10202_v13, %v10202_v13  ;;  %v4326_v39 = vsel %vm4278_vm3, %v10202_v13, 0.0  ;;  %v4527_v56 = vsel %vm4278_vm3, %v4438_v35, 0.0 }
 0x508   :  { %v4520_v3 = vadd.f32 %v4519_v54, %v4518_v8  ;;  %v4325_v59 = vadd.f32 %v4324_v60, %v4323_v15  ;;  %v10209_v48 = vpop.f32.mrf.mxu1 }
 0x509   :  { %v4523_v5 = vsel %vm4278_vm3, %v4436_v51, 0.0  ;;  %v4439_v28 = vmul.f32 %v10209_v48, %v10209_v48  ;;  %v4332_v62 = vsel %vm4278_vm3, %v10209_v48, 0.0 }
 0x50a   :  { %v4327_v36 = vadd.f32 %v4326_v39, %v4325_v59  ;;  %v4522_v44 = vadd.f32 %v4521_v6, %v4520_v3  ;;  %v10214_v40 = vpop.f32.mrf.mxu1 }
 0x50b   :  { %v4328_v21 = vsel %vm4278_vm3, %v10214_v40, 0.0  ;;  %v4437_v41 = vmul.f32 %v10214_v40, %v10214_v40  ;;  %v4529_v50 = vsel %vm4278_vm3, %v4439_v28, 0.0 }
 0x50c   :  { %v4524_v22 = vadd.f32 %v4523_v5, %v4522_v44  ;;  %v4329_v26 = vadd.f32 %v4328_v21, %v4327_v36  ;;  %v10223_v20 = vpop.f32.mrf.mxu1 }
 0x50d   :  { %v4525_v25 = vsel %vm4278_vm3, %v4437_v41, 0.0  ;;  %v4442_v12 = vmul.f32 %v10223_v20, %v10223_v20  ;;  %v4338_v59 = vsel %vm4278_vm3, %v10223_v20, 0.0 }
 0x50e   :  { %v4331_v17 = vadd.f32 %v4330_v46, %v4329_v26  ;;  %v4526_v11 = vadd.f32 %v4525_v25, %v4524_v22  ;;  %v10230_v19 = vpop.f32.mrf.mxu1 }
 0x50f   :  { %v4440_v2 = vmul.f32 %v10230_v19, %v10230_v19  ;;  %v4334_v55 = vsel %vm4278_vm3, %v10230_v19, 0.0  ;;  %v4535_v5 = vsel %vm4278_vm3, %v4442_v12, 0.0 }
 0x510   :  { %v4528_v33 = vadd.f32 %v4527_v56, %v4526_v11  ;;  %v4333_v18 = vadd.f32 %v4332_v62, %v4331_v17  ;;  %v10237_v37 = vpop.f32.mrf.mxu1 }
 0x511   :  { %v4531_v15 = vsel %vm4278_vm3, %v4440_v2, 0.0  ;;  %v4443_v6 = vmul.f32 %v10237_v37, %v10237_v37  ;;  %v4340_v21 = vsel %vm4278_vm3, %v10237_v37, 0.0 }
 0x512   :  { %v4335_v45 = vadd.f32 %v4334_v55, %v4333_v18  ;;  %v4530_v34 = vadd.f32 %v4529_v50, %v4528_v33  ;;  %v10242_v52 = vpop.f32.mrf.mxu1 }
 0x513   :  { %v4336_v8 = vsel %vm4278_vm3, %v10242_v52, 0.0  ;;  %v4441_v54 = vmul.f32 %v10242_v52, %v10242_v52  ;;  %v4537_v28 = vsel %vm4278_vm3, %v4443_v6, 0.0 }
 0x514   :  { %v4532_v60 = vadd.f32 %v4531_v15, %v4530_v34  ;;  %v4337_v51 = vadd.f32 %v4336_v8, %v4335_v45  ;;  %v10251_v3 = vpop.f32.mrf.mxu1 }
 0x515   :  { %v4533_v39 = vsel %vm4278_vm3, %v4441_v54, 0.0  ;;  %v4446_v62 = vmul.f32 %v10251_v3, %v10251_v3  ;;  %v4346_v34 = vsel %vm4278_vm3, %v10251_v3, 0.0 }
 0x516   :  { %v4339_v36 = vadd.f32 %v4338_v59, %v4337_v51  ;;  %v4534_v44 = vadd.f32 %v4533_v39, %v4532_v60  ;;  %v10258_v35 = vpop.f32.mrf.mxu1 }
 0x517   :  { %v4444_v41 = vmul.f32 %v10258_v35, %v10258_v35  ;;  %v4342_v25 = vsel %vm4278_vm3, %v10258_v35, 0.0  ;;  %v4543_v51 = vsel %vm4278_vm3, %v4446_v62, 0.0 }
 0x518   :  { %v4536_v22 = vadd.f32 %v4535_v5, %v4534_v44  ;;  %v4341_v26 = vadd.f32 %v4340_v21, %v4339_v36  ;;  %v10265_v46 = vpop.f32.mrf.mxu1 }
 0x519   :  { %v4539_v2 = vsel %vm4278_vm3, %v4444_v41, 0.0  ;;  %v4447_v12 = vmul.f32 %v10265_v46, %v10265_v46  ;;  %v4348_v59 = vsel %vm4278_vm3, %v10265_v46, 0.0 }
 0x51a   :  { %v4343_v17 = vadd.f32 %v4342_v25, %v4341_v26  ;;  %v4538_v11 = vadd.f32 %v4537_v28, %v4536_v22  ;;  %v10270_v56 = vpop.f32.mrf.mxu1 }
 0x51b   :  { %v4344_v33 = vsel %vm4278_vm3, %v10270_v56, 0.0  ;;  %v4445_v18 = vmul.f32 %v10270_v56, %v10270_v56  ;;  %v4545_v5 = vsel %vm4278_vm3, %v4447_v12, 0.0 }
 0x51c   :  { %v4540_v50 = vadd.f32 %v4539_v2, %v4538_v11  ;;  %v4345_v55 = vadd.f32 %v4344_v33, %v4343_v17  ;;  %v10279_v45 = vpop.f32.mrf.mxu1 }
 0x51d   :  { %v4541_v15 = vsel %vm4278_vm3, %v4445_v18, 0.0  ;;  %v4450_v28 = vmul.f32 %v10279_v45, %v10279_v45  ;;  %v4354_v18 = vsel %vm4278_vm3, %v10279_v45, 0.0 }
 0x51e   :  { %v4347_v8 = vadd.f32 %v4346_v34, %v4345_v55  ;;  %v4542_v54 = vadd.f32 %v4541_v15, %v4540_v50  ;;  %v10286_v60 = vpop.f32.mrf.mxu1 }
 0x51f   :  { %v4448_v6 = vmul.f32 %v10286_v60, %v10286_v60  ;;  %v4350_v21 = vsel %vm4278_vm3, %v10286_v60, 0.0 }
 0x520   :  { %v4544_v39 = vadd.f32 %v4543_v51, %v4542_v54  ;;  %v4349_v36 = vadd.f32 %v4348_v59, %v4347_v8  ;;  %v10293_v44 = vpop.f32.mrf.mxu1  ;;  %v4551_v8 = vsel %vm4278_vm3, %v4450_v28, 0.0 }
 0x521   :  { %v4547_v25 = vsel %vm4278_vm3, %v4448_v6, 0.0  ;;  %v4451_v50 = vmul.f32 %v10293_v44, %v10293_v44  ;;  %v4356_v54 = vsel %vm4278_vm3, %v10293_v44, 0.0 }
 0x522   :  { %v4351_v41 = vadd.f32 %v4350_v21, %v4349_v36  ;;  %v4546_v22 = vadd.f32 %v4545_v5, %v4544_v39  ;;  %v10298_v26 = vpop.f32.mrf.mxu1 }
 0x523   :  { %v4352_v17 = vsel %vm4278_vm3, %v10298_v26, 0.0  ;;  %v4449_v11 = vmul.f32 %v10298_v26, %v10298_v26  ;;  %v4553_v36 = vsel %vm4278_vm3, %v4451_v50, 0.0 }
 0x524   :  { %v4548_v62 = vadd.f32 %v4547_v25, %v4546_v22  ;;  %v4353_v2 = vadd.f32 %v4352_v17, %v4351_v41  ;;  %v10307_v33 = vpop.f32.mrf.mxu1 }
 0x525   :  { %12245 = vst [vmem:[#allocation107_spill] sm:$0xff] %v10307_v33  ;;  %v4549_v55 = vsel %vm4278_vm3, %v4449_v11, 0.0  ;;  %v4454_v28 = vmul.f32 %v10307_v33, %v10307_v33  ;;  %v4362_v50 = vsel %vm4278_vm3, %v10307_v33, 0.0 }
 0x526   :  { %v4355_v34 = vadd.f32 %v4354_v18, %v4353_v2  ;;  %v4550_v12 = vadd.f32 %v4549_v55, %v4548_v62  ;;  %v10314_v15 = vpop.f32.mrf.mxu1 }
 0x527   :  { %12246 = vst [vmem:[#allocation108_spill] sm:$0xff] %v10314_v15  ;;  %v4452_v51 = vmul.f32 %v10314_v15, %v10314_v15  ;;  %v4358_v5 = vsel %vm4278_vm3, %v10314_v15, 0.0 }
 0x528   :  { %v4552_v59 = vadd.f32 %v4551_v8, %v4550_v12  ;;  %v4357_v6 = vadd.f32 %v4356_v54, %v4355_v34  ;;  %v10321_v39 = vpop.f32.mrf.mxu1 }
 0x529   :  { %12247 = vst [vmem:[#allocation8_spill] sm:$0xff] %v10321_v39  ;;  %v4555_v25 = vsel %vm4278_vm3, %v4452_v51, 0.0  ;;  %v4455_v55 = vmul.f32 %v10321_v39, %v10321_v39  ;;  %v4559_v51 = vsel %vm4278_vm3, %v4454_v28, 0.0 }
 0x52a   :  { %v4359_v21 = vadd.f32 %v4358_v5, %v4357_v6  ;;  %v4554_v41 = vadd.f32 %v4553_v36, %v4552_v59  ;;  %v10326_v22 = vpop.f32.mrf.mxu1  ;;  %v4364_v59 = vsel %vm4278_vm3, %v10321_v39, 0.0 }
 0x52b   :  { %12248 = vst [vmem:[#allocation78_spill] sm:$0xff] %v10326_v22  ;;  %v4360_v17 = vsel %vm4278_vm3, %v10326_v22, 0.0  ;;  %v4453_v11 = vmul.f32 %v10326_v22, %v10326_v22 }
 0x52c   :  { %v4556_v62 = vadd.f32 %v4555_v25, %v4554_v41  ;;  %v4361_v2 = vadd.f32 %v4360_v17, %v4359_v21  ;;  %v10335_v18 = vpop.f32.mrf.mxu1  ;;  %v4561_v41 = vsel %vm4278_vm3, %v4455_v55, 0.0 }
 0x52d   :  { %12249 = vst [vmem:[#allocation89_spill] sm:$0xff] %v10335_v18  ;;  %v4557_v34 = vsel %vm4278_vm3, %v4453_v11, 0.0  ;;  %v4458_v28 = vmul.f32 %v10335_v18, %v10335_v18 }
 0x52e   :  { %v4363_v12 = vadd.f32 %v4362_v50, %v4361_v2  ;;  %v4558_v8 = vadd.f32 %v4557_v34, %v4556_v62  ;;  %v10342_v54 = vpop.f32.mrf.mxu1 }
 0x52f   :  { %12250 = vst [vmem:[#allocation3_spill] sm:$0xff] %v10342_v54  ;;  %v4456_v6 = vmul.f32 %v10342_v54, %v10342_v54  ;;  %v4366_v25 = vsel %vm4278_vm3, %v10342_v54, 0.0 }
 0x530   :  { %v4560_v36 = vadd.f32 %v4559_v51, %v4558_v8  ;;  %v4365_v5 = vadd.f32 %v4364_v59, %v4363_v12  ;;  %v10349_v21 = vpop.f32.mrf.mxu1  ;;  %v4370_v51 = vsel %vm4278_vm3, %v10335_v18, 0.0 }
 0x531   :  { %12251 = vst [vmem:[#allocation9_spill] sm:$0xff] %v10349_v21  ;;  %v4563_v2 = vsel %vm4278_vm3, %v4456_v6, 0.0  ;;  %v4459_v59 = vmul.f32 %v10349_v21, %v10349_v21 }
 0x532   :  { %v4367_v17 = vadd.f32 %v4366_v25, %v4365_v5  ;;  %v4562_v11 = vadd.f32 %v4561_v41, %v4560_v36  ;;  %v10354_v62 = vpop.f32.mrf.mxu1  ;;  %v4567_v25 = vsel %vm4278_vm3, %v4458_v28, 0.0 }
 0x533   :  { %12252 = vst [vmem:[#allocation32_spill] sm:$0xff] %v10354_v62  ;;  %v4368_v50 = vsel %vm4278_vm3, %v10354_v62, 0.0  ;;  %v4457_v34 = vmul.f32 %v10354_v62, %v10354_v62  ;;  %v4569_v62 = vsel %vm4278_vm3, %v4459_v59, 0.0 }
 0x534   :  { %v4564_v12 = vadd.f32 %v4563_v2, %v4562_v11  ;;  %v4369_v55 = vadd.f32 %v4368_v50, %v4367_v17  ;;  %v10363_v8 = vpop.f32.mrf.mxu1  ;;  %v4372_v11 = vsel %vm4278_vm3, %v10349_v21, 0.0 }
 0x535   :  { %12253 = vst [vmem:[#allocation31_spill] sm:$0xff] %v10363_v8  ;;  %v4565_v36 = vsel %vm4278_vm3, %v4457_v34, 0.0  ;;  %v4462_v28 = vmul.f32 %v10363_v8, %v10363_v8 }
 0x536   :  { %v4371_v5 = vadd.f32 %v4370_v51, %v4369_v55  ;;  %v4566_v6 = vadd.f32 %v4565_v36, %v4564_v12  ;;  %v10370_v41 = vpop.f32.mrf.mxu1 }
 0x537   :  { %12254 = vst [vmem:[#allocation33_spill] sm:$0xff] %v10370_v41  ;;  %v4460_v17 = vmul.f32 %v10370_v41, %v10370_v41  ;;  %v4374_v34 = vsel %vm4278_vm3, %v10370_v41, 0.0  ;;  %v4575_v21 = vsel %vm4278_vm3, %v4462_v28, 0.0 }
 0x538   :  { %v4568_v2 = vadd.f32 %v4567_v25, %v4566_v6  ;;  %v4373_v50 = vadd.f32 %v4372_v11, %v4371_v5  ;;  %v10377_v18 = vpop.f32.mrf.mxu1 }
 0x539   :  { %12255 = vst [vmem:[#allocation10_spill] sm:$0xff] %v10377_v18  ;;  %v4571_v36 = vsel %vm4278_vm3, %v4460_v17, 0.0 }
 0x53a   :  { %v4375_v12 = vadd.f32 %v4374_v34, %v4373_v50  ;;  %v4570_v55 = vadd.f32 %v4569_v62, %v4568_v2  ;;  %v10382_v51 = vpop.f32.mrf.mxu1  ;;  %v4378_v62 = vsel %vm4278_vm3, %v10363_v8, 0.0  ;;  %v4463_v2 = vmul.f32 %v10377_v18, %v10377_v18 }
 0x53b   :  { %12256 = vst [vmem:[#allocation36_spill] sm:$0xff] %v10382_v51  ;;  %v4376_v6 = vsel %vm4278_vm3, %v10382_v51, 0.0  ;;  %v4461_v5 = vmul.f32 %v10382_v51, %v10382_v51 }
 0x53c   :  { %v4572_v25 = vadd.f32 %v4571_v36, %v4570_v55  ;;  %v4377_v59 = vadd.f32 %v4376_v6, %v4375_v12  ;;  %v10391_v11 = vpop.f32.mrf.mxu1  ;;  %v4380_v55 = vsel %vm4278_vm3, %v10377_v18, 0.0  ;;  %v4577_v51 = vsel %vm4278_vm3, %v4463_v2, 0.0 }
 0x53d   :  { %12257 = vst [vmem:[#allocation35_spill] sm:$0xff] %v10391_v11  ;;  %v4573_v50 = vsel %vm4278_vm3, %v4461_v5, 0.0  ;;  %v4466_v28 = vmul.f32 %v10391_v11, %v10391_v11 }
 0x53e   :  { %v4379_v34 = vadd.f32 %v4378_v62, %v4377_v59  ;;  %v4574_v17 = vadd.f32 %v4573_v50, %v4572_v25  ;;  %v10398_v41 = vpop.f32.mrf.mxu1 }
 0x53f   :  { %12258 = vst [vmem:[#allocation37_spill] sm:$0xff] %v10398_v41  ;;  %v4464_v12 = vmul.f32 %v10398_v41, %v10398_v41  ;;  %v4382_v5 = vsel %vm4278_vm3, %v10398_v41, 0.0  ;;  %v4583_v18 = vsel %vm4278_vm3, %v4466_v28, 0.0 }
 0x540   :  { %v4576_v36 = vadd.f32 %v4575_v21, %v4574_v17  ;;  %v4381_v6 = vadd.f32 %v4380_v55, %v4379_v34  ;;  %v10405_v8 = vpop.f32.mrf.mxu1 }
 0x541   :  { %12259 = vst [vmem:[#allocation43_spill] sm:$0xff] %v10405_v8  ;;  %v4579_v50 = vsel %vm4278_vm3, %v4464_v12, 0.0 }
 0x542   :  { %v4383_v25 = vadd.f32 %v4382_v5, %v4381_v6  ;;  %v4578_v59 = vadd.f32 %v4577_v51, %v4576_v36  ;;  %v10410_v62 = vpop.f32.mrf.mxu1  ;;  %v4386_v51 = vsel %vm4278_vm3, %v10391_v11, 0.0  ;;  %v4467_v36 = vmul.f32 %v10405_v8, %v10405_v8 }
 0x543   :  { %12260 = vst [vmem:[#allocation41_spill] sm:$0xff] %v10410_v62  ;;  %v4384_v21 = vsel %vm4278_vm3, %v10410_v62, 0.0  ;;  %v4465_v34 = vmul.f32 %v10410_v62, %v10410_v62 }
 0x544   :  { %v4580_v17 = vadd.f32 %v4579_v50, %v4578_v59  ;;  %v4385_v2 = vadd.f32 %v4384_v21, %v4383_v25  ;;  %v10419_v55 = vpop.f32.mrf.mxu1  ;;  %v4388_v59 = vsel %vm4278_vm3, %v10405_v8, 0.0  ;;  %v4585_v62 = vsel %vm4278_vm3, %v4467_v36, 0.0 }
 0x545   :  { %12261 = vst [vmem:[#allocation45_spill] sm:$0xff] %v10419_v55  ;;  %v4581_v6 = vsel %vm4278_vm3, %v4465_v34, 0.0  ;;  %v4470_v28 = vmul.f32 %v10419_v55, %v10419_v55 }
 0x546   :  { %v4387_v5 = vadd.f32 %v4386_v51, %v4385_v2  ;;  %v4582_v12 = vadd.f32 %v4581_v6, %v4580_v17  ;;  %v10426_v41 = vpop.f32.mrf.mxu1 }
 0x547   :  { %12262 = vst [vmem:[#allocation54_spill] sm:$0xff] %v10426_v41  ;;  %v4468_v25 = vmul.f32 %v10426_v41, %v10426_v41  ;;  %v4390_v34 = vsel %vm4278_vm3, %v10426_v41, 0.0  ;;  %v4591_v8 = vsel %vm4278_vm3, %v4470_v28, 0.0 }
 0x548   :  { %v4584_v50 = vadd.f32 %v4583_v18, %v4582_v12  ;;  %v4389_v21 = vadd.f32 %v4388_v59, %v4387_v5  ;;  %v10433_v11 = vpop.f32.mrf.mxu1 }
 0x549   :  { %12263 = vst [vmem:[#allocation51_spill] sm:$0xff] %v10433_v11  ;;  %v4587_v6 = vsel %vm4278_vm3, %v4468_v25, 0.0 }
 0x54a   :  { %v4391_v17 = vadd.f32 %v4390_v34, %v4389_v21  ;;  %v4586_v2 = vadd.f32 %v4585_v62, %v4584_v50  ;;  %v10438_v51 = vpop.f32.mrf.mxu1  ;;  %v4394_v62 = vsel %vm4278_vm3, %v10419_v55, 0.0  ;;  %v4471_v50 = vmul.f32 %v10433_v11, %v10433_v11 }
 0x54b   :  { %12264 = vst [vmem:[#allocation57_spill] sm:$0xff] %v10438_v51  ;;  %v4392_v18 = vsel %vm4278_vm3, %v10438_v51, 0.0  ;;  %v4469_v5 = vmul.f32 %v10438_v51, %v10438_v51 }
 0x54c   :  { %v4588_v12 = vadd.f32 %v4587_v6, %v4586_v2  ;;  %v4393_v36 = vadd.f32 %v4392_v18, %v4391_v17  ;;  %v10447_v59 = vpop.f32.mrf.mxu1  ;;  %v4396_v2 = vsel %vm4278_vm3, %v10433_v11, 0.0  ;;  %v4593_v51 = vsel %vm4278_vm3, %v4471_v50, 0.0 }
 0x54d   :  { %12265 = vst [vmem:[#allocation102_spill] sm:$0xff] %v10447_v59  ;;  %v4589_v21 = vsel %vm4278_vm3, %v4469_v5, 0.0  ;;  %v4474_v28 = vmul.f32 %v10447_v59, %v10447_v59 }
 0x54e   :  { %v4395_v34 = vadd.f32 %v4394_v62, %v4393_v36  ;;  %v4590_v25 = vadd.f32 %v4589_v21, %v4588_v12  ;;  %v10454_v41 = vpop.f32.mrf.mxu1 }
 0x54f   :  { %12266 = vst [vmem:[#allocation79_spill] sm:$0xff] %v10454_v41  ;;  %v4472_v17 = vmul.f32 %v10454_v41, %v10454_v41  ;;  %v4398_v5 = vsel %vm4278_vm3, %v10454_v41, 0.0 }
 0x550   :  { %v4592_v6 = vadd.f32 %v4591_v8, %v4590_v25  ;;  %v4397_v18 = vadd.f32 %v4396_v2, %v4395_v34  ;;  %v10461_v55 = vpop.f32.mrf.mxu1  ;;  %v4402_v2 = vsel %vm4278_vm3, %v10447_v59, 0.0 }
 0x551   :  { %12267 = vst [vmem:[#allocation95_spill] sm:$0xff] %v10461_v55  ;;  %v4595_v21 = vsel %vm4278_vm3, %v4472_v17, 0.0  ;;  %v4599_v17 = vsel %vm4278_vm3, %v4474_v28, 0.0  ;;  %v4404_v41 = vsel %vm4278_vm3, %v10461_v55, 0.0 }
 0x552   :  { %v4399_v12 = vadd.f32 %v4398_v5, %v4397_v18  ;;  %v4594_v36 = vadd.f32 %v4593_v51, %v4592_v6  ;;  %v10466_v62 = vpop.f32.mrf.mxu1  ;;  %v4475_v51 = vmul.f32 %v10461_v55, %v10461_v55 }
 0x553   :  { %12268 = vst [vmem:[#allocation11_spill] sm:$0xff] %v10466_v62  ;;  %v4400_v8 = vsel %vm4278_vm3, %v10466_v62, 0.0  ;;  %v4473_v34 = vmul.f32 %v10466_v62, %v10466_v62 }
 0x554   :  { %v4596_v25 = vadd.f32 %v4595_v21, %v4594_v36  ;;  %v4401_v50 = vadd.f32 %v4400_v8, %v4399_v12  ;;  %v4601_v36 = vsel %vm4278_vm3, %v4475_v51, 0.0 }
 0x555   :  { %v4597_v6 = vsel %vm4278_vm3, %v4473_v34, 0.0 }
 0x556   :  { %v4403_v18 = vadd.f32 %v4402_v2, %v4401_v50  ;;  %v4598_v5 = vadd.f32 %v4597_v6, %v4596_v25 }
 0x558   :  { %v4405_v11 = vadd.f32 %v4404_v41, %v4403_v18  ;;  %v4600_v54 = vadd.f32 %v4599_v17, %v4598_v5 }
 0x55a   :  { %v4406_v12 = vrot.slane %v4405_v11, 4  ;;  %v4602_v21 = vadd.f32 %v4601_v36, %v4600_v54  ;;  %v4276_v54 = vld [vmem:[%s11539_s12] sm:$0x1] }
 0x55c   :  { %v4407_v8 = vadd.f32 %v4406_v12, %v4405_v11  ;;  %v4603_v59 = vrot.slane %v4602_v21, 4  ;;  %v12270_v12 = vld [vmem:[#allocation108_spill] sm:$0xff] }
 0x55e   :  { %v4408_v62 = vrot.slane %v4407_v8, 2  ;;  %v4604_v39 = vadd.f32 %v4603_v59, %v4602_v21  ;;  %v10490_v59 = vld [vmem:[%s11540_s13] sm:$0x1] }
 0x55f   :  { %v12271_v21 = vld [vmem:[#allocation78_spill] sm:$0xff] }
 0x560   :  { %v4409_v33 = vadd.f32 %v4408_v62, %v4407_v8  ;;  %v4605_v22 = vrot.slane %v4604_v39, 2  ;;  %v12272_v8 = vld [vmem:[#allocation107_spill] sm:$0xff] }
 0x562   :  { %v4410_v34 = vrot.slane %v4409_v33, 1  ;;  %v4606_v50 = vadd.f32 %v4605_v22, %v4604_v39  ;;  %v12269_v39 = vld [vmem:[#allocation47_spill] sm:$0xff] }
 0x564   :  { %v4411_v25 = vadd.f32 %v4410_v34, %v4409_v33  ;;  %v4607_v2 = vrot.slane %v4606_v50, 1  ;;  %v12273_v34 = vld [vmem:[#allocation8_spill] sm:$0xff] }
 0x566   :  { %v4608_v28 = vadd.f32 %v4607_v2, %v4606_v50  ;;  %v4609_v6 = vmul.f32 0.001953125, %v4411_v25  ;;  %v12274_v50 = vld [vmem:[#allocation3_spill] sm:$0xff]  ;;  %v12275_v25 = vld [vmem:[#allocation32_spill] sm:$0xff] }
 0x568   :  { %v4610_v15 = vmul.f32 0.001953125, %v4608_v28  ;;  %v4611_v55 = vmul.f32 %v4609_v6, %v4609_v6  ;;  %v12276_v28 = vld [vmem:[#allocation89_spill] sm:$0xff] }
 0x56a   :  { %v4612_v41 = vsub.f32 %v4610_v15, %v4611_v55 }
 0x56c   :  { %v4613_v18 = vadd.f32 1e-05, %v4612_v41  ;;  %v12277_v41 = vld [vmem:[#allocation9_spill] sm:$0xff] }
 0x56e   :  { %6104 = vrsqrt.f32 %v4613_v18 }
 0x57b   :  { %v6105_v11 = vpop.eup %6104 }
 0x57c   :  { %v4615_v51 = vmul.f32 %v6105_v11, %v4276_v54  ;;  %v12278_v54 = vld [vmem:[#allocation33_spill] sm:$0xff] }
 0x57e   :  { %v10492_v33 = vmul.f32 %v4615_v51, %v4609_v6  ;;  %v10495_v22 = vrot.slane %v4615_v51, %v12269_v39  ;;  %v12279_v51 = vld [vmem:[#allocation36_spill] sm:$0xff] }
 0x580   :  { %v4617_v15 = vsub.f32 %v10490_v59, %v10492_v33  ;;  %v10501_v55 = vmul.f32 %v10495_v22, %v10038_v61  ;;  %v10505_v62 = vmul.f32 %v10495_v22, %v10044_v29  ;;  %v10509_v5 = vmul.f32 %v10036_v57, %v10495_v22  ;;  %v12280_v33 = vld [vmem:[#allocation31_spill] sm:$0xff] }
 0x581   :  { %v10513_v17 = vmul.f32 %v10040_v49, %v10495_v22  ;;  %v10517_v36 = vmul.f32 %v10495_v22, %v10062_v27  ;;  %v10521_v61 = vmul.f32 %v10495_v22, %v10074_v9  ;;  %v10525_v29 = vmul.f32 %v10054_v63, %v10495_v22 }
 0x582   :  { %v10529_v57 = vmul.f32 %v10069_v4, %v10495_v22  ;;  %v10533_v49 = vmul.f32 %v10495_v22, %v10090_v1  ;;  %v10537_v27 = vmul.f32 %v10495_v22, %v10102_v32  ;;  %v10541_v9 = vmul.f32 %v10083_v0, %v10495_v22 }
 0x583   :  { %v10545_v63 = vmul.f32 %v10097_v47, %v10495_v22  ;;  %v10549_v4 = vmul.f32 %v10495_v22, %v10118_v24  ;;  %v10553_v1 = vmul.f32 %v10495_v22, %v10130_v58  ;;  %v10557_v32 = vmul.f32 %v10111_v38, %v10495_v22 }
 0x584   :  { %v10561_v0 = vmul.f32 %v10125_v10, %v10495_v22  ;;  %v10565_v47 = vmul.f32 %v10495_v22, %v10146_v14  ;;  %v10569_v24 = vmul.f32 %v10495_v22, %v10158_v42  ;;  %v10573_v58 = vmul.f32 %v10139_v30, %v10495_v22 }
 0x585   :  { %v10577_v38 = vmul.f32 %v10153_v31, %v10495_v22  ;;  %v10581_v10 = vmul.f32 %v10495_v22, %v10174_v23  ;;  %v10585_v14 = vmul.f32 %v10495_v22, %v10186_v16  ;;  %v10589_v42 = vmul.f32 %v10167_v43, %v10495_v22 }
 0x586   :  { %v10593_v30 = vmul.f32 %v10181_v53, %v10495_v22  ;;  %v10597_v31 = vmul.f32 %v10495_v22, %v10202_v13  ;;  %v10601_v23 = vmul.f32 %v10495_v22, %v10214_v40  ;;  %v10605_v16 = vmul.f32 %v10195_v7, %v10495_v22 }
 0x587   :  { %v10609_v43 = vmul.f32 %v10209_v48, %v10495_v22  ;;  %v10613_v53 = vmul.f32 %v10495_v22, %v10230_v19  ;;  %v10617_v13 = vmul.f32 %v10495_v22, %v10242_v52  ;;  %v10621_v40 = vmul.f32 %v10223_v20, %v10495_v22 }
 0x588   :  { %v10625_v7 = vmul.f32 %v10237_v37, %v10495_v22  ;;  %v10629_v48 = vmul.f32 %v10495_v22, %v10258_v35  ;;  %v10633_v19 = vmul.f32 %v10495_v22, %v10270_v56  ;;  %v10637_v52 = vmul.f32 %v10251_v3, %v10495_v22 }
 0x589   :  { %v10641_v20 = vmul.f32 %v10265_v46, %v10495_v22  ;;  %v10645_v37 = vmul.f32 %v10495_v22, %v10286_v60  ;;  %v10649_v35 = vmul.f32 %v10495_v22, %v10298_v26  ;;  %v10653_v56 = vmul.f32 %v10279_v45, %v10495_v22 }
 0x58a   :  { %v10657_v3 = vmul.f32 %v10293_v44, %v10495_v22  ;;  %v10661_v46 = vmul.f32 %v10495_v22, %v12270_v12  ;;  %v10665_v60 = vmul.f32 %v10495_v22, %v12271_v21  ;;  %v10669_v26 = vmul.f32 %v12272_v8, %v10495_v22  ;;  %v12282_v21 = vld [vmem:[#allocation10_spill] sm:$0xff] }
 0x58b   :  { %v10673_v45 = vmul.f32 %v12273_v34, %v10495_v22  ;;  %v10677_v44 = vmul.f32 %v10495_v22, %v12274_v50  ;;  %v10681_v2 = vmul.f32 %v10495_v22, %v12275_v25  ;;  %v10685_v6 = vmul.f32 %v12276_v28, %v10495_v22  ;;  %v12284_v34 = vld [vmem:[#allocation37_spill] sm:$0xff] }
 0x58c   :  { %v10689_v18 = vmul.f32 %v12277_v41, %v10495_v22  ;;  %v10693_v11 = vmul.f32 %v10495_v22, %v12278_v54  ;;  %v10697_v59 = vmul.f32 %v10495_v22, %v12279_v51  ;;  %v10701_v12 = vmul.f32 %v12280_v33, %v10495_v22  ;;  %v12286_v25 = vld [vmem:[#allocation41_spill] sm:$0xff]  ;;  %v12288_v41 = vld [vmem:[#allocation35_spill] sm:$0xff] }
 0x58d   :  { %v10705_v8 = vmul.f32 %v12282_v21, %v10495_v22  ;;  %v10709_v50 = vmul.f32 %v10495_v22, %v12284_v34  ;;  %v10713_v28 = vmul.f32 %v10495_v22, %v12286_v25  ;;  %v10717_v54 = vmul.f32 %v12288_v41, %v10495_v22  ;;  %v12290_v51 = vld [vmem:[#allocation43_spill] sm:$0xff] }
 0x58e   :  { %12281 = vst [vmem:[#allocation12_spill] sm:$0xff] %v10701_v12  ;;  %v10721_v33 = vmul.f32 %v12290_v51, %v10495_v22  ;;  %v12292_v12 = vld [vmem:[#allocation54_spill] sm:$0xff]  ;;  %v12299_v51 = vld [vmem:[#allocation79_spill] sm:$0xff] }
 0x58f   :  { %12283 = vst [vmem:[#allocation13_spill] sm:$0xff] %v10705_v8  ;;  %12285 = vst [vmem:[#allocation14_spill] sm:$0xff] %v10709_v50  ;;  %v10725_v21 = vmul.f32 %v10495_v22, %v12292_v12  ;;  %v12294_v8 = vld [vmem:[#allocation57_spill] sm:$0xff]  ;;  %v12300_v12 = vld [vmem:[#allocation11_spill] sm:$0xff] }
 0x590   :  { %12287 = vst [vmem:[#allocation60_spill] sm:$0xff] %v10713_v28  ;;  %12289 = vst [vmem:[#allocation81_spill] sm:$0xff] %v10717_v54  ;;  %v10729_v34 = vmul.f32 %v10495_v22, %v12294_v8  ;;  %v12296_v50 = vld [vmem:[#allocation45_spill] sm:$0xff]  ;;  %v12298_v28 = vld [vmem:[#allocation51_spill] sm:$0xff]  ;;  %v10740_v54 = vrot.slane %v4617_v15, %v12269_v39 }
 0x591   :  { %12291 = vst [vmem:[#allocation63_spill] sm:$0xff] %v10721_v33  ;;  %12293 = vst [vmem:[#allocation82_spill] sm:$0xff] %v10725_v21  ;;  %v10733_v25 = vmul.f32 %v12296_v50, %v10495_v22  ;;  %v10737_v41 = vmul.f32 %v12298_v28, %v10495_v22  ;;  %v10744_v33 = vmul.f32 %v10495_v22, %v12299_v51  ;;  %v12301_v8 = vld [vmem:[#allocation102_spill] sm:$0xff]  ;;  %v12302_v50 = vld [vmem:[#allocation95_spill] sm:$0xff] }
 0x592   :  { %12295 = vst [vmem:[#allocation83_spill] sm:$0xff] %v10729_v34  ;;  %v10748_v21 = vmul.f32 %v10495_v22, %v12300_v12  ;;  %v10752_v34 = vmul.f32 %v12301_v8, %v10495_v22  ;;  %v10760_v39 = vadd.f32 %v10740_v54, %v10501_v55  ;;  %v10764_v15 = vadd.f32 %v10740_v54, %v10505_v62 }
 0x593   :  { %12297 = vst [vmem:[#allocation59_spill] sm:$0xff] %v10733_v25  ;;  %v10756_v25 = vmul.f32 %v12302_v50, %v10495_v22  ;;  %v10768_v28 = vadd.f32 %v10740_v54, %v10509_v5  ;;  %v10772_v51 = vadd.f32 %v10740_v54, %v10513_v17  ;;  %v10776_v22 = vadd.f32 %v10740_v54, %v10517_v36 }
 0x594   :  { %v10780_v55 = vadd.f32 %v10740_v54, %v10521_v61  ;;  %v10784_v62 = vadd.f32 %v10740_v54, %v10525_v29  ;;  %v10788_v5 = vadd.f32 %v10740_v54, %v10529_v57  ;;  %v10792_v17 = vadd.f32 %v10740_v54, %v10533_v49 }
 0x595   :  { %v10796_v36 = vadd.f32 %v10740_v54, %v10537_v27  ;;  %v10800_v61 = vadd.f32 %v10740_v54, %v10541_v9  ;;  %v10804_v29 = vadd.f32 %v10740_v54, %v10545_v63  ;;  %v10808_v57 = vadd.f32 %v10740_v54, %v10549_v4  ;;  %v12311_v12 = vld [vmem:[#allocation12_spill] sm:$0xff] }
 0x596   :  { %v10812_v49 = vadd.f32 %v10740_v54, %v10553_v1  ;;  %v10816_v27 = vadd.f32 %v10740_v54, %v10557_v32  ;;  %v10820_v9 = vadd.f32 %v10740_v54, %v10561_v0  ;;  %v10824_v63 = vadd.f32 %v10740_v54, %v10565_v47  ;;  %v12313_v8 = vld [vmem:[#allocation13_spill] sm:$0xff]  ;;  %v12315_v50 = vld [vmem:[#allocation14_spill] sm:$0xff] }
 0x597   :  { %v10828_v4 = vadd.f32 %v10740_v54, %v10569_v24  ;;  %v10832_v1 = vadd.f32 %v10740_v54, %v10573_v58  ;;  %v10836_v32 = vadd.f32 %v10740_v54, %v10577_v38  ;;  %v10840_v0 = vadd.f32 %v10740_v54, %v10581_v10 }
 0x598   :  { %v10844_v47 = vadd.f32 %v10740_v54, %v10585_v14  ;;  %v10848_v24 = vadd.f32 %v10740_v54, %v10589_v42  ;;  %v10852_v58 = vadd.f32 %v10740_v54, %v10593_v30  ;;  %v10856_v38 = vadd.f32 %v10740_v54, %v10597_v31 }
 0x599   :  { %v10860_v10 = vadd.f32 %v10740_v54, %v10601_v23  ;;  %v10864_v14 = vadd.f32 %v10740_v54, %v10605_v16  ;;  %v10868_v42 = vadd.f32 %v10740_v54, %v10609_v43  ;;  %v10872_v30 = vadd.f32 %v10740_v54, %v10613_v53 }
 0x59a   :  { %v10876_v31 = vadd.f32 %v10740_v54, %v10617_v13  ;;  %v10880_v23 = vadd.f32 %v10740_v54, %v10621_v40  ;;  %v10884_v16 = vadd.f32 %v10740_v54, %v10625_v7  ;;  %v10888_v43 = vadd.f32 %v10740_v54, %v10629_v48 }
 0x59b   :  { %v10892_v53 = vadd.f32 %v10740_v54, %v10633_v19  ;;  %v10896_v13 = vadd.f32 %v10740_v54, %v10637_v52  ;;  %v10900_v40 = vadd.f32 %v10740_v54, %v10641_v20  ;;  %v10904_v7 = vadd.f32 %v10740_v54, %v10645_v37 }
 0x59c   :  { %v10908_v48 = vadd.f32 %v10740_v54, %v10649_v35  ;;  %v10912_v19 = vadd.f32 %v10740_v54, %v10653_v56  ;;  %v10916_v52 = vadd.f32 %v10740_v54, %v10657_v3  ;;  %v10920_v20 = vadd.f32 %v10740_v54, %v10661_v46 }
 0x59d   :  { %v10924_v37 = vadd.f32 %v10740_v54, %v10665_v60  ;;  %v10928_v35 = vadd.f32 %v10740_v54, %v10669_v26  ;;  %v10932_v56 = vadd.f32 %v10740_v54, %v10673_v45  ;;  %v10936_v3 = vadd.f32 %v10740_v54, %v10677_v44 }
 0x59e   :  { %12303 = vst [vmem:[#allocation84_spill] sm:$0xff] %v10908_v48  ;;  %12304 = vst [vmem:[#allocation85_spill] sm:$0xff] %v10912_v19  ;;  %v10940_v46 = vadd.f32 %v10740_v54, %v10681_v2  ;;  %v10944_v60 = vadd.f32 %v10740_v54, %v10685_v6  ;;  %v10948_v26 = vadd.f32 %v10740_v54, %v10689_v18 }
 0x59f   :  { %12305 = vst [vmem:[#allocation86_spill] sm:$0xff] %v10916_v52  ;;  %12306 = vst [vmem:[#allocation66_spill] sm:$0xff] %v10920_v20  ;;  %v10952_v45 = vadd.f32 %v10740_v54, %v10693_v11  ;;  %v10956_v44 = vadd.f32 %v10740_v54, %v10697_v59  ;;  %v10960_v2 = vadd.f32 %v10740_v54, %v12311_v12 }
 0x5a0   :  { %12307 = vst [vmem:[#allocation87_spill] sm:$0xff] %v10924_v37  ;;  %12308 = vst [vmem:[#allocation65_spill] sm:$0xff] %v10948_v26  ;;  %v10964_v6 = vadd.f32 %v10740_v54, %v12313_v8  ;;  %v10968_v18 = vadd.f32 %v10740_v54, %v12315_v50  ;;  %v12317_v26 = vld [vmem:[#allocation60_spill] sm:$0xff] }
 0x5a1   :  { %12309 = vst [vmem:[#allocation90_spill] sm:$0xff] %v10952_v45  ;;  %12310 = vst [vmem:[#allocation91_spill] sm:$0xff] %v10956_v44  ;;  %v10972_v11 = vadd.f32 %v10740_v54, %v12317_v26  ;;  %v12318_v45 = vld [vmem:[#allocation81_spill] sm:$0xff]  ;;  %v12319_v44 = vld [vmem:[#allocation63_spill] sm:$0xff] }
 0x5a2   :  { %12312 = vst [vmem:[#allocation62_spill] sm:$0xff] %v10960_v2  ;;  %12314 = vst [vmem:[#allocation92_spill] sm:$0xff] %v10964_v6  ;;  %v10976_v59 = vadd.f32 %v10740_v54, %v12318_v45  ;;  %v10980_v12 = vadd.f32 %v10740_v54, %v12319_v44  ;;  %v12320_v2 = vld [vmem:[#allocation82_spill] sm:$0xff]  ;;  %v12321_v6 = vld [vmem:[#allocation83_spill] sm:$0xff]  ;;  %v10996_v45 = vadd.f32 %v10740_v54, %v10737_v41 }
 0x5a3   :  { %12316 = vst [vmem:[#allocation69_spill] sm:$0xff] %v10968_v18  ;;  %v10984_v8 = vadd.f32 %v10740_v54, %v12320_v2  ;;  %v10988_v50 = vadd.f32 %v10740_v54, %v12321_v6  ;;  %v12322_v18 = vld [vmem:[#allocation59_spill] sm:$0xff]  ;;  %v11000_v44 = vadd.f32 %v10740_v54, %v10744_v33  ;;  %v11004_v2 = vadd.f32 %v10740_v54, %v10748_v21 }
 0x5a4   :  { %v10992_v26 = vadd.f32 %v10740_v54, %v12322_v18  ;;  %12324 = vst [vmem:[#allocation67_spill] sm:$0xff] %v10996_v45  ;;  %v11008_v6 = vadd.f32 %v10740_v54, %v10752_v34  ;;  %v11012_v18 = vadd.f32 %v10740_v54, %v10756_v25  ;;  %v12335_v48 = vmov %v10996_v45 }
 0x5a5   :  { %12325 = vst [vmem:[#allocation73_spill] sm:$0xff] %v11000_v44  ;;  %12326 = vst [vmem:[#allocation71_spill] sm:$0xff] %v11004_v2  ;;  %v12336_v19 = vmov %v11000_v44  ;;  %v12337_v52 = vmov %v11004_v2  ;;  %v12339_v44 = vmax.f32 %v10760_v39, 0.0  ;;  %v12340_v2 = vmax.f32 %v10764_v15, 0.0 }
 0x5a6   :  { %12323 = vst [vmem:[#allocation4_spill] sm:$0xff] %v10992_v26  ;;  %12327 = vst [vmem:[#allocation15_spill] sm:$0xff] %v11008_v6  ;;  %v12338_v20 = vmov %v11008_v6  ;;  %v12341_v6 = vmax.f32 %v10768_v28, 0.0  ;;  %v12342_v25 = vmax.f32 %v10772_v51, 0.0  ;;  %v12343_v45 = vmax.f32 %v10776_v22, 0.0 }
 0x5a7   :  { %v5582_v21 = vpack.c.bf16 %v12339_v44, %v12339_v44  ;;  %v5583_v34 = vpack.c.bf16 %v12340_v2, %v12340_v2  ;;  %v12344_v39 = vmax.f32 %v10780_v55, 0.0  ;;  %v12345_v15 = vmax.f32 %v10784_v62, 0.0 }
 0x5a8   :  { %v5584_v54 = vpack.c.bf16 %v12341_v6, %v12341_v6  ;;  %v5585_v41 = vpack.c.bf16 %v12342_v25, %v12342_v25  ;;  %v5586_v33 = vpack.c.bf16 %v12343_v45, %v12343_v45  ;;  %v12346_v28 = vmax.f32 %v10788_v5, 0.0 }
 0x5a9   :  { %v5587_v44 = vpack.c.bf16 %v12344_v39, %v12344_v39  ;;  %v5588_v2 = vpack.c.bf16 %v12345_v15, %v12345_v15  ;;  %v12347_v51 = vmax.f32 %v10792_v17, 0.0  ;;  %v12348_v22 = vmax.f32 %v10796_v36, 0.0  ;;  %5079 = vst.msk [vmem:[%s11541_s15] sm:$0xf] %vm5078_vm4, %v5582_v21  ;;  %5080 = vst.msk [vmem:[%s11541_s15 + $0x4] sm:$0xf] %vm5078_vm4, %v5583_v34 }
 0x5aa   :  { %v12333_v37 = vld [vmem:[#allocation69_spill] sm:$0xff]  ;;  %v5589_v6 = vpack.c.bf16 %v12346_v28, %v12346_v28  ;;  %v12349_v55 = vmax.f32 %v10800_v61, 0.0  ;;  %v12350_v62 = vmax.f32 %v10804_v29, 0.0  ;;  %5081 = vst.msk [vmem:[%s11541_s15 + $0x8] sm:$0xf] %vm5078_vm4, %v5584_v54  ;;  %v12351_v5 = vmax.f32 %v10808_v57, 0.0 }
 0x5ab   :  { %v5590_v25 = vpack.c.bf16 %v12347_v51, %v12347_v51  ;;  %v5591_v45 = vpack.c.bf16 %v12348_v22, %v12348_v22  ;;  %5082 = vst.msk [vmem:[%s11541_s15 + $0xc] sm:$0xf] %vm5078_vm4, %v5585_v41  ;;  %v12352_v36 = vmax.f32 %v10812_v49, 0.0  ;;  %v12353_v29 = vmax.f32 %v10816_v27, 0.0  ;;  %5083 = vst.msk [vmem:[%s11541_s15 + $0x10] sm:$0xf] %vm5078_vm4, %v5586_v33 }
 0x5ac   :  { %v5592_v39 = vpack.c.bf16 %v12349_v55, %v12349_v55  ;;  %v5593_v15 = vpack.c.bf16 %v12350_v62, %v12350_v62  ;;  %v5594_v17 = vpack.c.bf16 %v12351_v5, %v12351_v5  ;;  %v12354_v34 = vmax.f32 %v10820_v9, 0.0  ;;  %5084 = vst.msk [vmem:[%s11541_s15 + $0x14] sm:$0xf] %vm5078_vm4, %v5587_v44  ;;  %5085 = vst.msk [vmem:[%s11541_s15 + $0x18] sm:$0xf] %vm5078_vm4, %v5588_v2 }
 0x5ad   :  { %v12334_v26 = vld [vmem:[#allocation4_spill] sm:$0xff]  ;;  %v5595_v61 = vpack.c.bf16 %v12352_v36, %v12352_v36  ;;  %v5596_v21 = vpack.c.bf16 %v12353_v29, %v12353_v29  ;;  %5086 = vst.msk [vmem:[%s11541_s15 + $0x1c] sm:$0xf] %vm5078_vm4, %v5589_v6  ;;  %v12355_v57 = vmax.f32 %v10824_v63, 0.0  ;;  %v12356_v27 = vmax.f32 %v10828_v4, 0.0 }
 0x5ae   :  { %v5597_v54 = vpack.c.bf16 %v12354_v34, %v12354_v34  ;;  %v12357_v41 = vmax.f32 %v10832_v1, 0.0  ;;  %v12358_v44 = vmax.f32 %v10836_v32, 0.0  ;;  %5087 = vst.msk [vmem:[%s11541_s15 + $0x20] sm:$0xf] %vm5078_vm4, %v5590_v25  ;;  %5088 = vst.msk [vmem:[%s11541_s15 + $0x24] sm:$0xf] %vm5078_vm4, %v5591_v45 }
 0x5af   :  { %v5598_v49 = vpack.c.bf16 %v12355_v57, %v12355_v57  ;;  %v5599_v9 = vpack.c.bf16 %v12356_v27, %v12356_v27  ;;  %5089 = vst.msk [vmem:[%s11541_s15 + $0x28] sm:$0xf] %vm5078_vm4, %v5592_v39  ;;  %5090 = vst.msk [vmem:[%s11541_s15 + $0x2c] sm:$0xf] %vm5078_vm4, %v5593_v15  ;;  %v12359_v63 = vmax.f32 %v10840_v0, 0.0  ;;  %v12360_v1 = vmax.f32 %v10844_v47, 0.0 }
 0x5b0   :  { %v5600_v33 = vpack.c.bf16 %v12357_v41, %v12357_v41  ;;  %v5601_v2 = vpack.c.bf16 %v12358_v44, %v12358_v44  ;;  %v12361_v28 = vmax.f32 %v10848_v24, 0.0  ;;  %v12362_v51 = vmax.f32 %v10852_v58, 0.0  ;;  %5091 = vst.msk [vmem:[%s11541_s15 + $0x30] sm:$0xf] %vm5078_vm4, %v5594_v17  ;;  %5092 = vst.msk [vmem:[%s11541_s15 + $0x34] sm:$0xf] %vm5078_vm4, %v5595_v61 }
 0x5b1   :  { %v5602_v4 = vpack.c.bf16 %v12359_v63, %v12359_v63  ;;  %v5603_v32 = vpack.c.bf16 %v12360_v1, %v12360_v1  ;;  %5093 = vst.msk [vmem:[%s11541_s15 + $0x38] sm:$0xf] %vm5078_vm4, %v5596_v21  ;;  %5094 = vst.msk [vmem:[%s11541_s15 + $0x3c] sm:$0xf] %vm5078_vm4, %v5597_v54  ;;  %v12363_v0 = vmax.f32 %v10856_v38, 0.0  ;;  %v12364_v24 = vmax.f32 %v10860_v10, 0.0 }
 0x5b2   :  { %v5604_v6 = vpack.c.bf16 %v12361_v28, %v12361_v28  ;;  %v5605_v25 = vpack.c.bf16 %v12362_v51, %v12362_v51  ;;  %v12365_v22 = vmax.f32 %v10864_v14, 0.0  ;;  %v12366_v55 = vmax.f32 %v10868_v42, 0.0  ;;  %5095 = vst.msk [vmem:[%s11541_s15 + $0x40] sm:$0xf] %vm5078_vm4, %v5598_v49  ;;  %5096 = vst.msk [vmem:[%s11541_s15 + $0x44] sm:$0xf] %vm5078_vm4, %v5599_v9 }
 0x5b3   :  { %v5606_v47 = vpack.c.bf16 %v12363_v0, %v12363_v0  ;;  %v5607_v58 = vpack.c.bf16 %v12364_v24, %v12364_v24  ;;  %5097 = vst.msk [vmem:[%s11541_s15 + $0x48] sm:$0xf] %vm5078_vm4, %v5600_v33  ;;  %5098 = vst.msk [vmem:[%s11541_s15 + $0x4c] sm:$0xf] %vm5078_vm4, %v5601_v2  ;;  %v12367_v38 = vmax.f32 %v10872_v30, 0.0  ;;  %v12368_v14 = vmax.f32 %v10876_v31, 0.0 }
 0x5b4   :  { %v5608_v45 = vpack.c.bf16 %v12365_v22, %v12365_v22  ;;  %v5609_v39 = vpack.c.bf16 %v12366_v55, %v12366_v55  ;;  %v12369_v62 = vmax.f32 %v10880_v23, 0.0  ;;  %v12370_v5 = vmax.f32 %v10884_v16, 0.0  ;;  %5099 = vst.msk [vmem:[%s11541_s15 + $0x50] sm:$0xf] %vm5078_vm4, %v5602_v4  ;;  %5100 = vst.msk [vmem:[%s11541_s15 + $0x54] sm:$0xf] %vm5078_vm4, %v5603_v32 }
 0x5b5   :  { %v5610_v10 = vpack.c.bf16 %v12367_v38, %v12367_v38  ;;  %v5611_v42 = vpack.c.bf16 %v12368_v14, %v12368_v14  ;;  %5101 = vst.msk [vmem:[%s11541_s15 + $0x58] sm:$0xf] %vm5078_vm4, %v5604_v6  ;;  %5102 = vst.msk [vmem:[%s11541_s15 + $0x5c] sm:$0xf] %vm5078_vm4, %v5605_v25  ;;  %v12371_v30 = vmax.f32 %v10888_v43, 0.0  ;;  %v12372_v23 = vmax.f32 %v10892_v53, 0.0 }
 0x5b6   :  { %v5612_v15 = vpack.c.bf16 %v12369_v62, %v12369_v62  ;;  %v5613_v17 = vpack.c.bf16 %v12370_v5, %v12370_v5  ;;  %v12373_v36 = vmax.f32 %v10896_v13, 0.0  ;;  %v12374_v29 = vmax.f32 %v10900_v40, 0.0  ;;  %5103 = vst.msk [vmem:[%s11541_s15 + $0x60] sm:$0xf] %vm5078_vm4, %v5606_v47  ;;  %5104 = vst.msk [vmem:[%s11541_s15 + $0x64] sm:$0xf] %vm5078_vm4, %v5607_v58 }
 0x5b7   :  { %v5614_v31 = vpack.c.bf16 %v12371_v30, %v12371_v30  ;;  %v5615_v16 = vpack.c.bf16 %v12372_v23, %v12372_v23  ;;  %5105 = vst.msk [vmem:[%s11541_s15 + $0x68] sm:$0xf] %vm5078_vm4, %v5608_v45  ;;  %5106 = vst.msk [vmem:[%s11541_s15 + $0x6c] sm:$0xf] %vm5078_vm4, %v5609_v39  ;;  %v12375_v43 = vmax.f32 %v10904_v7, 0.0  ;;  %v12376_v13 = vld [vmem:[#allocation84_spill] sm:$0xff] }
 0x5b8   :  { %v5616_v61 = vpack.c.bf16 %v12373_v36, %v12373_v36  ;;  %v5617_v21 = vpack.c.bf16 %v12374_v29, %v12374_v29  ;;  %v12377_v40 = vmax.f32 %v12376_v13, 0.0  ;;  %v12378_v54 = vld [vmem:[#allocation85_spill] sm:$0xff]  ;;  %v12380_v27 = vld [vmem:[#allocation86_spill] sm:$0xff]  ;;  %5107 = vst.msk [vmem:[%s11541_s15 + $0x70] sm:$0xf] %vm5078_vm4, %v5610_v10  ;;  %v12384_v2 = vld [vmem:[#allocation87_spill] sm:$0xff] }
 0x5b9   :  { %v5618_v53 = vpack.c.bf16 %v12375_v43, %v12375_v43  ;;  %v12379_v57 = vmax.f32 %v12378_v54, 0.0  ;;  %v12381_v9 = vmax.f32 %v12380_v27, 0.0  ;;  %5108 = vst.msk [vmem:[%s11541_s15 + $0x74] sm:$0xf] %vm5078_vm4, %v5611_v42  ;;  %5109 = vst.msk [vmem:[%s11541_s15 + $0x78] sm:$0xf] %vm5078_vm4, %v5612_v15 }
 0x5ba   :  { %v5619_v34 = vpack.c.bf16 %v12377_v40, %v12377_v40  ;;  %5110 = vst.msk [vmem:[%s11541_s15 + $0x7c] sm:$0xf] %vm5078_vm4, %v5613_v17  ;;  %v12382_v7 = vld [vmem:[#allocation66_spill] sm:$0xff]  ;;  %v12385_v63 = vmax.f32 %v12384_v2, 0.0  ;;  %v12386_v1 = vmax.f32 %v10928_v35, 0.0  ;;  %v12387_v28 = vmax.f32 %v10932_v56, 0.0 }
 0x5bb   :  { %v5620_v49 = vpack.c.bf16 %v12379_v57, %v12379_v57  ;;  %v5621_v41 = vpack.c.bf16 %v12381_v9, %v12381_v9  ;;  %v12383_v33 = vmax.f32 %v12382_v7, 0.0  ;;  %5111 = vst.msk [vmem:[%s11541_s15 + $0x80] sm:$0xf] %vm5078_vm4, %v5614_v31  ;;  %5112 = vst.msk [vmem:[%s11541_s15 + $0x84] sm:$0xf] %vm5078_vm4, %v5615_v16  ;;  %v12388_v35 = vmax.f32 %v10936_v3, 0.0 }
 0x5bc   :  { %v5623_v4 = vpack.c.bf16 %v12385_v63, %v12385_v63  ;;  %v5624_v32 = vpack.c.bf16 %v12386_v1, %v12386_v1  ;;  %v5625_v6 = vpack.c.bf16 %v12387_v28, %v12387_v28  ;;  %5113 = vst.msk [vmem:[%s11541_s15 + $0x88] sm:$0xf] %vm5078_vm4, %v5616_v61  ;;  %5114 = vst.msk [vmem:[%s11541_s15 + $0x8c] sm:$0xf] %vm5078_vm4, %v5617_v21  ;;  %v12389_v51 = vmax.f32 %v10940_v46, 0.0  ;;  %v12391_v24 = vld [vmem:[#allocation65_spill] sm:$0xff] }
 0x5bd   :  { %v5622_v44 = vpack.c.bf16 %v12383_v33, %v12383_v33  ;;  %v5626_v56 = vpack.c.bf16 %v12388_v35, %v12388_v35  ;;  %v12390_v0 = vmax.f32 %v10944_v60, 0.0  ;;  %v12392_v58 = vmax.f32 %v12391_v24, 0.0  ;;  %5115 = vst.msk [vmem:[%s11541_s15 + $0x90] sm:$0xf] %vm5078_vm4, %v5618_v53  ;;  %5116 = vst.msk [vmem:[%s11541_s15 + $0x94] sm:$0xf] %vm5078_vm4, %v5619_v34 }
 0x5be   :  { %v5627_v25 = vpack.c.bf16 %v12389_v51, %v12389_v51  ;;  %5117 = vst.msk [vmem:[%s11541_s15 + $0x98] sm:$0xf] %vm5078_vm4, %v5620_v49  ;;  %5118 = vst.msk [vmem:[%s11541_s15 + $0x9c] sm:$0xf] %vm5078_vm4, %v5621_v41  ;;  %v12393_v3 = vld [vmem:[#allocation90_spill] sm:$0xff]  ;;  %v12395_v45 = vld [vmem:[#allocation91_spill] sm:$0xff] }
 0x5bf   :  { %v5628_v47 = vpack.c.bf16 %v12390_v0, %v12390_v0  ;;  %v5629_v22 = vpack.c.bf16 %v12392_v58, %v12392_v58  ;;  %v12394_v46 = vmax.f32 %v12393_v3, 0.0  ;;  %v12396_v55 = vmax.f32 %v12395_v45, 0.0  ;;  %v12397_v38 = vld [vmem:[#allocation62_spill] sm:$0xff]  ;;  %v12399_v42 = vld [vmem:[#allocation92_spill] sm:$0xff]  ;;  %5119 = vst.msk [vmem:[%s11541_s15 + $0xa0] sm:$0xf] %vm5078_vm4, %v5622_v44 }
 0x5c0   :  { %v12398_v10 = vmax.f32 %v12397_v38, 0.0  ;;  %v12400_v62 = vmax.f32 %v12399_v42, 0.0  ;;  %5120 = vst.msk [vmem:[%s11541_s15 + $0xa4] sm:$0xf] %vm5078_vm4, %v5623_v4  ;;  %5121 = vst.msk [vmem:[%s11541_s15 + $0xa8] sm:$0xf] %vm5078_vm4, %v5624_v32 }
 0x5c1   :  { %v5630_v60 = vpack.c.bf16 %v12394_v46, %v12394_v46  ;;  %v5631_v39 = vpack.c.bf16 %v12396_v55, %v12396_v55  ;;  %5122 = vst.msk [vmem:[%s11541_s15 + $0xac] sm:$0xf] %vm5078_vm4, %v5625_v6  ;;  %v12401_v5 = vmax.f32 %v12333_v37, 0.0  ;;  %v12402_v30 = vmax.f32 %v10972_v11, 0.0  ;;  %5123 = vst.msk [vmem:[%s11541_s15 + $0xb0] sm:$0xf] %vm5078_vm4, %v5626_v56 }
 0x5c2   :  { %v5632_v14 = vpack.c.bf16 %v12398_v10, %v12398_v10  ;;  %v5633_v15 = vpack.c.bf16 %v12400_v62, %v12400_v62  ;;  %v12403_v23 = vmax.f32 %v10976_v59, 0.0  ;;  %v12404_v36 = vmax.f32 %v10980_v12, 0.0  ;;  %5124 = vst.msk [vmem:[%s11541_s15 + $0xb4] sm:$0xf] %vm5078_vm4, %v5627_v25  ;;  %5125 = vst.msk [vmem:[%s11541_s15 + $0xb8] sm:$0xf] %vm5078_vm4, %v5628_v47 }
 0x5c3   :  { %v5634_v17 = vpack.c.bf16 %v12401_v5, %v12401_v5  ;;  %v5635_v31 = vpack.c.bf16 %v12402_v30, %v12402_v30  ;;  %5126 = vst.msk [vmem:[%s11541_s15 + $0xbc] sm:$0xf] %vm5078_vm4, %v5629_v22  ;;  %v12405_v37 = vmax.f32 %v10984_v8, 0.0  ;;  %v12406_v59 = vmax.f32 %v10988_v50, 0.0  ;;  %5127 = vst.msk [vmem:[%s11541_s15 + $0xc0] sm:$0xf] %vm5078_vm4, %v5630_v60 }
 0x5c4   :  { %v5636_v16 = vpack.c.bf16 %v12403_v23, %v12403_v23  ;;  %v5637_v61 = vpack.c.bf16 %v12404_v36, %v12404_v36  ;;  %v12407_v29 = vmax.f32 %v12334_v26, 0.0  ;;  %v12408_v43 = vmax.f32 %v12335_v48, 0.0  ;;  %5128 = vst.msk [vmem:[%s11541_s15 + $0xc4] sm:$0xf] %vm5078_vm4, %v5631_v39  ;;  %5129 = vst.msk [vmem:[%s11541_s15 + $0xc8] sm:$0xf] %vm5078_vm4, %v5632_v14 }
 0x5c5   :  { %v5638_v11 = vpack.c.bf16 %v12405_v37, %v12405_v37  ;;  %v5639_v12 = vpack.c.bf16 %v12406_v59, %v12406_v59  ;;  %5130 = vst.msk [vmem:[%s11541_s15 + $0xcc] sm:$0xf] %vm5078_vm4, %v5633_v15  ;;  %v12409_v48 = vmax.f32 %v12336_v19, 0.0  ;;  %v12410_v50 = vmax.f32 %v12337_v52, 0.0  ;;  %5131 = vst.msk [vmem:[%s11541_s15 + $0xd0] sm:$0xf] %vm5078_vm4, %v5634_v17 }
 0x5c6   :  { %v5640_v21 = vpack.c.bf16 %v12407_v29, %v12407_v29  ;;  %v5641_v53 = vpack.c.bf16 %v12408_v43, %v12408_v43  ;;  %v12411_v13 = vmax.f32 %v12338_v20, 0.0  ;;  %v12412_v34 = vmax.f32 %v11012_v18, 0.0  ;;  %5132 = vst.msk [vmem:[%s11541_s15 + $0xd4] sm:$0xf] %vm5078_vm4, %v5635_v31  ;;  %5133 = vst.msk [vmem:[%s11541_s15 + $0xd8] sm:$0xf] %vm5078_vm4, %v5636_v16 }
 0x5c7   :  { %v5642_v8 = vpack.c.bf16 %v12409_v48, %v12409_v48  ;;  %v5643_v26 = vpack.c.bf16 %v12410_v50, %v12410_v50  ;;  %5134 = vst.msk [vmem:[%s11541_s15 + $0xdc] sm:$0xf] %vm5078_vm4, %v5637_v61  ;;  %5135 = vst.msk [vmem:[%s11541_s15 + $0xe0] sm:$0xf] %vm5078_vm4, %v5638_v11 }
 0x5c8   :  { %v5644_v40 = vpack.c.bf16 %v12411_v13, %v12411_v13  ;;  %v5645_v54 = vpack.c.bf16 %v12412_v34, %v12412_v34  ;;  %5136 = vst.msk [vmem:[%s11541_s15 + $0xe4] sm:$0xf] %vm5078_vm4, %v5639_v12  ;;  %5137 = vst.msk [vmem:[%s11541_s15 + $0xe8] sm:$0xf] %vm5078_vm4, %v5640_v21 }
 0x5c9   :  { %5138 = vst.msk [vmem:[%s11541_s15 + $0xec] sm:$0xf] %vm5078_vm4, %v5641_v53  ;;  %5139 = vst.msk [vmem:[%s11541_s15 + $0xf0] sm:$0xf] %vm5078_vm4, %v5642_v8 }
 0x5ca   :  { %5140 = vst.msk [vmem:[%s11541_s15 + $0xf4] sm:$0xf] %vm5078_vm4, %v5643_v26  ;;  %5141 = vst.msk [vmem:[%s11541_s15 + $0xf8] sm:$0xf] %vm5078_vm4, %v5644_v40 }
 0x5cb   :  { %5142 = vst.msk [vmem:[%s11541_s15 + $0xfc] sm:$0xf] %vm5078_vm4, %v5645_v54 }

// kernel: _lambda_.6
= control target key start
LH: loop header
LB: loop body
LE: loop exit
PB: predicated region body
PF: predicated region fallthrough
CT: control target
= control target key end

     0   :  { %vm346_vm0 = vcmask 261120   ;;  %vm814_vm1 = vcmask 523264   ;;  %vm1805_vm2 = vcmask 519168   ;;  %s3277_s1 = inlined_call_operand.vmem [shape: bf16[288,32], index: 1, kind: input, shape index: {}]   ;;  %s3278_s0 = inlined_call_operand.vmem [shape: bf16[128,288], index: 0, kind: input, shape index: {}]   ;;  %s3279_s8 = inlined_call_operand.vmem [shape: bf16[64,128], index: 8, kind: input, shape index: {}]   ;;  %s3280_s7 = inlined_call_operand.vmem [shape: bf16[128,64], index: 7, kind: input, shape index: {}]   ;;  %s3281_s4 = inlined_call_operand.vmem [shape: bf16[32,128], index: 4, kind: input, shape index: {}]   ;;  %s3282_s2 = inlined_call_operand.vmem [shape: f32[1,32], index: 2, kind: input, shape index: {}]   ;;  %s3283_s3 = inlined_call_operand.vmem [shape: f32[1,32], index: 3, kind: input, shape index: {}]   ;;  %s3284_s11 = inlined_call_operand.vmem [shape: bf16[128,64], index: 11, kind: input, shape index: {}]   ;;  %s3285_s9 = inlined_call_operand.vmem [shape: f32[1,128], index: 9, kind: input, shape index: {}, may-alias: {5,9}]   ;;  %s3286_s10 = inlined_call_operand.vmem [shape: f32[1,128], index: 10, kind: input, shape index: {}, may-alias: {6,10}]   ;;  %s3287_s5 = inlined_call_operand.vmem [shape: f32[1,128], index: 5, kind: input, shape index: {}, may-alias: {5,9}]   ;;  %s3288_s6 = inlined_call_operand.vmem [shape: f32[1,128], index: 6, kind: input, shape index: {}, may-alias: {6,10}]   ;;  %s3289_s14 = inlined_call_operand.vmem [shape: bf16[128,128], index: 14, kind: output, shape index: {0}]   ;;  %s3290_s12 = inlined_call_operand.vmem [shape: f32[1,64], index: 12, kind: input, shape index: {}]   ;;  %s3291_s13 = inlined_call_operand.vmem [shape: f32[1,64], index: 13, kind: input, shape index: {}]   ;;  %s3292_s15 = inlined_call_operand.vmem [shape: bf16[128,64], index: 15, kind: output, shape index: {1}]  }
   0x1   :  { %v2253_v0 = vld [vmem:[%s3277_s1 + $0x78] sm:$0xff]   ;;  %v2255_v2 = vld [vmem:[%s3277_s1 + $0x70] sm:$0xff]   ;;  %v2257_v4 = vld [vmem:[%s3277_s1 + $0x68] sm:$0xff]  }
   0x2   :  { %v2254_v1 = vld [vmem:[%s3277_s1 + $0x38] sm:$0xff]   ;;  %2029 = vmatprep.subr.bf16.mxu0 %v2253_v0  ;;  %v2256_v3 = vld [vmem:[%s3277_s1 + $0x30] sm:$0xff]   ;;  %v2258_v5 = vld [vmem:[%s3277_s1 + $0x28] sm:$0xff]  }
   0x3   :  { %2030 = vmatpush3.bf16.msra.mxu0 %v2254_v1  ;;  %v2259_v6 = vld [vmem:[%s3277_s1 + $0x60] sm:$0xff]   ;;  %v2261_v8 = vld [vmem:[%s3277_s1 + $0x58] sm:$0xff]   ;;  %v2267_v9 = vld [vmem:[%s3277_s1 + $0x88] sm:$0xff]  }
   0x4   :  { %2031 = vmatprep.subr.bf16.mxu0 %v2255_v2  ;;  %v2260_v7 = vld [vmem:[%s3277_s1 + $0x20] sm:$0xff]   ;;  %v2262_v10 = vld [vmem:[%s3277_s1 + $0x18] sm:$0xff]   ;;  %v2263_v11 = vld [vmem:[%s3277_s1 + $0x50] sm:$0xff]   ;;  %2141 = vmatprep.subr.bf16.mxu1 %v2267_v9 }
   0x5   :  { %v2264_v12 = vld [vmem:[%s3277_s1 + $0x10] sm:$0xff]   ;;  %2142 = vmatpush3.bf16.msra.mxu1 %v2267_v9  ;;  %v2270_v13 = vld [vmem:[%s3277_s1 + $0x80] sm:$0xff]   ;;  %v2265_v14 = vld [vmem:[%s3277_s1 + $0x48] sm:$0xff]  }
   0x6   :  { %2143 = vmatprep.subr.bf16.mxu1 %v2270_v13  ;;  %v2273_v15 = vld [vmem:[%s3278_s0 + $0x4] ss:$12 sps:$4 sm:$0xff]   ;;  %v2274_v16 = vld [vmem:[%s3278_s0 + $0x8] ss:$12 sps:$4 sm:$0xff]   ;;  %v2275_v17 = vld [vmem:[%s3278_s0 + $0x20] ss:$12 sps:$4 sm:$0xff]  }
   0x7   :  { %2032 = vmatpush3.bf16.msra.mxu0 %v2256_v3  ;;  %403 = vmatprep.mubr.bf16.mxu0 %v2273_v15  ;;  %v2266_v18 = vld [vmem:[%s3277_s1 + $0x8] sm:$0xff]   ;;  %v2268_v19 = vld [vmem:[%s3277_s1 + $0x40] sm:$0xff]   ;;  %v2283_v22 = vld [vmem:[%s3278_s0 + $0x50] ss:$12 sps:$4 sm:$0xff]  }
   0x8   :  { %2033 = vmatprep.subr.bf16.mxu0 %v2257_v4  ;;  %2145 = vmatprep.mubr.msk.bf16.mxu1 %vm346_vm0, %v2274_v16  ;;  %v2282_v20 = vld [vmem:[%s3278_s0 + $0x38] ss:$12 sps:$4 sm:$0xff]   ;;  %v2290_v23 = vld [vmem:[%s3278_s0 + $0x68] ss:$12 sps:$4 sm:$0xff]   ;;  %v2271_v24 = vld [vmem:[%s3278_s0] ss:$12 sps:$4 sm:$0xff]  }
   0x9   :  { %2144 = vmatpush3.bf16.msra.mxu1 %v2270_v13  ;;  %v2269_v21 = vld [vmem:[%s3277_s1] sm:$0xff]   ;;  %v2276_v25 = vld [vmem:[%s3278_s0 + $0x1c] ss:$12 sps:$4 sm:$0xff]   ;;  %v2304_v31 = vld [vmem:[%s3279_s8 + $0x10] sm:$0xff]  }
   0xa   :  { %v2278_v26 = vld [vmem:[%s3278_s0 + $0x18] ss:$12 sps:$4 sm:$0xff]   ;;  %v2291_v27 = vld [vmem:[%s3278_s0 + $0x80] ss:$12 sps:$4 sm:$0xff]   ;;  %v2299_v32 = vld [vmem:[%s3278_s0 + $0xb0] ss:$12 sps:$4 sm:$0xff]  }
   0xb   :  { %2034 = vmatpush3.bf16.msra.mxu0 %v2258_v5  ;;  %v2297_v28 = vld [vmem:[%s3278_s0 + $0x98] ss:$12 sps:$4 sm:$0xff]   ;;  %v2279_v29 = vld [vmem:[%s3278_s0 + $0x34] ss:$12 sps:$4 sm:$0xff]   ;;  %v2281_v33 = vld [vmem:[%s3278_s0 + $0x30] ss:$12 sps:$4 sm:$0xff]  }
   0xc   :  { %2035 = vmatprep.subr.bf16.mxu0 %v2259_v6  ;;  %2146 = vmatmul.mubr.msk.bf16.vlgmr.msra.gmra.mxu1 %vm346_vm0, %v2275_v17  ;;  %v2303_v30 = vld [vmem:[%s3279_s8 + $0x18] sm:$0xff]   ;;  %v2286_v35 = vld [vmem:[%s3278_s0 + $0x48] ss:$12 sps:$4 sm:$0xff]   ;;  %v2287_v36 = vld [vmem:[%s3278_s0 + $0x64] ss:$12 sps:$4 sm:$0xff]  }
   0xd   :  { %2149 = vmatprep.mubr.msk.bf16.mxu1 %vm346_vm0, %v2282_v20  ;;  %2161 = vmatprep.subr.bf16.mxu1 %v2303_v30  ;;  %v2284_v34 = vld [vmem:[%s3278_s0 + $0x4c] ss:$12 sps:$4 sm:$0xff]   ;;  %v2292_v38 = vld [vmem:[%s3278_s0 + $0x7c] ss:$12 sps:$4 sm:$0xff]   ;;  %v2295_v40 = vld [vmem:[%s3278_s0 + $0x94] ss:$12 sps:$4 sm:$0xff]  }
   0xe   :  { %2162 = vmatpush3.bf16.msra.mxu1 %v2303_v30  ;;  %v2289_v37 = vld [vmem:[%s3278_s0 + $0x60] ss:$12 sps:$4 sm:$0xff]   ;;  %v2294_v39 = vld [vmem:[%s3278_s0 + $0x78] ss:$12 sps:$4 sm:$0xff]   ;;  %v2298_v41 = vld [vmem:[%s3278_s0 + $0x90] ss:$12 sps:$4 sm:$0xff]  }
   0xf   :  { %2036 = vmatpush3.bf16.msra.mxu0 %v2260_v7  ;;  %2163 = vmatprep.subr.bf16.mxu1 %v2304_v31  ;;  %v2300_v42 = vld [vmem:[%s3278_s0 + $0xac] ss:$12 sps:$4 sm:$0xff]   ;;  %v2302_v43 = vld [vmem:[%s3278_s0 + $0xa8] ss:$12 sps:$4 sm:$0xff]   ;;  %v2306_v45 = vld [vmem:[%s3279_s8] sm:$0xff]  }
  0x10   :  { %2037 = vmatprep.subr.bf16.mxu0 %v2261_v8  ;;  %v2305_v44 = vld [vmem:[%s3279_s8 + $0x8] sm:$0xff]   ;;  %v2307_v46 = vld [vmem:[%s3280_s7] sm:$0xff]   ;;  %v2309_v48 = vld [vmem:[%s3280_s7 + $0x10] sm:$0xff]  }
  0x11   :  { %v2308_v47 = vld [vmem:[%s3280_s7 + $0x8] sm:$0xff]   ;;  %v2310_v49 = vld [vmem:[%s3280_s7 + $0x18] sm:$0xff]   ;;  %v2311_v50 = vld [vmem:[%s3280_s7 + $0x20] sm:$0xff]  }
  0x12   :  { %2164 = vmatpush3.bf16.msra.mxu1 %v2304_v31  ;;  %v2312_v51 = vld [vmem:[%s3280_s7 + $0x28] sm:$0xff]   ;;  %v2313_v52 = vld [vmem:[%s3280_s7 + $0x30] sm:$0xff]   ;;  %v2314_v53 = vld [vmem:[%s3280_s7 + $0x38] sm:$0xff]  }
  0x13   :  { %2038 = vmatpush3.bf16.msra.mxu0 %v2262_v10  ;;  %2165 = vmatprep.subr.bf16.mxu1 %v2305_v44  ;;  %v2315_v54 = vld [vmem:[%s3281_s4 + $0x8] sm:$0xff]   ;;  %v2316_v55 = vld [vmem:[%s3281_s4] sm:$0xff]  }
  0x14   :  { %2039 = vmatprep.subr.bf16.mxu0 %v2263_v11  ;;  %2150 = vmatmul.mubr.msk.bf16.gmra.mxu1 %vm346_vm0, %v2283_v22 }
  0x15   :  { %2153 = vmatprep.mubr.msk.bf16.mxu1 %vm346_vm0, %v2290_v23 }
  0x16   :  { %2166 = vmatpush3.bf16.msra.mxu1 %v2305_v44 }
  0x17   :  { %2040 = vmatpush3.bf16.msra.mxu0 %v2264_v12  ;;  %2167 = vmatprep.subr.bf16.mxu1 %v2306_v45 }
  0x18   :  { %2041 = vmatprep.subr.bf16.mxu0 %v2265_v14 }
  0x1a   :  { %2168 = vmatpush3.bf16.msra.mxu1 %v2306_v45 }
  0x1b   :  { %2042 = vmatpush3.bf16.msra.mxu0 %v2266_v18  ;;  %2185 = vmatprep.subr.bf16.mxu1 %v2315_v54 }
  0x1c   :  { %2043 = vmatprep.subr.bf16.mxu0 %v2268_v19  ;;  %2154 = vmatmul.mubr.msk.bf16.gmra.mxu1 %vm346_vm0, %v2291_v27 }
  0x1d   :  { %2157 = vmatprep.mubr.msk.bf16.mxu1 %vm346_vm0, %v2297_v28 }
  0x1f   :  { %2044 = vmatpush3.bf16.msra.mxu0 %v2269_v21 }
  0x22   :  { %404 = vmatmul.mubr.bf16.vlgmr.msra.gmra.mxu0 %v2271_v24 }
  0x23   :  { %411 = vmatprep.mubr.bf16.mxu0 %v2276_v25 }
  0x24   :  { %2158 = vmatmul.mubr.msk.bf16.gmra.mxu1 %vm346_vm0, %v2299_v32 }
  0x25   :  { %2169 = vmatprep.mubr.msk.bf16.mxu1 %vm814_vm1, %v2307_v46 }
  0x2a   :  { %412 = vmatmul.mubr.bf16.gmra.mxu0 %v2278_v26 }
  0x2b   :  { %419 = vmatprep.mubr.bf16.mxu0 %v2279_v29 }
  0x2c   :  { %2170 = vmatmul.mubr.msk.bf16.vlgmr.msra.gmra.mxu1 %vm814_vm1, %v2308_v47 }
  0x2d   :  { %2173 = vmatprep.mubr.msk.bf16.mxu1 %vm814_vm1, %v2309_v48  ;;  %2186 = vmatpush3.bf16.msra.mxu1 %v2315_v54 }
  0x2e   :  { %2187 = vmatprep.subr.bf16.mxu1 %v2316_v55 }
  0x31   :  { %2188 = vmatpush3.bf16.msra.mxu1 %v2316_v55 }
  0x32   :  { %420 = vmatmul.mubr.bf16.gmra.mxu0 %v2281_v33 }
  0x33   :  { %427 = vmatprep.mubr.bf16.mxu0 %v2284_v34 }
  0x34   :  { %2174 = vmatmul.mubr.msk.bf16.gmra.mxu1 %vm814_vm1, %v2310_v49 }
  0x35   :  { %2177 = vmatprep.mubr.msk.bf16.mxu1 %vm814_vm1, %v2311_v50 }
  0x3a   :  { %428 = vmatmul.mubr.bf16.gmra.mxu0 %v2286_v35 }
  0x3b   :  { %435 = vmatprep.mubr.bf16.mxu0 %v2287_v36 }
  0x3c   :  { %2178 = vmatmul.mubr.msk.bf16.gmra.mxu1 %vm814_vm1, %v2312_v51 }
  0x3d   :  { %2181 = vmatprep.mubr.msk.bf16.mxu1 %vm814_vm1, %v2313_v52 }
  0x42   :  { %436 = vmatmul.mubr.bf16.gmra.mxu0 %v2289_v37 }
  0x43   :  { %443 = vmatprep.mubr.bf16.mxu0 %v2292_v38 }
  0x44   :  { %2182 = vmatmul.mubr.msk.bf16.gmra.mxu1 %vm814_vm1, %v2314_v53 }
  0x4a   :  { %444 = vmatmul.mubr.bf16.gmra.mxu0 %v2294_v39 }
  0x4b   :  { %451 = vmatprep.mubr.bf16.mxu0 %v2295_v40 }
  0x52   :  { %452 = vmatmul.mubr.bf16.gmra.mxu0 %v2298_v41 }
  0x53   :  { %459 = vmatprep.mubr.bf16.mxu0 %v2300_v42 }
  0x5a   :  { %460 = vmatmul.mubr.bf16.gmra.mxu0 %v2302_v43 }
  0xcc   :  { %v2147_v58 = vpop.f32.mrf.mxu1 }
  0xce   :  { %v502_v60 = vpop.f32.mrf.mxu1 }
  0xd0   :  { %v2148_v63 = vpop.f32.mrf.mxu1 }
  0xd2   :  { %v505_v2 = vpop.f32.mrf.mxu1 }
  0xd4   :  { %v2151_v5 = vpop.f32.mrf.mxu1 }
  0xd6   :  { %v518_v8 = vpop.f32.mrf.mxu1 }
  0xd8   :  { %v2152_v10 = vpop.f32.mrf.mxu1 }
  0xda   :  { %v521_v15 = vpop.f32.mrf.mxu1 }
  0xdc   :  { %v2597_v19 = vpop.f32.mrf.mxu1 }
  0xde   :  { %v534_v27 = vpop.f32.mrf.mxu1 }
  0xe0   :  { %v2156_v40 = vpop.f32.mrf.mxu1 }
  0xe2   :  { %v2045_v56 = vpop.f32.mrf.mxu0 }
  0xe4   :  { %v2046_v57 = vpop.f32.mrf.mxu0 }
  0xe5   :  { %v2047_v14 = vadd.f32 %v2046_v57, %v2045_v56  ;;  %v537_v56 = vpop.f32.mrf.mxu1 }
  0xe6   :  { %v2048_v59 = vpop.f32.mrf.mxu0 }
  0xe7   :  { %v2601_v22 = vadd.f32 %v2047_v14, %v502_v60 }
  0xe8   :  { %v2049_v61 = vpop.f32.mrf.mxu0 }
  0xe9   :  { %v2050_v13 = vadd.f32 %v2049_v61, %v2048_v59  ;;  %v604_v31 = vmul.f32 %v2601_v22, %v2601_v22  ;;  %v567_v37 = vsel %vm346_vm0, %v2601_v22, 0.0 }
  0xea   :  { %v2051_v62 = vpop.f32.mrf.mxu0 }
  0xeb   :  { %v2599_v20 = vadd.f32 %v2050_v13, %v505_v2  ;;  %v620_v45 = vsel %vm346_vm0, %v604_v31, 0.0  ;;  %v2642_v2 = vpop.f32.mrf.mxu1 }
  0xec   :  { %v2052_v0 = vpop.f32.mrf.mxu0 }
  0xed   :  { %v2053_v17 = vadd.f32 %v2052_v0, %v2051_v62  ;;  %v605_v28 = vmul.f32 %v2599_v20, %v2599_v20  ;;  %v568_v34 = vsel %vm346_vm0, %v2599_v20, 0.0 }
  0xee   :  { %v2054_v1 = vpop.f32.mrf.mxu0  ;;  %v569_v46 = vadd.f32 %v568_v34, %v567_v37 }
  0xef   :  { %v2603_v25 = vadd.f32 %v2147_v58, %v2053_v17  ;;  %v621_v41 = vsel %vm346_vm0, %v605_v28, 0.0 }
  0xf0   :  { %v2055_v3 = vpop.f32.mrf.mxu0  ;;  %v622_v53 = vadd.f32 %v621_v41, %v620_v45 }
  0xf1   :  { %v2056_v21 = vadd.f32 %v2055_v3, %v2054_v1  ;;  %v606_v35 = vmul.f32 %v2603_v25, %v2603_v25  ;;  %v570_v42 = vsel %vm346_vm0, %v2603_v25, 0.0 }
  0xf2   :  { %v2057_v4 = vpop.f32.mrf.mxu0  ;;  %v571_v54 = vadd.f32 %v570_v42, %v569_v46 }
  0xf3   :  { %v2607_v29 = vadd.f32 %v2148_v63, %v2056_v21  ;;  %v623_v49 = vsel %vm346_vm0, %v606_v35, 0.0 }
  0xf4   :  { %v2058_v6 = vpop.f32.mrf.mxu0  ;;  %v624_v62 = vadd.f32 %v623_v49, %v622_v53 }
  0xf5   :  { %v2059_v23 = vadd.f32 %v2058_v6, %v2057_v4  ;;  %v607_v43 = vmul.f32 %v2607_v29, %v2607_v29  ;;  %v572_v50 = vsel %vm346_vm0, %v2607_v29, 0.0 }
  0xf6   :  { %v2060_v7 = vpop.f32.mrf.mxu0  ;;  %v573_v63 = vadd.f32 %v572_v50, %v571_v54 }
  0xf7   :  { %v2611_v32 = vadd.f32 %v2059_v23, %v518_v8  ;;  %v625_v58 = vsel %vm346_vm0, %v607_v43, 0.0 }
  0xf8   :  { %v2061_v9 = vpop.f32.mrf.mxu0  ;;  %v626_v8 = vadd.f32 %v625_v58, %v624_v62 }
  0xf9   :  { %v2062_v30 = vadd.f32 %v2061_v9, %v2060_v7  ;;  %v608_v47 = vmul.f32 %v2611_v32, %v2611_v32  ;;  %v574_v59 = vsel %vm346_vm0, %v2611_v32, 0.0 }
  0xfa   :  { %v2063_v11 = vpop.f32.mrf.mxu0  ;;  %v575_v7 = vadd.f32 %v574_v59, %v573_v63 }
  0xfb   :  { %v2624_v44 = vadd.f32 %v2062_v30, %v521_v15  ;;  %v627_v0 = vsel %vm346_vm0, %v608_v47, 0.0 }
  0xfc   :  { %v2064_v12 = vpop.f32.mrf.mxu0  ;;  %v628_v15 = vadd.f32 %v627_v0, %v626_v8 }
  0xfd   :  { %v2065_v36 = vadd.f32 %v2064_v12, %v2063_v11  ;;  %v609_v60 = vmul.f32 %v2624_v44, %v2624_v44  ;;  %v576_v3 = vsel %vm346_vm0, %v2624_v44, 0.0 }
  0xfe   :  { %v2066_v16 = vpop.f32.mrf.mxu0 }
  0xff   :  { %v2632_v51 = vadd.f32 %v2151_v5, %v2065_v36  ;;  %v629_v11 = vsel %vm346_vm0, %v609_v60, 0.0 }
 0x100   :  { %v2067_v18 = vpop.f32.mrf.mxu0 }
 0x101   :  { %v2068_v38 = vadd.f32 %v2067_v18, %v2066_v16  ;;  %v610_v4 = vmul.f32 %v2632_v51, %v2632_v51  ;;  %v578_v12 = vsel %vm346_vm0, %v2632_v51, 0.0  ;;  %v577_v16 = vadd.f32 %v576_v3, %v575_v7  ;;  %v550_v18 = vpop.f32.mrf.mxu1 }
 0x102   :  { %v2069_v24 = vpop.f32.mrf.mxu0 }
 0x103   :  { %v2634_v55 = vadd.f32 %v2152_v10, %v2068_v38  ;;  %v631_v21 = vsel %vm346_vm0, %v610_v4, 0.0  ;;  %v579_v28 = vadd.f32 %v578_v12, %v577_v16  ;;  %v2160_v41 = vpop.f32.mrf.mxu1 }
 0x104   :  { %v2070_v26 = vpop.f32.mrf.mxu0 }
 0x105   :  { %v2071_v52 = vadd.f32 %v2070_v26, %v2069_v24  ;;  %v611_v9 = vmul.f32 %v2634_v55, %v2634_v55  ;;  %v580_v23 = vsel %vm346_vm0, %v2634_v55, 0.0 }
 0x106   :  { %v2072_v33 = vpop.f32.mrf.mxu0  ;;  %v581_v38 = vadd.f32 %v580_v23, %v579_v28 }
 0x107   :  { %v2648_v5 = vadd.f32 %v2071_v52, %v534_v27  ;;  %v630_v27 = vadd.f32 %v629_v11, %v628_v15  ;;  %v633_v30 = vsel %vm346_vm0, %v611_v9, 0.0 }
 0x108   :  { %v2073_v39 = vpop.f32.mrf.mxu0 }
 0x109   :  { %v2074_v61 = vadd.f32 %v2073_v39, %v2072_v33  ;;  %v612_v24 = vmul.f32 %v2648_v5, %v2648_v5  ;;  %v582_v33 = vsel %vm346_vm0, %v2648_v5, 0.0  ;;  %v632_v37 = vadd.f32 %v631_v21, %v630_v27 }
 0x10a   :  { %v2075_v48 = vpop.f32.mrf.mxu0  ;;  %v583_v46 = vadd.f32 %v582_v33, %v581_v38 }
 0x10b   :  { %v2655_v13 = vadd.f32 %v2074_v61, %v537_v56  ;;  %v634_v47 = vadd.f32 %v633_v30, %v632_v37  ;;  %v553_v56 = vpop.f32.mrf.mxu1 }
 0x10c   :  { %v2076_v57 = vpop.f32.mrf.mxu0 }
 0x10d   :  { %v2077_v6 = vadd.f32 %v2076_v57, %v2075_v48  ;;  %v613_v34 = vmul.f32 %v2655_v13, %v2655_v13  ;;  %v584_v42 = vsel %vm346_vm0, %v2655_v13, 0.0 }
 0x10e   :  { %v2078_v1 = vpop.f32.mrf.mxu0  ;;  %v585_v54 = vadd.f32 %v584_v42, %v583_v46 }
 0x10f   :  { %v2663_v26 = vadd.f32 %v2597_v19, %v2077_v6  ;;  %v635_v19 = vsel %vm346_vm0, %v612_v24, 0.0 }
 0x110   :  { %v2079_v10 = vpop.f32.mrf.mxu0  ;;  %v636_v53 = vadd.f32 %v635_v19, %v634_v47 }
 0x111   :  { %v2080_v14 = vadd.f32 %v2079_v10, %v2078_v1  ;;  %v614_v43 = vmul.f32 %v2663_v26, %v2663_v26  ;;  %v586_v49 = vsel %vm346_vm0, %v2663_v26, 0.0 }
 0x112   :  { %v2081_v17 = vpop.f32.mrf.mxu0  ;;  %v587_v63 = vadd.f32 %v586_v49, %v585_v54 }
 0x113   :  { %v2670_v35 = vadd.f32 %v2156_v40, %v2080_v14  ;;  %v637_v40 = vsel %vm346_vm0, %v613_v34, 0.0  ;;  %v639_v58 = vsel %vm346_vm0, %v614_v43, 0.0 }
 0x114   :  { %v2082_v31 = vpop.f32.mrf.mxu0  ;;  %v638_v62 = vadd.f32 %v637_v40, %v636_v53 }
 0x115   :  { %v2083_v36 = vadd.f32 %v2082_v31, %v2081_v17  ;;  %v615_v50 = vmul.f32 %v2670_v35, %v2670_v35  ;;  %v588_v59 = vsel %vm346_vm0, %v2670_v35, 0.0 }
 0x116   :  { %v2084_v39 = vpop.f32.mrf.mxu0  ;;  %v640_v7 = vadd.f32 %v639_v58, %v638_v62  ;;  %v589_v8 = vadd.f32 %v588_v59, %v587_v63  ;;  %v565_v63 = vld [vmem:[%s3282_s2] sm:$0x1] }
 0x117   :  { %v2677_v45 = vadd.f32 %v2083_v36, %v550_v18  ;;  %v641_v1 = vsel %vm346_vm0, %v615_v50, 0.0 }
 0x118   :  { %v2085_v48 = vpop.f32.mrf.mxu0  ;;  %v642_v15 = vadd.f32 %v641_v1, %v640_v7 }
 0x119   :  { %v2086_v52 = vadd.f32 %v2085_v48, %v2084_v39  ;;  %v616_v60 = vmul.f32 %v2677_v45, %v2677_v45  ;;  %v590_v3 = vsel %vm346_vm0, %v2677_v45, 0.0 }
 0x11a   :  { %v2087_v57 = vpop.f32.mrf.mxu0  ;;  %v591_v14 = vadd.f32 %v590_v3, %v589_v8 }
 0x11b   :  { %v2689_v61 = vadd.f32 %v2086_v52, %v553_v56  ;;  %v643_v10 = vsel %vm346_vm0, %v616_v60, 0.0  ;;  %v667_v60 = vlaneseq }
 0x11c   :  { %v2088_v0 = vpop.f32.mrf.mxu0  ;;  %v644_v24 = vadd.f32 %v643_v10, %v642_v15 }
 0x11d   :  { %v617_v4 = vmul.f32 %v2689_v61, %v2689_v61  ;;  %v2089_v6 = vadd.f32 %v2088_v0, %v2087_v57  ;;  %v592_v11 = vsel %vm346_vm0, %v2689_v61, 0.0  ;;  %v668_v62 = vshrl.u32 %v667_v60, 7 }
 0x11e   :  { %v2090_v9 = vpop.f32.mrf.mxu0  ;;  %v593_v27 = vadd.f32 %v592_v11, %v591_v14 }
 0x11f   :  { %v2700_v12 = vadd.f32 %v2642_v2, %v2089_v6  ;;  %v645_v17 = vsel %vm346_vm0, %v617_v4, 0.0  ;;  %v2713_v0 = vsub.s32 0, %v668_v62  ;;  %v566_v4 = vld [vmem:[%s3283_s3] sm:$0x1] }
 0x120   :  { %v2091_v16 = vpop.f32.mrf.mxu0  ;;  %v646_v31 = vadd.f32 %v645_v17, %v644_v24 }
 0x121   :  { %v594_v18 = vsel %vm346_vm0, %v2700_v12, 0.0  ;;  %v618_v21 = vmul.f32 %v2700_v12, %v2700_v12  ;;  %v2092_v23 = vadd.f32 %v2091_v16, %v2090_v9 }
 0x122   :  { %v595_v2 = vadd.f32 %v594_v18, %v593_v27 }
 0x123   :  { %v647_v28 = vsel %vm346_vm0, %v618_v21, 0.0  ;;  %v562_v30 = vadd.f32 %v2160_v41, %v2092_v23 }
 0x124   :  { %v648_v36 = vadd.f32 %v647_v28, %v646_v31 }
 0x125   :  { %v596_v33 = vsel %vm346_vm0, %v562_v30, 0.0  ;;  %v619_v34 = vmul.f32 %v562_v30, %v562_v30 }
 0x126   :  { %v597_v37 = vadd.f32 %v596_v33, %v595_v2 }
 0x127   :  { %v649_v38 = vsel %vm346_vm0, %v619_v34, 0.0 }
 0x128   :  { %v598_v39 = vrot.slane %v597_v37, 4  ;;  %v650_v19 = vadd.f32 %v649_v38, %v648_v36 }
 0x12a   :  { %v599_v42 = vadd.f32 %v598_v39, %v597_v37  ;;  %v651_v43 = vrot.slane %v650_v19, 4 }
 0x12c   :  { %v600_v46 = vrot.slane %v599_v42, 2  ;;  %v652_v47 = vadd.f32 %v651_v43, %v650_v19 }
 0x12e   :  { %v601_v48 = vadd.f32 %v600_v46, %v599_v42  ;;  %v653_v40 = vrot.slane %v652_v47, 2 }
 0x130   :  { %v602_v49 = vrot.slane %v601_v48, 1  ;;  %v654_v50 = vadd.f32 %v653_v40, %v652_v47 }
 0x132   :  { %v603_v41 = vadd.f32 %v602_v49, %v601_v48  ;;  %v655_v52 = vrot.slane %v654_v50, 1 }
 0x134   :  { %v656_v53 = vadd.f32 %v655_v52, %v654_v50  ;;  %v657_v54 = vmul.f32 0.0078125, %v603_v41 }
 0x136   :  { %v658_v56 = vmul.f32 0.0078125, %v656_v53  ;;  %v659_v57 = vmul.f32 %v657_v54, %v657_v54 }
 0x138   :  { %v660_v58 = vsub.f32 %v658_v56, %v659_v57 }
 0x13a   :  { %v661_v59 = vadd.f32 1e-05, %v660_v58 }
 0x13c   :  { %2325 = vrsqrt.f32 %v661_v59 }
 0x149   :  { %v2326_v1 = vpop.eup %2325 }
 0x14a   :  { %v663_v3 = vmul.f32 %v2326_v1, %v565_v63 }
 0x14c   :  { %v664_v6 = vmul.f32 %v663_v3, %v657_v54  ;;  %v670_v7 = vrot.slane %v663_v3, %v2713_v0  ;;  %v2746_v3 = vpop.f32.mrf.mxu1 }
 0x14e   :  { %v665_v8 = vsub.f32 %v566_v4, %v664_v6  ;;  %v687_v9 = vmul.f32 %v670_v7, %v562_v30  ;;  %v672_v10 = vmul.f32 %v670_v7, %v2601_v22  ;;  %v673_v14 = vmul.f32 %v670_v7, %v2599_v20  ;;  %v2748_v4 = vpop.f32.mrf.mxu1 }
 0x14f   :  { %v674_v15 = vmul.f32 %v670_v7, %v2603_v25  ;;  %v675_v16 = vmul.f32 %v670_v7, %v2607_v29  ;;  %v676_v17 = vmul.f32 %v670_v7, %v2611_v32  ;;  %v677_v18 = vmul.f32 %v670_v7, %v2624_v44 }
 0x150   :  { %v692_v11 = vrot.slane %v665_v8, %v2713_v0  ;;  %v678_v21 = vmul.f32 %v670_v7, %v2632_v51  ;;  %v679_v23 = vmul.f32 %v670_v7, %v2634_v55  ;;  %v680_v22 = vmul.f32 %v670_v7, %v2648_v5  ;;  %v2750_v6 = vpop.f32.mrf.mxu1 }
 0x151   :  { %v681_v25 = vmul.f32 %v670_v7, %v2655_v13  ;;  %v682_v32 = vmul.f32 %v670_v7, %v2663_v26  ;;  %v683_v55 = vmul.f32 %v670_v7, %v2670_v35  ;;  %v684_v5 = vmul.f32 %v670_v7, %v2677_v45 }
 0x152   :  { %v694_v24 = vadd.f32 %v692_v11, %v672_v10  ;;  %v695_v27 = vadd.f32 %v692_v11, %v673_v14  ;;  %v696_v28 = vadd.f32 %v692_v11, %v674_v15  ;;  %v697_v30 = vadd.f32 %v692_v11, %v675_v16 }
 0x153   :  { %v698_v31 = vadd.f32 %v692_v11, %v676_v17  ;;  %v699_v20 = vadd.f32 %v692_v11, %v677_v18  ;;  %v700_v37 = vadd.f32 %v692_v11, %v678_v21  ;;  %v701_v38 = vadd.f32 %v692_v11, %v679_v23  ;;  %v2318_v18 = vld [vmem:[%s3284_s11 + $0x30] sm:$0xff]  }
 0x154   :  { %v710_v2 = vmax.f32 %v694_v24, 0.0  ;;  %v711_v29 = vmax.f32 %v695_v27, 0.0  ;;  %v712_v33 = vmax.f32 %v696_v28, 0.0  ;;  %v713_v44 = vmax.f32 %v697_v30, 0.0  ;;  %v2319_v28 = vld [vmem:[%s3284_s11 + $0x28] sm:$0xff]  }
 0x155   :  { %v714_v34 = vmax.f32 %v698_v31, 0.0  ;;  %v715_v51 = vmax.f32 %v699_v20, 0.0  ;;  %v709_v39 = vadd.f32 %v692_v11, %v687_v9  ;;  %v704_v42 = vadd.f32 %v692_v11, %v682_v32 }
 0x156   :  { %v1049_v36 = vpack.c.bf16 %v711_v29, %v710_v2  ;;  %v1050_v19 = vpack.c.bf16 %v713_v44, %v712_v33  ;;  %v705_v43 = vadd.f32 %v692_v11, %v683_v55  ;;  %v702_v46 = vadd.f32 %v692_v11, %v680_v22  ;;  %v2321_v2 = vld [vmem:[%s3284_s11 + $0x18] sm:$0xff]  }
 0x157   :  { %v1051_v13 = vpack.c.bf16 %v715_v51, %v714_v34  ;;  %v703_v47 = vadd.f32 %v692_v11, %v681_v25  ;;  %v685_v26 = vmul.f32 %v670_v7, %v2689_v61  ;;  %v720_v48 = vmax.f32 %v704_v42, 0.0  ;;  %v2320_v25 = vld [vmem:[%s3284_s11 + $0x20] sm:$0xff]   ;;  %v2322_v34 = vld [vmem:[%s3284_s11 + $0x10] sm:$0xff]  }
 0x158   :  { %2189 = vmatprep.mubr.msk.bf16.mxu1 %vm346_vm0, %v1049_v36  ;;  %v721_v35 = vmax.f32 %v705_v43, 0.0  ;;  %v706_v40 = vadd.f32 %v692_v11, %v684_v5  ;;  %v686_v49 = vmul.f32 %v670_v7, %v2700_v12  ;;  %v716_v45 = vmax.f32 %v700_v37, 0.0  ;;  %v2317_v12 = vld [vmem:[%s3284_s11 + $0x38] sm:$0xff]   ;;  %v2752_v7 = vpop.f32.mrf.mxu1  ;;  %v2324_v43 = vld [vmem:[%s3284_s11] sm:$0xff]  }
 0x159   :  { %2190 = vmatmul.mubr.msk.bf16.vlgmr.msra.gmra.mxu1 %vm346_vm0, %v1050_v19  ;;  %v717_v50 = vmax.f32 %v701_v38, 0.0  ;;  %v707_v41 = vadd.f32 %v692_v11, %v685_v26  ;;  %v725_v56 = vmax.f32 %v709_v39, 0.0  ;;  %v718_v57 = vmax.f32 %v702_v46, 0.0  ;;  %2205 = vmatprep.subr.bf16.mxu0 %v2317_v12  ;;  %v2323_v38 = vld [vmem:[%s3284_s11 + $0x8] sm:$0xff]  }
 0x15a   :  { %2193 = vmatprep.mubr.msk.bf16.mxu1 %vm346_vm0, %v1051_v13  ;;  %v1054_v52 = vpack.c.bf16 %v721_v35, %v720_v48  ;;  %v722_v53 = vmax.f32 %v706_v40, 0.0  ;;  %v708_v54 = vadd.f32 %v692_v11, %v686_v49  ;;  %v719_v58 = vmax.f32 %v703_v47, 0.0  ;;  %2237 = vmatprep.subr.bf16.mxu1 %v2317_v12  ;;  %v2760_v11 = vpop.f32.mrf.mxu1 }
 0x15b   :  { %v723_v59 = vmax.f32 %v707_v41, 0.0  ;;  %v1052_v62 = vpack.c.bf16 %v717_v50, %v716_v45  ;;  %2206 = vmatpush3.bf16.msra.mxu0 %v2317_v12  ;;  %2245 = vmatpush3.bf16.msra.mxu1 %v2317_v12  ;;  %v938_v8 = vadd.f32 %v2752_v7, %v2748_v4  ;;  %v959_v9 = vmul.f32 %v2748_v4, %v2748_v4 }
 0x15c   :  { %v724_v61 = vmax.f32 %v708_v54, 0.0  ;;  %v1053_v1 = vpack.c.bf16 %v719_v58, %v718_v57  ;;  %v960_v10 = vmul.f32 %v2752_v7, %v2752_v7  ;;  %v961_v15 = vmul.f32 %v2746_v3, %v2746_v3  ;;  %v2765_v17 = vpop.f32.mrf.mxu1  ;;  %2207 = vmatprep.subr.bf16.mxu0 %v2318_v18  ;;  %2238 = vmatprep.subr.bf16.mxu1 %v2318_v18 }
 0x15d   :  { %v1055_v60 = vpack.c.bf16 %v723_v59, %v722_v53  ;;  %v939_v14 = vadd.f32 %v2746_v3, %v938_v8  ;;  %v962_v23 = vmul.f32 %v2750_v6, %v2750_v6  ;;  %v963_v30 = vmul.f32 %v2765_v17, %v2765_v17 }
 0x15e   :  { %v1056_v63 = vpack.c.bf16 %v725_v56, %v724_v61  ;;  %v975_v16 = vadd.f32 %v960_v10, %v959_v9  ;;  %v2773_v27 = vpop.f32.mrf.mxu1  ;;  %v965_v55 = vmul.f32 %v2760_v11, %v2760_v11 }
 0x15f   :  { %v940_v21 = vadd.f32 %v2750_v6, %v939_v14  ;;  %2208 = vmatpush3.bf16.msra.mxu0 %v2318_v18  ;;  %2246 = vmatpush3.bf16.msra.mxu1 %v2318_v18  ;;  %v966_v39 = vmul.f32 %v2773_v27, %v2773_v27 }
 0x160   :  { %v976_v24 = vadd.f32 %v975_v16, %v961_v15  ;;  %2209 = vmatprep.subr.bf16.mxu0 %v2319_v28  ;;  %2239 = vmatprep.subr.bf16.mxu1 %v2319_v28  ;;  %v2781_v20 = vpop.f32.mrf.mxu1 }
 0x161   :  { %2194 = vmatmul.mubr.msk.bf16.gmra.mxu1 %vm346_vm0, %v1052_v62  ;;  %v941_v22 = vadd.f32 %v940_v21, %v2765_v17  ;;  %v964_v32 = vmul.f32 %v2781_v20, %v2781_v20 }
 0x162   :  { %2197 = vmatprep.mubr.msk.bf16.mxu1 %vm346_vm0, %v1053_v1  ;;  %v977_v31 = vadd.f32 %v976_v24, %v962_v23  ;;  %v2792_v44 = vpop.f32.mrf.mxu1 }
 0x163   :  { %2210 = vmatpush3.bf16.msra.mxu0 %v2319_v28  ;;  %2247 = vmatpush3.bf16.msra.mxu1 %v2319_v28  ;;  %v942_v29 = vadd.f32 %v941_v22, %v2781_v20  ;;  %v969_v50 = vmul.f32 %v2792_v44, %v2792_v44 }
 0x164   :  { %2211 = vmatprep.subr.bf16.mxu0 %v2320_v25  ;;  %2240 = vmatprep.subr.bf16.mxu1 %v2320_v25  ;;  %v978_v33 = vadd.f32 %v977_v31, %v963_v30  ;;  %v2800_v37 = vpop.f32.mrf.mxu1 }
 0x165   :  { %v943_v51 = vadd.f32 %v2760_v11, %v942_v29  ;;  %v967_v46 = vmul.f32 %v2800_v37, %v2800_v37 }
 0x166   :  { %v979_v36 = vadd.f32 %v978_v33, %v964_v32  ;;  %v2808_v42 = vpop.f32.mrf.mxu1 }
 0x167   :  { %2212 = vmatpush3.bf16.msra.mxu0 %v2320_v25  ;;  %2248 = vmatpush3.bf16.msra.mxu1 %v2320_v25  ;;  %v944_v5 = vadd.f32 %v2773_v27, %v943_v51  ;;  %v970_v54 = vmul.f32 %v2808_v42, %v2808_v42 }
 0x168   :  { %2213 = vmatprep.subr.bf16.mxu0 %v2321_v2  ;;  %2241 = vmatprep.subr.bf16.mxu1 %v2321_v2  ;;  %v980_v19 = vadd.f32 %v979_v36, %v965_v55  ;;  %v2816_v26 = vpop.f32.mrf.mxu1 }
 0x169   :  { %2198 = vmatmul.mubr.msk.bf16.gmra.mxu1 %vm346_vm0, %v1054_v52  ;;  %v945_v13 = vadd.f32 %v944_v5, %v2800_v37  ;;  %v968_v40 = vmul.f32 %v2816_v26, %v2816_v26 }
 0x16a   :  { %2201 = vmatprep.mubr.msk.bf16.mxu1 %vm346_vm0, %v1055_v60  ;;  %v981_v47 = vadd.f32 %v980_v19, %v966_v39  ;;  %v2821_v49 = vpop.f32.mrf.mxu1 }
 0x16b   :  { %2214 = vmatpush3.bf16.msra.mxu0 %v2321_v2  ;;  %2249 = vmatpush3.bf16.msra.mxu1 %v2321_v2  ;;  %v946_v48 = vadd.f32 %v945_v13, %v2816_v26  ;;  %v973_v8 = vmul.f32 %v2821_v49, %v2821_v49 }
 0x16c   :  { %2215 = vmatprep.subr.bf16.mxu0 %v2322_v34  ;;  %2242 = vmatprep.subr.bf16.mxu1 %v2322_v34  ;;  %v982_v35 = vadd.f32 %v981_v47, %v967_v46  ;;  %v2826_v52 = vpop.f32.mrf.mxu1 }
 0x16d   :  { %v947_v45 = vadd.f32 %v2792_v44, %v946_v48  ;;  %v971_v59 = vmul.f32 %v2826_v52, %v2826_v52 }
 0x16e   :  { %v983_v41 = vadd.f32 %v982_v35, %v968_v40  ;;  %v2831_v57 = vpop.f32.mrf.mxu1 }
 0x16f   :  { %2216 = vmatpush3.bf16.msra.mxu0 %v2322_v34  ;;  %2250 = vmatpush3.bf16.msra.mxu1 %v2322_v34  ;;  %v948_v53 = vadd.f32 %v2808_v42, %v947_v45  ;;  %v974_v14 = vmul.f32 %v2831_v57, %v2831_v57 }
 0x170   :  { %2217 = vmatprep.subr.bf16.mxu0 %v2323_v38  ;;  %2243 = vmatprep.subr.bf16.mxu1 %v2323_v38  ;;  %v984_v56 = vadd.f32 %v983_v41, %v969_v50  ;;  %v2836_v60 = vpop.f32.mrf.mxu1 }
 0x171   :  { %2202 = vmatmul.mubr.msk.bf16.gmra.mxu1 %vm346_vm0, %v1056_v63  ;;  %v949_v58 = vadd.f32 %v948_v53, %v2826_v52  ;;  %v972_v1 = vmul.f32 %v2836_v60, %v2836_v60 }
 0x172   :  { %v985_v61 = vadd.f32 %v984_v56, %v970_v54 }
 0x173   :  { %2218 = vmatpush3.bf16.msra.mxu0 %v2323_v38  ;;  %2251 = vmatpush3.bf16.msra.mxu1 %v2323_v38  ;;  %v950_v62 = vadd.f32 %v949_v58, %v2836_v60 }
 0x174   :  { %2219 = vmatprep.subr.bf16.mxu0 %v2324_v43  ;;  %2244 = vmatprep.subr.bf16.mxu1 %v2324_v43  ;;  %v986_v63 = vadd.f32 %v985_v61, %v971_v59 }
 0x175   :  { %v951_v12 = vadd.f32 %v2821_v49, %v950_v62 }
 0x176   :  { %v987_v9 = vadd.f32 %v986_v63, %v972_v1 }
 0x177   :  { %2220 = vmatpush3.bf16.msra.mxu0 %v2324_v43  ;;  %2252 = vmatpush3.bf16.msra.mxu1 %v2324_v43  ;;  %v952_v10 = vadd.f32 %v2831_v57, %v951_v12 }
 0x178   :  { %v988_v15 = vadd.f32 %v987_v9, %v973_v8 }
 0x179   :  { %v953_v16 = vrot.slane %v952_v10, 4 }
 0x17a   :  { %v989_v18 = vadd.f32 %v988_v15, %v974_v14 }
 0x17b   :  { %v954_v21 = vadd.f32 %v953_v16, %v952_v10 }
 0x17c   :  { %v990_v24 = vrot.slane %v989_v18, 4 }
 0x17d   :  { %v955_v22 = vrot.slane %v954_v21, 2 }
 0x17e   :  { %v991_v31 = vadd.f32 %v990_v24, %v989_v18 }
 0x17f   :  { %v956_v32 = vadd.f32 %v955_v22, %v954_v21 }
 0x180   :  { %v992_v51 = vrot.slane %v991_v31, 2 }
 0x181   :  { %v957_v13 = vrot.slane %v956_v32, 1 }
 0x182   :  { %v993_v47 = vadd.f32 %v992_v51, %v991_v31 }
 0x183   :  { %v958_v54 = vadd.f32 %v957_v13, %v956_v32 }
 0x184   :  { %v994_v58 = vrot.slane %v993_v47, 1 }
 0x185   :  { %v996_v9 = vmul.f32 0.0078125, %v958_v54 }
 0x186   :  { %v995_v14 = vadd.f32 %v994_v58, %v993_v47 }
 0x219   :  { %v2847_v23 = vpop.f32.mrf.mxu1 }
 0x21a   :  { %v1219_v55 = vmul.f32 %v2847_v23, %v2847_v23 }
 0x21b   :  { %v2849_v28 = vpop.f32.mrf.mxu1 }
 0x21c   :  { %v1217_v2 = vmul.f32 %v2849_v28, %v2849_v28 }
 0x21d   :  { %v2851_v30 = vpop.f32.mrf.mxu1 }
 0x21e   :  { %v1220_v39 = vmul.f32 %v2851_v30, %v2851_v30 }
 0x21f   :  { %v2853_v25 = vpop.f32.mrf.mxu1 }
 0x220   :  { %v1196_v29 = vadd.f32 %v2853_v25, %v2849_v28  ;;  %v1218_v33 = vmul.f32 %v2853_v25, %v2853_v25 }
 0x221   :  { %v2861_v34 = vpop.f32.mrf.mxu1 }
 0x222   :  { %v1197_v36 = vadd.f32 %v2847_v23, %v1196_v29  ;;  %v1233_v38 = vadd.f32 %v1218_v33, %v1217_v2  ;;  %v1223_v59 = vmul.f32 %v2861_v34, %v2861_v34  ;;  %v998_v2 = vmul.f32 %v996_v9, %v996_v9 }
 0x223   :  { %v2866_v5 = vpop.f32.mrf.mxu1  ;;  %v997_v33 = vmul.f32 0.0078125, %v995_v14 }
 0x224   :  { %v1234_v19 = vadd.f32 %v1233_v38, %v1219_v55  ;;  %v1198_v43 = vadd.f32 %v2851_v30, %v1197_v36  ;;  %v1221_v35 = vmul.f32 %v2866_v5, %v2866_v5 }
 0x225   :  { %v2871_v46 = vpop.f32.mrf.mxu1  ;;  %v999_v13 = vsub.f32 %v997_v33, %v998_v2 }
 0x226   :  { %v1199_v48 = vadd.f32 %v1198_v43, %v2866_v5  ;;  %v1235_v40 = vadd.f32 %v1234_v19, %v1220_v39  ;;  %v1224_v1 = vmul.f32 %v2871_v46, %v2871_v46 }
 0x227   :  { %v2876_v45 = vpop.f32.mrf.mxu1  ;;  %v1000_v54 = vadd.f32 1e-05, %v999_v13 }
 0x228   :  { %v1236_v50 = vadd.f32 %v1235_v40, %v1221_v35  ;;  %v1200_v41 = vadd.f32 %v1199_v48, %v2876_v45  ;;  %v1222_v53 = vmul.f32 %v2876_v45, %v2876_v45 }
 0x229   :  { %v2881_v56 = vpop.f32.mrf.mxu1  ;;  %2327 = vrsqrt.f32 %v1000_v54 }
 0x22a   :  { %v1201_v61 = vadd.f32 %v2861_v34, %v1200_v41  ;;  %v1237_v62 = vadd.f32 %v1236_v50, %v1222_v53  ;;  %v1227_v32 = vmul.f32 %v2881_v56, %v2881_v56 }
 0x22b   :  { %v2886_v63 = vpop.f32.mrf.mxu1 }
 0x22c   :  { %v1238_v12 = vadd.f32 %v1237_v62, %v1223_v59  ;;  %v1202_v8 = vadd.f32 %v2871_v46, %v1201_v61  ;;  %v1225_v16 = vmul.f32 %v2886_v63, %v2886_v63 }
 0x22d   :  { %v2891_v10 = vpop.f32.mrf.mxu1 }
 0x22e   :  { %v1203_v15 = vadd.f32 %v1202_v8, %v2886_v63  ;;  %v1239_v18 = vadd.f32 %v1238_v12, %v1224_v1  ;;  %v1228_v38 = vmul.f32 %v2891_v10, %v2891_v10 }
 0x22f   :  { %v2896_v21 = vpop.f32.mrf.mxu1 }
 0x230   :  { %v1240_v24 = vadd.f32 %v1239_v18, %v1225_v16  ;;  %v1204_v22 = vadd.f32 %v1203_v15, %v2896_v21  ;;  %v1226_v31 = vmul.f32 %v2896_v21, %v2896_v21 }
 0x231   :  { %v2901_v29 = vpop.f32.mrf.mxu1 }
 0x232   :  { %v1205_v51 = vadd.f32 %v2881_v56, %v1204_v22  ;;  %v1241_v55 = vadd.f32 %v1240_v24, %v1226_v31  ;;  %v1231_v58 = vmul.f32 %v2901_v29, %v2901_v29 }
 0x233   :  { %v2906_v36 = vpop.f32.mrf.mxu1 }
 0x234   :  { %v1242_v39 = vadd.f32 %v1241_v55, %v1227_v32  ;;  %v1206_v19 = vadd.f32 %v2891_v10, %v1205_v51  ;;  %v1229_v48 = vmul.f32 %v2906_v36, %v2906_v36 }
 0x235   :  { %v2911_v43 = vpop.f32.mrf.mxu1 }
 0x236   :  { %v1207_v47 = vadd.f32 %v1206_v19, %v2906_v36  ;;  %v1243_v35 = vadd.f32 %v1242_v39, %v1228_v38  ;;  %v1232_v62 = vmul.f32 %v2911_v43, %v2911_v43  ;;  %v2328_v39 = vpop.eup %2327  ;;  %v936_v19 = vld [vmem:[%s3285_s9] sm:$0x1] }
 0x237   :  { %v2916_v40 = vpop.f32.mrf.mxu1 }
 0x238   :  { %v1244_v50 = vadd.f32 %v1243_v35, %v1229_v48  ;;  %v1208_v41 = vadd.f32 %v1207_v47, %v2916_v40  ;;  %v1230_v53 = vmul.f32 %v2916_v40, %v2916_v40  ;;  %v1002_v48 = vmul.f32 %v2328_v39, %v936_v19 }
 0x23a   :  { %v1209_v59 = vadd.f32 %v2901_v29, %v1208_v41  ;;  %v1245_v61 = vadd.f32 %v1244_v50, %v1230_v53  ;;  %v1003_v41 = vmul.f32 %v1002_v48, %v996_v9  ;;  %v937_v53 = vld [vmem:[%s3286_s10] sm:$0x1] }
 0x23c   :  { %v1210_v1 = vadd.f32 %v2911_v43, %v1209_v59  ;;  %v1246_v12 = vadd.f32 %v1245_v61, %v1231_v58  ;;  %v1004_v54 = vsub.f32 %v937_v53, %v1003_v41  ;;  %v1009_v58 = vrot.slane %v1002_v48, %v2713_v0 }
 0x23e   :  { %v1211_v8 = vrot.slane %v1210_v1, 4  ;;  %v1247_v14 = vadd.f32 %v1246_v12, %v1232_v62  ;;  %v1024_v59 = vmul.f32 %v1009_v58, %v2836_v60  ;;  %v2936_v61 = vrot.slane %v1004_v54, %v2713_v0 }
 0x23f   :  { %v1011_v62 = vmul.f32 %v1009_v58, %v2748_v4  ;;  %v1013_v12 = vmul.f32 %v2746_v3, %v1009_v58  ;;  %v1014_v9 = vmul.f32 %v2750_v6, %v1009_v58  ;;  %v1017_v60 = vmul.f32 %v2760_v11, %v1009_v58 }
 0x240   :  { %v1212_v15 = vadd.f32 %v1211_v8, %v1210_v1  ;;  %v1248_v16 = vrot.slane %v1247_v14, 4  ;;  %v1012_v1 = vmul.f32 %v1009_v58, %v2752_v7  ;;  %v1015_v8 = vmul.f32 %v1009_v58, %v2765_v17 }
 0x241   :  { %v1046_v4 = vadd.f32 %v2936_v61, %v1024_v59  ;;  %v1033_v7 = vadd.f32 %v2936_v61, %v1011_v62  ;;  %v1019_v6 = vmul.f32 %v1009_v58, %v2800_v37  ;;  %v1023_v17 = vmul.f32 %v1009_v58, %v2826_v52  ;;  %v1195_v37 = vld [vmem:[%s3288_s6] sm:$0x1] }
 0x242   :  { %v1213_v18 = vrot.slane %v1212_v15, 2  ;;  %v1249_v24 = vadd.f32 %v1248_v16, %v1247_v14  ;;  %v1194_v14 = vld [vmem:[%s3287_s5] sm:$0x1]  ;;  %v1018_v16 = vmul.f32 %v2773_v27, %v1009_v58  ;;  %v1034_v3 = vadd.f32 %v2936_v61, %v1012_v1 }
 0x243   :  { %v1035_v27 = vadd.f32 %v2936_v61, %v1013_v12  ;;  %v1045_v39 = vadd.f32 %v2936_v61, %v1023_v17 }
 0x244   :  { %v1214_v22 = vadd.f32 %v1213_v18, %v1212_v15  ;;  %v1250_v31 = vrot.slane %v1249_v24, 2  ;;  %v1016_v15 = vmul.f32 %v1009_v58, %v2781_v20  ;;  %v1020_v20 = vmul.f32 %v1009_v58, %v2816_v26 }
 0x245   :  { %v2972_v26 = vadd.f32 %v2936_v61, %v1018_v16 }
 0x246   :  { %v1215_v2 = vrot.slane %v1214_v22, 1  ;;  %v1251_v33 = vadd.f32 %v1250_v31, %v1249_v24  ;;  %v1025_v24 = vmul.f32 %v2821_v49, %v1009_v58  ;;  %v1036_v31 = vadd.f32 %v2936_v61, %v1014_v9 }
 0x247   :  { %v2966_v52 = vadd.f32 %v2936_v61, %v1016_v15  ;;  %v2969_v49 = vadd.f32 %v2936_v61, %v1017_v60 }
 0x248   :  { %v1216_v32 = vadd.f32 %v1215_v2, %v1214_v22  ;;  %v1252_v51 = vrot.slane %v1251_v33, 1  ;;  %v1026_v22 = vmul.f32 %v2831_v57, %v1009_v58  ;;  %v2960_v2 = vadd.f32 %v2936_v61, %v1015_v8 }
 0x249   :  { %v2975_v57 = vmul.f32 %v2792_v44, %v1009_v58  ;;  %v1047_v19 = vadd.f32 %v2936_v61, %v1025_v24 }
 0x24a   :  { %v1253_v55 = vadd.f32 %v1252_v51, %v1251_v33  ;;  %v1254_v38 = vmul.f32 0.0078125, %v1216_v32  ;;  %v2981_v51 = vadd.f32 %v2936_v61, %v1019_v6 }
 0x24c   :  { %v1255_v13 = vmul.f32 0.0078125, %v1253_v55  ;;  %v1256_v47 = vmul.f32 %v1254_v38, %v1254_v38  ;;  %v2984_v55 = vmul.f32 %v2808_v42, %v1009_v58 }
 0x24e   :  { %v1257_v35 = vsub.f32 %v1255_v13, %v1256_v47  ;;  %v1048_v13 = vadd.f32 %v2936_v61, %v1026_v22  ;;  %v2990_v47 = vadd.f32 %v2936_v61, %v1020_v20 }
 0x250   :  { %v1258_v50 = vadd.f32 1e-05, %v1257_v35 }
 0x252   :  { %2329 = vrsqrt.f32 %v1258_v50 }
 0x25f   :  { %v2330_v18 = vpop.eup %2329 }
 0x260   :  { %v1260_v11 = vmul.f32 %v2330_v18, %v1194_v14 }
 0x262   :  { %v1261_v33 = vmul.f32 %v1260_v11, %v1254_v38  ;;  %v2978_v32 = vrot.slane %v1260_v11, %v2713_v0 }
 0x264   :  { %v1262_v44 = vsub.f32 %v1195_v37, %v1261_v33  ;;  %v1282_v38 = vmul.f32 %v2978_v32, %v2916_v40  ;;  %v1269_v48 = vmul.f32 %v2978_v32, %v2849_v28  ;;  %v1270_v42 = vmul.f32 %v2978_v32, %v2853_v25 }
 0x265   :  { %v1281_v35 = vmul.f32 %v2978_v32, %v2906_v36  ;;  %v1271_v50 = vmul.f32 %v2847_v23, %v2978_v32  ;;  %v1272_v41 = vmul.f32 %v2851_v30, %v2978_v32  ;;  %v1283_v53 = vmul.f32 %v2901_v29, %v2978_v32 }
 0x266   :  { %v3007_v40 = vrot.slane %v1262_v44, %v2713_v0  ;;  %v1284_v28 = vmul.f32 %v2911_v43, %v2978_v32  ;;  %v1273_v25 = vmul.f32 %v2978_v32, %v2866_v5  ;;  %v1274_v36 = vmul.f32 %v2978_v32, %v2876_v45 }
 0x267   :  { %v1275_v23 = vmul.f32 %v2861_v34, %v2978_v32  ;;  %v1276_v30 = vmul.f32 %v2871_v46, %v2978_v32  ;;  %v1277_v29 = vmul.f32 %v2978_v32, %v2886_v63  ;;  %v1278_v54 = vmul.f32 %v2978_v32, %v2896_v21 }
 0x268   :  { %v1304_v43 = vadd.f32 %v3007_v40, %v1282_v38  ;;  %v1291_v58 = vadd.f32 %v3007_v40, %v1269_v48  ;;  %v1292_v5 = vadd.f32 %v3007_v40, %v1270_v42  ;;  %v1303_v45 = vadd.f32 %v3007_v40, %v1281_v35 }
 0x269   :  { %v1293_v59 = vadd.f32 %v3007_v40, %v1271_v50  ;;  %v1294_v34 = vadd.f32 %v3007_v40, %v1272_v41  ;;  %v1305_v46 = vadd.f32 %v3007_v40, %v1283_v53  ;;  %v1306_v62 = vadd.f32 %v3007_v40, %v1284_v28 }
 0x26a   :  { %v1307_v63 = vadd.f32 %v1291_v58, %v1033_v7  ;;  %v1308_v1 = vadd.f32 %v1292_v5, %v1034_v3  ;;  %v1319_v12 = vadd.f32 %v1303_v45, %v1045_v39  ;;  %v1320_v21 = vadd.f32 %v1304_v43, %v1046_v4 }
 0x26b   :  { %v1309_v9 = vadd.f32 %v1293_v59, %v1035_v27  ;;  %v1310_v8 = vadd.f32 %v1294_v34, %v1036_v31  ;;  %v1321_v14 = vadd.f32 %v1305_v46, %v1047_v19  ;;  %v1322_v15 = vadd.f32 %v1306_v62, %v1048_v13 }
 0x26c   :  { %v1323_v60 = vmax.f32 %v1307_v63, 0.0  ;;  %v1324_v16 = vmax.f32 %v1308_v1, 0.0  ;;  %v1335_v6 = vmax.f32 %v1319_v12, 0.0  ;;  %v1336_v18 = vmax.f32 %v1320_v21, 0.0 }
 0x26d   :  { %v1325_v17 = vmax.f32 %v1309_v9, 0.0  ;;  %v1326_v24 = vmax.f32 %v1310_v8, 0.0  ;;  %v1337_v22 = vmax.f32 %v1321_v14, 0.0  ;;  %v1338_v20 = vmax.f32 %v1322_v15, 0.0 }
 0x26e   :  { %v1339_v11 = vpack.c.bf16 %v1324_v16, %v1323_v60  ;;  %v1345_v37 = vpack.c.bf16 %v1336_v18, %v1335_v6  ;;  %v1295_v33 = vadd.f32 %v3007_v40, %v1273_v25  ;;  %v1296_v7 = vadd.f32 %v3007_v40, %v1274_v36 }
 0x26f   :  { %v1340_v3 = vpack.c.bf16 %v1326_v24, %v1325_v17  ;;  %v1346_v4 = vpack.c.bf16 %v1338_v20, %v1337_v22  ;;  %v1297_v27 = vadd.f32 %v3007_v40, %v1275_v23  ;;  %v1298_v31 = vadd.f32 %v3007_v40, %v1276_v30 }
 0x270   :  { %1986 = vst [vmem:[%s3289_s14] sm:$0xff] %v1339_v11   ;;  %2221 = vmatprep.mubr.bf16.mxu0 %v1339_v11  ;;  %2027 = vst [vmem:[%s3289_s14 + $0x30] sm:$0xff] %v1345_v37   ;;  %2233 = vmatprep.mubr.bf16.mxu1 %v1345_v37  ;;  %v1311_v39 = vadd.f32 %v1295_v33, %v2960_v2  ;;  %v1312_v19 = vadd.f32 %v1296_v7, %v2966_v52 }
 0x271   :  { %v1299_v13 = vadd.f32 %v3007_v40, %v1277_v29  ;;  %2022 = vst [vmem:[%s3289_s14 + $0x8] sm:$0xff] %v1340_v3   ;;  %2222 = vmatmul.mubr.bf16.vlgmr.msra.gmra.mxu0 %v1340_v3  ;;  %2028 = vst [vmem:[%s3289_s14 + $0x38] sm:$0xff] %v1346_v4   ;;  %2234 = vmatmul.mubr.bf16.vlgmr.msra.gmra.mxu1 %v1346_v4  ;;  %v1313_v44 = vadd.f32 %v1297_v27, %v2969_v49 }
 0x272   :  { %v1314_v38 = vadd.f32 %v1298_v31, %v2972_v26  ;;  %v1300_v2 = vadd.f32 %v3007_v40, %v1278_v54  ;;  %v1327_v48 = vmax.f32 %v1311_v39, 0.0  ;;  %v1328_v52 = vmax.f32 %v1312_v19, 0.0 }
 0x273   :  { %v1315_v42 = vadd.f32 %v1299_v13, %v2981_v51  ;;  %v1279_v35 = vmul.f32 %v2881_v56, %v2978_v32  ;;  %v1329_v50 = vmax.f32 %v1313_v44, 0.0  ;;  %v1280_v28 = vmul.f32 %v2891_v10, %v2978_v32 }
 0x274   :  { %v1330_v41 = vmax.f32 %v1314_v38, 0.0  ;;  %v1316_v53 = vadd.f32 %v1300_v2, %v2990_v47  ;;  %v1341_v25 = vpack.c.bf16 %v1328_v52, %v1327_v48  ;;  %v1043_v26 = vadd.f32 %v2936_v61, %v2975_v57 }
 0x275   :  { %v1331_v49 = vmax.f32 %v1315_v42, 0.0  ;;  %v1301_v36 = vadd.f32 %v3007_v40, %v1279_v35  ;;  %v1044_v51 = vadd.f32 %v2936_v61, %v2984_v55  ;;  %v1302_v56 = vadd.f32 %v3007_v40, %v1280_v28 }
 0x276   :  { %v1342_v23 = vpack.c.bf16 %v1330_v41, %v1329_v50  ;;  %v1332_v30 = vmax.f32 %v1316_v53, 0.0  ;;  %2023 = vst [vmem:[%s3289_s14 + $0x10] sm:$0xff] %v1341_v25   ;;  %2225 = vmatprep.mubr.bf16.mxu0 %v1341_v25 }
 0x277   :  { %v1317_v10 = vadd.f32 %v1301_v36, %v1043_v26  ;;  %v1318_v32 = vadd.f32 %v1302_v56, %v1044_v51 }
 0x278   :  { %2024 = vst [vmem:[%s3289_s14 + $0x18] sm:$0xff] %v1342_v23   ;;  %v1343_v57 = vpack.c.bf16 %v1332_v30, %v1331_v49 }
 0x279   :  { %v1333_v47 = vmax.f32 %v1317_v10, 0.0  ;;  %2226 = vmatmul.mubr.bf16.gmra.mxu0 %v1342_v23  ;;  %v1334_v61 = vmax.f32 %v1318_v32, 0.0 }
 0x27a   :  { %2025 = vst [vmem:[%s3289_s14 + $0x20] sm:$0xff] %v1343_v57   ;;  %2229 = vmatprep.mubr.bf16.mxu0 %v1343_v57 }
 0x27b   :  { %v1344_v55 = vpack.c.bf16 %v1334_v61, %v1333_v47 }
 0x27d   :  { %2026 = vst [vmem:[%s3289_s14 + $0x28] sm:$0xff] %v1344_v55  }
 0x281   :  { %2230 = vmatmul.mubr.bf16.gmra.mxu0 %v1344_v55 }
 0x331   :  { %v3077_v40 = vpop.f32.mrf.mxu0  ;;  %v3115_v20 = vpop.f32.mrf.mxu1 }
 0x332   :  { %v1621_v5 = vmul.f32 %v3077_v40, %v3077_v40  ;;  %v1585_v63 = vsel %vm814_vm1, %v3077_v40, 0.0 }
 0x333   :  { %v3079_v29 = vpop.f32.mrf.mxu0  ;;  %v3133_v2 = vpop.f32.mrf.mxu1 }
 0x334   :  { %v1619_v43 = vmul.f32 %v3079_v29, %v3079_v29  ;;  %v1582_v45 = vsel %vm814_vm1, %v3079_v29, 0.0  ;;  %v1638_v15 = vsel %vm814_vm1, %v1621_v5, 0.0 }
 0x335   :  { %v3081_v54 = vpop.f32.mrf.mxu0  ;;  %v3147_v36 = vpop.f32.mrf.mxu1 }
 0x336   :  { %v1635_v1 = vsel %vm814_vm1, %v1619_v43, 0.0  ;;  %v1622_v12 = vmul.f32 %v3081_v54, %v3081_v54  ;;  %v1587_v60 = vsel %vm814_vm1, %v3081_v54, 0.0 }
 0x337   :  { %v3085_v58 = vpop.f32.mrf.mxu0 }
 0x338   :  { %v1583_v59 = vsel %vm814_vm1, %v3085_v58, 0.0  ;;  %v1620_v34 = vmul.f32 %v3085_v58, %v3085_v58  ;;  %v1640_v24 = vsel %vm814_vm1, %v1622_v12, 0.0 }
 0x339   :  { %v1584_v46 = vadd.f32 %v1583_v59, %v1582_v45  ;;  %v3095_v62 = vpop.f32.mrf.mxu0  ;;  %v3163_v45 = vpop.f32.mrf.mxu1 }
 0x33a   :  { %v1636_v21 = vsel %vm814_vm1, %v1620_v34, 0.0  ;;  %v1625_v7 = vmul.f32 %v3095_v62, %v3095_v62  ;;  %v1593_v13 = vsel %vm814_vm1, %v3095_v62, 0.0 }
 0x33b   :  { %v1586_v9 = vadd.f32 %v1585_v63, %v1584_v46  ;;  %v1637_v8 = vadd.f32 %v1636_v21, %v1635_v1  ;;  %v3103_v14 = vpop.f32.mrf.mxu0  ;;  %v1631_v46 = vmul.f32 %v3133_v2, %v3133_v2 }
 0x33c   :  { %v1623_v16 = vmul.f32 %v3103_v14, %v3103_v14  ;;  %v1589_v22 = vsel %vm814_vm1, %v3103_v14, 0.0  ;;  %v1646_v35 = vsel %vm814_vm1, %v1625_v7, 0.0  ;;  %v1634_v7 = vmul.f32 %v3147_v36, %v3147_v36 }
 0x33d   :  { %v1639_v6 = vadd.f32 %v1638_v15, %v1637_v8  ;;  %v1588_v18 = vadd.f32 %v1587_v60, %v1586_v9  ;;  %v3110_v17 = vpop.f32.mrf.mxu0  ;;  %v1605_v9 = vsel %vm814_vm1, %v3133_v2, 0.0  ;;  %v1632_v8 = vmul.f32 %v3163_v45, %v3163_v45 }
 0x33e   :  { %v1642_v3 = vsel %vm814_vm1, %v1623_v16, 0.0  ;;  %v1626_v44 = vmul.f32 %v3110_v17, %v3110_v17  ;;  %v1595_v50 = vsel %vm814_vm1, %v3110_v17, 0.0 }
 0x33f   :  { %v1590_v11 = vadd.f32 %v1589_v22, %v1588_v18  ;;  %v1641_v37 = vadd.f32 %v1640_v24, %v1639_v6  ;;  %v3117_v33 = vpop.f32.mrf.mxu0  ;;  %v1633_v6 = vmul.f32 %v3115_v20, %v3115_v20  ;;  %v1658_v18 = vsel %vm814_vm1, %v1631_v46, 0.0 }
 0x340   :  { %v1591_v4 = vsel %vm814_vm1, %v3117_v33, 0.0  ;;  %v1624_v27 = vmul.f32 %v3117_v33, %v3117_v33  ;;  %v1648_v49 = vsel %vm814_vm1, %v1626_v44, 0.0  ;;  %v1607_v24 = vsel %vm814_vm1, %v3163_v45, 0.0 }
 0x341   :  { %v1643_v31 = vadd.f32 %v1642_v3, %v1641_v37  ;;  %v1592_v39 = vadd.f32 %v1591_v4, %v1590_v11  ;;  %v3126_v19 = vpop.f32.mrf.mxu0  ;;  %v1609_v37 = vsel %vm814_vm1, %v3115_v20, 0.0  ;;  %v1660_v3 = vsel %vm814_vm1, %v1632_v8, 0.0 }
 0x342   :  { %v1644_v38 = vsel %vm814_vm1, %v1624_v27, 0.0  ;;  %v1629_v56 = vmul.f32 %v3126_v19, %v3126_v19  ;;  %v1601_v55 = vsel %vm814_vm1, %v3126_v19, 0.0 }
 0x343   :  { %v1594_v48 = vadd.f32 %v1593_v13, %v1592_v39  ;;  %v1645_v52 = vadd.f32 %v1644_v38, %v1643_v31  ;;  %v3135_v42 = vpop.f32.mrf.mxu0  ;;  %v1662_v31 = vsel %vm814_vm1, %v1633_v6, 0.0  ;;  %v1611_v39 = vsel %vm814_vm1, %v3147_v36, 0.0 }
 0x344   :  { %v1627_v41 = vmul.f32 %v3135_v42, %v3135_v42  ;;  %v1597_v26 = vsel %vm814_vm1, %v3135_v42, 0.0  ;;  %v1654_v63 = vsel %vm814_vm1, %v1629_v56, 0.0  ;;  %v1664_v38 = vsel %vm814_vm1, %v1634_v7, 0.0 }
 0x345   :  { %v1647_v53 = vadd.f32 %v1646_v35, %v1645_v52  ;;  %v1596_v28 = vadd.f32 %v1595_v50, %v1594_v48  ;;  %v3142_v25 = vpop.f32.mrf.mxu0 }
 0x346   :  { %v1650_v10 = vsel %vm814_vm1, %v1627_v41, 0.0  ;;  %v1630_v43 = vmul.f32 %v3142_v25, %v3142_v25  ;;  %v1603_v1 = vsel %vm814_vm1, %v3142_v25, 0.0 }
 0x347   :  { %v1598_v23 = vadd.f32 %v1597_v26, %v1596_v28  ;;  %v1649_v30 = vadd.f32 %v1648_v49, %v1647_v53  ;;  %v3149_v51 = vpop.f32.mrf.mxu0 }
 0x348   :  { %v1599_v57 = vsel %vm814_vm1, %v3149_v51, 0.0  ;;  %v1628_v32 = vmul.f32 %v3149_v51, %v3149_v51  ;;  %v1656_v15 = vsel %vm814_vm1, %v1630_v43, 0.0  ;;  %v1580_v43 = vld [vmem:[%s3290_s12] sm:$0x1] }
 0x349   :  { %v1651_v47 = vadd.f32 %v1650_v10, %v1649_v30  ;;  %v1600_v61 = vadd.f32 %v1599_v57, %v1598_v23 }
 0x34a   :  { %v1652_v5 = vsel %vm814_vm1, %v1628_v32, 0.0 }
 0x34b   :  { %v1602_v59 = vadd.f32 %v1601_v55, %v1600_v61  ;;  %v1653_v34 = vadd.f32 %v1652_v5, %v1651_v47 }
 0x34d   :  { %v1604_v12 = vadd.f32 %v1603_v1, %v1602_v59  ;;  %v1655_v21 = vadd.f32 %v1654_v63, %v1653_v34  ;;  %v1581_v34 = vld [vmem:[%s3291_s13] sm:$0x1] }
 0x34f   :  { %v1606_v60 = vadd.f32 %v1605_v9, %v1604_v12  ;;  %v1657_v16 = vadd.f32 %v1656_v15, %v1655_v21 }
 0x351   :  { %v1608_v22 = vadd.f32 %v1607_v24, %v1606_v60  ;;  %v1659_v11 = vadd.f32 %v1658_v18, %v1657_v16 }
 0x353   :  { %v1610_v4 = vadd.f32 %v1609_v37, %v1608_v22  ;;  %v1661_v27 = vadd.f32 %v1660_v3, %v1659_v11 }
 0x355   :  { %v1612_v13 = vadd.f32 %v1611_v39, %v1610_v4  ;;  %v1663_v44 = vadd.f32 %v1662_v31, %v1661_v27 }
 0x357   :  { %v1613_v48 = vrot.slane %v1612_v13, 4  ;;  %v1665_v52 = vadd.f32 %v1664_v38, %v1663_v44 }
 0x359   :  { %v1614_v35 = vadd.f32 %v1613_v48, %v1612_v13  ;;  %v1666_v50 = vrot.slane %v1665_v52, 4 }
 0x35b   :  { %v1615_v41 = vrot.slane %v1614_v35, 2  ;;  %v1667_v53 = vadd.f32 %v1666_v50, %v1665_v52 }
 0x35d   :  { %v1616_v28 = vadd.f32 %v1615_v41, %v1614_v35  ;;  %v1668_v49 = vrot.slane %v1667_v53, 2 }
 0x35f   :  { %v1617_v26 = vrot.slane %v1616_v28, 1  ;;  %v1669_v23 = vadd.f32 %v1668_v49, %v1667_v53 }
 0x361   :  { %v1618_v30 = vadd.f32 %v1617_v26, %v1616_v28  ;;  %v1670_v56 = vrot.slane %v1669_v23, 1 }
 0x363   :  { %v1671_v10 = vadd.f32 %v1670_v56, %v1669_v23  ;;  %v1672_v57 = vmul.f32 0.0078125, %v1618_v30 }
 0x365   :  { %v1673_v32 = vmul.f32 0.0078125, %v1671_v10  ;;  %v1674_v47 = vmul.f32 %v1672_v57, %v1672_v57 }
 0x367   :  { %v1675_v61 = vsub.f32 %v1673_v32, %v1674_v47 }
 0x369   :  { %v1676_v55 = vadd.f32 1e-05, %v1675_v61 }
 0x36b   :  { %2331 = vrsqrt.f32 %v1676_v55 }
 0x378   :  { %v2332_v5 = vpop.eup %2331 }
 0x379   :  { %v1678_v59 = vmul.f32 %v2332_v5, %v1580_v43 }
 0x37b   :  { %v1679_v46 = vmul.f32 %v1678_v59, %v1672_v57  ;;  %v1685_v63 = vrot.slane %v1678_v59, %v2713_v0 }
 0x37d   :  { %v1680_v1 = vsub.f32 %v1581_v34, %v1679_v46  ;;  %v1687_v12 = vmul.f32 %v1685_v63, %v3079_v29  ;;  %v1688_v21 = vmul.f32 %v1685_v63, %v3085_v58  ;;  %v1689_v9 = vmul.f32 %v3077_v40, %v1685_v63 }
 0x37e   :  { %v1690_v8 = vmul.f32 %v3081_v54, %v1685_v63  ;;  %v1691_v15 = vmul.f32 %v1685_v63, %v3103_v14  ;;  %v1692_v60 = vmul.f32 %v1685_v63, %v3117_v33  ;;  %v1693_v16 = vmul.f32 %v3095_v62, %v1685_v63 }
 0x37f   :  { %v1694_v6 = vmul.f32 %v3110_v17, %v1685_v63  ;;  %v1695_v18 = vmul.f32 %v1685_v63, %v3135_v42  ;;  %v1696_v24 = vmul.f32 %v1685_v63, %v3149_v51  ;;  %v1697_v29 = vmul.f32 %v3126_v19, %v1685_v63 }
 0x380   :  { %v1698_v58 = vmul.f32 %v3142_v25, %v1685_v63  ;;  %v1707_v40 = vrot.slane %v1680_v1, %v2713_v0  ;;  %v1699_v54 = vmul.f32 %v1685_v63, %v3133_v2  ;;  %v1700_v14 = vmul.f32 %v1685_v63, %v3163_v45 }
 0x381   :  { %v1701_v33 = vmul.f32 %v3115_v20, %v1685_v63  ;;  %v1702_v62 = vmul.f32 %v3147_v36, %v1685_v63 }
 0x382   :  { %v1709_v17 = vadd.f32 %v1707_v40, %v1687_v12  ;;  %v1710_v22 = vadd.f32 %v1707_v40, %v1688_v21  ;;  %v1711_v42 = vadd.f32 %v1707_v40, %v1689_v9  ;;  %v1712_v11 = vadd.f32 %v1707_v40, %v1690_v8 }
 0x383   :  { %v1713_v51 = vadd.f32 %v1707_v40, %v1691_v15  ;;  %v1714_v37 = vadd.f32 %v1707_v40, %v1692_v60  ;;  %v1715_v19 = vadd.f32 %v1707_v40, %v1693_v16  ;;  %v1716_v7 = vadd.f32 %v1707_v40, %v1694_v6 }
 0x384   :  { %v1717_v25 = vadd.f32 %v1707_v40, %v1695_v18  ;;  %v1718_v3 = vadd.f32 %v1707_v40, %v1696_v24  ;;  %v1719_v0 = vadd.f32 %v1707_v40, %v1697_v29  ;;  %v1720_v4 = vadd.f32 %v1707_v40, %v1698_v58 }
 0x385   :  { %v1721_v2 = vadd.f32 %v1707_v40, %v1699_v54  ;;  %v1722_v27 = vadd.f32 %v1707_v40, %v1700_v14  ;;  %v1723_v45 = vadd.f32 %v1707_v40, %v1701_v33  ;;  %v1724_v31 = vadd.f32 %v1707_v40, %v1702_v62 }
 0x386   :  { %v1725_v20 = vmax.f32 %v1709_v17, 0.0  ;;  %v1726_v39 = vmax.f32 %v1710_v22, 0.0  ;;  %v1727_v36 = vmax.f32 %v1711_v42, 0.0  ;;  %v1728_v13 = vmax.f32 %v1712_v11, 0.0 }
 0x387   :  { %v1729_v44 = vmax.f32 %v1713_v51, 0.0  ;;  %v1730_v38 = vmax.f32 %v1714_v37, 0.0  ;;  %v1731_v48 = vmax.f32 %v1715_v19, 0.0  ;;  %v1732_v52 = vmax.f32 %v1716_v7, 0.0 }
 0x388   :  { %v1733_v35 = vmax.f32 %v1717_v25, 0.0  ;;  %v1734_v50 = vmax.f32 %v1718_v3, 0.0  ;;  %v1735_v41 = vmax.f32 %v1719_v0, 0.0  ;;  %v1736_v53 = vmax.f32 %v1720_v4, 0.0 }
 0x389   :  { %v1737_v28 = vmax.f32 %v1721_v2, 0.0  ;;  %v1738_v49 = vmax.f32 %v1722_v27, 0.0  ;;  %v1739_v26 = vmax.f32 %v1723_v45, 0.0  ;;  %v1740_v23 = vmax.f32 %v1724_v31, 0.0 }
 0x38a   :  { %v1966_v30 = vpack.c.bf16 %v1725_v20, %v1725_v20  ;;  %v1967_v56 = vpack.c.bf16 %v1726_v39, %v1726_v39  ;;  %v1968_v10 = vpack.c.bf16 %v1727_v36, %v1727_v36  ;;  %v1969_v57 = vpack.c.bf16 %v1728_v13, %v1728_v13 }
 0x38b   :  { %v1970_v32 = vpack.c.bf16 %v1729_v44, %v1729_v44  ;;  %v1971_v47 = vpack.c.bf16 %v1730_v38, %v1730_v38  ;;  %v1972_v61 = vpack.c.bf16 %v1731_v48, %v1731_v48  ;;  %v1973_v55 = vpack.c.bf16 %v1732_v52, %v1732_v52 }
 0x38c   :  { %v1974_v43 = vpack.c.bf16 %v1733_v35, %v1733_v35  ;;  %v1975_v5 = vpack.c.bf16 %v1734_v50, %v1734_v50  ;;  %v1976_v59 = vpack.c.bf16 %v1735_v41, %v1735_v41  ;;  %v1977_v34 = vpack.c.bf16 %v1736_v53, %v1736_v53  ;;  %1806 = vst.msk [vmem:[%s3292_s15] sm:$0xf] %vm1805_vm2, %v1966_v30 }
 0x38d   :  { %1807 = vst.msk [vmem:[%s3292_s15 + $0x4] sm:$0xf] %vm1805_vm2, %v1967_v56  ;;  %1808 = vst.msk [vmem:[%s3292_s15 + $0x8] sm:$0xf] %vm1805_vm2, %v1968_v10  ;;  %v1978_v46 = vpack.c.bf16 %v1737_v28, %v1737_v28  ;;  %v1979_v63 = vpack.c.bf16 %v1738_v49, %v1738_v49  ;;  %v1980_v1 = vpack.c.bf16 %v1739_v26, %v1739_v26 }
 0x38e   :  { %1809 = vst.msk [vmem:[%s3292_s15 + $0xc] sm:$0xf] %vm1805_vm2, %v1969_v57  ;;  %v1981_v12 = vpack.c.bf16 %v1740_v23, %v1740_v23  ;;  %1810 = vst.msk [vmem:[%s3292_s15 + $0x10] sm:$0xf] %vm1805_vm2, %v1970_v32 }
 0x38f   :  { %1811 = vst.msk [vmem:[%s3292_s15 + $0x14] sm:$0xf] %vm1805_vm2, %v1971_v47  ;;  %1812 = vst.msk [vmem:[%s3292_s15 + $0x18] sm:$0xf] %vm1805_vm2, %v1972_v61 }
 0x390   :  { %1813 = vst.msk [vmem:[%s3292_s15 + $0x1c] sm:$0xf] %vm1805_vm2, %v1973_v55  ;;  %1814 = vst.msk [vmem:[%s3292_s15 + $0x20] sm:$0xf] %vm1805_vm2, %v1974_v43 }
 0x391   :  { %1815 = vst.msk [vmem:[%s3292_s15 + $0x24] sm:$0xf] %vm1805_vm2, %v1975_v5  ;;  %1816 = vst.msk [vmem:[%s3292_s15 + $0x28] sm:$0xf] %vm1805_vm2, %v1976_v59 }
 0x392   :  { %1817 = vst.msk [vmem:[%s3292_s15 + $0x2c] sm:$0xf] %vm1805_vm2, %v1977_v34  ;;  %1818 = vst.msk [vmem:[%s3292_s15 + $0x30] sm:$0xf] %vm1805_vm2, %v1978_v46 }
 0x393   :  { %1819 = vst.msk [vmem:[%s3292_s15 + $0x34] sm:$0xf] %vm1805_vm2, %v1979_v63  ;;  %1820 = vst.msk [vmem:[%s3292_s15 + $0x38] sm:$0xf] %vm1805_vm2, %v1980_v1 }
 0x394   :  { %1821 = vst.msk [vmem:[%s3292_s15 + $0x3c] sm:$0xf] %vm1805_vm2, %v1981_v12 }

// kernel: _lambda_.7
= control target key start
LH: loop header
LB: loop body
LE: loop exit
PB: predicated region body
PF: predicated region fallthrough
CT: control target
= control target key end

     0   :  { %vm389_vm0 = vcmask 523264   ;;  %v1460_v63 = vmov 0   ;;  %s1913_s1 = inlined_call_operand.vmem [shape: bf16[576,64], index: 1, kind: input, shape index: {}]   ;;  %s1914_s0 = inlined_call_operand.vmem [shape: bf16[32,576], index: 0, kind: input, shape index: {}]   ;;  %s1915_s8 = inlined_call_operand.vmem [shape: bf16[128,256], index: 8, kind: input, shape index: {}]   ;;  %s1916_s7 = inlined_call_operand.vmem [shape: bf16[32,128], index: 7, kind: input, shape index: {}]   ;;  %s1917_s4 = inlined_call_operand.vmem [shape: bf16[64,256], index: 4, kind: input, shape index: {}]   ;;  %s1918_s2 = inlined_call_operand.vmem [shape: f32[1,64], index: 2, kind: input, shape index: {}]   ;;  %s1919_s3 = inlined_call_operand.vmem [shape: f32[1,64], index: 3, kind: input, shape index: {}]   ;;  %s1920_s9 = inlined_call_operand.vmem [shape: f32[1,256], index: 9, kind: input, shape index: {}, may-alias: {5,9}]   ;;  %s1921_s5 = inlined_call_operand.vmem [shape: f32[1,256], index: 5, kind: input, shape index: {}, may-alias: {5,9}]   ;;  %s1922_s10 = inlined_call_operand.vmem [shape: f32[1,256], index: 10, kind: input, shape index: {}, may-alias: {6,10}]   ;;  %s1923_s6 = inlined_call_operand.vmem [shape: f32[1,256], index: 6, kind: input, shape index: {}, may-alias: {6,10}]   ;;  %s1924_s11 = inlined_call_operand.vmem [shape: bf16[32,256], index: 11, kind: output, shape index: {}]  }
   0x1   :  { %v1362_v0 = vld [vmem:[%s1913_s1 + $0x78] sm:$0xff]   ;;  %v1366_v4 = vld [vmem:[%s1913_s1 + $0x70] sm:$0xff]   ;;  %v1370_v8 = vld [vmem:[%s1913_s1 + $0x68] sm:$0xff]  }
   0x2   :  { %v1363_v1 = vld [vmem:[%s1913_s1 + $0xf8] sm:$0xff]   ;;  %1286 = vmatprep.subr.bf16.mxu0 %v1362_v0  ;;  %v1367_v5 = vld [vmem:[%s1913_s1 + $0xf0] sm:$0xff]   ;;  %v1371_v9 = vld [vmem:[%s1913_s1 + $0xe8] sm:$0xff]  }
   0x3   :  { %v1364_v2 = vld [vmem:[%s1913_s1 + $0x38] sm:$0xff]   ;;  %1314 = vmatprep.subr.bf16.mxu1 %v1363_v1  ;;  %v1368_v6 = vld [vmem:[%s1913_s1 + $0x30] sm:$0xff]   ;;  %v1372_v10 = vld [vmem:[%s1913_s1 + $0x28] sm:$0xff]  }
   0x4   :  { %v1365_v3 = vld [vmem:[%s1913_s1 + $0xb8] sm:$0xff]   ;;  %1287 = vmatpush3.bf16.msra.mxu0 %v1364_v2  ;;  %v1369_v7 = vld [vmem:[%s1913_s1 + $0xb0] sm:$0xff]   ;;  %v1373_v11 = vld [vmem:[%s1913_s1 + $0xa8] sm:$0xff]  }
   0x5   :  { %1315 = vmatpush3.bf16.msra.mxu1 %v1365_v3  ;;  %1288 = vmatprep.subr.bf16.mxu0 %v1366_v4  ;;  %v1374_v12 = vld [vmem:[%s1913_s1 + $0x60] sm:$0xff]   ;;  %v1378_v16 = vld [vmem:[%s1913_s1 + $0x58] sm:$0xff]   ;;  %v1382_v20 = vld [vmem:[%s1913_s1 + $0x50] sm:$0xff]  }
   0x6   :  { %1316 = vmatprep.subr.bf16.mxu1 %v1367_v5  ;;  %v1375_v13 = vld [vmem:[%s1913_s1 + $0xe0] sm:$0xff]   ;;  %v1379_v17 = vld [vmem:[%s1913_s1 + $0xd8] sm:$0xff]   ;;  %v1383_v21 = vld [vmem:[%s1913_s1 + $0xd0] sm:$0xff]  }
   0x7   :  { %v1376_v14 = vld [vmem:[%s1913_s1 + $0x20] sm:$0xff]   ;;  %v1380_v18 = vld [vmem:[%s1913_s1 + $0x18] sm:$0xff]   ;;  %v1384_v22 = vld [vmem:[%s1913_s1 + $0x10] sm:$0xff]  }
   0x8   :  { %1289 = vmatpush3.bf16.msra.mxu0 %v1368_v6  ;;  %v1377_v15 = vld [vmem:[%s1913_s1 + $0xa0] sm:$0xff]   ;;  %v1381_v19 = vld [vmem:[%s1913_s1 + $0x98] sm:$0xff]   ;;  %v1385_v23 = vld [vmem:[%s1913_s1 + $0x90] sm:$0xff]  }
   0x9   :  { %1317 = vmatpush3.bf16.msra.mxu1 %v1369_v7  ;;  %1290 = vmatprep.subr.bf16.mxu0 %v1370_v8  ;;  %v1386_v24 = vld [vmem:[%s1913_s1 + $0x48] sm:$0xff]   ;;  %v1390_v28 = vld [vmem:[%s1913_s1 + $0x40] sm:$0xff]   ;;  %v1400_v36 = vld [vmem:[%s1913_s1 + $0x118] sm:$0xff]  }
   0xa   :  { %1318 = vmatprep.subr.bf16.mxu1 %v1371_v9  ;;  %v1387_v25 = vld [vmem:[%s1913_s1 + $0xc8] sm:$0xff]   ;;  %v1391_v29 = vld [vmem:[%s1913_s1 + $0xc0] sm:$0xff]   ;;  %v1401_v37 = vld [vmem:[%s1913_s1 + $0x110] sm:$0xff]  }
   0xb   :  { %v1388_v26 = vld [vmem:[%s1913_s1 + $0x8] sm:$0xff]   ;;  %v1392_v30 = vld [vmem:[%s1913_s1] sm:$0xff]   ;;  %v1412_v45 = vld [vmem:[%s1915_s8 + $0x70] ss:$8 sps:$4 sm:$0xff]  }
   0xc   :  { %1291 = vmatpush3.bf16.msra.mxu0 %v1372_v10  ;;  %v1389_v27 = vld [vmem:[%s1913_s1 + $0x88] sm:$0xff]   ;;  %v1393_v31 = vld [vmem:[%s1913_s1 + $0x80] sm:$0xff]   ;;  %v1414_v46 = vld [vmem:[%s1915_s8 + $0x74] ss:$8 sps:$4 sm:$0xff]  }
   0xd   :  { %1319 = vmatpush3.bf16.msra.mxu1 %v1373_v11  ;;  %1292 = vmatprep.subr.bf16.mxu0 %v1374_v12  ;;  %v1394_v32 = vld [vmem:[%s1914_s0] ss:$20 sps:$4 sm:$0xff]   ;;  %v1396_v33 = vld [vmem:[%s1914_s0 + $0x4] ss:$20 sps:$4 sm:$0xff]   ;;  %v1397_v34 = vld [vmem:[%s1914_s0 + $0x8] ss:$20 sps:$4 sm:$0xff]  }
   0xe   :  { %1320 = vmatprep.subr.bf16.mxu1 %v1375_v13  ;;  %v1399_v35 = vld [vmem:[%s1914_s0 + $0xc] ss:$20 sps:$4 sm:$0xff]   ;;  %428 = vmatprep.mubr.bf16.mxu0 %v1396_v33  ;;  %v1404_v39 = vld [vmem:[%s1914_s0 + $0x34] ss:$20 sps:$4 sm:$0xff]   ;;  %v1407_v42 = vld [vmem:[%s1914_s0 + $0x30] ss:$20 sps:$4 sm:$0xff]  }
   0xf   :  { %477 = vmatprep.mubr.bf16.mxu1 %v1399_v35  ;;  %v1402_v38 = vld [vmem:[%s1914_s0 + $0x2c] ss:$20 sps:$4 sm:$0xff]   ;;  %v1406_v40 = vld [vmem:[%s1914_s0 + $0x28] ss:$20 sps:$4 sm:$0xff]   ;;  %v1410_v43 = vld [vmem:[%s1914_s0 + $0x10] ss:$20 sps:$4 sm:$0xff]  }
  0x10   :  { %1293 = vmatpush3.bf16.msra.mxu0 %v1376_v14  ;;  %v1408_v41 = vld [vmem:[%s1913_s1 + $0x108] sm:$0xff]   ;;  %v1409_v44 = vld [vmem:[%s1913_s1 + $0x100] sm:$0xff]   ;;  %v1420_v49 = vld [vmem:[%s1915_s8 + $0x54] ss:$8 sps:$4 sm:$0xff]  }
  0x11   :  { %1321 = vmatpush3.bf16.msra.mxu1 %v1377_v15  ;;  %1294 = vmatprep.subr.bf16.mxu0 %v1378_v16  ;;  %v1417_v47 = vld [vmem:[%s1915_s8 + $0x64] ss:$8 sps:$4 sm:$0xff]   ;;  %v1415_v48 = vld [vmem:[%s1915_s8 + $0x60] ss:$8 sps:$4 sm:$0xff]   ;;  %v1418_v51 = vld [vmem:[%s1915_s8 + $0x50] ss:$8 sps:$4 sm:$0xff]  }
  0x12   :  { %1322 = vmatprep.subr.bf16.mxu1 %v1379_v17  ;;  %v1411_v50 = vld [vmem:[%s1914_s0 + $0x38] ss:$20 sps:$4 sm:$0xff]   ;;  %v1421_v53 = vld [vmem:[%s1915_s8 + $0x40] ss:$8 sps:$4 sm:$0xff]   ;;  %v1426_v54 = vld [vmem:[%s1915_s8 + $0x34] ss:$8 sps:$4 sm:$0xff]  }
  0x13   :  { %v1423_v52 = vld [vmem:[%s1915_s8 + $0x44] ss:$8 sps:$4 sm:$0xff]   ;;  %v1424_v55 = vld [vmem:[%s1915_s8 + $0x30] ss:$8 sps:$4 sm:$0xff]   ;;  %v1427_v57 = vld [vmem:[%s1915_s8 + $0x20] ss:$8 sps:$4 sm:$0xff]  }
  0x14   :  { %1295 = vmatpush3.bf16.msra.mxu0 %v1380_v18  ;;  %v1429_v56 = vld [vmem:[%s1915_s8 + $0x24] ss:$8 sps:$4 sm:$0xff]   ;;  %v1432_v58 = vld [vmem:[%s1915_s8 + $0x14] ss:$8 sps:$4 sm:$0xff]   ;;  %v1430_v59 = vld [vmem:[%s1915_s8 + $0x10] ss:$8 sps:$4 sm:$0xff]  }
  0x15   :  { %1323 = vmatpush3.bf16.msra.mxu1 %v1381_v19  ;;  %1296 = vmatprep.subr.bf16.mxu0 %v1382_v20  ;;  %v1435_v60 = vld [vmem:[%s1915_s8 + $0x4] ss:$8 sps:$4 sm:$0xff]   ;;  %v1433_v61 = vld [vmem:[%s1915_s8] ss:$8 sps:$4 sm:$0xff]   ;;  %v1440_v1 = vld [vmem:[%s1917_s4 + $0x34] ss:$8 sps:$4 sm:$0xff]  }
  0x16   :  { %1324 = vmatprep.subr.bf16.mxu1 %v1383_v21  ;;  %v1436_v62 = vld [vmem:[%s1916_s7] sm:$0xff]   ;;  %v1437_v0 = vld [vmem:[%s1916_s7 + $0x8] sm:$0xff]   ;;  %v1438_v2 = vld [vmem:[%s1917_s4 + $0x30] ss:$8 sps:$4 sm:$0xff]  }
  0x17   :  { %v1443_v3 = vld [vmem:[%s1917_s4 + $0x24] ss:$8 sps:$4 sm:$0xff]   ;;  %v1441_v4 = vld [vmem:[%s1917_s4 + $0x20] ss:$8 sps:$4 sm:$0xff]   ;;  %v1446_v5 = vld [vmem:[%s1917_s4 + $0x14] ss:$8 sps:$4 sm:$0xff]  }
  0x18   :  { %1297 = vmatpush3.bf16.msra.mxu0 %v1384_v22  ;;  %v1444_v6 = vld [vmem:[%s1917_s4 + $0x10] ss:$8 sps:$4 sm:$0xff]   ;;  %v1449_v7 = vld [vmem:[%s1917_s4 + $0x4] ss:$8 sps:$4 sm:$0xff]   ;;  %v1447_v8 = vld [vmem:[%s1917_s4] ss:$8 sps:$4 sm:$0xff]  }
  0x19   :  { %1325 = vmatpush3.bf16.msra.mxu1 %v1385_v23  ;;  %1298 = vmatprep.subr.bf16.mxu0 %v1386_v24 }
  0x1a   :  { %1326 = vmatprep.subr.bf16.mxu1 %v1387_v25 }
  0x1c   :  { %1299 = vmatpush3.bf16.msra.mxu0 %v1388_v26 }
  0x1d   :  { %1327 = vmatpush3.bf16.msra.mxu1 %v1389_v27  ;;  %1300 = vmatprep.subr.bf16.mxu0 %v1390_v28 }
  0x1e   :  { %1328 = vmatprep.subr.bf16.mxu1 %v1391_v29 }
  0x20   :  { %1301 = vmatpush3.bf16.msra.mxu0 %v1392_v30 }
  0x21   :  { %1329 = vmatpush3.bf16.msra.mxu1 %v1393_v31  ;;  %1348 = vmatprep.subr.bf16.mxu0 %v1400_v36 }
  0x22   :  { %720 = vmatprep.subr.bf16.mxu1 %v1414_v46 }
  0x23   :  { %429 = vmatmul.mubr.bf16.vlgmr.msra.gmra.mxu0 %v1394_v32 }
  0x24   :  { %478 = vmatmul.mubr.bf16.vlgmr.msra.gmra.mxu1 %v1397_v34  ;;  %1349 = vmatpush3.bf16.msra.mxu0 %v1400_v36 }
  0x25   :  { %1350 = vmatprep.subr.bf16.mxu0 %v1401_v37  ;;  %436 = vmatprep.mubr.bf16.mxu0 %v1402_v38 }
  0x26   :  { %485 = vmatprep.mubr.bf16.mxu1 %v1404_v39  ;;  %721 = vmatpush1.bf16.msra.mxu1 %v1412_v45 }
  0x27   :  { %722 = vmatprep.subr.bf16.mxu1 %v1417_v47 }
  0x28   :  { %1351 = vmatpush3.bf16.msra.mxu0 %v1401_v37 }
  0x29   :  { %1352 = vmatprep.subr.bf16.mxu0 %v1408_v41 }
  0x2a   :  { %723 = vmatpush1.bf16.msra.mxu1 %v1415_v48 }
  0x2b   :  { %437 = vmatmul.mubr.bf16.gmra.mxu0 %v1406_v40  ;;  %724 = vmatprep.subr.bf16.mxu1 %v1420_v49 }
  0x2c   :  { %486 = vmatmul.mubr.bf16.gmra.mxu1 %v1407_v42  ;;  %1356 = vmatprep.mubr.msk.bf16.mxu0 %vm389_vm0, %v1410_v43 }
  0x2d   :  { %1353 = vmatpush3.bf16.msra.mxu0 %v1408_v41  ;;  %752 = vmatprep.mubr.bf16.mxu1 %v1460_v63 }
  0x2e   :  { %1354 = vmatprep.subr.bf16.mxu0 %v1409_v44  ;;  %725 = vmatpush1.bf16.msra.mxu1 %v1418_v51 }
  0x2f   :  { %726 = vmatprep.subr.bf16.mxu1 %v1423_v52 }
  0x31   :  { %1355 = vmatpush3.bf16.msra.mxu0 %v1409_v44 }
  0x32   :  { %727 = vmatpush1.bf16.msra.mxu1 %v1421_v53  ;;  %973 = vmatprep.subr.bf16.mxu0 %v1440_v1 }
  0x33   :  { %728 = vmatprep.subr.bf16.mxu1 %v1426_v54 }
  0x34   :  { %1357 = vmatmul.mubr.msk.bf16.vlgmr.msra.gmra.mxu0 %vm389_vm0, %v1411_v50 }
  0x35   :  { %997 = vmatprep.mubr.bf16.mxu0 %v1460_v63  ;;  %974 = vmatpush1.bf16.msra.mxu0 %v1438_v2 }
  0x36   :  { %729 = vmatpush1.bf16.msra.mxu1 %v1424_v55  ;;  %975 = vmatprep.subr.bf16.mxu0 %v1443_v3 }
  0x37   :  { %730 = vmatprep.subr.bf16.mxu1 %v1429_v56 }
  0x39   :  { %976 = vmatpush1.bf16.msra.mxu0 %v1441_v4 }
  0x3a   :  { %731 = vmatpush1.bf16.msra.mxu1 %v1427_v57  ;;  %977 = vmatprep.subr.bf16.mxu0 %v1446_v5 }
  0x3b   :  { %732 = vmatprep.subr.bf16.mxu1 %v1432_v58 }
  0x3d   :  { %978 = vmatpush1.bf16.msra.mxu0 %v1444_v6 }
  0x3e   :  { %733 = vmatpush1.bf16.msra.mxu1 %v1430_v59  ;;  %979 = vmatprep.subr.bf16.mxu0 %v1449_v7 }
  0x3f   :  { %734 = vmatprep.subr.bf16.mxu1 %v1435_v60 }
  0x41   :  { %980 = vmatpush1.bf16.msra.mxu0 %v1447_v8 }
  0x42   :  { %735 = vmatpush1.bf16.msra.mxu1 %v1433_v61 }
  0x45   :  { %753 = vmatmul.mubr.bf16.vlgmr.msra.gmra.mxu1 %v1436_v62 }
  0x46   :  { %762 = vmatprep.mubr.bf16.mxu1 %v1460_v63 }
  0x4d   :  { %763 = vmatmul.mubr.bf16.gmra.mxu1 %v1437_v0 }
  0xe3   :  { %v1302_v9 = vpop.f32.mrf.mxu0 }
  0xe4   :  { %v1330_v10 = vpop.f32.mrf.mxu1 }
  0xe5   :  { %v1303_v11 = vpop.f32.mrf.mxu0 }
  0xe6   :  { %v1331_v12 = vpop.f32.mrf.mxu1  ;;  %v1304_v22 = vadd.f32 %v1303_v11, %v1302_v9 }
  0xe7   :  { %v1305_v13 = vpop.f32.mrf.mxu0  ;;  %v1332_v23 = vadd.f32 %v1331_v12, %v1330_v10 }
  0xe8   :  { %v1333_v14 = vpop.f32.mrf.mxu1 }
  0xe9   :  { %v1306_v15 = vpop.f32.mrf.mxu0  ;;  %v480_v30 = vadd.f32 %v1332_v23, %v1304_v22  ;;  %v544_v23 = vld [vmem:[%s1919_s3] sm:$0x1] }
  0xea   :  { %v1334_v16 = vpop.f32.mrf.mxu1  ;;  %v1307_v31 = vadd.f32 %v1306_v15, %v1305_v13 }
  0xeb   :  { %v1308_v17 = vpop.f32.mrf.mxu0  ;;  %v1335_v32 = vadd.f32 %v1334_v16, %v1333_v14 }
  0xec   :  { %v1336_v18 = vpop.f32.mrf.mxu1 }
  0xed   :  { %v1309_v19 = vpop.f32.mrf.mxu0  ;;  %v483_v41 = vadd.f32 %v1335_v32, %v1307_v31 }
  0xee   :  { %v1337_v20 = vpop.f32.mrf.mxu1  ;;  %v1310_v27 = vadd.f32 %v1309_v19, %v1308_v17  ;;  %v585_v17 = vlaneseq  ;;  %v543_v19 = vld [vmem:[%s1918_s2] sm:$0x1] }
  0xef   :  { %v1311_v21 = vpop.f32.mrf.mxu0  ;;  %v1338_v28 = vadd.f32 %v1337_v20, %v1336_v18 }
  0xf0   :  { %v1339_v24 = vpop.f32.mrf.mxu1  ;;  %v1751_v18 = vshrl.u32 %v585_v17, 7 }
  0xf1   :  { %v1312_v25 = vpop.f32.mrf.mxu0  ;;  %v488_v36 = vadd.f32 %v1338_v28, %v1310_v27 }
  0xf2   :  { %v1340_v26 = vpop.f32.mrf.mxu1  ;;  %v1313_v33 = vadd.f32 %v1312_v25, %v1311_v21  ;;  %v1757_v20 = vsub.s32 0, %v1751_v18 }
  0xf3   :  { %v1341_v34 = vadd.f32 %v1340_v26, %v1339_v24 }
  0xf4   :  { %v1358_v29 = vpop.f32.mrf.mxu0 }
  0xf5   :  { %v537_v39 = vadd.f32 %v1358_v29, %v488_v36  ;;  %v491_v40 = vadd.f32 %v1341_v34, %v1313_v33 }
  0xf6   :  { %v528_v35 = vpop.f32.mrf.mxu0 }
  0xf7   :  { %v529_v37 = vadd.f32 %v528_v35, %v480_v30  ;;  %v560_v46 = vmul.f32 %v537_v39, %v537_v39  ;;  %v548_v51 = vsel %vm389_vm0, %v537_v39, 0.0 }
  0xf8   :  { %v1359_v38 = vpop.f32.mrf.mxu0 }
  0xf9   :  { %v558_v43 = vmul.f32 %v529_v37, %v529_v37  ;;  %v540_v44 = vadd.f32 %v1359_v38, %v491_v40  ;;  %v545_v47 = vsel %vm389_vm0, %v529_v37, 0.0  ;;  %v565_v57 = vsel %vm389_vm0, %v560_v46, 0.0 }
  0xfa   :  { %v531_v42 = vpop.f32.mrf.mxu0 }
  0xfb   :  { %v532_v45 = vadd.f32 %v531_v42, %v483_v41  ;;  %v562_v52 = vsel %vm389_vm0, %v558_v43, 0.0  ;;  %v561_v53 = vmul.f32 %v540_v44, %v540_v44  ;;  %v550_v58 = vsel %vm389_vm0, %v540_v44, 0.0 }
  0xfd   :  { %v546_v48 = vsel %vm389_vm0, %v532_v45, 0.0  ;;  %v559_v49 = vmul.f32 %v532_v45, %v532_v45  ;;  %v567_v61 = vsel %vm389_vm0, %v561_v53, 0.0 }
  0xfe   :  { %v547_v50 = vadd.f32 %v546_v48, %v545_v47 }
  0xff   :  { %v563_v54 = vsel %vm389_vm0, %v559_v49, 0.0 }
 0x100   :  { %v549_v55 = vadd.f32 %v548_v51, %v547_v50  ;;  %v564_v56 = vadd.f32 %v563_v54, %v562_v52 }
 0x102   :  { %v551_v59 = vadd.f32 %v550_v58, %v549_v55  ;;  %v566_v60 = vadd.f32 %v565_v57, %v564_v56 }
 0x104   :  { %v552_v62 = vrot.slane %v551_v59, 4  ;;  %v568_v0 = vadd.f32 %v567_v61, %v566_v60 }
 0x106   :  { %v553_v1 = vadd.f32 %v552_v62, %v551_v59  ;;  %v569_v2 = vrot.slane %v568_v0, 4 }
 0x108   :  { %v554_v3 = vrot.slane %v553_v1, 2  ;;  %v570_v4 = vadd.f32 %v569_v2, %v568_v0 }
 0x10a   :  { %v555_v5 = vadd.f32 %v554_v3, %v553_v1  ;;  %v571_v6 = vrot.slane %v570_v4, 2 }
 0x10c   :  { %v556_v7 = vrot.slane %v555_v5, 1  ;;  %v572_v8 = vadd.f32 %v571_v6, %v570_v4 }
 0x10e   :  { %v557_v9 = vadd.f32 %v556_v7, %v555_v5  ;;  %v573_v10 = vrot.slane %v572_v8, 1 }
 0x110   :  { %v574_v11 = vadd.f32 %v573_v10, %v572_v8  ;;  %v575_v12 = vmul.f32 0.03125, %v557_v9 }
 0x112   :  { %v576_v13 = vmul.f32 0.03125, %v574_v11  ;;  %v577_v14 = vmul.f32 %v575_v12, %v575_v12 }
 0x114   :  { %v578_v15 = vsub.f32 %v576_v13, %v577_v14 }
 0x116   :  { %v579_v16 = vadd.f32 1e-05, %v578_v15 }
 0x118   :  { %1450 = vrsqrt.f32 %v579_v16 }
 0x125   :  { %v1451_v21 = vpop.eup %1450 }
 0x126   :  { %v581_v22 = vmul.f32 %v1451_v21, %v543_v19 }
 0x128   :  { %v582_v24 = vmul.f32 %v581_v22, %v575_v12  ;;  %v588_v25 = vrot.slane %v581_v22, %v1757_v20 }
 0x12a   :  { %v583_v26 = vsub.f32 %v544_v23, %v582_v24  ;;  %v590_v27 = vmul.f32 %v588_v25, %v529_v37  ;;  %v591_v28 = vmul.f32 %v588_v25, %v532_v45  ;;  %v592_v34 = vmul.f32 %v588_v25, %v537_v39  ;;  %v1767_v37 = vpop.f32.mrf.mxu1 }
 0x12b   :  { %v593_v35 = vmul.f32 %v588_v25, %v540_v44 }
 0x12c   :  { %v598_v29 = vrot.slane %v583_v26, %v1757_v20  ;;  %v1769_v45 = vpop.f32.mrf.mxu1 }
 0x12d   :  { %v794_v50 = vmul.f32 %v1769_v45, %v1769_v45 }
 0x12e   :  { %v600_v30 = vadd.f32 %v598_v29, %v590_v27  ;;  %v601_v31 = vadd.f32 %v598_v29, %v591_v28  ;;  %v602_v38 = vadd.f32 %v598_v29, %v592_v34  ;;  %v603_v40 = vadd.f32 %v598_v29, %v593_v35  ;;  %v1771_v46 = vpop.f32.mrf.mxu1 }
 0x12f   :  { %v775_v48 = vadd.f32 %v1771_v46, %v1767_v37  ;;  %v795_v49 = vmul.f32 %v1771_v46, %v1771_v46 }
 0x130   :  { %v604_v32 = vmax.f32 %v600_v30, 0.0  ;;  %v605_v33 = vmax.f32 %v601_v31, 0.0  ;;  %v606_v41 = vmax.f32 %v602_v38, 0.0  ;;  %v607_v42 = vmax.f32 %v603_v40, 0.0  ;;  %v1773_v39 = vpop.f32.mrf.mxu1 }
 0x131   :  { %v784_v51 = vadd.f32 %v1773_v39, %v1769_v45  ;;  %v796_v52 = vmul.f32 %v1773_v39, %v1773_v39 }
 0x132   :  { %v909_v36 = vpack.c.bf16 %v605_v33, %v604_v32  ;;  %v910_v43 = vpack.c.bf16 %v607_v42, %v606_v41  ;;  %v1775_v44 = vpop.f32.mrf.mxu1 }
 0x133   :  { %v776_v55 = vadd.f32 %v775_v48, %v1775_v44  ;;  %v797_v56 = vmul.f32 %v1775_v44, %v1775_v44  ;;  %v810_v57 = vadd.f32 %v796_v52, %v794_v50 }
 0x134   :  { %1276 = vmatmul.mubr.msk.bf16.vlgmr.msra.gmra.mxu0 %vm389_vm0, %v909_v36  ;;  %v1777_v47 = vpop.f32.mrf.mxu1 }
 0x135   :  { %1007 = vmatprep.mubr.bf16.mxu0 %v1460_v63  ;;  %v793_v63 = vmul.f32 %v1767_v37, %v1767_v37  ;;  %v785_v58 = vadd.f32 %v784_v51, %v1777_v47  ;;  %v798_v59 = vmul.f32 %v1777_v47, %v1777_v47 }
 0x136   :  { %v1791_v53 = vpop.f32.mrf.mxu1 }
 0x137   :  { %v801_v54 = vadd.f32 %v795_v49, %v793_v63  ;;  %v777_v62 = vadd.f32 %v776_v55, %v1791_v53  ;;  %v799_v0 = vmul.f32 %v1791_v53, %v1791_v53  ;;  %v811_v1 = vadd.f32 %v810_v57, %v798_v59 }
 0x138   :  { %v1799_v60 = vpop.f32.mrf.mxu1 }
 0x139   :  { %v802_v61 = vadd.f32 %v801_v54, %v797_v56  ;;  %v786_v2 = vadd.f32 %v785_v58, %v1799_v60  ;;  %v800_v3 = vmul.f32 %v1799_v60, %v1799_v60  ;;  %v778_v4 = vrot.slane %v777_v62, 4 }
 0x13b   :  { %v803_v5 = vadd.f32 %v802_v61, %v799_v0  ;;  %v787_v6 = vrot.slane %v786_v2, 4  ;;  %v812_v7 = vadd.f32 %v811_v1, %v800_v3  ;;  %v779_v8 = vadd.f32 %v778_v4, %v777_v62 }
 0x13c   :  { %1277 = vmatmul.mubr.msk.bf16.gmra.mxu0 %vm389_vm0, %v910_v43 }
 0x13d   :  { %v804_v9 = vrot.slane %v803_v5, 4  ;;  %v788_v10 = vadd.f32 %v787_v6, %v786_v2  ;;  %v813_v11 = vrot.slane %v812_v7, 4  ;;  %v780_v12 = vrot.slane %v779_v8, 2 }
 0x13f   :  { %v805_v13 = vadd.f32 %v804_v9, %v803_v5  ;;  %v789_v14 = vrot.slane %v788_v10, 2  ;;  %v814_v15 = vadd.f32 %v813_v11, %v812_v7  ;;  %v781_v16 = vadd.f32 %v780_v12, %v779_v8 }
 0x141   :  { %v806_v17 = vrot.slane %v805_v13, 2  ;;  %v790_v19 = vadd.f32 %v789_v14, %v788_v10  ;;  %v815_v21 = vrot.slane %v814_v15, 2  ;;  %v782_v22 = vrot.slane %v781_v16, 1 }
 0x142   :  { %v1461_v14 = vmov 1966171168  }
 0x143   :  { %v807_v23 = vadd.f32 %v806_v17, %v805_v13  ;;  %v791_v24 = vrot.slane %v790_v19, 1  ;;  %v816_v25 = vadd.f32 %v815_v21, %v814_v15  ;;  %v783_v26 = vadd.f32 %v782_v22, %v781_v16 }
 0x144   :  { %v835_v15 = vunpack.c.l.s4 %v1461_v14 }
 0x145   :  { %v808_v27 = vrot.slane %v807_v23, 1  ;;  %v792_v28 = vadd.f32 %v791_v24, %v790_v19  ;;  %v817_v29 = vrot.slane %v816_v25, 1  ;;  %v1807_v31 = vmul.f32 0.03125, %v783_v26 }
 0x147   :  { %v809_v30 = vadd.f32 %v808_v27, %v807_v23  ;;  %v818_v32 = vadd.f32 %v817_v29, %v816_v25  ;;  %v1809_v33 = vmul.f32 0.03125, %v792_v28  ;;  %v823_v35 = vmul.f32 %v1807_v31, %v1807_v31 }
 0x148   :  { %v836_v27 = vunpack.c.0.s8 %v835_v15  ;;  %v857_v15 = vsub.s32 1, %v1751_v18 }
 0x149   :  { %v821_v34 = vmul.f32 0.03125, %v809_v30  ;;  %v822_v36 = vmul.f32 0.03125, %v818_v32  ;;  %v824_v38 = vmul.f32 %v1809_v33, %v1809_v33 }
 0x14b   :  { %v825_v40 = vsub.f32 %v821_v34, %v823_v35  ;;  %v826_v41 = vsub.f32 %v822_v36, %v824_v38 }
 0x14d   :  { %v827_v63 = vadd.f32 1e-05, %v825_v40  ;;  %v828_v48 = vadd.f32 1e-05, %v826_v41  ;;  %v1856_v41 = vsub.s32 %v836_v27, %v1751_v18  ;;  %v1018_v18 = vld [vmem:[%s1921_s5] sm:$0x3] }
 0x14f   :  { %1452 = vrsqrt.f32 %v827_v63 }
 0x150   :  { %1454 = vrsqrt.f32 %v828_v48 }
 0x15c   :  { %v1453_v26 = vpop.eup %1452 }
 0x15d   :  { %v1455_v28 = vpop.eup %1454 }
 0x15e   :  { %v833_v63 = vcombine.low %v1453_v26, %v1455_v28 }
 0x1f4   :  { %v1815_v42 = vpop.f32.mrf.mxu0 }
 0x1f5   :  { %v1038_v55 = vmul.f32 %v1815_v42, %v1815_v42 }
 0x1f6   :  { %v1817_v43 = vpop.f32.mrf.mxu0 }
 0x1f7   :  { %v1039_v58 = vmul.f32 %v1817_v43, %v1817_v43 }
 0x1f8   :  { %v1819_v49 = vpop.f32.mrf.mxu0 }
 0x1f9   :  { %v1040_v51 = vmul.f32 %v1819_v49, %v1819_v49  ;;  %v1020_v56 = vadd.f32 %v1819_v49, %v1815_v42 }
 0x1fa   :  { %v1821_v50 = vpop.f32.mrf.mxu0 }
 0x1fb   :  { %v1041_v52 = vmul.f32 %v1821_v50, %v1821_v50  ;;  %v1046_v61 = vadd.f32 %v1040_v51, %v1038_v55  ;;  %v1029_v62 = vadd.f32 %v1821_v50, %v1817_v43 }
 0x1fc   :  { %v1827_v54 = vpop.f32.mrf.mxu0 }
 0x1fd   :  { %v1042_v57 = vmul.f32 %v1827_v54, %v1827_v54  ;;  %v1021_v0 = vadd.f32 %v1020_v56, %v1827_v54  ;;  %v1055_v2 = vadd.f32 %v1041_v52, %v1039_v58 }
 0x1fe   :  { %v1837_v59 = vpop.f32.mrf.mxu0 }
 0x1ff   :  { %v1043_v1 = vmul.f32 %v1837_v59, %v1837_v59  ;;  %v1047_v4 = vadd.f32 %v1046_v61, %v1042_v57  ;;  %v1030_v5 = vadd.f32 %v1029_v62, %v1837_v59  ;;  %v840_v62 = vrot.slane %v833_v63, %v1856_v41 }
 0x200   :  { %v1844_v3 = vpop.f32.mrf.mxu0 }
 0x201   :  { %v1022_v6 = vadd.f32 %v1021_v0, %v1844_v3  ;;  %v1044_v7 = vmul.f32 %v1844_v3, %v1844_v3  ;;  %v1056_v8 = vadd.f32 %v1055_v2, %v1043_v1 }
 0x202   :  { %v1850_v9 = vpop.f32.mrf.mxu0 }
 0x203   :  { %v1023_v10 = vrot.slane %v1022_v6, 4  ;;  %v1048_v11 = vadd.f32 %v1047_v4, %v1044_v7  ;;  %v1031_v12 = vadd.f32 %v1030_v5, %v1850_v9  ;;  %v1045_v13 = vmul.f32 %v1850_v9, %v1850_v9 }
 0x205   :  { %v1024_v16 = vadd.f32 %v1023_v10, %v1022_v6  ;;  %v1049_v17 = vrot.slane %v1048_v11, 4  ;;  %v1032_v19 = vrot.slane %v1031_v12, 4  ;;  %v1057_v21 = vadd.f32 %v1056_v8, %v1045_v13  ;;  %v773_v10 = vld [vmem:[%s1920_s9] sm:$0x3] }
 0x206   :  { %v847_v8 = vrot.slane %v840_v62, %v1856_v41 }
 0x207   :  { %v1025_v22 = vrot.slane %v1024_v16, 2  ;;  %v1050_v23 = vadd.f32 %v1049_v17, %v1048_v11  ;;  %v1033_v24 = vadd.f32 %v1032_v19, %v1031_v12  ;;  %v1058_v25 = vrot.slane %v1057_v21, 4 }
 0x208   :  { %v849_v14 = vmul.f32 %v847_v8, %v773_v10 }
 0x209   :  { %v1026_v29 = vadd.f32 %v1025_v22, %v1024_v16  ;;  %v1051_v30 = vrot.slane %v1050_v23, 2  ;;  %v1034_v32 = vrot.slane %v1033_v24, 2  ;;  %v1059_v34 = vadd.f32 %v1058_v25, %v1057_v21 }
 0x20a   :  { %v854_v16 = vrot.slane %v849_v14, %v1757_v20  ;;  %v858_v17 = vrot.slane %v849_v14, %v857_v15 }
 0x20b   :  { %v1027_v35 = vrot.slane %v1026_v29, 1  ;;  %v1052_v36 = vadd.f32 %v1051_v30, %v1050_v23  ;;  %v1035_v38 = vadd.f32 %v1034_v32, %v1033_v24  ;;  %v1060_v40 = vrot.slane %v1059_v34, 2 }
 0x20c   :  { %v861_v19 = vmul.f32 %v854_v16, %v1807_v31  ;;  %v862_v21 = vmul.f32 %v858_v17, %v1809_v33  ;;  %v774_v31 = vld [vmem:[%s1922_s10] sm:$0x3]  ;;  %v883_v63 = vmul.f32 %v858_v17, %v1769_v45 }
 0x20d   :  { %v1028_v48 = vadd.f32 %v1027_v35, %v1026_v29  ;;  %v1053_v51 = vrot.slane %v1052_v36, 1  ;;  %v1036_v52 = vrot.slane %v1035_v38, 1  ;;  %v1061_v55 = vadd.f32 %v1060_v40, %v1059_v34  ;;  %v1019_v45 = vld [vmem:[%s1923_s6] sm:$0x3] }
 0x20e   :  { %v865_v22 = vcombine.low %v861_v19, %v862_v21 }
 0x20f   :  { %v1054_v56 = vadd.f32 %v1053_v51, %v1052_v36  ;;  %v1064_v57 = vmul.f32 0.03125, %v1028_v48  ;;  %v1037_v58 = vadd.f32 %v1036_v52, %v1035_v38  ;;  %v1062_v61 = vrot.slane %v1061_v55, 1 }
 0x210   :  { %v872_v26 = vrot.slane %v865_v22, %v1856_v41  ;;  %v882_v38 = vmul.f32 %v854_v16, %v1767_v37  ;;  %v884_v48 = vmul.f32 %v854_v16, %v1771_v46  ;;  %v888_v37 = vmul.f32 %v854_v16, %v1791_v53 }
 0x211   :  { %v1066_v0 = vmul.f32 0.03125, %v1054_v56  ;;  %v1068_v1 = vmul.f32 %v1064_v57, %v1064_v57  ;;  %v1063_v2 = vadd.f32 %v1062_v61, %v1061_v55  ;;  %v1065_v4 = vmul.f32 0.03125, %v1037_v58 }
 0x212   :  { %v879_v29 = vrot.slane %v872_v26, %v1856_v41  ;;  %v885_v55 = vmul.f32 %v858_v17, %v1773_v39  ;;  %v886_v56 = vmul.f32 %v854_v16, %v1775_v44  ;;  %v887_v58 = vmul.f32 %v858_v17, %v1777_v47 }
 0x213   :  { %v1070_v5 = vsub.f32 %v1066_v0, %v1068_v1  ;;  %v1067_v6 = vmul.f32 0.03125, %v1063_v2  ;;  %v1069_v7 = vmul.f32 %v1065_v4, %v1065_v4 }
 0x214   :  { %v881_v34 = vsub.f32 %v774_v31, %v879_v29 }
 0x215   :  { %v1072_v11 = vadd.f32 1e-05, %v1070_v5  ;;  %v1071_v12 = vsub.f32 %v1067_v6, %v1069_v7 }
 0x216   :  { %v894_v51 = vrot.slane %v881_v34, %v1757_v20  ;;  %v898_v52 = vrot.slane %v881_v34, %v857_v15 }
 0x217   :  { %v1073_v13 = vadd.f32 1e-05, %v1071_v12  ;;  %1456 = vrsqrt.f32 %v1072_v11 }
 0x218   :  { %v901_v62 = vadd.f32 %v894_v51, %v882_v38  ;;  %v902_v0 = vadd.f32 %v898_v52, %v883_v63  ;;  %v903_v1 = vadd.f32 %v894_v51, %v884_v48  ;;  %v904_v39 = vadd.f32 %v898_v52, %v885_v55 }
 0x219   :  { %1458 = vrsqrt.f32 %v1073_v13  ;;  %v905_v2 = vadd.f32 %v894_v51, %v886_v56  ;;  %v906_v44 = vadd.f32 %v898_v52, %v887_v58  ;;  %v907_v5 = vadd.f32 %v894_v51, %v888_v37 }
 0x224   :  { %v1457_v23 = vpop.eup %1456 }
 0x226   :  { %v1459_v24 = vpop.eup %1458 }
 0x227   :  { %v1078_v25 = vcombine.low %v1457_v23, %v1459_v24 }
 0x229   :  { %v1085_v27 = vrot.slane %v1078_v25, %v1856_v41 }
 0x22b   :  { %v1092_v28 = vrot.slane %v1085_v27, %v1856_v41 }
 0x22d   :  { %v1094_v33 = vmul.f32 %v1092_v28, %v1018_v18 }
 0x22f   :  { %v1099_v30 = vrot.slane %v1094_v33, %v1757_v20  ;;  %v1103_v32 = vrot.slane %v1094_v33, %v857_v15 }
 0x231   :  { %v1106_v35 = vmul.f32 %v1099_v30, %v1064_v57  ;;  %v1107_v36 = vmul.f32 %v1103_v32, %v1065_v4  ;;  %v889_v57 = vmul.f32 %v858_v17, %v1799_v60  ;;  %v1127_v6 = vmul.f32 %v1099_v30, %v1815_v42 }
 0x232   :  { %v1128_v60 = vmul.f32 %v1103_v32, %v1817_v43  ;;  %v1129_v53 = vmul.f32 %v1099_v30, %v1819_v49  ;;  %v1130_v7 = vmul.f32 %v1103_v32, %v1821_v50  ;;  %v1131_v10 = vmul.f32 %v1099_v30, %v1827_v54 }
 0x233   :  { %v1110_v40 = vcombine.low %v1106_v35, %v1107_v36  ;;  %v908_v47 = vadd.f32 %v898_v52, %v889_v57  ;;  %v1132_v11 = vmul.f32 %v1103_v32, %v1837_v59  ;;  %v1133_v12 = vmul.f32 %v1099_v30, %v1844_v3 }
 0x234   :  { %v1134_v13 = vmul.f32 %v1103_v32, %v1850_v9 }
 0x235   :  { %v1117_v61 = vrot.slane %v1110_v40, %v1856_v41 }
 0x237   :  { %v1124_v46 = vrot.slane %v1117_v61, %v1856_v41 }
 0x239   :  { %v1126_v4 = vsub.f32 %v1019_v45, %v1124_v46 }
 0x23b   :  { %v1139_v8 = vrot.slane %v1126_v4, %v1757_v20  ;;  %v1143_v41 = vrot.slane %v1126_v4, %v857_v15 }
 0x23d   :  { %v1146_v14 = vadd.f32 %v1139_v8, %v1127_v6  ;;  %v1147_v16 = vadd.f32 %v1143_v41, %v1128_v60  ;;  %v1148_v42 = vadd.f32 %v1139_v8, %v1129_v53  ;;  %v1149_v17 = vadd.f32 %v1143_v41, %v1130_v7 }
 0x23e   :  { %v1150_v43 = vadd.f32 %v1139_v8, %v1131_v10  ;;  %v1151_v19 = vadd.f32 %v1143_v41, %v1132_v11  ;;  %v1152_v49 = vadd.f32 %v1139_v8, %v1133_v12  ;;  %v1153_v21 = vadd.f32 %v1143_v41, %v1134_v13 }
 0x23f   :  { %v1154_v50 = vadd.f32 %v1146_v14, %v901_v62  ;;  %v1155_v22 = vadd.f32 %v1147_v16, %v902_v0  ;;  %v1156_v20 = vadd.f32 %v1148_v42, %v903_v1  ;;  %v1157_v15 = vadd.f32 %v1149_v17, %v904_v39 }
 0x240   :  { %v1158_v23 = vadd.f32 %v1150_v43, %v905_v2  ;;  %v1159_v54 = vadd.f32 %v1151_v19, %v906_v44  ;;  %v1160_v24 = vadd.f32 %v1152_v49, %v907_v5  ;;  %v1161_v59 = vadd.f32 %v1153_v21, %v908_v47 }
 0x241   :  { %v1162_v25 = vmax.f32 %v1154_v50, 0.0  ;;  %v1163_v3 = vmax.f32 %v1155_v22, 0.0  ;;  %v1164_v26 = vmax.f32 %v1156_v20, 0.0  ;;  %v1165_v9 = vmax.f32 %v1157_v15, 0.0 }
 0x242   :  { %v1166_v27 = vmax.f32 %v1158_v23, 0.0  ;;  %v1167_v18 = vmax.f32 %v1159_v54, 0.0  ;;  %v1168_v28 = vmax.f32 %v1160_v24, 0.0  ;;  %v1169_v29 = vmax.f32 %v1161_v59, 0.0 }
 0x243   :  { %v1282_v31 = vpack.c.bf16 %v1163_v3, %v1162_v25  ;;  %v1283_v33 = vpack.c.bf16 %v1165_v9, %v1164_v26 }
 0x244   :  { %v1284_v30 = vpack.c.bf16 %v1167_v18, %v1166_v27  ;;  %v1285_v32 = vpack.c.bf16 %v1169_v29, %v1168_v28 }
 0x245   :  { %1194 = vst [vmem:[%s1924_s11] sm:$0xff] %v1282_v31  ;;  %1195 = vst [vmem:[%s1924_s11 + $0x8] sm:$0xff] %v1283_v33 }
 0x246   :  { %1196 = vst [vmem:[%s1924_s11 + $0x10] sm:$0xff] %v1284_v30  ;;  %1197 = vst [vmem:[%s1924_s11 + $0x18] sm:$0xff] %v1285_v32 }

</bundles_post_ra>
